<compile_context>
chip_gen: v6e
topology: v6e:2x2x1
jax: 0.10.0
libtpu: 0.0.40
codegen_flags: <defaults>
</compile_context>

<pallas_src>
import numpy as np
import jax
import jax.numpy as jnp
from jax.experimental import pallas as pl
from jax.experimental.pallas import tpu as pltpu


def _vmem_limit_bytes():
    # v5e/v6e: 128 MiB physical VMEM per core; v7x: 64 MiB.  Leave headroom.
    try:
        cap = int(pltpu.get_tpu_info().vmem_capacity_bytes)
        return max(32 << 20, min(cap - (16 << 20), 100 << 20))
    except Exception:
        return 32 << 20


def _sigmoid(x):
    return 1.0 / (1.0 + jnp.exp(-x))


# ---------------------------------------------------------------------------
# Fused HG_Block kernel: conv3x3+BN+ReLU (xN) -> 1x1 agg+BN+ReLU -> ESE gate
# ---------------------------------------------------------------------------
def _make_hg_block_kernel(H, W, in_chs, mid_chs, out_chs, layer_num, residual):
    src_chs = [in_chs] + [mid_chs] * layer_num
    n_src = len(src_chs)

    def kernel(*refs):
        x_ref = refs[0]
        pos = 1
        conv_w, conv_b = [], []
        for _ in range(layer_num):
            conv_w.append(refs[pos])
            conv_b.append(refs[pos + 1])
            pos += 2
        wagg = list(refs[pos:pos + n_src]); pos += n_src
        bagg_ref, wese_ref, bese_ref = refs[pos:pos + 3]; pos += 3
        o_ref = refs[pos]
        xpad_ref = refs[pos + 1]

        cdt = x_ref.dtype
        _, wp, cmax = xpad_ref.shape

        # Zero only the 1-px halo border (interior gets overwritten below).
        # Done every grid step -> no cross-step dependency -> batch axis is
        # safely "parallel".
        xpad_ref[0:1, :, :] = jnp.zeros((1, wp, cmax), cdt)
        xpad_ref[H + 1:H + 2, :, :] = jnp.zeros((1, wp, cmax), cdt)
        xpad_ref[1:H + 1, 0:1, :] = jnp.zeros((H, 1, cmax), cdt)
        xpad_ref[1:H + 1, W + 1:W + 2, :] = jnp.zeros((H, 1, cmax), cdt)

        cur = x_ref[0]                                  # (H, W, in_chs) bf16
        srcs = [cur.reshape(H * W, in_chs)]
        cin = in_chs
        for l in range(layer_num):
            # write interior of the padded image
            xpad_ref[1:H + 1, 1:W + 1, 0:cin] = cur
            # 3x3 conv as 9 accumulated MXU matmuls (no concat / im2col copy)
            acc = None
            for kh in range(3):
                slab = xpad_ref[kh:kh + H, :, 0:cin]    # (H, W+2, cin)
                for kw in range(3):
                    tap = slab[:, kw:kw + W, :].reshape(H * W, cin)
                    d = jnp.dot(tap, conv_w[l][kh * 3 + kw],
                                preferred_element_type=jnp.float32)
                    acc = d if acc is None else acc + d
            y = jnp.maximum(acc + conv_b[l][...], 0.0)  # folded-BN bias + ReLU
            cur = y.astype(cdt).reshape(H, W, mid_chs)
            srcs.append(cur.reshape(H * W, mid_chs))
            cin = mid_chs

        # 1x1 aggregation conv with pre-split weights (no HBM/VMEM concat).
        agg = None
        for i in range(n_src):
            d = jnp.dot(srcs[i], wagg[i][...],
                        preferred_element_type=jnp.float32)
            agg = d if agg is None else agg + d
        agg = jnp.maximum(agg + bagg_ref[...], 0.0)     # (H*W, Cout) f32

        # EseModule: spatial mean -> 1x1 conv (+bias) -> sigmoid -> gate.
        m = jnp.mean(agg, axis=0, keepdims=True)        # (1, Cout) f32
        s = jnp.dot(m.astype(cdt), wese_ref[...],       # bf16 MXU operands
                    preferred_element_type=jnp.float32)
        s = _sigmoid(s + bese_ref[...])
        out = agg * s

        if residual:
            out = out + srcs[0].astype(jnp.float32)

        # Lane-dense channels-first store: (1, Cout, H*W), last dim % 128 == 0.
        o_ref[...] = out.T.reshape(1, out_chs, H * W).astype(o_ref.dtype)

    return kernel


# ---------------------------------------------------------------------------
# Parameter folding (BN scale folded into weights, agg weight pre-split)
# ---------------------------------------------------------------------------
def _fold_params(params, compute_dtype=jnp.bfloat16):
    layers = []
    src_chs = [int(params["layers"][0]["w"].shape[2])]
    for p in params["layers"]:
        w = p["w"] * p["scale"][0]                      # fold BN scale (HWIO)
        layers.append({
            "w_hwio": w.astype(compute_dtype),
            "w_taps": jnp.reshape(w, (9, w.shape[2], w.shape[3])
                                  ).astype(compute_dtype),
            "b": p["bias"],                             # (1, Cmid) f32
        })
        src_chs.append(int(w.shape[3]))
    a = params["agg"]
    wagg_full = (a["w"] * a["scale"]).astype(compute_dtype)   # (Ctot, Cout)
    offs = np.cumsum([0] + src_chs)
    wagg_split = [wagg_full[int(offs[i]):int(offs[i + 1]), :]
                  for i in range(len(src_chs))]
    return {
        "layers": layers,
        "src_chs": src_chs,
        "wagg_full": wagg_full,
        "wagg_split": wagg_split,
        "bagg": a["bias"],
        "wese": a["w_ese"].astype(compute_dtype),
        "bese": a["b_ese"],
    }


# ---------------------------------------------------------------------------
# HG_Block forward (wrapper, NCHW in/out like PyTorch)
# ---------------------------------------------------------------------------
def hg_block_forward(x_nchw, params, residual=False,
                     compute_dtype=jnp.bfloat16):
    N, _, H, W = x_nchw.shape
    folded = _fold_params(params, compute_dtype)
    src_chs = folded["src_chs"]
    in_chs = src_chs[0]
    mid_chs = src_chs[-1] if len(src_chs) > 1 else in_chs
    layer_num = len(folded["layers"])
    out_chs = int(folded["wagg_full"].shape[1])
    if residual:
        assert in_chs == out_chs, "residual requires in_chs == out_chs"

    x = jnp.transpose(x_nchw, (0, 2, 3, 1)).astype(compute_dtype)  # -> NHWC

    kernel = _make_hg_block_kernel(H, W, in_chs, mid_chs, out_chs,
                                   layer_num, residual)

    operands = [x]
    in_specs = [pl.BlockSpec((1, H, W, in_chs), lambda n: (n, 0, 0, 0))]
    for lp in folded["layers"]:
        cin_l = int(lp["w_taps"].shape[1])
        operands += [lp["w_taps"], lp["b"]]
        in_specs += [pl.BlockSpec((9, cin_l, mid_chs), lambda n: (0, 0, 0)),
                     pl.BlockSpec((1, mid_chs), lambda n: (0, 0))]
    for wsp in folded["wagg_split"]:
        operands.append(wsp)
        in_specs.append(pl.BlockSpec((int(wsp.shape[0]), out_chs),
                                     lambda n: (0, 0)))
    operands += [folded["bagg"], folded["wese"], folded["bese"]]
    in_specs += [pl.BlockSpec((1, out_chs), lambda n: (0, 0)),
                 pl.BlockSpec((out_chs, out_chs), lambda n: (0, 0)),
                 pl.BlockSpec((1, out_chs), lambda n: (0, 0))]

    cmax = max(in_chs, mid_chs)
    out = pl.pallas_call(
        kernel,
        out_shape=jax.ShapeDtypeStruct((N, out_chs, H * W), compute_dtype),
        grid=(N,),
        in_specs=in_specs,
        out_specs=pl.BlockSpec((1, out_chs, H * W), lambda n: (n, 0, 0)),
        scratch_shapes=[pltpu.VMEM((H + 2, W + 2, cmax), compute_dtype)],
        compiler_params=pltpu.CompilerParams(
            dimension_semantics=("parallel",),
            vmem_limit_bytes=_vmem_limit_bytes()),
    )(*operands)

    # Output is already channels-first and lane-dense; only a reshape remains.
    return out.reshape(N, out_chs, H, W).astype(x_nchw.dtype)


# ---------------------------------------------------------------------------
# Pure-JAX reference (same folded bf16 weights / dtype flow as the kernel)
# ---------------------------------------------------------------------------
def ref_forward(x_nchw, params, residual=False, compute_dtype=jnp.bfloat16):
    folded = _fold_params(params, compute_dtype)
    x = jnp.transpose(x_nchw, (0, 2, 3, 1)).astype(compute_dtype)
    identity = x
    outs = [x]
    for lp in folded["layers"]:
        y = jax.lax.conv_general_dilated(
            x, lp["w_hwio"], (1, 1), ((1, 1), (1, 1)),
            dimension_numbers=("NHWC", "HWIO", "NHWC"),
            preferred_element_type=jnp.float32)
        y = jnp.maximum(y + lp["b"][0], 0.0)
        x = y.astype(compute_dtype)
        outs.append(x)
    cat = jnp.concatenate(outs, axis=-1)
    agg = jnp.einsum("nhwc,cd->nhwd", cat, folded["wagg_full"],
                     preferred_element_type=jnp.float32)
    agg = jnp.maximum(agg + folded["bagg"][0], 0.0)
    m = jnp.mean(agg, axis=(1, 2), keepdims=True)
    s = jnp.einsum("nhwc,cd->nhwd", m.astype(compute_dtype), folded["wese"],
                   preferred_element_type=jnp.float32)
    s = _sigmoid(s + folded["bese"][0])
    y = agg * s
    if residual:
        y = y + identity.astype(jnp.float32)
    y = y.astype(compute_dtype)
    return jnp.transpose(y, (0, 3, 1, 2)).astype(x_nchw.dtype)


# ---------------------------------------------------------------------------
# Deterministic parameter construction (BatchNorm folded into scale/bias)
# ---------------------------------------------------------------------------
def make_bn_fold(key, cout, eps=1e-5):
    k1, k2, k3, k4 = jax.random.split(key, 4)
    gamma = 1.0 + 0.1 * jax.random.normal(k1, (cout,), jnp.float32)
    beta = 0.1 * jax.random.normal(k2, (cout,), jnp.float32)
    mean = 0.1 * jax.random.normal(k3, (cout,), jnp.float32)
    var = jax.random.uniform(k4, (cout,), jnp.float32, 0.5, 1.5)
    scale = gamma / jnp.sqrt(var + eps)
    bias = beta - mean * scale
    return scale.reshape(1, cout), bias.reshape(1, cout)


def make_params(key, in_chs, mid_chs, out_chs, layer_num):
    layers = []
    c_in = in_chs
    for _ in range(layer_num):
        key, kw, kb = jax.random.split(key, 3)
        w = 0.1 * jax.random.normal(kw, (3, 3, c_in, mid_chs), jnp.float32)
        scale, bias = make_bn_fold(kb, mid_chs)
        layers.append({"w": w, "scale": scale, "bias": bias})
        c_in = mid_chs
    total_chs = in_chs + layer_num * mid_chs
    key, kw, kb, ke1, ke2 = jax.random.split(key, 5)
    wagg = 0.1 * jax.random.normal(kw, (total_chs, out_chs), jnp.float32)
    sagg, bagg = make_bn_fold(kb, out_chs)
    wese = 0.1 * jax.random.normal(ke1, (out_chs, out_chs), jnp.float32)
    bese = 0.1 * jax.random.normal(ke2, (1, out_chs), jnp.float32)
    agg = {"w": wagg, "scale": sagg, "bias": bagg, "w_ese": wese,
           "b_ese": bese}
    return {"layers": layers, "agg": agg}


if __name__ == "__main__":
    # Small HG_Block: in_chs=4, mid_chs=8, out_chs=16, layer_num=2, k=3,
    # residual=False, light_block=False, use_lab=False, agg='ese'.
    N, C, H, W = 2, 4, 16, 16
    mid_chs, out_chs, layer_num = 8, 16, 2

    key = jax.random.PRNGKey(0)
    kx, kp = jax.random.split(key)
    x = jax.random.normal(kx, (N, C, H, W), jnp.float32)   # NCHW input
    params = make_params(kp, C, mid_chs, out_chs, layer_num)

    out = jax.block_until_ready(hg_block_forward(x, params, residual=False))
    ref = jax.block_until_ready(ref_forward(x, params, residual=False))

    # bf16 activations/weights (f32 accumulation) -> loosened tolerance.
    np.testing.assert_allclose(np.asarray(out, np.float32),
                               np.asarray(ref, np.float32),
                               rtol=2e-2, atol=2e-2)
    assert out.shape == (N, out_chs, H, W)
    print("KERNEL_OK")
</pallas_src>

<mosaic_0001>
module attributes {stable_mosaic.version = 11 : i64} {
  func.func @kernel(%arg0: i32, %arg1: memref<1x16x16x4xbf16, #tpu.memory_space<vmem>>, %arg2: memref<9x4x8xbf16, #tpu.memory_space<vmem>>, %arg3: memref<1x8xf32, #tpu.memory_space<vmem>>, %arg4: memref<9x8x8xbf16, #tpu.memory_space<vmem>>, %arg5: memref<1x8xf32, #tpu.memory_space<vmem>>, %arg6: memref<4x16xbf16, #tpu.memory_space<vmem>>, %arg7: memref<8x16xbf16, #tpu.memory_space<vmem>>, %arg8: memref<8x16xbf16, #tpu.memory_space<vmem>>, %arg9: memref<1x16xf32, #tpu.memory_space<vmem>>, %arg10: memref<16x16xbf16, #tpu.memory_space<vmem>>, %arg11: memref<1x16xf32, #tpu.memory_space<vmem>>, %arg12: memref<1x16x256xbf16, #tpu.memory_space<vmem>>, %arg13: memref<18x18x8xbf16, #tpu.memory_space<vmem>>) attributes {dimension_semantics = [#tpu.dimension_semantics<parallel>], iteration_bounds = array<i64: 2>, scalar_prefetch = 0 : i64, scratch_operands = 1 : i64, tpu.core_type = #tpu.core_type<tc>, window_params = [{transform_indices = @transform_0, window_bounds = array<i64: 1, 16, 16, 4>}, {pipeline_mode = #tpu.pipeline_mode<synchronous>, transform_indices = @transform_1, window_bounds = array<i64: 9, 4, 8>}, {pipeline_mode = #tpu.pipeline_mode<synchronous>, transform_indices = @transform_2, window_bounds = array<i64: 1, 8>}, {pipeline_mode = #tpu.pipeline_mode<synchronous>, transform_indices = @transform_3, window_bounds = array<i64: 9, 8, 8>}, {pipeline_mode = #tpu.pipeline_mode<synchronous>, transform_indices = @transform_4, window_bounds = array<i64: 1, 8>}, {pipeline_mode = #tpu.pipeline_mode<synchronous>, transform_indices = @transform_5, window_bounds = array<i64: 4, 16>}, {pipeline_mode = #tpu.pipeline_mode<synchronous>, transform_indices = @transform_6, window_bounds = array<i64: 8, 16>}, {pipeline_mode = #tpu.pipeline_mode<synchronous>, transform_indices = @transform_7, window_bounds = array<i64: 8, 16>}, {pipeline_mode = #tpu.pipeline_mode<synchronous>, transform_indices = @transform_8, window_bounds = array<i64: 1, 16>}, {pipeline_mode = #tpu.pipeline_mode<synchronous>, transform_indices = @transform_9, window_bounds = array<i64: 16, 16>}, {pipeline_mode = #tpu.pipeline_mode<synchronous>, transform_indices = @transform_10, window_bounds = array<i64: 1, 16>}, {transform_indices = @transform_11, window_bounds = array<i64: 1, 16, 256>}]} {
    %cst = arith.constant 0.000000e+00 : bf16
    %0 = vector.broadcast %cst : bf16 to vector<1x18x8xbf16>
    %c0 = arith.constant 0 : index
    %c0_0 = arith.constant 0 : index
    %c0_1 = arith.constant 0 : index
    %1 = vector.load %arg13[%c0, %c0_0, %c0_1] : memref<18x18x8xbf16, #tpu.memory_space<vmem>>, vector<1x18x8xbf16>
    tpu.vector_store %arg13[%c0, %c0_0, %c0_1], %0 {strides = array<i32>} : memref<18x18x8xbf16, #tpu.memory_space<vmem>>, vector<1x18x8xbf16>,
    %cst_2 = arith.constant 0.000000e+00 : bf16
    %2 = vector.broadcast %cst_2 : bf16 to vector<1x18x8xbf16>
    %c17 = arith.constant 17 : index
    %c0_3 = arith.constant 0 : index
    %c0_4 = arith.constant 0 : index
    %3 = vector.load %arg13[%c17, %c0_3, %c0_4] : memref<18x18x8xbf16, #tpu.memory_space<vmem>>, vector<1x18x8xbf16>
    tpu.vector_store %arg13[%c17, %c0_3, %c0_4], %2 {strides = array<i32>} : memref<18x18x8xbf16, #tpu.memory_space<vmem>>, vector<1x18x8xbf16>,
    %cst_5 = arith.constant 0.000000e+00 : bf16
    %4 = vector.broadcast %cst_5 : bf16 to vector<16x1x8xbf16>
    %c1 = arith.constant 1 : index
    %c0_6 = arith.constant 0 : index
    %c0_7 = arith.constant 0 : index
    %5 = vector.load %arg13[%c1, %c0_6, %c0_7] : memref<18x18x8xbf16, #tpu.memory_space<vmem>>, vector<16x1x8xbf16>
    tpu.vector_store %arg13[%c1, %c0_6, %c0_7], %4 {strides = array<i32>} : memref<18x18x8xbf16, #tpu.memory_space<vmem>>, vector<16x1x8xbf16>,
    %cst_8 = arith.constant 0.000000e+00 : bf16
    %6 = vector.broadcast %cst_8 : bf16 to vector<16x1x8xbf16>
    %c1_9 = arith.constant 1 : index
    %c17_10 = arith.constant 17 : index
    %c0_11 = arith.constant 0 : index
    %7 = vector.load %arg13[%c1_9, %c17_10, %c0_11] : memref<18x18x8xbf16, #tpu.memory_space<vmem>>, vector<16x1x8xbf16>
    tpu.vector_store %arg13[%c1_9, %c17_10, %c0_11], %6 {strides = array<i32>} : memref<18x18x8xbf16, #tpu.memory_space<vmem>>, vector<16x1x8xbf16>,
    %c0_12 = arith.constant 0 : index
    %c0_13 = arith.constant 0 : index
    %c0_14 = arith.constant 0 : index
    %c0_15 = arith.constant 0 : index
    %8 = vector.load %arg1[%c0_12, %c0_13, %c0_14, %c0_15] : memref<1x16x16x4xbf16, #tpu.memory_space<vmem>>, vector<1x16x16x4xbf16>
    %9 = vector.shape_cast %8 : vector<1x16x16x4xbf16> to vector<16x16x4xbf16>
    %10 = vector.shape_cast %9 : vector<16x16x4xbf16> to vector<256x4xbf16>
    %c1_16 = arith.constant 1 : index
    %c1_17 = arith.constant 1 : index
    %c0_18 = arith.constant 0 : index
    %11 = vector.load %arg13[%c1_16, %c1_17, %c0_18] : memref<18x18x8xbf16, #tpu.memory_space<vmem>>, vector<16x16x4xbf16>
    tpu.vector_store %arg13[%c1_16, %c1_17, %c0_18], %9 {strides = array<i32>} : memref<18x18x8xbf16, #tpu.memory_space<vmem>>, vector<16x16x4xbf16>,
    %c0_19 = arith.constant 0 : index
    %c0_20 = arith.constant 0 : index
    %c0_21 = arith.constant 0 : index
    %12 = vector.load %arg13[%c0_19, %c0_20, %c0_21] : memref<18x18x8xbf16, #tpu.memory_space<vmem>>, vector<16x18x4xbf16>
    %13 = vector.extract_strided_slice %12 {offsets = [0, 0, 0], sizes = [16, 16, 4], strides = [1, 1, 1]} : vector<16x18x4xbf16> to vector<16x16x4xbf16>
    %14 = vector.shape_cast %13 : vector<16x16x4xbf16> to vector<256x4xbf16>
    %c0_22 = arith.constant 0 : index
    %c0_23 = arith.constant 0 : index
    %c0_24 = arith.constant 0 : index
    %15 = vector.load %arg2[%c0_22, %c0_23, %c0_24] : memref<9x4x8xbf16, #tpu.memory_space<vmem>>, vector<1x4x8xbf16>
    %16 = vector.shape_cast %15 : vector<1x4x8xbf16> to vector<4x8xbf16>
    %cst_25 = arith.constant dense<0.000000e+00> : vector<256x8xf32>
    %17 = tpu.matmul %14, %16, %cst_25 {dimension_numbers = #tpu.dot_dimension_numbers<[1], [0], [0], [1], [0, 0, 1, 1], [], []>} : vector<256x4xbf16>, vector<4x8xbf16>, vector<256x8xf32> -> vector<256x8xf32>
    %18 = vector.extract_strided_slice %12 {offsets = [0, 1, 0], sizes = [16, 16, 4], strides = [1, 1, 1]} : vector<16x18x4xbf16> to vector<16x16x4xbf16>
    %19 = vector.shape_cast %18 : vector<16x16x4xbf16> to vector<256x4xbf16>
    %c1_26 = arith.constant 1 : index
    %c0_27 = arith.constant 0 : index
    %c0_28 = arith.constant 0 : index
    %20 = vector.load %arg2[%c1_26, %c0_27, %c0_28] : memref<9x4x8xbf16, #tpu.memory_space<vmem>>, vector<1x4x8xbf16>
    %21 = vector.shape_cast %20 : vector<1x4x8xbf16> to vector<4x8xbf16>
    %cst_29 = arith.constant dense<0.000000e+00> : vector<256x8xf32>
    %22 = tpu.matmul %19, %21, %cst_29 {dimension_numbers = #tpu.dot_dimension_numbers<[1], [0], [0], [1], [0, 0, 1, 1], [], []>} : vector<256x4xbf16>, vector<4x8xbf16>, vector<256x8xf32> -> vector<256x8xf32>
    %23 = arith.addf %17, %22 : vector<256x8xf32>
    %24 = vector.extract_strided_slice %12 {offsets = [0, 2, 0], sizes = [16, 16, 4], strides = [1, 1, 1]} : vector<16x18x4xbf16> to vector<16x16x4xbf16>
    %25 = vector.shape_cast %24 : vector<16x16x4xbf16> to vector<256x4xbf16>
    %c2 = arith.constant 2 : index
    %c0_30 = arith.constant 0 : index
    %c0_31 = arith.constant 0 : index
    %26 = vector.load %arg2[%c2, %c0_30, %c0_31] : memref<9x4x8xbf16, #tpu.memory_space<vmem>>, vector<1x4x8xbf16>
    %27 = vector.shape_cast %26 : vector<1x4x8xbf16> to vector<4x8xbf16>
    %cst_32 = arith.constant dense<0.000000e+00> : vector<256x8xf32>
    %28 = tpu.matmul %25, %27, %cst_32 {dimension_numbers = #tpu.dot_dimension_numbers<[1], [0], [0], [1], [0, 0, 1, 1], [], []>} : vector<256x4xbf16>, vector<4x8xbf16>, vector<256x8xf32> -> vector<256x8xf32>
    %29 = arith.addf %23, %28 : vector<256x8xf32>
    %c1_33 = arith.constant 1 : index
    %c0_34 = arith.constant 0 : index
    %c0_35 = arith.constant 0 : index
    %30 = vector.load %arg13[%c1_33, %c0_34, %c0_35] : memref<18x18x8xbf16, #tpu.memory_space<vmem>>, vector<16x18x4xbf16>
    %31 = vector.extract_strided_slice %30 {offsets = [0, 0, 0], sizes = [16, 16, 4], strides = [1, 1, 1]} : vector<16x18x4xbf16> to vector<16x16x4xbf16>
    %32 = vector.shape_cast %31 : vector<16x16x4xbf16> to vector<256x4xbf16>
    %c3 = arith.constant 3 : index
    %c0_36 = arith.constant 0 : index
    %c0_37 = arith.constant 0 : index
    %33 = vector.load %arg2[%c3, %c0_36, %c0_37] : memref<9x4x8xbf16, #tpu.memory_space<vmem>>, vector<1x4x8xbf16>
    %34 = vector.shape_cast %33 : vector<1x4x8xbf16> to vector<4x8xbf16>
    %cst_38 = arith.constant dense<0.000000e+00> : vector<256x8xf32>
    %35 = tpu.matmul %32, %34, %cst_38 {dimension_numbers = #tpu.dot_dimension_numbers<[1], [0], [0], [1], [0, 0, 1, 1], [], []>} : vector<256x4xbf16>, vector<4x8xbf16>, vector<256x8xf32> -> vector<256x8xf32>
    %36 = arith.addf %29, %35 : vector<256x8xf32>
    %37 = vector.extract_strided_slice %30 {offsets = [0, 1, 0], sizes = [16, 16, 4], strides = [1, 1, 1]} : vector<16x18x4xbf16> to vector<16x16x4xbf16>
    %38 = vector.shape_cast %37 : vector<16x16x4xbf16> to vector<256x4xbf16>
    %c4 = arith.constant 4 : index
    %c0_39 = arith.constant 0 : index
    %c0_40 = arith.constant 0 : index
    %39 = vector.load %arg2[%c4, %c0_39, %c0_40] : memref<9x4x8xbf16, #tpu.memory_space<vmem>>, vector<1x4x8xbf16>
    %40 = vector.shape_cast %39 : vector<1x4x8xbf16> to vector<4x8xbf16>
    %cst_41 = arith.constant dense<0.000000e+00> : vector<256x8xf32>
    %41 = tpu.matmul %38, %40, %cst_41 {dimension_numbers = #tpu.dot_dimension_numbers<[1], [0], [0], [1], [0, 0, 1, 1], [], []>} : vector<256x4xbf16>, vector<4x8xbf16>, vector<256x8xf32> -> vector<256x8xf32>
    %42 = arith.addf %36, %41 : vector<256x8xf32>
    %43 = vector.extract_strided_slice %30 {offsets = [0, 2, 0], sizes = [16, 16, 4], strides = [1, 1, 1]} : vector<16x18x4xbf16> to vector<16x16x4xbf16>
    %44 = vector.shape_cast %43 : vector<16x16x4xbf16> to vector<256x4xbf16>
    %c5 = arith.constant 5 : index
    %c0_42 = arith.constant 0 : index
    %c0_43 = arith.constant 0 : index
    %45 = vector.load %arg2[%c5, %c0_42, %c0_43] : memref<9x4x8xbf16, #tpu.memory_space<vmem>>, vector<1x4x8xbf16>
    %46 = vector.shape_cast %45 : vector<1x4x8xbf16> to vector<4x8xbf16>
    %cst_44 = arith.constant dense<0.000000e+00> : vector<256x8xf32>
    %47 = tpu.matmul %44, %46, %cst_44 {dimension_numbers = #tpu.dot_dimension_numbers<[1], [0], [0], [1], [0, 0, 1, 1], [], []>} : vector<256x4xbf16>, vector<4x8xbf16>, vector<256x8xf32> -> vector<256x8xf32>
    %48 = arith.addf %42, %47 : vector<256x8xf32>
    %c2_45 = arith.constant 2 : index
    %c0_46 = arith.constant 0 : index
    %c0_47 = arith.constant 0 : index
    %49 = vector.load %arg13[%c2_45, %c0_46, %c0_47] : memref<18x18x8xbf16, #tpu.memory_space<vmem>>, vector<16x18x4xbf16>
    %50 = vector.extract_strided_slice %49 {offsets = [0, 0, 0], sizes = [16, 16, 4], strides = [1, 1, 1]} : vector<16x18x4xbf16> to vector<16x16x4xbf16>
    %51 = vector.shape_cast %50 : vector<16x16x4xbf16> to vector<256x4xbf16>
    %c6 = arith.constant 6 : index
    %c0_48 = arith.constant 0 : index
    %c0_49 = arith.constant 0 : index
    %52 = vector.load %arg2[%c6, %c0_48, %c0_49] : memref<9x4x8xbf16, #tpu.memory_space<vmem>>, vector<1x4x8xbf16>
    %53 = vector.shape_cast %52 : vector<1x4x8xbf16> to vector<4x8xbf16>
    %cst_50 = arith.constant dense<0.000000e+00> : vector<256x8xf32>
    %54 = tpu.matmul %51, %53, %cst_50 {dimension_numbers = #tpu.dot_dimension_numbers<[1], [0], [0], [1], [0, 0, 1, 1], [], []>} : vector<256x4xbf16>, vector<4x8xbf16>, vector<256x8xf32> -> vector<256x8xf32>
    %55 = arith.addf %48, %54 : vector<256x8xf32>
    %56 = vector.extract_strided_slice %49 {offsets = [0, 1, 0], sizes = [16, 16, 4], strides = [1, 1, 1]} : vector<16x18x4xbf16> to vector<16x16x4xbf16>
    %57 = vector.shape_cast %56 : vector<16x16x4xbf16> to vector<256x4xbf16>
    %c7 = arith.constant 7 : index
    %c0_51 = arith.constant 0 : index
    %c0_52 = arith.constant 0 : index
    %58 = vector.load %arg2[%c7, %c0_51, %c0_52] : memref<9x4x8xbf16, #tpu.memory_space<vmem>>, vector<1x4x8xbf16>
    %59 = vector.shape_cast %58 : vector<1x4x8xbf16> to vector<4x8xbf16>
    %cst_53 = arith.constant dense<0.000000e+00> : vector<256x8xf32>
    %60 = tpu.matmul %57, %59, %cst_53 {dimension_numbers = #tpu.dot_dimension_numbers<[1], [0], [0], [1], [0, 0, 1, 1], [], []>} : vector<256x4xbf16>, vector<4x8xbf16>, vector<256x8xf32> -> vector<256x8xf32>
    %61 = arith.addf %55, %60 : vector<256x8xf32>
    %62 = vector.extract_strided_slice %49 {offsets = [0, 2, 0], sizes = [16, 16, 4], strides = [1, 1, 1]} : vector<16x18x4xbf16> to vector<16x16x4xbf16>
    %63 = vector.shape_cast %62 : vector<16x16x4xbf16> to vector<256x4xbf16>
    %c8 = arith.constant 8 : index
    %c0_54 = arith.constant 0 : index
    %c0_55 = arith.constant 0 : index
    %64 = vector.load %arg2[%c8, %c0_54, %c0_55] : memref<9x4x8xbf16, #tpu.memory_space<vmem>>, vector<1x4x8xbf16>
    %65 = vector.shape_cast %64 : vector<1x4x8xbf16> to vector<4x8xbf16>
    %cst_56 = arith.constant dense<0.000000e+00> : vector<256x8xf32>
    %66 = tpu.matmul %63, %65, %cst_56 {dimension_numbers = #tpu.dot_dimension_numbers<[1], [0], [0], [1], [0, 0, 1, 1], [], []>} : vector<256x4xbf16>, vector<4x8xbf16>, vector<256x8xf32> -> vector<256x8xf32>
    %67 = arith.addf %61, %66 : vector<256x8xf32>
    %c0_57 = arith.constant 0 : index
    %c0_58 = arith.constant 0 : index
    %68 = vector.load %arg3[%c0_57, %c0_58] : memref<1x8xf32, #tpu.memory_space<vmem>>, vector<1x8xf32>
    %69 = vector.broadcast %68 : vector<1x8xf32> to vector<256x8xf32>
    %70 = arith.addf %67, %69 : vector<256x8xf32>
    %cst_59 = arith.constant 0.000000e+00 : f32
    %71 = vector.broadcast %cst_59 : f32 to vector<256x8xf32>
    %72 = arith.maximumf %70, %71 : vector<256x8xf32>
    %73 = arith.truncf %72 : vector<256x8xf32> to vector<256x8xbf16>
    %74 = vector.shape_cast %73 : vector<256x8xbf16> to vector<16x16x8xbf16>
    %75 = vector.shape_cast %74 : vector<16x16x8xbf16> to vector<256x8xbf16>
    %c1_60 = arith.constant 1 : index
    %c1_61 = arith.constant 1 : index
    %c0_62 = arith.constant 0 : index
    %76 = vector.load %arg13[%c1_60, %c1_61, %c0_62] : memref<18x18x8xbf16, #tpu.memory_space<vmem>>, vector<16x16x8xbf16>
    tpu.vector_store %arg13[%c1_60, %c1_61, %c0_62], %74 {strides = array<i32>} : memref<18x18x8xbf16, #tpu.memory_space<vmem>>, vector<16x16x8xbf16>,
    %c0_63 = arith.constant 0 : index
    %c0_64 = arith.constant 0 : index
    %c0_65 = arith.constant 0 : index
    %77 = vector.load %arg13[%c0_63, %c0_64, %c0_65] : memref<18x18x8xbf16, #tpu.memory_space<vmem>>, vector<16x18x8xbf16>
    %78 = vector.extract_strided_slice %77 {offsets = [0, 0, 0], sizes = [16, 16, 8], strides = [1, 1, 1]} : vector<16x18x8xbf16> to vector<16x16x8xbf16>
    %79 = vector.shape_cast %78 : vector<16x16x8xbf16> to vector<256x8xbf16>
    %c0_66 = arith.constant 0 : index
    %c0_67 = arith.constant 0 : index
    %c0_68 = arith.constant 0 : index
    %80 = vector.load %arg4[%c0_66, %c0_67, %c0_68] : memref<9x8x8xbf16, #tpu.memory_space<vmem>>, vector<1x8x8xbf16>
    %81 = vector.shape_cast %80 : vector<1x8x8xbf16> to vector<8x8xbf16>
    %cst_69 = arith.constant dense<0.000000e+00> : vector<256x8xf32>
    %82 = tpu.matmul %79, %81, %cst_69 {dimension_numbers = #tpu.dot_dimension_numbers<[1], [0], [0], [1], [0, 0, 1, 1], [], []>} : vector<256x8xbf16>, vector<8x8xbf16>, vector<256x8xf32> -> vector<256x8xf32>
    %83 = vector.extract_strided_slice %77 {offsets = [0, 1, 0], sizes = [16, 16, 8], strides = [1, 1, 1]} : vector<16x18x8xbf16> to vector<16x16x8xbf16>
    %84 = vector.shape_cast %83 : vector<16x16x8xbf16> to vector<256x8xbf16>
    %c1_70 = arith.constant 1 : index
    %c0_71 = arith.constant 0 : index
    %c0_72 = arith.constant 0 : index
    %85 = vector.load %arg4[%c1_70, %c0_71, %c0_72] : memref<9x8x8xbf16, #tpu.memory_space<vmem>>, vector<1x8x8xbf16>
    %86 = vector.shape_cast %85 : vector<1x8x8xbf16> to vector<8x8xbf16>
    %cst_73 = arith.constant dense<0.000000e+00> : vector<256x8xf32>
    %87 = tpu.matmul %84, %86, %cst_73 {dimension_numbers = #tpu.dot_dimension_numbers<[1], [0], [0], [1], [0, 0, 1, 1], [], []>} : vector<256x8xbf16>, vector<8x8xbf16>, vector<256x8xf32> -> vector<256x8xf32>
    %88 = arith.addf %82, %87 : vector<256x8xf32>
    %89 = vector.extract_strided_slice %77 {offsets = [0, 2, 0], sizes = [16, 16, 8], strides = [1, 1, 1]} : vector<16x18x8xbf16> to vector<16x16x8xbf16>
    %90 = vector.shape_cast %89 : vector<16x16x8xbf16> to vector<256x8xbf16>
    %c2_74 = arith.constant 2 : index
    %c0_75 = arith.constant 0 : index
    %c0_76 = arith.constant 0 : index
    %91 = vector.load %arg4[%c2_74, %c0_75, %c0_76] : memref<9x8x8xbf16, #tpu.memory_space<vmem>>, vector<1x8x8xbf16>
    %92 = vector.shape_cast %91 : vector<1x8x8xbf16> to vector<8x8xbf16>
    %cst_77 = arith.constant dense<0.000000e+00> : vector<256x8xf32>
    %93 = tpu.matmul %90, %92, %cst_77 {dimension_numbers = #tpu.dot_dimension_numbers<[1], [0], [0], [1], [0, 0, 1, 1], [], []>} : vector<256x8xbf16>, vector<8x8xbf16>, vector<256x8xf32> -> vector<256x8xf32>
    %94 = arith.addf %88, %93 : vector<256x8xf32>
    %c1_78 = arith.constant 1 : index
    %c0_79 = arith.constant 0 : index
    %c0_80 = arith.constant 0 : index
    %95 = vector.load %arg13[%c1_78, %c0_79, %c0_80] : memref<18x18x8xbf16, #tpu.memory_space<vmem>>, vector<16x18x8xbf16>
    %96 = vector.extract_strided_slice %95 {offsets = [0, 0, 0], sizes = [16, 16, 8], strides = [1, 1, 1]} : vector<16x18x8xbf16> to vector<16x16x8xbf16>
    %97 = vector.shape_cast %96 : vector<16x16x8xbf16> to vector<256x8xbf16>
    %c3_81 = arith.constant 3 : index
    %c0_82 = arith.constant 0 : index
    %c0_83 = arith.constant 0 : index
    %98 = vector.load %arg4[%c3_81, %c0_82, %c0_83] : memref<9x8x8xbf16, #tpu.memory_space<vmem>>, vector<1x8x8xbf16>
    %99 = vector.shape_cast %98 : vector<1x8x8xbf16> to vector<8x8xbf16>
    %cst_84 = arith.constant dense<0.000000e+00> : vector<256x8xf32>
    %100 = tpu.matmul %97, %99, %cst_84 {dimension_numbers = #tpu.dot_dimension_numbers<[1], [0], [0], [1], [0, 0, 1, 1], [], []>} : vector<256x8xbf16>, vector<8x8xbf16>, vector<256x8xf32> -> vector<256x8xf32>
    %101 = arith.addf %94, %100 : vector<256x8xf32>
    %102 = vector.extract_strided_slice %95 {offsets = [0, 1, 0], sizes = [16, 16, 8], strides = [1, 1, 1]} : vector<16x18x8xbf16> to vector<16x16x8xbf16>
    %103 = vector.shape_cast %102 : vector<16x16x8xbf16> to vector<256x8xbf16>
    %c4_85 = arith.constant 4 : index
    %c0_86 = arith.constant 0 : index
    %c0_87 = arith.constant 0 : index
    %104 = vector.load %arg4[%c4_85, %c0_86, %c0_87] : memref<9x8x8xbf16, #tpu.memory_space<vmem>>, vector<1x8x8xbf16>
    %105 = vector.shape_cast %104 : vector<1x8x8xbf16> to vector<8x8xbf16>
    %cst_88 = arith.constant dense<0.000000e+00> : vector<256x8xf32>
    %106 = tpu.matmul %103, %105, %cst_88 {dimension_numbers = #tpu.dot_dimension_numbers<[1], [0], [0], [1], [0, 0, 1, 1], [], []>} : vector<256x8xbf16>, vector<8x8xbf16>, vector<256x8xf32> -> vector<256x8xf32>
    %107 = arith.addf %101, %106 : vector<256x8xf32>
    %108 = vector.extract_strided_slice %95 {offsets = [0, 2, 0], sizes = [16, 16, 8], strides = [1, 1, 1]} : vector<16x18x8xbf16> to vector<16x16x8xbf16>
    %109 = vector.shape_cast %108 : vector<16x16x8xbf16> to vector<256x8xbf16>
    %c5_89 = arith.constant 5 : index
    %c0_90 = arith.constant 0 : index
    %c0_91 = arith.constant 0 : index
    %110 = vector.load %arg4[%c5_89, %c0_90, %c0_91] : memref<9x8x8xbf16, #tpu.memory_space<vmem>>, vector<1x8x8xbf16>
    %111 = vector.shape_cast %110 : vector<1x8x8xbf16> to vector<8x8xbf16>
    %cst_92 = arith.constant dense<0.000000e+00> : vector<256x8xf32>
    %112 = tpu.matmul %109, %111, %cst_92 {dimension_numbers = #tpu.dot_dimension_numbers<[1], [0], [0], [1], [0, 0, 1, 1], [], []>} : vector<256x8xbf16>, vector<8x8xbf16>, vector<256x8xf32> -> vector<256x8xf32>
    %113 = arith.addf %107, %112 : vector<256x8xf32>
    %c2_93 = arith.constant 2 : index
    %c0_94 = arith.constant 0 : index
    %c0_95 = arith.constant 0 : index
    %114 = vector.load %arg13[%c2_93, %c0_94, %c0_95] : memref<18x18x8xbf16, #tpu.memory_space<vmem>>, vector<16x18x8xbf16>
    %115 = vector.extract_strided_slice %114 {offsets = [0, 0, 0], sizes = [16, 16, 8], strides = [1, 1, 1]} : vector<16x18x8xbf16> to vector<16x16x8xbf16>
    %116 = vector.shape_cast %115 : vector<16x16x8xbf16> to vector<256x8xbf16>
    %c6_96 = arith.constant 6 : index
    %c0_97 = arith.constant 0 : index
    %c0_98 = arith.constant 0 : index
    %117 = vector.load %arg4[%c6_96, %c0_97, %c0_98] : memref<9x8x8xbf16, #tpu.memory_space<vmem>>, vector<1x8x8xbf16>
    %118 = vector.shape_cast %117 : vector<1x8x8xbf16> to vector<8x8xbf16>
    %cst_99 = arith.constant dense<0.000000e+00> : vector<256x8xf32>
    %119 = tpu.matmul %116, %118, %cst_99 {dimension_numbers = #tpu.dot_dimension_numbers<[1], [0], [0], [1], [0, 0, 1, 1], [], []>} : vector<256x8xbf16>, vector<8x8xbf16>, vector<256x8xf32> -> vector<256x8xf32>
    %120 = arith.addf %113, %119 : vector<256x8xf32>
    %121 = vector.extract_strided_slice %114 {offsets = [0, 1, 0], sizes = [16, 16, 8], strides = [1, 1, 1]} : vector<16x18x8xbf16> to vector<16x16x8xbf16>
    %122 = vector.shape_cast %121 : vector<16x16x8xbf16> to vector<256x8xbf16>
    %c7_100 = arith.constant 7 : index
    %c0_101 = arith.constant 0 : index
    %c0_102 = arith.constant 0 : index
    %123 = vector.load %arg4[%c7_100, %c0_101, %c0_102] : memref<9x8x8xbf16, #tpu.memory_space<vmem>>, vector<1x8x8xbf16>
    %124 = vector.shape_cast %123 : vector<1x8x8xbf16> to vector<8x8xbf16>
    %cst_103 = arith.constant dense<0.000000e+00> : vector<256x8xf32>
    %125 = tpu.matmul %122, %124, %cst_103 {dimension_numbers = #tpu.dot_dimension_numbers<[1], [0], [0], [1], [0, 0, 1, 1], [], []>} : vector<256x8xbf16>, vector<8x8xbf16>, vector<256x8xf32> -> vector<256x8xf32>
    %126 = arith.addf %120, %125 : vector<256x8xf32>
    %127 = vector.extract_strided_slice %114 {offsets = [0, 2, 0], sizes = [16, 16, 8], strides = [1, 1, 1]} : vector<16x18x8xbf16> to vector<16x16x8xbf16>
    %128 = vector.shape_cast %127 : vector<16x16x8xbf16> to vector<256x8xbf16>
    %c8_104 = arith.constant 8 : index
    %c0_105 = arith.constant 0 : index
    %c0_106 = arith.constant 0 : index
    %129 = vector.load %arg4[%c8_104, %c0_105, %c0_106] : memref<9x8x8xbf16, #tpu.memory_space<vmem>>, vector<1x8x8xbf16>
    %130 = vector.shape_cast %129 : vector<1x8x8xbf16> to vector<8x8xbf16>
    %cst_107 = arith.constant dense<0.000000e+00> : vector<256x8xf32>
    %131 = tpu.matmul %128, %130, %cst_107 {dimension_numbers = #tpu.dot_dimension_numbers<[1], [0], [0], [1], [0, 0, 1, 1], [], []>} : vector<256x8xbf16>, vector<8x8xbf16>, vector<256x8xf32> -> vector<256x8xf32>
    %132 = arith.addf %126, %131 : vector<256x8xf32>
    %c0_108 = arith.constant 0 : index
    %c0_109 = arith.constant 0 : index
    %133 = vector.load %arg5[%c0_108, %c0_109] : memref<1x8xf32, #tpu.memory_space<vmem>>, vector<1x8xf32>
    %134 = vector.broadcast %133 : vector<1x8xf32> to vector<256x8xf32>
    %135 = arith.addf %132, %134 : vector<256x8xf32>
    %cst_110 = arith.constant 0.000000e+00 : f32
    %136 = vector.broadcast %cst_110 : f32 to vector<256x8xf32>
    %137 = arith.maximumf %135, %136 : vector<256x8xf32>
    %138 = arith.truncf %137 : vector<256x8xf32> to vector<256x8xbf16>
    %139 = vector.shape_cast %138 : vector<256x8xbf16> to vector<16x16x8xbf16>
    %140 = vector.shape_cast %139 : vector<16x16x8xbf16> to vector<256x8xbf16>
    %c0_111 = arith.constant 0 : index
    %c0_112 = arith.constant 0 : index
    %141 = vector.load %arg6[%c0_111, %c0_112] : memref<4x16xbf16, #tpu.memory_space<vmem>>, vector<4x16xbf16>
    %cst_113 = arith.constant dense<0.000000e+00> : vector<256x16xf32>
    %142 = tpu.matmul %10, %141, %cst_113 {dimension_numbers = #tpu.dot_dimension_numbers<[1], [0], [0], [1], [0, 0, 1, 1], [], []>} : vector<256x4xbf16>, vector<4x16xbf16>, vector<256x16xf32> -> vector<256x16xf32>
    %c0_114 = arith.constant 0 : index
    %c0_115 = arith.constant 0 : index
    %143 = vector.load %arg7[%c0_114, %c0_115] : memref<8x16xbf16, #tpu.memory_space<vmem>>, vector<8x16xbf16>
    %cst_116 = arith.constant dense<0.000000e+00> : vector<256x16xf32>
    %144 = tpu.matmul %75, %143, %cst_116 {dimension_numbers = #tpu.dot_dimension_numbers<[1], [0], [0], [1], [0, 0, 1, 1], [], []>} : vector<256x8xbf16>, vector<8x16xbf16>, vector<256x16xf32> -> vector<256x16xf32>
    %145 = arith.addf %142, %144 : vector<256x16xf32>
    %c0_117 = arith.constant 0 : index
    %c0_118 = arith.constant 0 : index
    %146 = vector.load %arg8[%c0_117, %c0_118] : memref<8x16xbf16, #tpu.memory_space<vmem>>, vector<8x16xbf16>
    %cst_119 = arith.constant dense<0.000000e+00> : vector<256x16xf32>
    %147 = tpu.matmul %140, %146, %cst_119 {dimension_numbers = #tpu.dot_dimension_numbers<[1], [0], [0], [1], [0, 0, 1, 1], [], []>} : vector<256x8xbf16>, vector<8x16xbf16>, vector<256x16xf32> -> vector<256x16xf32>
    %148 = arith.addf %145, %147 : vector<256x16xf32>
    %c0_120 = arith.constant 0 : index
    %c0_121 = arith.constant 0 : index
    %149 = vector.load %arg9[%c0_120, %c0_121] : memref<1x16xf32, #tpu.memory_space<vmem>>, vector<1x16xf32>
    %150 = vector.broadcast %149 : vector<1x16xf32> to vector<256x16xf32>
    %151 = arith.addf %148, %150 : vector<256x16xf32>
    %cst_122 = arith.constant 0.000000e+00 : f32
    %152 = vector.broadcast %cst_122 : f32 to vector<256x16xf32>
    %153 = arith.maximumf %151, %152 : vector<256x16xf32>
    %cst_123 = arith.constant dense<0.000000e+00> : vector<16xf32>
    %154 = vector.multi_reduction <add>, %153, %cst_123 [0] : vector<256x16xf32> to vector<16xf32>
    %155 = vector.shape_cast %154 : vector<16xf32> to vector<1x16xf32>
    %cst_124 = arith.constant 2.560000e+02 : f32
    %156 = vector.broadcast %cst_124 : f32 to vector<1x16xf32>
    %157 = arith.divf %155, %156 : vector<1x16xf32>
    %158 = arith.truncf %157 : vector<1x16xf32> to vector<1x16xbf16>
    %c0_125 = arith.constant 0 : index
    %c0_126 = arith.constant 0 : index
    %159 = vector.load %arg10[%c0_125, %c0_126] : memref<16x16xbf16, #tpu.memory_space<vmem>>, vector<16x16xbf16>
    %cst_127 = arith.constant dense<0.000000e+00> : vector<1x16xf32>
    %160 = tpu.matmul %158, %159, %cst_127 {dimension_numbers = #tpu.dot_dimension_numbers<[1], [0], [0], [1], [0, 0, 1, 1], [], []>} : vector<1x16xbf16>, vector<16x16xbf16>, vector<1x16xf32> -> vector<1x16xf32>
    %c0_128 = arith.constant 0 : index
    %c0_129 = arith.constant 0 : index
    %161 = vector.load %arg11[%c0_128, %c0_129] : memref<1x16xf32, #tpu.memory_space<vmem>>, vector<1x16xf32>
    %162 = arith.addf %160, %161 : vector<1x16xf32>
    %cst_130 = arith.constant 0.000000e+00 : f32
    %163 = vector.broadcast %cst_130 : f32 to vector<1x16xf32>
    %164 = arith.subf %163, %162 : vector<1x16xf32>
    %165 = math.exp %164 : vector<1x16xf32>
    %cst_131 = arith.constant 1.000000e+00 : f32
    %166 = vector.broadcast %cst_131 : f32 to vector<1x16xf32>
    %167 = arith.addf %166, %165 : vector<1x16xf32>
    %cst_132 = arith.constant 1.000000e+00 : f32
    %168 = vector.broadcast %cst_132 : f32 to vector<1x16xf32>
    %169 = arith.divf %168, %167 : vector<1x16xf32>
    %170 = vector.broadcast %169 : vector<1x16xf32> to vector<256x16xf32>
    %171 = arith.mulf %153, %170 : vector<256x16xf32>
    %172 = tpu.transpose %171, [1, 0] : vector<256x16xf32> -> vector<16x256xf32>
    %173 = vector.shape_cast %172 : vector<16x256xf32> to vector<1x16x256xf32>
    %174 = arith.truncf %173 : vector<1x16x256xf32> to vector<1x16x256xbf16>
    %c0_133 = arith.constant 0 : index
    %c0_134 = arith.constant 0 : index
    %c0_135 = arith.constant 0 : index
    %175 = vector.load %arg12[%c0_133, %c0_134, %c0_135] : memref<1x16x256xbf16, #tpu.memory_space<vmem>>, vector<1x16x256xbf16>
    tpu.vector_store %arg12[%c0_133, %c0_134, %c0_135], %174 {strides = array<i32>} : memref<1x16x256xbf16, #tpu.memory_space<vmem>>, vector<1x16x256xbf16>,
    return
  }
  func.func @transform_0(%arg0: i32) -> (i32, i32, i32, i32) {
    %c0_i32 = arith.constant 0 : i32
    %c0_i32_0 = arith.constant 0 : i32
    %c0_i32_1 = arith.constant 0 : i32
    %c0_i32_2 = arith.constant 0 : i32
    return %arg0, %c0_i32, %c0_i32_0, %c0_i32_1 : i32, i32, i32, i32
  }
  func.func @transform_1(%arg0: i32) -> (i32, i32, i32) {
    %c0_i32 = arith.constant 0 : i32
    %c0_i32_0 = arith.constant 0 : i32
    %c0_i32_1 = arith.constant 0 : i32
    %c0_i32_2 = arith.constant 0 : i32
    return %c0_i32, %c0_i32_0, %c0_i32_1 : i32, i32, i32
  }
  func.func @transform_2(%arg0: i32) -> (i32, i32) {
    %c0_i32 = arith.constant 0 : i32
    %c0_i32_0 = arith.constant 0 : i32
    %c0_i32_1 = arith.constant 0 : i32
    return %c0_i32, %c0_i32_0 : i32, i32
  }
  func.func @transform_3(%arg0: i32) -> (i32, i32, i32) {
    %c0_i32 = arith.constant 0 : i32
    %c0_i32_0 = arith.constant 0 : i32
    %c0_i32_1 = arith.constant 0 : i32
    %c0_i32_2 = arith.constant 0 : i32
    return %c0_i32, %c0_i32_0, %c0_i32_1 : i32, i32, i32
  }
  func.func @transform_4(%arg0: i32) -> (i32, i32) {
    %c0_i32 = arith.constant 0 : i32
    %c0_i32_0 = arith.constant 0 : i32
    %c0_i32_1 = arith.constant 0 : i32
    return %c0_i32, %c0_i32_0 : i32, i32
  }
  func.func @transform_5(%arg0: i32) -> (i32, i32) {
    %c0_i32 = arith.constant 0 : i32
    %c0_i32_0 = arith.constant 0 : i32
    %c0_i32_1 = arith.constant 0 : i32
    return %c0_i32, %c0_i32_0 : i32, i32
  }
  func.func @transform_6(%arg0: i32) -> (i32, i32) {
    %c0_i32 = arith.constant 0 : i32
    %c0_i32_0 = arith.constant 0 : i32
    %c0_i32_1 = arith.constant 0 : i32
    return %c0_i32, %c0_i32_0 : i32, i32
  }
  func.func @transform_7(%arg0: i32) -> (i32, i32) {
    %c0_i32 = arith.constant 0 : i32
    %c0_i32_0 = arith.constant 0 : i32
    %c0_i32_1 = arith.constant 0 : i32
    return %c0_i32, %c0_i32_0 : i32, i32
  }
  func.func @transform_8(%arg0: i32) -> (i32, i32) {
    %c0_i32 = arith.constant 0 : i32
    %c0_i32_0 = arith.constant 0 : i32
    %c0_i32_1 = arith.constant 0 : i32
    return %c0_i32, %c0_i32_0 : i32, i32
  }
  func.func @transform_9(%arg0: i32) -> (i32, i32) {
    %c0_i32 = arith.constant 0 : i32
    %c0_i32_0 = arith.constant 0 : i32
    %c0_i32_1 = arith.constant 0 : i32
    return %c0_i32, %c0_i32_0 : i32, i32
  }
  func.func @transform_10(%arg0: i32) -> (i32, i32) {
    %c0_i32 = arith.constant 0 : i32
    %c0_i32_0 = arith.constant 0 : i32
    %c0_i32_1 = arith.constant 0 : i32
    return %c0_i32, %c0_i32_0 : i32, i32
  }
  func.func @transform_11(%arg0: i32) -> (i32, i32, i32) {
    %c0_i32 = arith.constant 0 : i32
    %c0_i32_0 = arith.constant 0 : i32
    %c0_i32_1 = arith.constant 0 : i32
    return %arg0, %c0_i32, %c0_i32_0 : i32, i32, i32
  }
}

</mosaic_0001>

<bundles_post_ra>
// kernel: tpu_custom_call.1
= control target key start
LH: loop header
LB: loop body
LE: loop exit
PB: predicated region body
PF: predicated region fallthrough
CT: control target
= control target key end

     0   :  { %s20351_s0 = inlined_call_operand.vmem [shape: bf16[2,16,16,4], index: 0, kind: input, shape index: {}]   ;;  %s20352_s1 = inlined_call_operand.vmem [shape: bf16[9,4,8], index: 1, kind: input, shape index: {}]   ;;  %s20353_s2 = inlined_call_operand.vmem [shape: f32[1,8], index: 2, kind: input, shape index: {}]   ;;  %s20354_s3 = inlined_call_operand.vmem [shape: bf16[9,8,8], index: 3, kind: input, shape index: {}]   ;;  %s20355_s4 = inlined_call_operand.vmem [shape: f32[1,8], index: 4, kind: input, shape index: {}]   ;;  %s20356_s5 = inlined_call_operand.vmem [shape: bf16[4,16], index: 5, kind: input, shape index: {}]   ;;  %s20357_s6 = inlined_call_operand.vmem [shape: bf16[8,16], index: 6, kind: input, shape index: {}]   ;;  %s20358_s7 = inlined_call_operand.vmem [shape: bf16[8,16], index: 7, kind: input, shape index: {}]   ;;  %s20359_s8 = inlined_call_operand.vmem [shape: f32[1,16], index: 8, kind: input, shape index: {}]   ;;  %s20360_s9 = inlined_call_operand.vmem [shape: bf16[16,16], index: 9, kind: input, shape index: {}]   ;;  %s20361_s10 = inlined_call_operand.vmem [shape: f32[1,16], index: 10, kind: input, shape index: {}]   ;;  %s20362_s11 = inlined_call_operand.hbm [shape: bf16[2,16,256], index: 11, kind: output, shape index: {}]  }
   0x1   :  { %20522 = sst [smem:[#allocation98_spill]] %s20351_s0 }
   0x2   :  { %16 = vsyncpa [#allocation4], 0 }
   0x3   :  { %18 = vsyncpa [#allocation4 + $0x1], 0  ;;  %s13846_s17 = smov 0   ;;  %s13848_s18 = smov 0  }
   0x4   :  { %s13850_s19 = smov 0   ;;  %s13852_s20 = smov 0  }
   0x5 LB: > { %s13867_s21 = sadd.s32 4294967295, %s13778_s20   ;;  %s11523_s22 = sadd.s32 4294967294, %s13778_s20   ;;  %s13778_s20 = sphi %s13852_s20, %s21239_s20   ;;  %s13774_s19 = sphi %s13850_s19, %s21238_s19   ;;  %s13770_s18 = sphi %s13848_s18, %s21237_s18   ;;  %s13766_s17 = sphi %s13846_s17, %s21236_s17  }
   0x6   : > { %s13871_s23 = sadd.s32 1, %s13778_s20   ;;  %s267_s24 = sadd.s32 1, %s13774_s19 }
   0x7   : > { %s264_s25 = ssub.s32 %s13778_s20, %s13871_s23  ;;  %p277_p0 = scmp.ne.s32.totalorder %s13774_s19, %s13770_s18 }
   0x8   : > { %p265_p1 = scmp.eq.s32.totalorder %s264_s25, 0  ;;  %p278_p2 = scmp.eq.s32.totalorder %s13867_s21, 1 }
   0x9   : > { %p283_p3 = scmp.ne.s32.totalorder %s13770_s18, %s13766_s17  ;;  %p284_p4 = scmp.eq.s32.totalorder %s11523_s22, 1 }
   0xa   : > { %s13882_s26 = scalar_select %p265_p1, %s13774_s19, %s267_s24  }
   0xb   : > { %p13884_p5 = por %p278_p2, %p277_p0  ;;  %p13888_p6 = por %p284_p4, %p283_p3 }
   0xc   : > { %p11526_p7 = scmp.ge.s32.totalorder %s13778_s20, 1  ;;  %p340_p8 = scmp.lt.s32.totalorder %s13778_s20, 3 }
   0xe   : > { %p341_p9 = pnand %p11526_p7, %p340_p8 }
  0x10   : > { %344 = sbr.rel (%p341_p9) target bundleno = 1852 (0x73c), region = 64 }
  0x15   : > { %v11530_v0 = vld [vmem:[%s20352_s1 + $0x2] sm:$0x3]  ;;  %vm1503_vm0 = vcmask 1041408   ;;  %vm386_vm1 = vcmask 60416   ;;  %vm389_vm2 = vcmask 57344   ;;  %v13780_v2 = vmov 0  }
  0x16   : > { %13443 = vmatprep.subr.msk.bf16.mxu0 %vm1503_vm0, %v11530_v0  ;;  %v1505_v1 = vsel %vm1503_vm0, %v11530_v0, 0  ;;  %13444 = vmatprep.subr.msk.bf16.mxu1 %vm1503_vm0, %v11530_v0  ;;  %387 = vst.msk [vmem:[#allocation2] sm:$0xf] %vm386_vm1, %v13780_v2  ;;  %388 = vst.msk [vmem:[#allocation2 + $0x4] sm:$0xf] %vm386_vm1, %v13780_v2  ;;  %v20525_v3 = vmov 0 }
  0x17   : > { %390 = vst.msk [vmem:[#allocation2 + $0x8] sm:$0x1] %vm389_vm2, %v13780_v2  ;;  %394 = vst.msk [vmem:[#allocation2 + $0xd4] sm:$0x1] %vm389_vm2, %v13780_v2  ;;  %vm397_vm3 = vsmask.f32 256  ;;  %12722 = vmatpush3.bf16.msra.mxu0 %v1505_v1  ;;  %13442 = vmatpush3.bf16.msra.mxu1 %v1505_v1 }
  0x18   : > { %vm447_vm4 = vsmask.f32 7938  ;;  %392 = vst.msk [vmem:[#allocation2 + $0xcc] sm:$0xf] %vm386_vm1, %v13780_v2  ;;  %393 = vst.msk [vmem:[#allocation2 + $0xd0] sm:$0xf] %vm386_vm1, %v13780_v2 }
  0x19   : > { %vm13908_vm5 = vmand %vm389_vm2, %vm397_vm3  ;;  %p380_p10 = scmp.lt.s32.totalorder %s13867_s21, 1  ;;  %v20528_v4 = vmov 0  ;;  %v13922_v5 = vld [vmem:[%s20352_s1 + $0x4] sm:$0x3]  ;;  %v399_v6 = vld [vmem:[#allocation2 + $0xc] sm:$0x1] }
  0x1a   : > { %v20526_v3 = vsel %vm13908_vm5, 4294967295, %v20525_v3  ;;  %vm13915_vm6 = vmand %vm389_vm2, %vm447_vm4  ;;  %vm1017_vm7 = vsmask.f32 3328  ;;  %13446 = vmatprep.subr.msk.bf16.mxu0 %vm1503_vm0, %v13922_v5  ;;  %v400_v7 = vsel %vm13908_vm5, 0, %v399_v6  ;;  %v449_v8 = vld [vmem:[#allocation2 + $0x14] sm:$0x1] }
  0x1b   : > { %20527 = vst [vmem:[#allocation6_spill] sm:$0xff] %v20526_v3  ;;  %v20529_v4 = vsel %vm13915_vm6, 4294967295, %v20528_v4  ;;  %s381_s14 = scalar_select %p380_p10, %s13867_s21, 1  ;;  %401 = vst [vmem:[#allocation2 + $0xc] sm:$0x1] %v400_v7  ;;  %v450_v9 = vsel %vm13915_vm6, 0, %v449_v8 }
  0x1c   : > { %20530 = vst [vmem:[#allocation7_spill] sm:$0xff] %v20529_v4  ;;  %v426_v10 = vld [vmem:[#allocation2 + $0x78] sm:$0x1]  ;;  %v476_v11 = vld [vmem:[#allocation2 + $0x80] sm:$0x1]  ;;  %vm851_vm8 = vcmask 27648  }
  0x1d   : > { %s12326_s15 = sshll.u32 %s381_s14, 7  ;;  %451 = vst [vmem:[#allocation2 + $0x14] sm:$0x1] %v450_v9  ;;  %v427_v12 = vsel %vm13908_vm5, 0, %v426_v10  ;;  %v477_v13 = vsel %vm13915_vm6, 0, %v476_v11  ;;  %s20531_s0 = sld [smem:[#allocation98_spill]]  ;;  %vm13947_vm13 = vmand %vm851_vm8, %vm447_vm4 }
  0x1e   : > { %v429_v14 = vld [vmem:[#allocation2 + $0x84] sm:$0x1]  ;;  %vm1018_vm9 = vsmask.f32 7440  ;;  %vm529_vm10 = vsmask.f32 4368 }
  0x1f   : > { %428 = vst [vmem:[#allocation2 + $0x78] sm:$0x1] %v427_v12  ;;  %478 = vst [vmem:[#allocation2 + $0x80] sm:$0x1] %v477_v13  ;;  %v430_v15 = vsel %vm13908_vm5, 0, %v429_v14  ;;  %vm1454_vm11 = vcmask 31744  }
  0x20   : > { %v968_v16 = vld [vmem:[#allocation2] sm:$0xf]  ;;  %v969_v17 = vld [vmem:[#allocation2 + $0x4] sm:$0xf]  ;;  %v970_v18 = vld [vmem:[#allocation2 + $0x8] sm:$0x1] }
  0x21   : > { %431 = vst [vmem:[#allocation2 + $0x84] sm:$0x1] %v430_v15  ;;  %v1021_v19 = vshrl.u32 %v968_v16, 16  ;;  %v1024_v20 = vshll.u32 %v968_v16, 16  ;;  %v1030_v21 = vshll.u32 %v969_v17, 16  ;;  %v1034_v22 = vshrl.u32 %v969_v17, 16  ;;  %vm13953_vm14 = vmor %vm1017_vm7, %vm1018_vm9 }
  0x22   : > { %v1040_v24 = vshll.u32 %v970_v18, 16  ;;  %vm858_vm12 = vcmask 24576   ;;  %v20534_v38 = vmov 0  ;;  %v853_v41 = vld [vmem:[#allocation2 + $0xc] sm:$0xf]  ;;  %vm13960_vm15 = vmor %vm397_vm3, %vm529_vm10  ;;  %v20537_v45 = vmov 0 }
  0x23   : > { %s13938_s24 = scalar_lea.vmem %s20531_s0, %s12326_s15  ;;  %v1023_v28 = vrot.slane %v1021_v19, 4  ;;  %v1026_v29 = vrot.slane %v1024_v20, 5  ;;  %v1032_v30 = vrot.slane %v1030_v21, 5  ;;  %v1036_v31 = vrot.slane %v1034_v22, 4  ;;  %v479_v50 = vld [vmem:[#allocation2 + $0x8c] sm:$0x1]  ;;  %vm13966_vm2 = vmand %vm858_vm12, %vm397_vm3 }
  0x24   : > { %v497_v23 = vld [vmem:[%s13938_s24] sm:$0xf]  ;;  %v498_v25 = vld [vmem:[%s13938_s24 + $0x4] sm:$0xf]  ;;  %v515_v32 = vld [vmem:[%s13938_s24 + $0x48] sm:$0xf] }
  0x25   : > { %v532_v26 = vshrl.u32 %v497_v23, 16  ;;  %v535_v27 = vshll.u32 %v497_v23, 16  ;;  %v1042_v34 = vrot.slane %v1040_v24, 5  ;;  %v540_v36 = vshrl.u32 %v498_v25, 16  ;;  %v516_v42 = vld [vmem:[%s13938_s24 + $0x4c] sm:$0xf]  ;;  %vm16781_vm10 = vmand %vm386_vm1, %vm447_vm4 }
  0x26   : > { %v543_v37 = vshll.u32 %v498_v25, 16  ;;  %v20535_v38 = vsel %vm13953_vm14, 4294967295, %v20534_v38  ;;  %v1027_v39 = vor.u32 %v1026_v29, %v1023_v28  ;;  %v1037_v40 = vor.u32 %v1036_v31, %v1032_v30  ;;  %v860_v54 = vld [vmem:[#allocation2 + $0x14] sm:$0x1]  ;;  %v919_v61 = vld [vmem:[#allocation2 + $0x78] sm:$0xf] }
  0x27   : > { %v534_v35 = vrot.slane %v532_v26, 7  ;;  %20536 = vst [vmem:[#allocation8_spill] sm:$0xff] %v20535_v38  ;;  %v685_v43 = vshrl.u32 %v515_v32, 16  ;;  %v688_v44 = vshll.u32 %v515_v32, 16  ;;  %v20538_v45 = vsel %vm13960_vm15, 4294967295, %v20537_v45  ;;  %s377_s15 = sand.u32 1, %s13770_s18  }
  0x28   : > { %20539 = vst [vmem:[#allocation9_spill] sm:$0xff] %v20538_v45  ;;  %v542_v48 = vrot.slane %v540_v36, 7  ;;  %v693_v49 = vshrl.u32 %v516_v42, 16  ;;  %v1028_v51 = vrot.slane %v1027_v39, 4  ;;  %v1038_v52 = vrot.slane %v1037_v40, 4  ;;  %s11527_s16 = sshll.u32 %s377_s15, 4 }
  0x29   : > { %v537_v46 = vor.u32 %v535_v27, %v534_v35  ;;  %v538_v47 = vrot.slane %v534_v35, 4  ;;  %v20540_v53 = vmov 0  ;;  %v687_v55 = vrot.slane %v685_v43, 7  ;;  %v517_v62 = vld [vmem:[%s13938_s24 + $0x50] sm:$0xf]  ;;  %s379_s22 = scalar_lea.vmem [#allocation3], %s11527_s16 }
  0x2a   : > { %v20541_v53 = vsel %vm13966_vm2, 4294967295, %v20540_v53  ;;  %v696_v56 = vshll.u32 %v516_v42, 16  ;;  %v545_v57 = vor.u32 %v543_v37, %v542_v48  ;;  %v547_v58 = vrot.slane %v542_v48, 4  ;;  %v518_v6 = vld [vmem:[%s13938_s24 + $0x54] sm:$0xf]  ;;  %s11461_s25 = sshll.u32 %s379_s22, 4  ;;  %s20309_s25 = int_to_ptr.vmem [resolvable:$true] %s11461_s25 }
  0x2b   : > { %20542 = vst [vmem:[#allocation10_spill] sm:$0xff] %v20541_v53  ;;  %v854_v59 = vsel %vm13947_vm13, %v537_v46, %v853_v41  ;;  %v695_v60 = vrot.slane %v693_v49, 7  ;;  %v1033_v63 = vsel %vm13953_vm14, %v1028_v51, %v1032_v30  ;;  %v1043_v0 = vsel %vm13953_vm14, %v1038_v52, %v1042_v34  ;;  %v402_v7 = vld [vmem:[#allocation2 + $0x18] sm:$0x1]  ;;  %v923_v12 = vld [vmem:[#allocation2 + $0x80] sm:$0x1] }
  0x2c   : > { %855 = vst [vmem:[#allocation2 + $0xc] sm:$0xf] %v854_v59  ;;  %v690_v1 = vor.u32 %v688_v44, %v687_v55  ;;  %v691_v2 = vrot.slane %v687_v55, 4  ;;  %v11531_v8 = vcombine.low %v1033_v63, %v1043_v0  ;;  %v546_v9 = vsel %vm13960_vm15, %v538_v47, %v545_v57  ;;  %v452_v13 = vld [vmem:[#allocation2 + $0x20] sm:$0x1]  ;;  %s20311_s13 = scalar_lea.sflag [#allocation4], %s377_s15 }
  0x2d   : > { %v861_v10 = vsel %vm13966_vm2, %v547_v58, %v860_v54  ;;  %v698_v11 = vor.u32 %v696_v56, %v695_v60  ;;  %v13983_v14 = vld [vmem:[%s13938_s24 + $0x8] sm:$0xf]  ;;  %857 = vst.msk [vmem:[#allocation2 + $0x10] sm:$0xf] %vm851_vm8, %v546_v9  ;;  %v700_v15 = vrot.slane %v695_v60, 4  ;;  %v480_v17 = vsel %vm13915_vm6, 0, %v479_v50 }
  0x2e   : > { %862 = vst [vmem:[#allocation2 + $0x14] sm:$0x1] %v861_v10  ;;  %v920_v16 = vsel %vm13947_vm13, %v690_v1, %v919_v61  ;;  %v702_v18 = vshrl.u32 %v517_v62, 16  ;;  %v500_v19 = vld [vmem:[%s13938_s24 + $0xc] sm:$0xf]  ;;  %12723 = vmatprep.mubr.msk.bf16.mxu0 %vm1454_vm11, %v11531_v8  ;;  %v705_v21 = vshll.u32 %v517_v62, 16 }
  0x2f   : > { %v699_v20 = vsel %vm13960_vm15, %v691_v2, %v698_v11  ;;  %921 = vst [vmem:[#allocation2 + $0x78] sm:$0xf] %v920_v16  ;;  %481 = vst [vmem:[#allocation2 + $0x8c] sm:$0x1] %v480_v17  ;;  %v710_v22 = vshrl.u32 %v518_v6, 16  ;;  %v713_v23 = vshll.u32 %v518_v6, 16  ;;  %v924_v25 = vsel %vm13966_vm2, %v700_v15, %v923_v12 }
  0x30   : > { %v405_v24 = vld [vmem:[#allocation2 + $0x24] sm:$0x1]  ;;  %922 = vst.msk [vmem:[#allocation2 + $0x7c] sm:$0xf] %vm851_vm8, %v699_v20  ;;  %v704_v26 = vrot.slane %v702_v18, 7  ;;  %v403_v28 = vsel %vm13908_vm5, 0, %v402_v7 }
  0x31   : > { %v926_v27 = vld [vmem:[#allocation2 + $0x84] sm:$0xf]  ;;  %v453_v29 = vsel %vm13915_vm6, 0, %v452_v13  ;;  %925 = vst [vmem:[#allocation2 + $0x80] sm:$0x1] %v924_v25  ;;  %v14003_v30 = vsel %vm1503_vm0, %v13922_v5, 0 }
  0x32   : > { %v712_v31 = vrot.slane %v710_v22, 7  ;;  %404 = vst [vmem:[#allocation2 + $0x18] sm:$0x1] %v403_v28  ;;  %454 = vst [vmem:[#allocation2 + $0x20] sm:$0x1] %v453_v29  ;;  %v549_v32 = vshrl.u32 %v13983_v14, 16  ;;  %v707_v36 = vor.u32 %v705_v21, %v704_v26 }
  0x33   : > { %v557_v34 = vshrl.u32 %v500_v19, 16  ;;  %v455_v35 = vld [vmem:[#allocation2 + $0x2c] sm:$0x1]  ;;  %v708_v37 = vrot.slane %v704_v26, 4  ;;  %v552_v39 = vshll.u32 %v13983_v14, 16  ;;  %v406_v40 = vsel %vm13908_vm5, 0, %v405_v24 }
  0x34   : > { %v14009_v41 = vld [vmem:[#allocation2 + $0xc] sm:$0xf]  ;;  %v715_v42 = vor.u32 %v713_v23, %v712_v31  ;;  %v551_v43 = vrot.slane %v549_v32, 7  ;;  %v560_v44 = vshll.u32 %v500_v19, 16  ;;  %407 = vst [vmem:[#allocation2 + $0x24] sm:$0x1] %v406_v40  ;;  %v927_v48 = vsel %vm13947_vm13, %v707_v36, %v926_v27 }
  0x35   : > { %v14011_v5 = vrot.slane %v557_v34, 7  ;;  %v1045_v46 = vshrl.u32 %v14009_v41, 16  ;;  %v1048_v47 = vshll.u32 %v14009_v41, 16  ;;  %v456_v49 = vsel %vm13915_vm6, 0, %v455_v35  ;;  %v14019_v50 = vld [vmem:[#allocation2 + $0x10] sm:$0xf] }
  0x36   : > { %v973_v51 = vld [vmem:[#allocation2 + $0x14] sm:$0x1]  ;;  %v716_v52 = vsel %vm13960_vm15, %v708_v37, %v715_v42  ;;  %v717_v54 = vrot.slane %v712_v31, 4  ;;  %928 = vst [vmem:[#allocation2 + $0x84] sm:$0xf] %v927_v48  ;;  %v555_v55 = vrot.slane %v551_v43, 4  ;;  %v554_v22 = vor.u32 %v552_v39, %v551_v43 }
  0x37   : > { %457 = vst [vmem:[#allocation2 + $0x2c] sm:$0x1] %v456_v49  ;;  %v1047_v56 = vrot.slane %v1045_v46, 4  ;;  %v1050_v57 = vrot.slane %v1048_v47, 5  ;;  %v1054_v58 = vshll.u32 %v14019_v50, 16  ;;  %v1058_v59 = vshrl.u32 %v14019_v50, 16 }
  0x38   : > { %v998_v60 = vld [vmem:[#allocation2 + $0x78] sm:$0xf]  ;;  %929 = vst.msk [vmem:[#allocation2 + $0x88] sm:$0xf] %vm851_vm8, %v716_v52  ;;  %v1064_v61 = vshll.u32 %v973_v51, 16  ;;  %v562_v1 = vor.u32 %v560_v44, %v14011_v5  ;;  %v564_v42 = vrot.slane %v14011_v5, 4 }
  0x39   : > { %v999_v62 = vld [vmem:[#allocation2 + $0x7c] sm:$0xf]  ;;  %v1261_v63 = vshrl.u32 %v998_v60, 16  ;;  %v1264_v0 = vshll.u32 %v998_v60, 16  ;;  %v1051_v2 = vor.u32 %v1050_v57, %v1047_v56  ;;  %v1056_v6 = vrot.slane %v1054_v58, 5  ;;  %s13783_s14 = smov [#allocation3]  }
  0x3a   : > { %v1060_v7 = vrot.slane %v1058_v59, 4  ;;  %v1000_v8 = vld [vmem:[#allocation2 + $0x80] sm:$0x1]  ;;  %v1270_v9 = vshll.u32 %v999_v62, 16  ;;  %v1066_v10 = vrot.slane %v1064_v61, 5  ;;  %v1274_v13 = vshrl.u32 %v999_v62, 16 }
  0x3b   : > { %v1263_v11 = vrot.slane %v1261_v63, 4  ;;  %v1266_v12 = vrot.slane %v1264_v0, 5  ;;  %v930_v14 = vld [vmem:[#allocation2 + $0x8c] sm:$0x1]  ;;  %v1052_v15 = vrot.slane %v1051_v2, 4  ;;  %v1280_v18 = vshll.u32 %v1000_v8, 16 }
  0x3c   : > { %v1061_v16 = vor.u32 %v1060_v7, %v1056_v6  ;;  %v1272_v17 = vrot.slane %v1270_v9, 5  ;;  %v1276_v20 = vrot.slane %v1274_v13, 4  ;;  %v931_v21 = vsel %vm13966_vm2, %v717_v54, %v930_v14  ;;  %v863_v28 = vld [vmem:[#allocation2 + $0x18] sm:$0xf]  ;;  %v501_v29 = vld [vmem:[%s13938_s24 + $0x10] sm:$0xf] }
  0x3d   : > { %v1267_v19 = vor.u32 %v1266_v12, %v1263_v11  ;;  %v1057_v23 = vsel %vm13953_vm14, %v1052_v15, %v1056_v6  ;;  %v1282_v25 = vrot.slane %v1280_v18, 5  ;;  %932 = vst [vmem:[#allocation2 + $0x8c] sm:$0x1] %v931_v21  ;;  %v1001_v26 = vld [vmem:[#allocation2 + $0x84] sm:$0xf]  ;;  %v563_v27 = vsel %vm13960_vm15, %v555_v55, %v562_v1  ;;  %s13722_s16 = sshll.u32 %s13783_s14, 4  ;;  %s13723_s16 = int_to_ptr.vmem [resolvable:$false] %s13722_s16 }
  0x3e   : > { %v1062_v24 = vrot.slane %v1061_v16, 4  ;;  %v1277_v32 = vor.u32 %v1276_v20, %v1272_v17  ;;  %v1285_v35 = vshrl.u32 %v1001_v26, 16  ;;  %v1288_v36 = vshll.u32 %v1001_v26, 16  ;;  %866 = vst.msk [vmem:[#allocation2 + $0x1c] sm:$0xf] %vm851_vm8, %v563_v27  ;;  %s13724_s29 = scalar_lea.vmem %s13723_s16, 512  ;;  %p13725_p0 = scmp.lt.s32.totalorder %s20309_s25, %s13723_s16 }
  0x3f   : > { %v1268_v31 = vrot.slane %v1267_v19, 4  ;;  %v1002_v34 = vld [vmem:[#allocation2 + $0x88] sm:$0xf]  ;;  %v867_v43 = vld [vmem:[#allocation2 + $0x20] sm:$0x1]  ;;  %v864_v56 = vsel %vm13947_vm13, %v554_v22, %v863_v28  ;;  %v566_v59 = vshrl.u32 %v501_v29, 16 }
  0x40   : > { %v1067_v37 = vsel %vm13953_vm14, %v1062_v24, %v1066_v10  ;;  %v1294_v39 = vshll.u32 %v1002_v34, 16  ;;  %v1298_v40 = vshrl.u32 %v1002_v34, 16  ;;  %v1278_v47 = vrot.slane %v1277_v32, 4  ;;  %v502_v49 = vld [vmem:[%s13938_s24 + $0x14] sm:$0xf] }
  0x41   : > { %v11532_v44 = vcombine.low %v1057_v23, %v1067_v37  ;;  %v1273_v46 = vsel %vm13953_vm14, %v1268_v31, %v1272_v17  ;;  %v1287_v48 = vrot.slane %v1285_v35, 4  ;;  %v432_v51 = vld [vmem:[#allocation2 + $0x90] sm:$0x1]  ;;  %v1290_v52 = vrot.slane %v1288_v36, 5  ;;  %v482_v57 = vld [vmem:[#allocation2 + $0x98] sm:$0x1] }
  0x42   : > { %v1296_v54 = vrot.slane %v1294_v39, 5  ;;  %v1300_v55 = vrot.slane %v1298_v40, 4  ;;  %v1283_v5 = vsel %vm13953_vm14, %v1278_v47, %v1282_v25  ;;  %865 = vst [vmem:[#allocation2 + $0x18] sm:$0xf] %v864_v56  ;;  %v868_v58 = vsel %vm13966_vm2, %v564_v42, %v867_v43  ;;  %v14051_v61 = vld [vmem:[%s20352_s1] sm:$0x3] }
  0x43   : > { %12724 = vmatmul.mubr.msk.bf16.vlgmr.msra.gmra.mxu0 %vm1454_vm11, %v11532_v44  ;;  %v569_v60 = vshll.u32 %v501_v29, 16  ;;  %v11541_v62 = vcombine.low %v1273_v46, %v1283_v5  ;;  %v1291_v63 = vor.u32 %v1290_v52, %v1287_v48  ;;  %869 = vst [vmem:[#allocation2 + $0x20] sm:$0x1] %v868_v58  ;;  %v574_v1 = vshrl.u32 %v502_v49, 16  ;;  %v870_v2 = vld [vmem:[#allocation2 + $0x24] sm:$0xf]  ;;  %13445 = vmatprep.subr.msk.bf16.mxu1 %vm1503_vm0, %v14051_v61 }
  0x44   : > { %12790 = vmatpush3.bf16.msra.mxu0 %v14003_v30  ;;  %v1301_v0 = vor.u32 %v1300_v55, %v1296_v54  ;;  %v519_v6 = vld [vmem:[%s13938_s24 + $0x58] sm:$0xf]  ;;  %v1003_v7 = vld [vmem:[#allocation2 + $0x8c] sm:$0x1]  ;;  %v568_v8 = vrot.slane %v566_v59, 7  ;;  %v577_v9 = vshll.u32 %v502_v49, 16 }
  0x45   : > { %v433_v10 = vsel %vm13908_vm5, 0, %v432_v51  ;;  %v483_v11 = vsel %vm13915_vm6, 0, %v482_v57  ;;  %12743 = vmatprep.mubr.msk.bf16.mxu1 %vm1454_vm11, %v11541_v62  ;;  %v1292_v30 = vrot.slane %v1291_v63, 4  ;;  %v1304_v13 = vshll.u32 %v1003_v7, 16  ;;  %v14062_v14 = vld [vmem:[#allocation2 + $0x1c] sm:$0xf] }
  0x46   : > { %v1302_v12 = vrot.slane %v1301_v0, 4  ;;  %v576_v15 = vrot.slane %v574_v1, 7  ;;  %434 = vst [vmem:[#allocation2 + $0x90] sm:$0x1] %v433_v10  ;;  %484 = vst [vmem:[#allocation2 + $0x98] sm:$0x1] %v483_v11  ;;  %v571_v18 = vor.u32 %v569_v60, %v568_v8 }
  0x47   : > { %v1078_v16 = vshll.u32 %v14062_v14, 16  ;;  %v1082_v17 = vshrl.u32 %v14062_v14, 16  ;;  %v572_v19 = vrot.slane %v568_v8, 4  ;;  %v874_v20 = vld [vmem:[#allocation2 + $0x2c] sm:$0x1]  ;;  %v1297_v21 = vsel %vm13953_vm14, %v1292_v30, %v1296_v54 }
  0x48   : > { %v1306_v22 = vrot.slane %v1304_v13, 5  ;;  %v579_v23 = vor.u32 %v577_v9, %v576_v15  ;;  %v581_v24 = vrot.slane %v576_v15, 4  ;;  %v871_v27 = vsel %vm13947_vm13, %v571_v18, %v870_v2  ;;  %v520_v28 = vld [vmem:[%s13938_s24 + $0x5c] sm:$0xf]  ;;  %v485_v46 = vld [vmem:[#allocation2 + $0xa4] sm:$0x1] }
  0x49   : > { %v14068_v25 = vrot.slane %v1078_v16, 5  ;;  %v1084_v26 = vrot.slane %v1082_v17, 4  ;;  %v719_v29 = vshrl.u32 %v519_v6, 16  ;;  %v14075_v32 = vld [vmem:[#allocation2 + $0x18] sm:$0xf]  ;;  %v722_v36 = vshll.u32 %v519_v6, 16 }
  0x4a   : > { %v1307_v31 = vsel %vm13953_vm14, %v1302_v12, %v1306_v22  ;;  %v580_v34 = vsel %vm13960_vm15, %v572_v19, %v579_v23  ;;  %872 = vst [vmem:[#allocation2 + $0x24] sm:$0xf] %v871_v27  ;;  %v875_v35 = vsel %vm13966_vm2, %v581_v24, %v874_v20  ;;  %v435_v37 = vld [vmem:[#allocation2 + $0x9c] sm:$0x1]  ;;  %v976_v40 = vld [vmem:[#allocation2 + $0x20] sm:$0x1] }
  0x4b   : > { %v11542_v39 = vcombine.low %v1297_v21, %v1307_v31  ;;  %v1069_v42 = vshrl.u32 %v14075_v32, 16  ;;  %v1072_v43 = vshll.u32 %v14075_v32, 16  ;;  %v1085_v44 = vor.u32 %v1084_v26, %v14068_v25  ;;  %873 = vst.msk [vmem:[#allocation2 + $0x28] sm:$0xf] %vm851_vm8, %v580_v34  ;;  %876 = vst [vmem:[#allocation2 + $0x2c] sm:$0x1] %v875_v35 }
  0x4c   : > { %v1088_v47 = vshll.u32 %v976_v40, 16  ;;  %v721_v48 = vrot.slane %v719_v29, 7  ;;  %v727_v49 = vshrl.u32 %v520_v28, 16  ;;  %v730_v51 = vshll.u32 %v520_v28, 16  ;;  %v521_v52 = vld [vmem:[%s13938_s24 + $0x60] sm:$0xf] }
  0x4d   : > { %12744 = vmatmul.mubr.msk.bf16.vlgmr.msra.gmra.mxu1 %vm1454_vm11, %v11542_v39  ;;  %v1071_v54 = vrot.slane %v1069_v42, 4  ;;  %v1074_v55 = vrot.slane %v1072_v43, 5  ;;  %v1086_v56 = vrot.slane %v1085_v44, 4  ;;  %v933_v57 = vld [vmem:[#allocation2 + $0x90] sm:$0xf]  ;;  %v436_v5 = vsel %vm13908_vm5, 0, %v435_v37 }
  0x4e   : > { %v1090_v58 = vrot.slane %v1088_v47, 5  ;;  %v724_v59 = vor.u32 %v722_v36, %v721_v48  ;;  %v725_v60 = vrot.slane %v721_v48, 4  ;;  %v729_v62 = vrot.slane %v727_v49, 7  ;;  %437 = vst [vmem:[#allocation2 + $0x9c] sm:$0x1] %v436_v5 }
  0x4f   : > { %v522_v63 = vld [vmem:[%s13938_s24 + $0x64] sm:$0xf]  ;;  %v1075_v0 = vor.u32 %v1074_v55, %v1071_v54  ;;  %v937_v1 = vld [vmem:[#allocation2 + $0x98] sm:$0x1]  ;;  %v486_v2 = vsel %vm13915_vm6, 0, %v485_v46  ;;  %v736_v6 = vshrl.u32 %v521_v52, 16 }
  0x50   : > { %v739_v7 = vshll.u32 %v521_v52, 16  ;;  %v1091_v8 = vsel %vm13953_vm14, %v1086_v56, %v1090_v58  ;;  %v732_v9 = vor.u32 %v730_v51, %v729_v62  ;;  %v734_v10 = vrot.slane %v729_v62, 4  ;;  %487 = vst [vmem:[#allocation2 + $0xa4] sm:$0x1] %v486_v2  ;;  %v408_v28 = vld [vmem:[#allocation2 + $0x30] sm:$0x1] }
  0x51   : > { %v934_v11 = vsel %vm13947_vm13, %v724_v59, %v933_v57  ;;  %v1076_v30 = vrot.slane %v1075_v0, 4  ;;  %v14096_v12 = vld [vmem:[#allocation2 + $0x24] sm:$0xf]  ;;  %v738_v13 = vrot.slane %v736_v6, 7  ;;  %v744_v15 = vshrl.u32 %v522_v63, 16 }
  0x52   : > { %935 = vst [vmem:[#allocation2 + $0x90] sm:$0xf] %v934_v11  ;;  %v747_v16 = vshll.u32 %v522_v63, 16  ;;  %v14098_v17 = vld [vmem:[#allocation2 + $0x28] sm:$0xf]  ;;  %v1093_v19 = vshrl.u32 %v14096_v12, 16  ;;  %v733_v21 = vsel %vm13960_vm15, %v725_v60, %v732_v9  ;;  %v938_v22 = vsel %vm13966_vm2, %v734_v10, %v937_v1 }
  0x53   : > { %v14100_v18 = vld [vmem:[#allocation2 + $0x2c] sm:$0x1]  ;;  %v1096_v20 = vshll.u32 %v14096_v12, 16  ;;  %v1081_v23 = vsel %vm13953_vm14, %v1076_v30, %v14068_v25  ;;  %v1102_v24 = vshll.u32 %v14098_v17, 16  ;;  %v1106_v26 = vshrl.u32 %v14098_v17, 16 }
  0x54   : > { %v1112_v27 = vshll.u32 %v14100_v18, 16  ;;  %936 = vst.msk [vmem:[#allocation2 + $0x94] sm:$0xf] %vm851_vm8, %v733_v21  ;;  %939 = vst [vmem:[#allocation2 + $0x98] sm:$0x1] %v938_v22  ;;  %v11533_v29 = vcombine.low %v1081_v23, %v1091_v8  ;;  %v1095_v31 = vrot.slane %v1093_v19, 4  ;;  %v741_v35 = vor.u32 %v739_v7, %v738_v13 }
  0x55   : > { %v1098_v34 = vrot.slane %v1096_v20, 5  ;;  %v458_v36 = vld [vmem:[#allocation2 + $0x38] sm:$0x1]  ;;  %v1104_v39 = vrot.slane %v1102_v24, 5  ;;  %v1108_v40 = vrot.slane %v1106_v26, 4  ;;  %v742_v42 = vrot.slane %v738_v13, 4 }
  0x56   : > { %v503_v37 = vld [vmem:[%s13938_s24 + $0x18] sm:$0xf]  ;;  %v1114_v25 = vrot.slane %v1112_v27, 5  ;;  %v940_v43 = vld [vmem:[#allocation2 + $0x9c] sm:$0xf]  ;;  %12727 = vmatprep.mubr.msk.bf16.mxu0 %vm1454_vm11, %v11533_v29  ;;  %v746_v46 = vrot.slane %v744_v15, 7 }
  0x57   : > { %v1099_v44 = vor.u32 %v1098_v34, %v1095_v31  ;;  %v941_v47 = vsel %vm13947_vm13, %v741_v35, %v940_v43  ;;  %v1797_v48 = vsel %vm1503_vm0, %v14051_v61, 0  ;;  %v504_v49 = vld [vmem:[%s13938_s24 + $0x1c] sm:$0xf]  ;;  %v1109_v51 = vor.u32 %v1108_v40, %v1104_v39  ;;  %v944_v52 = vld [vmem:[#allocation2 + $0xa4] sm:$0x1] }
  0x58   : > { %942 = vst [vmem:[#allocation2 + $0x9c] sm:$0xf] %v941_v47  ;;  %12756 = vmatpush3.bf16.msra.mxu1 %v1797_v48  ;;  %v409_v54 = vsel %vm13908_vm5, 0, %v408_v28  ;;  %v459_v55 = vsel %vm13915_vm6, 0, %v458_v36  ;;  %v583_v56 = vshrl.u32 %v503_v37, 16  ;;  %v749_v58 = vor.u32 %v747_v16, %v746_v46 }
  0x59   : > { %v1100_v57 = vrot.slane %v1099_v44, 4  ;;  %v1004_v5 = vld [vmem:[#allocation2 + $0x90] sm:$0xf]  ;;  %v751_v59 = vrot.slane %v746_v46, 4  ;;  %410 = vst [vmem:[#allocation2 + $0x30] sm:$0x1] %v409_v54 }
  0x5a   : > { %460 = vst [vmem:[#allocation2 + $0x38] sm:$0x1] %v459_v55  ;;  %v586_v60 = vshll.u32 %v503_v37, 16  ;;  %v1110_v61 = vrot.slane %v1109_v51, 4  ;;  %v1309_v62 = vshrl.u32 %v1004_v5, 16  ;;  %v1312_v63 = vshll.u32 %v1004_v5, 16 }
  0x5b   : > { %v585_v0 = vrot.slane %v583_v56, 7  ;;  %v1105_v1 = vsel %vm13953_vm14, %v1100_v57, %v1104_v39  ;;  %v1005_v2 = vld [vmem:[#allocation2 + $0x94] sm:$0xf]  ;;  %v1006_v6 = vld [vmem:[#allocation2 + $0x98] sm:$0x1]  ;;  %v750_v7 = vsel %vm13960_vm15, %v742_v42, %v749_v58  ;;  %v945_v8 = vsel %vm13966_vm2, %v751_v59, %v944_v52 }
  0x5c   : > { %v591_v9 = vshrl.u32 %v504_v49, 16  ;;  %v1115_v10 = vsel %vm13953_vm14, %v1110_v61, %v1114_v25  ;;  %v1311_v11 = vrot.slane %v1309_v62, 4  ;;  %v1314_v30 = vrot.slane %v1312_v63, 5  ;;  %943 = vst.msk [vmem:[#allocation2 + $0xa0] sm:$0xf] %vm851_vm8, %v750_v7 }
  0x5d   : > { %v1318_v13 = vshll.u32 %v1005_v2, 16  ;;  %946 = vst [vmem:[#allocation2 + $0xa4] sm:$0x1] %v945_v8  ;;  %v411_v15 = vld [vmem:[#allocation2 + $0x3c] sm:$0x1]  ;;  %v11534_v16 = vcombine.low %v1105_v1, %v1115_v10  ;;  %v1322_v19 = vshrl.u32 %v1005_v2, 16  ;;  %v588_v21 = vor.u32 %v586_v60, %v585_v0 }
  0x5e   : > { %v1328_v20 = vshll.u32 %v1006_v6, 16  ;;  %v461_v22 = vld [vmem:[#allocation2 + $0x44] sm:$0x1]  ;;  %v1315_v23 = vor.u32 %v1314_v30, %v1311_v11  ;;  %v589_v26 = vrot.slane %v585_v0, 4  ;;  %v593_v27 = vrot.slane %v591_v9, 7 }
  0x5f   : > { %v1320_v24 = vrot.slane %v1318_v13, 5  ;;  %v505_v28 = vld [vmem:[%s13938_s24 + $0x20] sm:$0xf]  ;;  %12728 = vmatmul.mubr.msk.bf16.gmra.mxu0 %vm1454_vm11, %v11534_v16  ;;  %v1324_v29 = vrot.slane %v1322_v19, 4  ;;  %v14137_v34 = vld [vmem:[#allocation2 + $0x9c] sm:$0xf] }
  0x60   : > { %v1330_v31 = vrot.slane %v1328_v20, 5  ;;  %v594_v35 = vshll.u32 %v504_v49, 16  ;;  %v412_v36 = vsel %vm13908_vm5, 0, %v411_v15  ;;  %v1316_v37 = vrot.slane %v1315_v23, 4  ;;  %v877_v42 = vld [vmem:[#allocation2 + $0x30] sm:$0xf] }
  0x61   : > { %v1333_v39 = vshrl.u32 %v14137_v34, 16  ;;  %v1336_v40 = vshll.u32 %v14137_v34, 16  ;;  %v598_v25 = vrot.slane %v593_v27, 4  ;;  %413 = vst [vmem:[#allocation2 + $0x3c] sm:$0x1] %v412_v36  ;;  %v1325_v43 = vor.u32 %v1324_v29, %v1320_v24 }
  0x62   : > { %v596_v44 = vor.u32 %v594_v35, %v593_v27  ;;  %v878_v46 = vsel %vm13947_vm13, %v588_v21, %v877_v42  ;;  %v881_v47 = vld [vmem:[#allocation2 + $0x38] sm:$0x1]  ;;  %v462_v48 = vsel %vm13915_vm6, 0, %v461_v22  ;;  %v506_v54 = vld [vmem:[%s13938_s24 + $0x24] sm:$0xf]  ;;  %v1321_v55 = vsel %vm13953_vm14, %v1316_v37, %v1320_v24 }
  0x63   : > { %v1335_v49 = vrot.slane %v1333_v39, 4  ;;  %v1338_v51 = vrot.slane %v1336_v40, 5  ;;  %879 = vst [vmem:[#allocation2 + $0x30] sm:$0xf] %v878_v46  ;;  %v882_v52 = vsel %vm13966_vm2, %v598_v25, %v881_v47  ;;  %463 = vst [vmem:[#allocation2 + $0x44] sm:$0x1] %v462_v48 }
  0x64   : > { %v1326_v56 = vrot.slane %v1325_v43, 4  ;;  %v14152_v57 = vld [vmem:[#allocation2 + $0xa0] sm:$0xf]  ;;  %v14154_v5 = vld [vmem:[#allocation2 + $0xa4] sm:$0x1]  ;;  %v597_v58 = vsel %vm13960_vm15, %v589_v26, %v596_v44  ;;  %v600_v59 = vshrl.u32 %v505_v28, 16 }
  0x65   : > { %883 = vst [vmem:[#allocation2 + $0x38] sm:$0x1] %v882_v52  ;;  %v1339_v60 = vor.u32 %v1338_v51, %v1335_v49  ;;  %v1342_v61 = vshll.u32 %v14152_v57, 16  ;;  %v1346_v62 = vshrl.u32 %v14152_v57, 16  ;;  %v1352_v63 = vshll.u32 %v14154_v5, 16 }
  0x66   : > { %880 = vst.msk [vmem:[#allocation2 + $0x34] sm:$0xf] %vm851_vm8, %v597_v58  ;;  %v1331_v0 = vsel %vm13953_vm14, %v1326_v56, %v1330_v31  ;;  %v602_v1 = vrot.slane %v600_v59, 7  ;;  %v603_v2 = vshll.u32 %v505_v28, 16  ;;  %v608_v6 = vshrl.u32 %v506_v54, 16 }
  0x67   : > { %v438_v7 = vld [vmem:[#allocation2 + $0xa8] sm:$0x1]  ;;  %v11543_v8 = vcombine.low %v1321_v55, %v1331_v0  ;;  %v1340_v9 = vrot.slane %v1339_v60, 4  ;;  %v1344_v10 = vrot.slane %v1342_v61, 5  ;;  %v1348_v11 = vrot.slane %v1346_v62, 4 }
  0x68   : > { %v488_v30 = vld [vmem:[#allocation2 + $0xb0] sm:$0x1]  ;;  %v1354_v13 = vrot.slane %v1352_v63, 5  ;;  %v605_v15 = vor.u32 %v603_v2, %v602_v1  ;;  %v610_v16 = vrot.slane %v608_v6, 7  ;;  %v884_v19 = vld [vmem:[#allocation2 + $0x3c] sm:$0xf] }
  0x69   : > { %12747 = vmatprep.mubr.msk.bf16.mxu1 %vm1454_vm11, %v11543_v8  ;;  %v1349_v20 = vor.u32 %v1348_v11, %v1344_v10  ;;  %v606_v21 = vrot.slane %v602_v1, 4  ;;  %v611_v22 = vshll.u32 %v506_v54, 16  ;;  %v439_v23 = vsel %vm13908_vm5, 0, %v438_v7  ;;  %v523_v24 = vld [vmem:[%s13938_s24 + $0x68] sm:$0xf] }
  0x6a   : > { %v1345_v26 = vsel %vm13953_vm14, %v1340_v9, %v1344_v10  ;;  %v14170_v27 = vld [vmem:[#allocation2 + $0x30] sm:$0xf]  ;;  %v615_v28 = vrot.slane %v610_v16, 4  ;;  %v885_v29 = vsel %vm13947_vm13, %v605_v15, %v884_v19  ;;  %v888_v31 = vld [vmem:[#allocation2 + $0x44] sm:$0x1]  ;;  %v489_v35 = vsel %vm13915_vm6, 0, %v488_v30 }
  0x6b   : > { %440 = vst [vmem:[#allocation2 + $0xa8] sm:$0x1] %v439_v23  ;;  %v524_v36 = vld [vmem:[%s13938_s24 + $0x6c] sm:$0xf]  ;;  %v1350_v37 = vrot.slane %v1349_v20, 4  ;;  %v1117_v40 = vshrl.u32 %v14170_v27, 16  ;;  %v613_v42 = vor.u32 %v611_v22, %v610_v16 }
  0x6c   : > { %v14177_v39 = vld [vmem:[#allocation2 + $0x38] sm:$0x1]  ;;  %v1120_v25 = vshll.u32 %v14170_v27, 16  ;;  %886 = vst [vmem:[#allocation2 + $0x3c] sm:$0xf] %v885_v29  ;;  %v889_v44 = vsel %vm13966_vm2, %v615_v28, %v888_v31  ;;  %v753_v46 = vshrl.u32 %v523_v24, 16 }
  0x6d   : > { %490 = vst [vmem:[#allocation2 + $0xb0] sm:$0x1] %v489_v35  ;;  %v14181_v43 = vld [vmem:[#allocation2 + $0x34] sm:$0xf]  ;;  %v756_v47 = vshll.u32 %v523_v24, 16  ;;  %v1355_v49 = vsel %vm13953_vm14, %v1350_v37, %v1354_v13  ;;  %v1119_v51 = vrot.slane %v1117_v40, 4  ;;  %v614_v60 = vsel %vm13960_vm15, %v606_v21, %v613_v42 }
  0x6e   : > { %v441_v48 = vld [vmem:[#allocation2 + $0xb4] sm:$0x1]  ;;  %v1122_v52 = vrot.slane %v1120_v25, 5  ;;  %v1126_v54 = vshll.u32 %v14181_v43, 16  ;;  %890 = vst [vmem:[#allocation2 + $0x44] sm:$0x1] %v889_v44  ;;  %v11544_v56 = vcombine.low %v1345_v26, %v1355_v49 }
  0x6f   : > { %v491_v55 = vld [vmem:[#allocation2 + $0xbc] sm:$0x1]  ;;  %v1130_v58 = vshrl.u32 %v14181_v43, 16  ;;  %v1136_v59 = vshll.u32 %v14177_v39, 16  ;;  %v525_v61 = vld [vmem:[%s13938_s24 + $0x70] sm:$0xf] }
  0x70   : > { %v14196_v62 = vld [vmem:[%s20352_s1 + $0x6] sm:$0x3]  ;;  %v1123_v63 = vor.u32 %v1122_v52, %v1119_v51  ;;  %v1128_v0 = vrot.slane %v1126_v54, 5  ;;  %887 = vst.msk [vmem:[#allocation2 + $0x40] sm:$0xf] %vm851_vm8, %v614_v60  ;;  %v755_v1 = vrot.slane %v753_v46, 7  ;;  %12748 = vmatmul.mubr.msk.bf16.gmra.mxu1 %vm1454_vm11, %v11544_v56 }
  0x71   : > { %v761_v2 = vshrl.u32 %v524_v36, 16  ;;  %13447 = vmatprep.subr.msk.bf16.mxu1 %vm1503_vm0, %v14196_v62  ;;  %v14204_v6 = vld [vmem:[%s20352_s1 + $0x8] sm:$0x3]  ;;  %v1132_v7 = vrot.slane %v1130_v58, 4  ;;  %v764_v8 = vshll.u32 %v524_v36, 16  ;;  %v442_v9 = vsel %vm13908_vm5, 0, %v441_v48 }
  0x72   : > { %v492_v10 = vsel %vm13915_vm6, 0, %v491_v55  ;;  %13448 = vmatprep.subr.msk.bf16.mxu0 %vm1503_vm0, %v14204_v6  ;;  %v1124_v11 = vrot.slane %v1123_v63, 4  ;;  %v758_v30 = vor.u32 %v756_v47, %v755_v1  ;;  %v759_v13 = vrot.slane %v755_v1, 4  ;;  %v947_v16 = vld [vmem:[#allocation2 + $0xa8] sm:$0xf] }
  0x73   : > { %v763_v15 = vrot.slane %v761_v2, 7  ;;  %443 = vst [vmem:[#allocation2 + $0xb4] sm:$0x1] %v442_v9  ;;  %493 = vst [vmem:[#allocation2 + $0xbc] sm:$0x1] %v492_v10  ;;  %v1133_v19 = vor.u32 %v1132_v7, %v1128_v0  ;;  %v1138_v20 = vrot.slane %v1136_v59, 5 }
  0x74   : > { %v14213_v21 = vld [vmem:[#allocation2 + $0x3c] sm:$0xf]  ;;  %v770_v22 = vshrl.u32 %v525_v61, 16  ;;  %v773_v23 = vshll.u32 %v525_v61, 16  ;;  %v1129_v24 = vsel %vm13953_vm14, %v1124_v11, %v1128_v0  ;;  %v951_v31 = vld [vmem:[#allocation2 + $0xb0] sm:$0x1]  ;;  %v948_v25 = vsel %vm13947_vm13, %v758_v30, %v947_v16 }
  0x75   : > { %v1141_v26 = vshrl.u32 %v14213_v21, 16  ;;  %v1144_v28 = vshll.u32 %v14213_v21, 16  ;;  %v766_v29 = vor.u32 %v764_v8, %v763_v15  ;;  %v526_v35 = vld [vmem:[%s13938_s24 + $0x74] sm:$0xf]  ;;  %v1134_v36 = vrot.slane %v1133_v19, 4 }
  0x76   : > { %v14220_v37 = vld [vmem:[#allocation2 + $0x44] sm:$0x1]  ;;  %v768_v40 = vrot.slane %v763_v15, 4  ;;  %v772_v42 = vrot.slane %v770_v22, 7  ;;  %949 = vst [vmem:[#allocation2 + $0xa8] sm:$0xf] %v948_v25 }
  0x77   : > { %v1143_v44 = vrot.slane %v1141_v26, 4  ;;  %v1146_v46 = vrot.slane %v1144_v28, 5  ;;  %v1160_v47 = vshll.u32 %v14220_v37, 16  ;;  %v767_v48 = vsel %vm13960_vm15, %v759_v13, %v766_v29  ;;  %v414_v49 = vld [vmem:[#allocation2 + $0x48] sm:$0x1] }
  0x78   : > { %v1139_v51 = vsel %vm13953_vm14, %v1134_v36, %v1138_v20  ;;  %v14229_v52 = vld [vmem:[#allocation2 + $0x40] sm:$0xf]  ;;  %950 = vst.msk [vmem:[#allocation2 + $0xac] sm:$0xf] %vm851_vm8, %v767_v48  ;;  %v952_v54 = vsel %vm13966_vm2, %v768_v40, %v951_v31  ;;  %v775_v55 = vor.u32 %v773_v23, %v772_v42  ;;  %v776_v56 = vrot.slane %v772_v42, 4 }
  0x79   : > { %v464_v58 = vld [vmem:[#allocation2 + $0x50] sm:$0x1]  ;;  %v11535_v59 = vcombine.low %v1129_v24, %v1139_v51  ;;  %v1147_v60 = vor.u32 %v1146_v46, %v1143_v44  ;;  %v1150_v61 = vshll.u32 %v14229_v52, 16  ;;  %v1154_v63 = vshrl.u32 %v14229_v52, 16  ;;  %953 = vst [vmem:[#allocation2 + $0xb0] sm:$0x1] %v952_v54 }
  0x7a   : > { %v507_v0 = vld [vmem:[%s13938_s24 + $0x28] sm:$0xf]  ;;  %v508_v1 = vld [vmem:[%s13938_s24 + $0x2c] sm:$0xf]  ;;  %v1162_v2 = vrot.slane %v1160_v47, 5  ;;  %v778_v7 = vshrl.u32 %v526_v35, 16 }
  0x7b   : > { %v781_v8 = vshll.u32 %v526_v35, 16  ;;  %v954_v9 = vld [vmem:[#allocation2 + $0xb4] sm:$0xf]  ;;  %v415_v10 = vsel %vm13908_vm5, 0, %v414_v49  ;;  %12731 = vmatprep.mubr.msk.bf16.mxu0 %vm1454_vm11, %v11535_v59  ;;  %v1148_v11 = vrot.slane %v1147_v60, 4  ;;  %v1152_v30 = vrot.slane %v1150_v61, 5 }
  0x7c   : > { %v1156_v13 = vrot.slane %v1154_v63, 4  ;;  %v955_v15 = vsel %vm13947_vm13, %v775_v55, %v954_v9  ;;  %416 = vst [vmem:[#allocation2 + $0x48] sm:$0x1] %v415_v10  ;;  %v417_v16 = vld [vmem:[#allocation2 + $0x54] sm:$0x1]  ;;  %v780_v19 = vrot.slane %v778_v7, 7 }
  0x7d   : > { %956 = vst [vmem:[#allocation2 + $0xb4] sm:$0xf] %v955_v15  ;;  %v465_v20 = vsel %vm13915_vm6, 0, %v464_v58  ;;  %v617_v22 = vshrl.u32 %v507_v0, 16  ;;  %v620_v23 = vshll.u32 %v507_v0, 16  ;;  %v1153_v24 = vsel %vm13953_vm14, %v1148_v11, %v1152_v30 }
  0x7e   : > { %v1157_v26 = vor.u32 %v1156_v13, %v1152_v30  ;;  %v958_v28 = vld [vmem:[#allocation2 + $0xbc] sm:$0x1]  ;;  %466 = vst [vmem:[#allocation2 + $0x50] sm:$0x1] %v465_v20  ;;  %v625_v29 = vshrl.u32 %v508_v1, 16  ;;  %v628_v31 = vshll.u32 %v508_v1, 16  ;;  %v783_v36 = vor.u32 %v781_v8, %v780_v19 }
  0x7f   : > { %v14247_v35 = vld [vmem:[#allocation2 + $0xa8] sm:$0xf]  ;;  %v785_v40 = vrot.slane %v780_v19, 4  ;;  %v619_v25 = vrot.slane %v617_v22, 7  ;;  %v418_v42 = vsel %vm13908_vm5, 0, %v417_v16  ;;  %vm1976_vm3 = vcmask 1042432  }
  0x80   : > { %v1158_v44 = vrot.slane %v1157_v26, 4  ;;  %v14251_v46 = vld [vmem:[#allocation2 + $0xac] sm:$0xf]  ;;  %v1357_v47 = vshrl.u32 %v14247_v35, 16  ;;  %v1360_v48 = vshll.u32 %v14247_v35, 16  ;;  %v627_v49 = vrot.slane %v625_v29, 7 }
  0x81   : > { %419 = vst [vmem:[#allocation2 + $0x54] sm:$0x1] %v418_v42  ;;  %v14255_v51 = vld [vmem:[#allocation2 + $0xb0] sm:$0x1]  ;;  %v1366_v54 = vshll.u32 %v14251_v46, 16  ;;  %v1370_v55 = vshrl.u32 %v14251_v46, 16  ;;  %v784_v58 = vsel %vm13960_vm15, %v776_v56, %v783_v36  ;;  %v959_v59 = vsel %vm13966_vm2, %v785_v40, %v958_v28 }
  0x82   : > { %v1163_v60 = vsel %vm13953_vm14, %v1158_v44, %v1162_v2  ;;  %v1359_v61 = vrot.slane %v1357_v47, 4  ;;  %v1362_v63 = vrot.slane %v1360_v48, 5  ;;  %v1376_v0 = vshll.u32 %v14255_v51, 16  ;;  %957 = vst.msk [vmem:[#allocation2 + $0xb8] sm:$0xf] %vm851_vm8, %v784_v58 }
  0x83   : > { %960 = vst [vmem:[#allocation2 + $0xbc] sm:$0x1] %v959_v59  ;;  %v467_v1 = vld [vmem:[#allocation2 + $0x5c] sm:$0x1]  ;;  %v11536_v7 = vcombine.low %v1153_v24, %v1163_v60  ;;  %v1368_v8 = vrot.slane %v1366_v54, 5  ;;  %v1372_v9 = vrot.slane %v1370_v55, 4  ;;  %v622_v10 = vor.u32 %v620_v23, %v619_v25 }
  0x84   : > { %v891_v56 = vld [vmem:[#allocation2 + $0x48] sm:$0xf]  ;;  %v509_v11 = vld [vmem:[%s13938_s24 + $0x30] sm:$0xf]  ;;  %v1363_v30 = vor.u32 %v1362_v63, %v1359_v61  ;;  %v1378_v13 = vrot.slane %v1376_v0, 5  ;;  %v623_v2 = vrot.slane %v619_v25, 4  ;;  %v630_v16 = vor.u32 %v628_v31, %v627_v49 }
  0x85   : > { %v14268_v15 = vld [vmem:[#allocation2 + $0xb4] sm:$0xf]  ;;  %12732 = vmatmul.mubr.msk.bf16.gmra.mxu0 %vm1454_vm11, %v11536_v7  ;;  %v1373_v20 = vor.u32 %v1372_v9, %v1368_v8  ;;  %v632_v24 = vrot.slane %v627_v49, 4  ;;  %v895_v28 = vld [vmem:[#allocation2 + $0x50] sm:$0x1]  ;;  %v892_v36 = vsel %vm13947_vm13, %v622_v10, %v891_v56  ;;  %v468_v31 = vsel %vm13915_vm6, 0, %v467_v1 }
  0x86   : > { %v510_v19 = vld [vmem:[%s13938_s24 + $0x34] sm:$0xf]  ;;  %v1381_v22 = vshrl.u32 %v14268_v15, 16  ;;  %v1384_v26 = vshll.u32 %v14268_v15, 16  ;;  %v1364_v29 = vrot.slane %v1363_v30, 4  ;;  %v631_v23 = vsel %vm13960_vm15, %v623_v2, %v630_v16 }
  0x87   : > { %v420_v40 = vld [vmem:[#allocation2 + $0x60] sm:$0x1]  ;;  %v1374_v25 = vrot.slane %v1373_v20, 4  ;;  %893 = vst [vmem:[#allocation2 + $0x48] sm:$0xf] %v892_v36  ;;  %v896_v47 = vsel %vm13966_vm2, %v632_v24, %v895_v28  ;;  %v634_v54 = vshrl.u32 %v509_v11, 16 }
  0x88   : > { %v1383_v42 = vrot.slane %v1381_v22, 4  ;;  %v1386_v44 = vrot.slane %v1384_v26, 5  ;;  %894 = vst.msk [vmem:[#allocation2 + $0x4c] sm:$0xf] %vm851_vm8, %v631_v23  ;;  %469 = vst [vmem:[#allocation2 + $0x5c] sm:$0x1] %v468_v31  ;;  %v1369_v49 = vsel %vm13953_vm14, %v1364_v29, %v1368_v8 }
  0x89   : > { %v470_v48 = vld [vmem:[#allocation2 + $0x68] sm:$0x1]  ;;  %897 = vst [vmem:[#allocation2 + $0x50] sm:$0x1] %v896_v47  ;;  %v637_v55 = vshll.u32 %v509_v11, 16  ;;  %v642_v58 = vshrl.u32 %v510_v19, 16  ;;  %v1379_v60 = vsel %vm13953_vm14, %v1374_v25, %v1378_v13 }
  0x8a   : > { %v14286_v59 = vld [vmem:[%s13938_s24 + $0x38] sm:$0xf]  ;;  %v14292_v63 = vld [vmem:[#allocation2 + $0xbc] sm:$0x1]  ;;  %v1387_v0 = vor.u32 %v1386_v44, %v1383_v42  ;;  %v645_v1 = vshll.u32 %v510_v19, 16  ;;  %v421_v7 = vsel %vm13908_vm5, 0, %v420_v40  ;;  %v11545_v9 = vcombine.low %v1369_v49, %v1379_v60 }
  0x8b   : > { %v14290_v61 = vld [vmem:[#allocation2 + $0xb8] sm:$0xf]  ;;  %v1400_v56 = vshll.u32 %v14292_v63, 16  ;;  %422 = vst [vmem:[#allocation2 + $0x60] sm:$0x1] %v421_v7  ;;  %v636_v30 = vrot.slane %v634_v54, 7 }
  0x8c   : > { %v1390_v8 = vshll.u32 %v14290_v61, 16  ;;  %v1394_v10 = vshrl.u32 %v14290_v61, 16  ;;  %v1388_v11 = vrot.slane %v1387_v0, 4  ;;  %v644_v13 = vrot.slane %v642_v58, 7  ;;  %12751 = vmatprep.mubr.msk.bf16.mxu1 %vm1454_vm11, %v11545_v9  ;;  %v898_v23 = vld [vmem:[#allocation2 + $0x54] sm:$0xf] }
  0x8d   : > { %v471_v2 = vsel %vm13915_vm6, 0, %v470_v48  ;;  %v1402_v20 = vrot.slane %v1400_v56, 5  ;;  %v651_v22 = vshrl.u32 %v14286_v59, 16  ;;  %v639_v26 = vor.u32 %v637_v55, %v636_v30  ;;  %v14309_v44 = vld [vmem:[#allocation2] sm:$0xf] }
  0x8e   : > { %v1392_v16 = vrot.slane %v1390_v8, 5  ;;  %v1396_v19 = vrot.slane %v1394_v10, 4  ;;  %472 = vst [vmem:[#allocation2 + $0x68] sm:$0x1] %v471_v2  ;;  %v640_v24 = vrot.slane %v636_v30, 4  ;;  %v647_v28 = vor.u32 %v645_v1, %v644_v13 }
  0x8f   : > { %v649_v29 = vrot.slane %v644_v13, 4  ;;  %v14305_v40 = vld [vmem:[#allocation2 + $0x48] sm:$0xf]  ;;  %v14307_v25 = vld [vmem:[#allocation2 + $0x4c] sm:$0xf]  ;;  %v899_v8 = vsel %vm13947_vm13, %v639_v26, %v898_v23  ;;  %vm1977_vm7 = vcmask 1046532  }
  0x90   : > { %v1393_v36 = vsel %vm13953_vm14, %v1388_v11, %v1392_v16  ;;  %v1397_v31 = vor.u32 %v1396_v19, %v1392_v16  ;;  %v902_v42 = vld [vmem:[#allocation2 + $0x5c] sm:$0x1]  ;;  %v14311_v47 = vld [vmem:[#allocation2 + $0x4] sm:$0xf]  ;;  %v14317_v54 = vld [vmem:[#allocation2 + $0x50] sm:$0x1]  ;;  %v648_v9 = vsel %vm13960_vm15, %v640_v24, %v647_v28 }
  0x91   : > { %v11563_v48 = vcombine.low %v14309_v44, %v14311_v47  ;;  %v1165_v55 = vshrl.u32 %v14305_v40, 16  ;;  %v1168_v58 = vshll.u32 %v14305_v40, 16  ;;  %v1174_v60 = vshll.u32 %v14307_v25, 16  ;;  %v512_v10 = vld [vmem:[%s13938_s24 + $0x3c] sm:$0xf]  ;;  %vm14430_vm9 = vmor %vm1976_vm3, %vm1977_vm7 }
  0x92   : > { %v1178_v0 = vshrl.u32 %v14307_v25, 16  ;;  %v1398_v1 = vrot.slane %v1397_v31, 4  ;;  %v1184_v7 = vshll.u32 %v14317_v54, 16  ;;  %900 = vst [vmem:[#allocation2 + $0x54] sm:$0xf] %v899_v8  ;;  %v903_v24 = vsel %vm13966_vm2, %v649_v29, %v902_v42 }
  0x93   : > { %v1167_v56 = vrot.slane %v1165_v55, 4  ;;  %v1170_v11 = vrot.slane %v1168_v58, 5  ;;  %v1176_v30 = vrot.slane %v1174_v60, 5  ;;  %901 = vst.msk [vmem:[#allocation2 + $0x58] sm:$0xf] %vm851_vm8, %v648_v9  ;;  %v653_v28 = vrot.slane %v651_v22, 7 }
  0x94   : > { %v1180_v13 = vrot.slane %v1178_v0, 4  ;;  %v423_v2 = vld [vmem:[#allocation2 + $0x6c] sm:$0x1]  ;;  %v1403_v16 = vsel %vm13953_vm14, %v1398_v1, %v1402_v20  ;;  %v1186_v19 = vrot.slane %v1184_v7, 5  ;;  %v473_v26 = vld [vmem:[#allocation2 + $0x74] sm:$0x1]  ;;  %v11565_v1 = vcombine.low %v14075_v32, %v14062_v14 }
  0x95   : > { %v11546_v23 = vcombine.low %v1393_v36, %v1403_v16  ;;  %v1171_v31 = vor.u32 %v1170_v11, %v1167_v56  ;;  %904 = vst [vmem:[#allocation2 + $0x5c] sm:$0x1] %v903_v24  ;;  %v654_v58 = vshll.u32 %v14286_v59, 16  ;;  %v513_v60 = vld [vmem:[%s13938_s24 + $0x40] sm:$0xf]  ;;  %v659_v8 = vshrl.u32 %v512_v10, 16 }
  0x96   : > { %v1181_v55 = vor.u32 %v1180_v13, %v1176_v30  ;;  %v514_v0 = vld [vmem:[%s13938_s24 + $0x44] sm:$0xf]  ;;  %v662_v9 = vshll.u32 %v512_v10, 16  ;;  %v905_v49 = vld [vmem:[#allocation2 + $0x60] sm:$0xf]  ;;  %v424_v20 = vsel %vm13908_vm5, 0, %v423_v2 }
  0x97   : > { %12752 = vmatmul.mubr.msk.bf16.gmra.mxu1 %vm1454_vm11, %v11546_v23  ;;  %v1172_v22 = vrot.slane %v1171_v31, 4  ;;  %v656_v36 = vor.u32 %v654_v58, %v653_v28  ;;  %425 = vst [vmem:[#allocation2 + $0x6c] sm:$0x1] %v424_v20  ;;  %v474_v59 = vsel %vm13915_vm6, 0, %v473_v26  ;;  %v657_v42 = vrot.slane %v653_v28, 4 }
  0x98   : > { %v1182_v29 = vrot.slane %v1181_v55, 4  ;;  %12757 = vmatprep.mubr.msk.bf16.mxu1 %vm1454_vm11, %v11563_v48  ;;  %v661_v7 = vrot.slane %v659_v8, 7  ;;  %475 = vst [vmem:[#allocation2 + $0x74] sm:$0x1] %v474_v59  ;;  %v668_v10 = vshrl.u32 %v513_v60, 16  ;;  %v671_v56 = vshll.u32 %v513_v60, 16 }
  0x99   : > { %v1177_v11 = vsel %vm13953_vm14, %v1172_v22, %v1176_v30  ;;  %v906_v32 = vsel %vm13947_vm13, %v656_v36, %v905_v49  ;;  %v909_v13 = vld [vmem:[#allocation2 + $0x68] sm:$0x1]  ;;  %v676_v2 = vshrl.u32 %v514_v0, 16  ;;  %v14351_v24 = vld [vmem:[#allocation2 + $0x54] sm:$0xf] }
  0x9a   : > { %v1187_v14 = vsel %vm13953_vm14, %v1182_v29, %v1186_v19  ;;  %v14353_v48 = vld [vmem:[#allocation2 + $0x58] sm:$0xf]  ;;  %v664_v28 = vor.u32 %v662_v9, %v661_v7  ;;  %v666_v26 = vrot.slane %v661_v7, 4  ;;  %907 = vst [vmem:[#allocation2 + $0x60] sm:$0xf] %v906_v32  ;;  %v670_v23 = vrot.slane %v668_v10, 7 }
  0x9b   : > { %v11537_v16 = vcombine.low %v1177_v11, %v1187_v14  ;;  %v1189_v31 = vshrl.u32 %v14351_v24, 16  ;;  %v1192_v30 = vshll.u32 %v14351_v24, 16  ;;  %v1198_v19 = vshll.u32 %v14353_v48, 16  ;;  %v14370_v59 = vld [vmem:[%s20352_s1 + $0xa] sm:$0x3] }
  0x9c   : > { %v1202_v55 = vshrl.u32 %v14353_v48, 16  ;;  %v14360_v49 = vld [vmem:[#allocation2 + $0x5c] sm:$0x1]  ;;  %v665_v58 = vsel %vm13960_vm15, %v657_v42, %v664_v28  ;;  %v910_v60 = vsel %vm13966_vm2, %v666_v26, %v909_v13  ;;  %v673_v8 = vor.u32 %v671_v56, %v670_v23 }
  0x9d   : > { %12735 = vmatprep.mubr.msk.bf16.mxu0 %vm1454_vm11, %v11537_v16  ;;  %v679_v9 = vshll.u32 %v514_v0, 16  ;;  %v1191_v20 = vrot.slane %v1189_v31, 4  ;;  %v1194_v22 = vrot.slane %v1192_v30, 5  ;;  %v1200_v29 = vrot.slane %v1198_v19, 5  ;;  %908 = vst.msk [vmem:[#allocation2 + $0x64] sm:$0xf] %vm851_vm8, %v665_v58 }
  0x9e   : > { %v1204_v36 = vrot.slane %v1202_v55, 4  ;;  %911 = vst [vmem:[#allocation2 + $0x68] sm:$0x1] %v910_v60  ;;  %v1208_v7 = vshll.u32 %v14360_v49, 16  ;;  %v674_v42 = vrot.slane %v670_v23, 4  ;;  %v678_v10 = vrot.slane %v676_v2, 7 }
  0x9f   : > { %v912_v11 = vld [vmem:[#allocation2 + $0x6c] sm:$0xf]  ;;  %v2564_v0 = vsel %vm1503_vm0, %v14196_v62, 0  ;;  %v1195_v56 = vor.u32 %v1194_v22, %v1191_v20  ;;  %v20543_v32 = vcombine.low %v14009_v41, %v14019_v50  ;;  %v916_v16 = vld [vmem:[#allocation2 + $0x74] sm:$0x1]  ;;  %v11566_v58 = vcombine.low %v14096_v12, %v14098_v17 }
  0xa0   : > { %v1205_v14 = vor.u32 %v1204_v36, %v1200_v29  ;;  %v913_v13 = vsel %vm13947_vm13, %v673_v8, %v912_v11  ;;  %v1210_v28 = vrot.slane %v1208_v7, 5  ;;  %v681_v26 = vor.u32 %v679_v9, %v678_v10 }
  0xa1   : > { %12758 = vmatmul.mubr.msk.bf16.vlgmr.msra.gmra.mxu1 %vm1454_vm11, %v20543_v32  ;;  %v683_v31 = vrot.slane %v678_v10, 4  ;;  %914 = vst [vmem:[#allocation2 + $0x6c] sm:$0xf] %v913_v13  ;;  %v1196_v2 = vrot.slane %v1195_v56, 4  ;;  %v14382_v23 = vld [vmem:[#allocation2 + $0x60] sm:$0xf]  ;;  %v11567_v36 = vcombine.low %v14170_v27, %v14181_v43 }
  0xa2   : > { %12761 = vmatprep.mubr.msk.bf16.mxu1 %vm1454_vm11, %v11565_v1  ;;  %12824 = vmatpush3.bf16.msra.mxu1 %v2564_v0  ;;  %v1206_v62 = vrot.slane %v1205_v14, 4  ;;  %v1213_v41 = vshrl.u32 %v14382_v23, 16  ;;  %v1216_v50 = vshll.u32 %v14382_v23, 16  ;;  %v682_v30 = vsel %vm13960_vm15, %v674_v42, %v681_v26  ;;  %v13639_v0 = vld [vmem:[#allocation2 + $0x8] sm:$0x1] }
  0xa3   : > { %13449 = vmatprep.subr.msk.bf16.mxu1 %vm1503_vm0, %v14370_v59  ;;  %v917_v19 = vsel %vm13966_vm2, %v683_v31, %v916_v16  ;;  %v1201_v1 = vsel %vm13953_vm14, %v1196_v2, %v1200_v29  ;;  %915 = vst.msk [vmem:[#allocation2 + $0x70] sm:$0xf] %vm851_vm8, %v682_v30  ;;  %v1981_v10 = vrot.slane %v14311_v47, 5  ;;  %v1984_v56 = vrot.slane %v13639_v0, 5 }
  0xa4   : > { %v1211_v55 = vsel %vm13953_vm14, %v1206_v62, %v1210_v28  ;;  %918 = vst [vmem:[#allocation2 + $0x74] sm:$0x1] %v917_v19  ;;  %v14399_v8 = vld [vmem:[#allocation2 + $0x64] sm:$0xf]  ;;  %v1215_v20 = vrot.slane %v1213_v41, 4  ;;  %v1218_v22 = vrot.slane %v1216_v50, 5 }
  0xa5   : > { %v11538_v60 = vcombine.low %v1201_v1, %v1211_v55  ;;  %v14401_v9 = vld [vmem:[#allocation2 + $0x68] sm:$0x1]  ;;  %v1222_v29 = vshll.u32 %v14399_v8, 16  ;;  %v1226_v7 = vshrl.u32 %v14399_v8, 16  ;;  %v11595_v2 = vrot.slane %v14309_v44, 9 }
  0xa6   : > { %v1232_v42 = vshll.u32 %v14401_v9, 16  ;;  %v1219_v11 = vor.u32 %v1218_v22, %v1215_v20  ;;  %v1983_v62 = vrot.slane %v1981_v10, 4  ;;  %v11568_v55 = vcombine.low %v14213_v21, %v14229_v52 }
  0xa7   : > { %12736 = vmatmul.mubr.msk.bf16.gmra.mxu0 %vm1454_vm11, %v11538_v60  ;;  %v1224_v14 = vrot.slane %v1222_v29, 5  ;;  %v1228_v32 = vrot.slane %v1226_v7, 4  ;;  %v20544_v22 = vmov 0  ;;  %v13640_v29 = vld [vmem:[#allocation2 + $0x10] sm:$0xf] }
  0xa8   : > { %v14410_v13 = vld [vmem:[#allocation2 + $0x6c] sm:$0xf]  ;;  %v1220_v16 = vrot.slane %v1219_v11, 4  ;;  %v1234_v31 = vrot.slane %v1232_v42, 5  ;;  %v20545_v22 = vsel %vm14430_vm9, 4294967295, %v20544_v22  ;;  %v1988_v7 = vrot.slane %v13640_v29, 5 }
  0xa9   : > { %12762 = vmatmul.mubr.msk.bf16.gmra.mxu1 %vm1454_vm11, %v11566_v58  ;;  %v1237_v28 = vshrl.u32 %v14410_v13, 16  ;;  %v1240_v26 = vshll.u32 %v14410_v13, 16  ;;  %v1229_v47 = vor.u32 %v1228_v32, %v1224_v14  ;;  %20546 = vst [vmem:[#allocation11_spill] sm:$0xff] %v20545_v22  ;;  %v11569_v42 = vcombine.low %v14305_v40, %v14307_v25  ;;  %v13641_v32 = vld [vmem:[#allocation2 + $0x1c] sm:$0xf] }
  0xaa   : > { %12765 = vmatprep.mubr.msk.bf16.mxu1 %vm1454_vm11, %v11567_v36  ;;  %v1225_v41 = vsel %vm13953_vm14, %v1220_v16, %v1224_v14  ;;  %v14419_v50 = vld [vmem:[#allocation2 + $0x70] sm:$0xf]  ;;  %v1995_v16 = vrot.slane %v13641_v32, 5  ;;  %v13642_v29 = vld [vmem:[#allocation2 + $0x14] sm:$0x1] }
  0xab   : > { %v14421_v30 = vld [vmem:[#allocation2 + $0x74] sm:$0x1]  ;;  %v1239_v19 = vrot.slane %v1237_v28, 4  ;;  %v1242_v1 = vrot.slane %v1240_v26, 5  ;;  %v1230_v58 = vrot.slane %v1229_v47, 4  ;;  %v1246_v60 = vshll.u32 %v14419_v50, 16 }
  0xac   : > { %v1250_v20 = vshrl.u32 %v14419_v50, 16  ;;  %v1256_v44 = vshll.u32 %v14421_v30, 16  ;;  %v1982_v47 = vsel %vm14430_vm9, %v11595_v2, %v1981_v10 }
  0xad   : > { %v1243_v36 = vor.u32 %v1242_v1, %v1239_v19  ;;  %v1235_v11 = vsel %vm13953_vm14, %v1230_v58, %v1234_v31  ;;  %v1248_v0 = vrot.slane %v1246_v60, 5  ;;  %v1985_v19 = vsel %vm14430_vm9, %v1983_v62, %v1984_v56  ;;  %v13643_v58 = vld [vmem:[#allocation2 + $0xc] sm:$0xf]  ;;  %v13645_v62 = vld [vmem:[#allocation2 + $0x20] sm:$0x1] }
  0xae   : > { %v1252_v14 = vrot.slane %v1250_v20, 4  ;;  %v11539_v28 = vcombine.low %v1225_v41, %v1235_v11  ;;  %v1258_v4 = vrot.slane %v1256_v44, 5  ;;  %v2002_v1 = vrot.slane %v14098_v17, 5  ;;  %v13644_v20 = vld [vmem:[#allocation2 + $0x18] sm:$0xf] }
  0xaf   : > { %v1244_v26 = vrot.slane %v1243_v36, 4  ;;  %v1991_v31 = vrot.slane %v13642_v29, 5  ;;  %v11596_v60 = vrot.slane %v13643_v58, 9  ;;  %v1990_v41 = vrot.slane %v1988_v7, 4 }
  0xb0   : > { %v1253_v53 = vor.u32 %v1252_v14, %v1248_v0  ;;  %12739 = vmatprep.mubr.msk.bf16.mxu0 %vm1454_vm11, %v11539_v28  ;;  %v11597_v36 = vrot.slane %v13644_v20, 9  ;;  %v1997_v56 = vrot.slane %v1995_v16, 4  ;;  %v11612_v44 = vcombine.low %v1982_v47, %v1985_v19 }
  0xb1   : > { %12766 = vmatmul.mubr.msk.bf16.gmra.mxu1 %vm1454_vm11, %v11568_v55  ;;  %v1249_v10 = vsel %vm13953_vm14, %v1244_v26, %v1248_v0  ;;  %v1998_v55 = vrot.slane %v13645_v62, 5  ;;  %v11598_v17 = vrot.slane %v14096_v12, 9  ;;  %v2005_v11 = vrot.slane %v14100_v18, 5 }
  0xb2   : > { %12769 = vmatprep.mubr.msk.bf16.mxu1 %vm1454_vm11, %v11569_v42  ;;  %v1254_v2 = vrot.slane %v1253_v53, 4  ;;  %v2009_v14 = vrot.slane %v14181_v43, 5  ;;  %v2004_v28 = vrot.slane %v2002_v1, 4  ;;  %v11570_v42 = vcombine.low %v14351_v24, %v14353_v48 }
  0xb3   : > { %v2016_v0 = vrot.slane %v14229_v52, 5  ;;  %v1989_v26 = vsel %vm14430_vm9, %v11596_v60, %v1988_v7  ;;  %v11571_v12 = vcombine.low %v14382_v23, %v14399_v8  ;;  %v1992_v18 = vsel %vm14430_vm9, %v1990_v41, %v1991_v31 }
  0xb4   : > { %v1259_v32 = vsel %vm13953_vm14, %v1254_v2, %v1258_v4  ;;  %v1996_v43 = vsel %vm14430_vm9, %v11597_v36, %v1995_v16  ;;  %v1999_v4 = vsel %vm14430_vm9, %v1997_v56, %v1998_v55  ;;  %v11599_v47 = vrot.slane %v14170_v27, 9 }
  0xb5   : > { %v11540_v53 = vcombine.low %v1249_v10, %v1259_v32  ;;  %v14470_v52 = vsel %vm14430_vm9, %v11598_v17, %v2002_v1  ;;  %v2011_v7 = vrot.slane %v2009_v14, 4  ;;  %v2012_v19 = vrot.slane %v14177_v39, 5  ;;  %v14482_v1 = vld [vmem:[#allocation2 + $0x80] sm:$0x1]  ;;  %v13648_v17 = vld [vmem:[#allocation2 + $0x7c] sm:$0xf] }
  0xb6   : > { %v11600_v29 = vrot.slane %v14213_v21, 9  ;;  %v14477_v16 = vsel %vm14430_vm9, %v2004_v28, %v2005_v11  ;;  %v2018_v27 = vrot.slane %v2016_v0, 4  ;;  %v2019_v31 = vrot.slane %v14220_v37, 5 }
  0xb7   : > { %12740 = vmatmul.mubr.msk.bf16.gmra.mxu0 %vm1454_vm11, %v11540_v53  ;;  %v2023_v58 = vrot.slane %v14307_v25, 5  ;;  %v2054_v60 = vrot.slane %v14482_v1, 5  ;;  %v3242_v39 = vsel %vm1503_vm0, %v14204_v6, 0  ;;  %v2030_v21 = vrot.slane %v14353_v48, 5 }
  0xb8   : > { %12791 = vmatprep.mubr.msk.bf16.mxu0 %vm1454_vm11, %v11612_v44  ;;  %v11613_v41 = vcombine.low %v1989_v26, %v1992_v18  ;;  %v11614_v20 = vcombine.low %v1996_v43, %v1999_v4  ;;  %v14491_v36 = vsel %vm14430_vm9, %v11599_v47, %v2009_v14  ;;  %v2037_v37 = vrot.slane %v14399_v8, 5  ;;  %v13647_v44 = vld [vmem:[#allocation2 + $0x78] sm:$0xf]  ;;  %v13649_v26 = vld [vmem:[#allocation2 + $0x84] sm:$0xf] }
  0xb9   : > { %12770 = vmatmul.mubr.msk.bf16.gmra.mxu1 %vm1454_vm11, %v11570_v42  ;;  %v11615_v25 = vcombine.low %v14470_v52, %v14477_v16  ;;  %v14498_v10 = vsel %vm14430_vm9, %v2011_v7, %v2012_v19  ;;  %v14502_v6 = vsel %vm14430_vm9, %v11600_v29, %v2016_v0  ;;  %v11601_v48 = vrot.slane %v14305_v40, 9  ;;  %v13651_v47 = vld [vmem:[#allocation2 + $0x90] sm:$0xf]  ;;  %v13652_v7 = vld [vmem:[#allocation2 + $0x94] sm:$0xf] }
  0xba   : > { %12773 = vmatprep.mubr.msk.bf16.mxu1 %vm1454_vm11, %v11571_v12  ;;  %v14507_v2 = vsel %vm14430_vm9, %v2018_v27, %v2019_v31  ;;  %v2025_v56 = vrot.slane %v2023_v58, 4  ;;  %v2026_v8 = vrot.slane %v14317_v54, 5  ;;  %v11602_v62 = vrot.slane %v14351_v24, 9  ;;  %v14520_v54 = vld [vmem:[%s20352_s1 + $0xc] sm:$0x3] }
  0xbb   : > { %v11572_v55 = vcombine.low %v14410_v13, %v14419_v50  ;;  %v11573_v11 = vcombine.low %v13647_v44, %v13648_v17  ;;  %v2032_v14 = vrot.slane %v2030_v21, 4  ;;  %v2033_v32 = vrot.slane %v14360_v49, 5  ;;  %v13650_v12 = vld [vmem:[#allocation2 + $0x88] sm:$0xf]  ;;  %v14597_v52 = vld [vmem:[#allocation2 + $0xc] sm:$0xf] }
  0xbc   : > { %v11603_v40 = vrot.slane %v14382_v23, 9  ;;  %v2039_v28 = vrot.slane %v2037_v37, 4  ;;  %v2040_v42 = vrot.slane %v14401_v9, 5  ;;  %v2044_v0 = vrot.slane %v14419_v50, 5  ;;  %v14599_v16 = vld [vmem:[#allocation2 + $0x10] sm:$0xf] }
  0xbd   : > { %v11616_v24 = vcombine.low %v14491_v36, %v14498_v10  ;;  %v11617_v49 = vcombine.low %v14502_v6, %v14507_v2  ;;  %v14529_v23 = vsel %vm14430_vm9, %v11601_v48, %v2023_v58  ;;  %v2051_v9 = vrot.slane %v13648_v17, 5  ;;  %v13653_v36 = vld [vmem:[#allocation2 + $0x8c] sm:$0x1] }
  0xbe   : > { %v14534_v50 = vsel %vm14430_vm9, %v2025_v56, %v2026_v8  ;;  %v14538_v53 = vsel %vm14430_vm9, %v11602_v62, %v2030_v21  ;;  %v11574_v18 = vcombine.low %v13649_v26, %v13650_v12  ;;  %v2058_v43 = vrot.slane %v13650_v12, 5  ;;  %v13654_v62 = vld [vmem:[#allocation2 + $0x98] sm:$0x1] }
  0xbf   : > { %12792 = vmatmul.mubr.msk.bf16.vlgmr.msra.gmra.mxu0 %vm1454_vm11, %v11613_v41  ;;  %v14543_v4 = vsel %vm14430_vm9, %v2032_v14, %v2033_v32  ;;  %v11575_v19 = vcombine.low %v13651_v47, %v13652_v7  ;;  %v11604_v29 = vrot.slane %v14410_v13, 9  ;;  %v2065_v27 = vrot.slane %v13652_v7, 5 }
  0xc0   : > { %12858 = vmatpush3.bf16.msra.mxu0 %v3242_v39  ;;  %12795 = vmatprep.mubr.msk.bf16.mxu0 %vm1454_vm11, %v11614_v20  ;;  %v14551_v31 = vsel %vm14430_vm9, %v11603_v40, %v2037_v37  ;;  %v14555_v58 = vsel %vm14430_vm9, %v2039_v28, %v2040_v42  ;;  %v2046_v39 = vrot.slane %v2044_v0, 4  ;;  %v2047_v21 = vrot.slane %v14421_v30, 5 }
  0xc1   : > { %12774 = vmatmul.mubr.msk.bf16.gmra.mxu1 %vm1454_vm11, %v11572_v55  ;;  %13450 = vmatprep.subr.msk.bf16.mxu0 %vm1503_vm0, %v14520_v54  ;;  %v11605_v41 = vrot.slane %v13647_v44, 9  ;;  %v2053_v20 = vrot.slane %v2051_v9, 4  ;;  %v11606_v13 = vrot.slane %v13649_v26, 9  ;;  %v2061_v10 = vrot.slane %v13653_v36, 5 }
  0xc2   : > { %12777 = vmatprep.mubr.msk.bf16.mxu1 %vm1454_vm11, %v11573_v11  ;;  %v2060_v48 = vrot.slane %v2058_v43, 4  ;;  %v11607_v56 = vrot.slane %v13651_v47, 9  ;;  %v2067_v8 = vrot.slane %v2065_v27, 4  ;;  %v2068_v55 = vrot.slane %v13654_v62, 5 }
  0xc3   : > { %v11618_v37 = vcombine.low %v14529_v23, %v14534_v50  ;;  %v11619_v17 = vcombine.low %v14538_v53, %v14543_v4  ;;  %v11576_v11 = vcombine.low %v14137_v34, %v14152_v57  ;;  %v2072_v30 = vrot.slane %v14152_v57, 5  ;;  %v14616_v50 = vld [vmem:[#allocation2 + $0x1c] sm:$0xf]  ;;  %v14764_v53 = vld [vmem:[#allocation2 + $0x54] sm:$0xf] }
  0xc4   : > { %v11620_v44 = vcombine.low %v14551_v31, %v14555_v58  ;;  %v14569_v14 = vsel %vm14430_vm9, %v11604_v29, %v2044_v0  ;;  %v14573_v32 = vsel %vm14430_vm9, %v2046_v39, %v2047_v21  ;;  %v11577_v40 = vcombine.low %v14247_v35, %v14251_v46  ;;  %v13655_v0 = vld [vmem:[#allocation2 + $0x9c] sm:$0xf]  ;;  %v14637_v21 = vld [vmem:[#allocation2 + $0x24] sm:$0xf]  ;;  %v14745_v31 = vld [vmem:[#allocation2 + $0x38] sm:$0x1] }
  0xc5   : > { %v14583_v34 = vsel %vm14430_vm9, %v11605_v41, %v2051_v9  ;;  %v14589_v57 = vsel %vm14430_vm9, %v2053_v20, %v2054_v60  ;;  %v14593_v28 = vsel %vm14430_vm9, %v11606_v13, %v2058_v43  ;;  %v11578_v42 = vcombine.low %v14268_v15, %v14290_v61  ;;  %v14614_v9 = vld [vmem:[#allocation2 + $0x18] sm:$0xf]  ;;  %v14639_v41 = vld [vmem:[#allocation2 + $0x28] sm:$0xf]  ;;  %v14641_v20 = vld [vmem:[#allocation2 + $0x30] sm:$0xf] }
  0xc6   : > { %v14604_v1 = vsel %vm14430_vm9, %v2060_v48, %v2061_v10  ;;  %v14608_v60 = vsel %vm14430_vm9, %v11607_v56, %v2065_v27  ;;  %v11608_v23 = vrot.slane %v13655_v0, 9  ;;  %v2074_v26 = vrot.slane %v2072_v30, 4  ;;  %20547 = vst [vmem:[#allocation12_spill] sm:$0xff] %v14641_v20  ;;  %v14648_v10 = vld [vmem:[#allocation2 + $0x34] sm:$0xf]  ;;  %20552 = vst [vmem:[#allocation17_spill] sm:$0xff] %v14745_v31 }
  0xc7   : > { %12796 = vmatmul.mubr.msk.bf16.gmra.mxu0 %vm1454_vm11, %v11615_v25  ;;  %v14612_v25 = vsel %vm14430_vm9, %v2067_v8, %v2068_v55  ;;  %v2075_v12 = vrot.slane %v14154_v5, 5  ;;  %v2079_v43 = vrot.slane %v14251_v46, 5  ;;  %v2086_v7 = vrot.slane %v14290_v61, 5  ;;  %20548 = vst [vmem:[#allocation13_spill] sm:$0xff] %v14648_v10  ;;  %v14706_v46 = vld [vmem:[#allocation2 + $0x20] sm:$0x1] }
  0xc8   : > { %12799 = vmatprep.mubr.msk.bf16.mxu0 %vm1454_vm11, %v11616_v24  ;;  %v2760_v29 = vshrl.u32 %v14597_v52, 16  ;;  %v2763_v27 = vshll.u32 %v14597_v52, 16  ;;  %v14645_v13 = vsel %vm14430_vm9, %v11608_v23, %v2072_v30  ;;  %v11609_v36 = vrot.slane %v14247_v35, 9  ;;  %v14704_v35 = vld [vmem:[#allocation2 + $0x3c] sm:$0xf]  ;;  %20554 = vst [vmem:[#allocation18_spill] sm:$0xff] %v14764_v53 }
  0xc9   : > { %12778 = vmatmul.mubr.msk.bf16.gmra.mxu1 %vm1454_vm11, %v11574_v18  ;;  %v2769_v48 = vshll.u32 %v14599_v16, 16  ;;  %v2773_v56 = vshrl.u32 %v14599_v16, 16  ;;  %v14654_v8 = vsel %vm14430_vm9, %v2074_v26, %v2075_v12  ;;  %v2081_v62 = vrot.slane %v2079_v43, 4  ;;  %v14667_v12 = vld [vmem:[#allocation2 + $0x14] sm:$0x1]  ;;  %20549 = vst [vmem:[#allocation14_spill] sm:$0xff] %v14704_v35 }
  0xca   : > { %12781 = vmatprep.mubr.msk.bf16.mxu1 %vm1454_vm11, %v11575_v19  ;;  %v2082_v55 = vrot.slane %v14255_v51, 5  ;;  %v11610_v0 = vrot.slane %v14268_v15, 9  ;;  %v2088_v39 = vrot.slane %v2086_v7, 4  ;;  %v2089_v30 = vrot.slane %v14292_v63, 5  ;;  %v14721_v19 = vld [vmem:[#allocation2 + $0x2c] sm:$0x1] }
  0xcb   : > { %v2762_v23 = vrot.slane %v2760_v29, 4  ;;  %v2765_v18 = vrot.slane %v2763_v27, 5  ;;  %v2784_v51 = vshrl.u32 %v14614_v9, 16  ;;  %v2787_v47 = vshll.u32 %v14614_v9, 16  ;;  %20551 = vst [vmem:[#allocation16_spill] sm:$0xff] %v14721_v19 }
  0xcc   : > { %v14672_v63 = vrot.slane %v2769_v48, 5  ;;  %v2775_v29 = vrot.slane %v2773_v56, 4  ;;  %v2793_v6 = vshll.u32 %v14616_v50, 16  ;;  %v2797_v2 = vshrl.u32 %v14616_v50, 16 }
  0xcd   : > { %v14681_v27 = vsel %vm14430_vm9, %v11609_v36, %v2079_v43  ;;  %v14685_v26 = vsel %vm14430_vm9, %v2081_v62, %v2082_v55  ;;  %v2766_v48 = vor.u32 %v2765_v18, %v2762_v23  ;;  %v2779_v43 = vshll.u32 %v14667_v12, 16  ;;  %v14717_v23 = vld [vmem:[#allocation2 + $0x40] sm:$0xf] }
  0xce   : > { %v2808_v36 = vshrl.u32 %v14637_v21, 16  ;;  %v2786_v56 = vrot.slane %v2784_v51, 4  ;;  %v2789_v62 = vrot.slane %v2787_v47, 5  ;;  %v2811_v55 = vshll.u32 %v14637_v21, 16  ;;  %20550 = vst [vmem:[#allocation15_spill] sm:$0xff] %v14717_v23 }
  0xcf   : > { %12800 = vmatmul.mubr.msk.bf16.gmra.mxu0 %vm1454_vm11, %v11617_v49  ;;  %v2821_v18 = vshrl.u32 %v14639_v41, 16  ;;  %v14715_v47 = vsel %vm1503_vm0, %v14370_v59, 0  ;;  %v2832_v24 = vshrl.u32 %v14641_v20, 16  ;;  %v2767_v59 = vrot.slane %v2766_v48, 4  ;;  %v14752_v48 = vld [vmem:[#allocation2 + $0x48] sm:$0xf] }
  0xd0   : > { %12803 = vmatprep.mubr.msk.bf16.mxu0 %vm1454_vm11, %v11618_v37  ;;  %v14689_v37 = vsel %vm14430_vm9, %v11610_v0, %v2086_v7  ;;  %v2817_v7 = vshll.u32 %v14639_v41, 16  ;;  %v2776_v0 = vor.u32 %v2775_v29, %v14672_v63  ;;  %v2810_v51 = vrot.slane %v2808_v36, 4 }
  0xd1   : > { %12782 = vmatmul.mubr.msk.bf16.gmra.mxu1 %vm1454_vm11, %v11576_v11  ;;  %v14697_v11 = vsel %vm14430_vm9, %v2088_v39, %v2089_v30  ;;  %v2799_v39 = vrot.slane %v2797_v2, 4  ;;  %v2813_v29 = vrot.slane %v2811_v55, 5  ;;  %v2823_v2 = vrot.slane %v2821_v18, 4 }
  0xd2   : > { %12785 = vmatprep.mubr.msk.bf16.mxu1 %vm1454_vm11, %v11577_v40  ;;  %v14708_v40 = vrot.slane %v2793_v6, 5  ;;  %v14723_v6 = vrot.slane %v2817_v7, 5  ;;  %v2790_v30 = vor.u32 %v2789_v62, %v2786_v56  ;;  %v2803_v36 = vshll.u32 %v14706_v46, 16 }
  0xd3   : > { %v2835_v55 = vshll.u32 %v14641_v20, 16  ;;  %v2777_v7 = vrot.slane %v2776_v0, 4  ;;  %v2781_v18 = vrot.slane %v2779_v43, 5  ;;  %v2841_v5 = vshll.u32 %v14648_v10, 16 }
  0xd4   : > { %v2800_v49 = vor.u32 %v2799_v39, %v14708_v40  ;;  %v2814_v4 = vor.u32 %v2813_v29, %v2810_v51  ;;  %v2845_v58 = vshrl.u32 %v14648_v10, 16  ;;  %v2824_v15 = vor.u32 %v2823_v2, %v14723_v6  ;;  %v14760_v39 = vld [vmem:[#allocation2 + $0x4c] sm:$0xf] }
  0xd5   : > { %v2834_v61 = vrot.slane %v2832_v24, 4  ;;  %v14755_v43 = vrot.slane %v2841_v5, 5  ;;  %v2772_v56 = vsel %vm13953_vm14, %v2767_v59, %v14672_v63  ;;  %v2791_v62 = vrot.slane %v2790_v30, 4 }
  0xd6   : > { %v2805_v0 = vrot.slane %v2803_v36, 5  ;;  %v2847_v51 = vrot.slane %v2845_v58, 4  ;;  %v2782_v29 = vsel %vm13953_vm14, %v2777_v7, %v2781_v18  ;;  %v2856_v24 = vshrl.u32 %v14704_v35, 16 }
  0xd7   : > { %12804 = vmatmul.mubr.msk.bf16.gmra.mxu0 %vm1454_vm11, %v11619_v17  ;;  %v2827_v17 = vshll.u32 %v14721_v19, 16  ;;  %v2859_v5 = vshll.u32 %v14704_v35, 16  ;;  %v2815_v2 = vrot.slane %v2814_v4, 4  ;;  %v2851_v63 = vshll.u32 %v14745_v31, 16 }
  0xd8   : > { %12807 = vmatprep.mubr.msk.bf16.mxu0 %vm1454_vm11, %v11620_v44  ;;  %v20553_v44 = vcombine.low %v14597_v52, %v14599_v16  ;;  %v2865_v30 = vshll.u32 %v14717_v23, 16  ;;  %v2869_v59 = vshrl.u32 %v14717_v23, 16  ;;  %v2825_v36 = vrot.slane %v2824_v15, 4  ;;  %v14789_v15 = vld [vmem:[#allocation2 + $0x44] sm:$0x1] }
  0xd9   : > { %12786 = vmatmul.mubr.msk.bf16.gmra.mxu1 %vm1454_vm11, %v11578_v42  ;;  %v2837_v42 = vrot.slane %v2835_v55, 5  ;;  %v14768_v55 = vld [vmem:[#allocation2 + $0x58] sm:$0xf]  ;;  %v2829_v58 = vrot.slane %v2827_v17, 5  ;;  %v20555_v7 = vcombine.low %v14569_v14, %v14573_v32  ;;  %v14778_v18 = vcombine.low %v2772_v56, %v2782_v29  ;;  %20556 = vst [vmem:[#allocation19_spill] sm:$0xff] %v14789_v15 }
  0xda   : > { %12825 = vmatprep.mubr.msk.bf16.mxu1 %vm1454_vm11, %v20553_v44  ;;  %v2801_v44 = vrot.slane %v2800_v49, 4  ;;  %v2848_v49 = vor.u32 %v2847_v51, %v14755_v43  ;;  %v2796_v4 = vsel %vm13953_vm14, %v2791_v62, %v14708_v40  ;;  %v14785_v31 = vsel %vm1503_vm0, %v14520_v54, 0  ;;  %v14801_v54 = vld [vmem:[#allocation2 + $0x64] sm:$0xf]  ;;  %v14806_v62 = vld [vmem:[%s20352_s1 + $0xe] sm:$0x3] }
  0xdb   : > { %v2838_v19 = vor.u32 %v2837_v42, %v2834_v61  ;;  %v20557_v14 = vcombine.low %v14583_v34, %v14589_v57  ;;  %v14799_v61 = vld [vmem:[#allocation2 + $0x60] sm:$0xf]  ;;  %v2858_v42 = vrot.slane %v2856_v24, 4  ;;  %v2861_v56 = vrot.slane %v2859_v5, 5  ;;  %20558 = vst [vmem:[#allocation20_spill] sm:$0xff] %v14806_v62 }
  0xdc   : > { %v2806_v32 = vsel %vm13953_vm14, %v2801_v44, %v2805_v0  ;;  %v20559_v34 = vcombine.low %v14614_v9, %v14616_v50  ;;  %v2820_v57 = vsel %vm13953_vm14, %v2815_v2, %v14723_v6  ;;  %v2853_v0 = vrot.slane %v2851_v63, 5  ;;  %v14817_v44 = vld [vmem:[#allocation2 + $0x6c] sm:$0xf]  ;;  %v14851_v17 = vld [vmem:[#allocation2 + $0x78] sm:$0xf] }
  0xdd   : > { %v14815_v51 = vrot.slane %v2865_v30, 5  ;;  %v2871_v29 = vrot.slane %v2869_v59, 4  ;;  %20560 = vst [vmem:[#allocation21_spill] sm:$0xff] %v14817_v44  ;;  %v20561_v24 = vcombine.low %v14637_v21, %v14639_v41  ;;  %v2830_v5 = vsel %vm13953_vm14, %v2825_v36, %v2829_v58  ;;  %20563 = vst [vmem:[#allocation23_spill] sm:$0xff] %v14851_v17 }
  0xde   : > { %v2880_v6 = vshrl.u32 %v14752_v48, 16  ;;  %v14829_v2 = vcombine.low %v2796_v4, %v2806_v32  ;;  %v2883_v63 = vshll.u32 %v14752_v48, 16  ;;  %v2889_v30 = vshll.u32 %v14760_v39, 16 }
  0xdf   : > { %12808 = vmatmul.mubr.msk.bf16.gmra.mxu0 %vm1454_vm11, %v20555_v7  ;;  %v2839_v7 = vrot.slane %v2838_v19, 4  ;;  %v2893_v59 = vshrl.u32 %v14760_v39, 16  ;;  %v2875_v36 = vshll.u32 %v14789_v15, 16  ;;  %v2904_v19 = vshrl.u32 %v14764_v53, 16 }
  0xe0   : > { %12811 = vmatprep.mubr.msk.bf16.mxu0 %vm1454_vm11, %v20557_v14  ;;  %v2849_v14 = vrot.slane %v2848_v49, 4  ;;  %v2907_v58 = vshll.u32 %v14764_v53, 16  ;;  %v14839_v49 = vcombine.low %v2820_v57, %v2830_v5  ;;  %v2872_v32 = vor.u32 %v2871_v29, %v14815_v51  ;;  %v14858_v29 = vld [vmem:[#allocation2 + $0x50] sm:$0x1] }
  0xe1   : > { %12826 = vmatmul.mubr.msk.bf16.vlgmr.msra.gmra.mxu1 %vm1454_vm11, %v20559_v34  ;;  %v14826_v34 = vld [vmem:[#allocation2 + $0x70] sm:$0xf]  ;;  %v2882_v40 = vrot.slane %v2880_v6, 4  ;;  %v2913_v57 = vshll.u32 %v14768_v55, 16  ;;  %v20564_v5 = vcombine.low %v14593_v28, %v14604_v1  ;;  %20565 = vst [vmem:[#allocation24_spill] sm:$0xff] %v14858_v29  ;;  %v14860_v4 = vrot.slane %v2889_v30, 5 }
  0xe2   : > { %12829 = vmatprep.mubr.msk.bf16.mxu1 %vm1454_vm11, %v20561_v24  ;;  %12892 = vmatpush3.bf16.msra.mxu1 %v14715_v47  ;;  %20562 = vst [vmem:[#allocation22_spill] sm:$0xff] %v14826_v34  ;;  %v2862_v47 = vor.u32 %v2861_v56, %v2858_v42  ;;  %v2844_v42 = vsel %vm13953_vm14, %v2839_v7, %v14755_v43  ;;  %v2885_v24 = vrot.slane %v2883_v63, 5  ;;  %v2895_v15 = vrot.slane %v2893_v59, 4  ;;  %v14867_v6 = vld [vmem:[#allocation2 + $0x7c] sm:$0xf] }
  0xe3   : > { %13451 = vmatprep.subr.msk.bf16.mxu1 %vm1503_vm0, %v14806_v62  ;;  %v2854_v56 = vsel %vm13953_vm14, %v2849_v14, %v2853_v0  ;;  %v2917_v43 = vshrl.u32 %v14768_v55, 16  ;;  %v20566_v0 = vcombine.low %v14608_v60, %v14612_v25  ;;  %v2877_v14 = vrot.slane %v2875_v36, 5  ;;  %20567 = vst [vmem:[#allocation25_spill] sm:$0xff] %v14867_v6  ;;  %v14875_v59 = vld [vmem:[#allocation2 + $0x5c] sm:$0x1] }
  0xe4   : > { %v2863_v7 = vrot.slane %v2862_v47, 4  ;;  %v2906_v28 = vrot.slane %v2904_v19, 4  ;;  %v2909_v1 = vrot.slane %v2907_v58, 5  ;;  %v14873_v63 = vcombine.low %v2844_v42, %v2854_v56  ;;  %20569 = vst [vmem:[#allocation26_spill] sm:$0xff] %v14875_v59 }
  0xe5   : > { %v2873_v30 = vrot.slane %v2872_v32, 4  ;;  %v2928_v60 = vshrl.u32 %v14799_v61, 16  ;;  %v2931_v25 = vshll.u32 %v14799_v61, 16  ;;  %v20570_v47 = vcombine.low %v14704_v35, %v14717_v23 }
  0xe6   : > { %v2899_v36 = vshll.u32 %v14858_v29, 16  ;;  %v14884_v19 = vrot.slane %v2913_v57, 5  ;;  %v2919_v58 = vrot.slane %v2917_v43, 4  ;;  %v2937_v42 = vshll.u32 %v14801_v54, 16  ;;  %v14896_v43 = vld [vmem:[#allocation2 + $0x68] sm:$0x1] }
  0xe7   : > { %12812 = vmatmul.mubr.msk.bf16.gmra.mxu0 %vm1454_vm11, %v20564_v5  ;;  %v20568_v5 = vcombine.low %v14641_v20, %v14648_v10  ;;  %v2886_v56 = vor.u32 %v2885_v24, %v2882_v40  ;;  %v2896_v32 = vor.u32 %v2895_v15, %v14860_v4  ;;  %v2868_v62 = vsel %vm13953_vm14, %v2863_v7, %v14815_v51 }
  0xe8   : > { %12815 = vmatprep.mubr.msk.bf16.mxu0 %vm1454_vm11, %v20566_v0  ;;  %v2923_v29 = vshll.u32 %v14875_v59, 16  ;;  %v2952_v57 = vshrl.u32 %v14817_v44, 16  ;;  %20571 = vst [vmem:[#allocation27_spill] sm:$0xff] %v14896_v43  ;;  %v2930_v35 = vrot.slane %v2928_v60, 4  ;;  %v2933_v40 = vrot.slane %v2931_v25, 5 }
  0xe9   : > { %12830 = vmatmul.mubr.msk.bf16.gmra.mxu1 %vm1454_vm11, %v20568_v5  ;;  %v2941_v5 = vshrl.u32 %v14801_v54, 16  ;;  %v14898_v24 = vrot.slane %v2937_v42, 5  ;;  %v2920_v0 = vor.u32 %v2919_v58, %v14884_v19  ;;  %v2955_v20 = vshll.u32 %v14817_v44, 16 }
  0xea   : > { %12833 = vmatprep.mubr.msk.bf16.mxu1 %vm1454_vm11, %v20570_v47  ;;  %v2910_v47 = vor.u32 %v2909_v1, %v2906_v28  ;;  %v2961_v23 = vshll.u32 %v14826_v34, 16  ;;  %v2965_v51 = vshrl.u32 %v14826_v34, 16  ;;  %v20572_v7 = vcombine.low %v14645_v13, %v14654_v8  ;;  %v14919_v8 = vld [vmem:[#allocation2 + $0x84] sm:$0xf] }
  0xeb   : > { %v2943_v15 = vrot.slane %v2941_v5, 4  ;;  %v2878_v28 = vsel %vm13953_vm14, %v2873_v30, %v2877_v14  ;;  %v2887_v1 = vrot.slane %v2886_v56, 4  ;;  %v2897_v60 = vrot.slane %v2896_v32, 4  ;;  %20575 = vst [vmem:[#allocation28_spill] sm:$0xff] %v14919_v8  ;;  %v14921_v14 = vld [vmem:[#allocation2 + $0x88] sm:$0xf] }
  0xec   : > { %v2901_v25 = vrot.slane %v2899_v36, 5  ;;  %v20573_v58 = vcombine.low %v14681_v27, %v14685_v26  ;;  %v2925_v42 = vrot.slane %v2923_v29, 5  ;;  %v2947_v5 = vshll.u32 %v14896_v43, 16  ;;  %20576 = vst [vmem:[#allocation29_spill] sm:$0xff] %v14921_v14  ;;  %v14930_v32 = vld [vmem:[#allocation2 + $0x74] sm:$0x1] }
  0xed   : > { %v2954_v59 = vrot.slane %v2952_v57, 4  ;;  %v2957_v10 = vrot.slane %v2955_v20, 5  ;;  %v20574_v13 = vcombine.low %v14752_v48, %v14760_v39  ;;  %v2934_v30 = vor.u32 %v2933_v40, %v2930_v35  ;;  %20578 = vst [vmem:[#allocation30_spill] sm:$0xff] %v14930_v32  ;;  %v14951_v43 = vld [vmem:[#allocation2 + $0x80] sm:$0x1] }
  0xee   : > { %v2944_v36 = vor.u32 %v2943_v15, %v14898_v24  ;;  %v14924_v26 = vrot.slane %v2961_v23, 5  ;;  %v2967_v27 = vrot.slane %v2965_v51, 4  ;;  %v20577_v29 = vcombine.low %v14764_v53, %v14768_v55  ;;  %v14945_v51 = vld [vmem:[#allocation2 + $0x90] sm:$0xf]  ;;  %20579 = vst [vmem:[#allocation31_spill] sm:$0xff] %v14951_v43 }
  0xef   : > { %12816 = vmatmul.mubr.msk.bf16.gmra.mxu0 %vm1454_vm11, %v20572_v7  ;;  %v2911_v20 = vrot.slane %v2910_v47, 4  ;;  %v2921_v56 = vrot.slane %v2920_v0, 4  ;;  %v2976_v57 = vshrl.u32 %v14851_v17, 16  ;;  %v2979_v7 = vshll.u32 %v14851_v17, 16 }
  0xf0   : > { %12819 = vmatprep.mubr.msk.bf16.mxu0 %vm1454_vm11, %v20573_v58  ;;  %v14934_v58 = vcombine.low %v2868_v62, %v2878_v28  ;;  %v2892_v35 = vsel %vm13953_vm14, %v2887_v1, %v14860_v4  ;;  %v2985_v23 = vshll.u32 %v14867_v6, 16  ;;  %v2989_v40 = vshrl.u32 %v14867_v6, 16 }
  0xf1   : > { %12834 = vmatmul.mubr.msk.bf16.gmra.mxu1 %vm1454_vm11, %v20574_v13  ;;  %v2902_v47 = vsel %vm13953_vm14, %v2897_v60, %v2901_v25  ;;  %v2949_v15 = vrot.slane %v2947_v5, 5  ;;  %v14947_v13 = vld [vmem:[#allocation2 + $0x94] sm:$0xf]  ;;  %v2958_v62 = vor.u32 %v2957_v10, %v2954_v59  ;;  %v2935_v28 = vrot.slane %v2934_v30, 4  ;;  %v14958_v5 = vld [vmem:[#allocation2 + $0x9c] sm:$0xf] }
  0xf2   : > { %12837 = vmatprep.mubr.msk.bf16.mxu1 %vm1454_vm11, %v20577_v29  ;;  %v2945_v29 = vrot.slane %v2944_v36, 4  ;;  %v2968_v4 = vor.u32 %v2967_v27, %v14924_v26  ;;  %v2971_v1 = vshll.u32 %v14930_v32, 16  ;;  %v2916_v60 = vsel %vm13953_vm14, %v2911_v20, %v14884_v19  ;;  %v14964_v59 = vld [vmem:[#allocation2 + $0xa0] sm:$0xf]  ;;  %v15030_v20 = vld [vmem:[%s20352_s1 + $0x10] sm:$0x3] }
  0xf3   : > { %v2926_v25 = vsel %vm13953_vm14, %v2921_v56, %v2925_v42  ;;  %v2978_v0 = vrot.slane %v2976_v57, 4  ;;  %v2981_v53 = vrot.slane %v2979_v7, 5  ;;  %v20580_v10 = vcombine.low %v14689_v37, %v14697_v11  ;;  %v15038_v32 = vld [vmem:[#allocation2 + $0xa8] sm:$0xf] }
  0xf4   : > { %v14966_v30 = vrot.slane %v2985_v23, 5  ;;  %v2991_v36 = vrot.slane %v2989_v40, 4  ;;  %v3000_v27 = vshrl.u32 %v14919_v8, 16  ;;  %v3003_v19 = vshll.u32 %v14919_v8, 16 }
  0xf5   : > { %v14972_v42 = vcombine.low %v2892_v35, %v2902_v47  ;;  %v14976_v37 = vrot.slane %v2958_v62, 4  ;;  %v2995_v11 = vshll.u32 %v14951_v43, 16  ;;  %v20581_v56 = vcombine.low %v14799_v61, %v14801_v54 }
  0xf6   : > { %v2940_v57 = vsel %vm13953_vm14, %v2935_v28, %v14898_v24  ;;  %v14988_v7 = vrot.slane %v2968_v4, 4  ;;  %v14990_v35 = vrot.slane %v2971_v1, 5  ;;  %v20582_v23 = vcombine.low %v14817_v44, %v14826_v34  ;;  %v444_v1 = vld [vmem:[#allocation2 + $0xc0] sm:$0x1] }
  0xf7   : > { %12820 = vmatmul.mubr.msk.bf16.gmra.mxu0 %vm1454_vm11, %v20580_v10  ;;  %v14996_v40 = vcombine.low %v2916_v60, %v2926_v25  ;;  %v3009_v62 = vshll.u32 %v14921_v14, 16  ;;  %v3013_v24 = vshrl.u32 %v14921_v14, 16  ;;  %v2992_v28 = vor.u32 %v2991_v36, %v14966_v30  ;;  %v527_v10 = vld [vmem:[%s13938_s24 + $0x78] sm:$0xf] }
  0xf8   : > { %12859 = vmatprep.mubr.msk.bf16.mxu0 %vm1454_vm11, %v14778_v18  ;;  %v2950_v18 = vsel %vm13953_vm14, %v2945_v29, %v2949_v15  ;;  %v2982_v15 = vor.u32 %v2981_v53, %v2978_v0  ;;  %v3002_v29 = vrot.slane %v3000_v27, 4  ;;  %v3005_v4 = vrot.slane %v3003_v19, 5  ;;  %v528_v19 = vld [vmem:[%s13938_s24 + $0x7c] sm:$0xf] }
  0xf9   : > { %12838 = vmatmul.mubr.msk.bf16.gmra.mxu1 %vm1454_vm11, %v20581_v56  ;;  %v15004_v56 = vcombine.low %v2940_v57, %v2950_v18  ;;  %v15010_v25 = vrot.slane %v2995_v11, 5  ;;  %v3024_v47 = vshrl.u32 %v14945_v51, 16  ;;  %v3027_v0 = vshll.u32 %v14945_v51, 16 }
  0xfa   : > { %12841 = vmatprep.mubr.msk.bf16.mxu1 %vm1454_vm11, %v20582_v23  ;;  %v15012_v23 = vld [vmem:[#allocation2 + $0x8c] sm:$0x1]  ;;  %v3033_v36 = vshll.u32 %v14947_v13, 16  ;;  %v3037_v27 = vshrl.u32 %v14947_v13, 16  ;;  %v15023_v57 = vrot.slane %v3009_v62, 5  ;;  %v3015_v11 = vrot.slane %v3013_v24, 4 }
  0xfb   : > { %20583 = vst [vmem:[#allocation32_spill] sm:$0xff] %v15012_v23  ;;  %v445_v18 = vsel %vm13908_vm5, 0, %v444_v1  ;;  %v787_v60 = vshrl.u32 %v527_v10, 16  ;;  %v15034_v53 = vrot.slane %v2982_v15, 4  ;;  %v15036_v43 = vrot.slane %v2992_v28, 4 }
  0xfc   : > { %v3006_v62 = vor.u32 %v3005_v4, %v3002_v29  ;;  %v3019_v24 = vshll.u32 %v15012_v23, 16  ;;  %446 = vst [vmem:[#allocation2 + $0xc0] sm:$0x1] %v445_v18  ;;  %v15044_v1 = vld [vmem:[#allocation2 + $0xac] sm:$0xf]  ;;  %v3026_v3 = vrot.slane %v3024_v47, 4  ;;  %v20584_v28 = vcombine.low %v14851_v17, %v14867_v6 }
  0xfd   : > { %v789_v44 = vrot.slane %v787_v60, 7  ;;  %v795_v15 = vshrl.u32 %v528_v19, 16  ;;  %v3029_v29 = vrot.slane %v3027_v0, 5  ;;  %v15050_v4 = vrot.slane %v3033_v36, 5  ;;  %v15059_v47 = vld [vmem:[#allocation2 + $0x98] sm:$0x1] }
  0xfe   : > { %v3039_v18 = vrot.slane %v3037_v27, 4  ;;  %v798_v23 = vshll.u32 %v528_v19, 16  ;;  %v3048_v0 = vshrl.u32 %v14958_v5, 16  ;;  %v3051_v19 = vshll.u32 %v14958_v5, 16 }
  0xff   : > { %12860 = vmatmul.mubr.msk.bf16.vlgmr.msra.gmra.mxu0 %vm1454_vm11, %v14829_v2  ;;  %v790_v2 = vshll.u32 %v527_v10, 16  ;;  %v793_v10 = vrot.slane %v789_v44, 4  ;;  %v15061_v60 = vrot.slane %v795_v15, 7  ;;  %v3061_v15 = vshrl.u32 %v14964_v59, 16 }
 0x100   : > { %12926 = vmatpush3.bf16.msra.mxu0 %v14785_v31  ;;  %12863 = vmatprep.mubr.msk.bf16.mxu0 %vm1454_vm11, %v14839_v49  ;;  %v20585_v31 = vcombine.low %v14919_v8, %v14921_v14  ;;  %v3016_v49 = vor.u32 %v3015_v11, %v15023_v57  ;;  %v2988_v11 = vsel %vm13953_vm14, %v15034_v53, %v14966_v30  ;;  %v3043_v14 = vshll.u32 %v15059_v47, 16 }
 0x101   : > { %12842 = vmatmul.mubr.msk.bf16.gmra.mxu1 %vm1454_vm11, %v20584_v28  ;;  %13452 = vmatprep.subr.msk.bf16.mxu0 %vm1503_vm0, %v15030_v20  ;;  %v792_v27 = vor.u32 %v790_v2, %v789_v44  ;;  %v3057_v28 = vshll.u32 %v14964_v59, 16  ;;  %v800_v8 = vor.u32 %v798_v23, %v15061_v60  ;;  %v2998_v36 = vsel %vm13953_vm14, %v15036_v43, %v15010_v25  ;;  %v15078_v44 = vld [vmem:[#allocation2 + $0xb4] sm:$0xf] }
 0x102   : > { %12845 = vmatprep.mubr.msk.bf16.mxu1 %vm1454_vm11, %v20585_v31  ;;  %v3021_v31 = vrot.slane %v3019_v24, 5  ;;  %20586 = vst [vmem:[#allocation33_spill] sm:$0xff] %v15078_v44  ;;  %v3030_v2 = vor.u32 %v3029_v29, %v3026_v3  ;;  %v3040_v17 = vor.u32 %v3039_v18, %v15050_v4  ;;  %v3007_v6 = vrot.slane %v3006_v62, 4  ;;  %v15086_v24 = vld [vmem:[#allocation2 + $0xb8] sm:$0xf] }
 0x103   : > { %v3017_v34 = vrot.slane %v3016_v49, 4  ;;  %v801_v30 = vsel %vm13960_vm15, %v793_v10, %v800_v8  ;;  %v961_v23 = vld [vmem:[#allocation2 + $0xc0] sm:$0xf]  ;;  %v3050_v53 = vrot.slane %v3048_v0, 4  ;;  %v3053_v3 = vrot.slane %v3051_v19, 5 }
 0x104   : > { %v962_v43 = vsel %vm13947_vm13, %v792_v27, %v961_v23  ;;  %964 = vst.msk [vmem:[#allocation2 + $0xc4] sm:$0xf] %vm851_vm8, %v801_v30  ;;  %v15091_v25 = vrot.slane %v3057_v28, 5  ;;  %v3063_v62 = vrot.slane %v3061_v15, 4  ;;  %v15095_v8 = vld [vmem:[#allocation2 + $0xa4] sm:$0x1]  ;;  %v20587_v49 = vcombine.low %v14945_v51, %v14947_v13 }
 0x105   : > { %963 = vst [vmem:[#allocation2 + $0xc0] sm:$0xf] %v962_v43  ;;  %v3072_v29 = vshrl.u32 %v15038_v32, 16  ;;  %v3081_v18 = vshll.u32 %v15044_v1, 16  ;;  %v3085_v33 = vshrl.u32 %v15044_v1, 16  ;;  %v20589_v10 = vsel %vm13953_vm14, %v14976_v37, %v14924_v26 }
 0x106   : > { %v15117_v27 = vrot.slane %v3030_v2, 4  ;;  %v15119_v19 = vrot.slane %v3040_v17, 4  ;;  %v15121_v28 = vrot.slane %v3043_v14, 5  ;;  %v20590_v15 = vcombine.low %v14958_v5, %v14964_v59  ;;  %v15139_v23 = vld [vmem:[#allocation2 + $0xb0] sm:$0x1] }
 0x107   : > { %12864 = vmatmul.mubr.msk.bf16.gmra.mxu0 %vm1454_vm11, %v14873_v63  ;;  %v3075_v63 = vshll.u32 %v15038_v32, 16  ;;  %v3022_v26 = vsel %vm13953_vm14, %v3017_v34, %v3021_v31  ;;  %v11659_v37 = vcombine.low %v15078_v44, %v15086_v24  ;;  %v3455_v17 = vrot.slane %v14599_v16, 5 }
 0x108   : > { %12867 = vmatprep.mubr.msk.bf16.mxu0 %vm1454_vm11, %v14934_v58  ;;  %v20588_v58 = vsel %vm13953_vm14, %v14988_v7, %v14990_v35  ;;  %v3012_v7 = vsel %vm13953_vm14, %v3007_v6, %v15023_v57  ;;  %v15135_v35 = vcombine.low %v2988_v11, %v2998_v36  ;;  %v3054_v14 = vor.u32 %v3053_v3, %v3050_v53 }
 0x109   : > { %12846 = vmatmul.mubr.msk.bf16.gmra.mxu1 %vm1454_vm11, %v20587_v49  ;;  %v15115_v0 = vcombine.low %v20589_v10, %v20588_v58  ;;  %v3064_v2 = vor.u32 %v3063_v62, %v15091_v25  ;;  %v3067_v30 = vshll.u32 %v15095_v8, 16  ;;  %v3074_v43 = vrot.slane %v3072_v29, 4  ;;  %v494_v58 = vld [vmem:[#allocation2 + $0xc8] sm:$0x1] }
 0x10a   : > { %12849 = vmatprep.mubr.msk.bf16.mxu1 %vm1454_vm11, %v20590_v15  ;;  %v3077_v49 = vrot.slane %v3075_v63, 5  ;;  %v15141_v6 = vrot.slane %v3081_v18, 5  ;;  %v3087_v57 = vrot.slane %v3085_v33, 4  ;;  %v15143_v34 = vcombine.low %v3012_v7, %v3022_v26  ;;  %v15176_v26 = vld [vmem:[#allocation2 + $0xbc] sm:$0x1] }
 0x10b   : > { %v11710_v31 = vrot.slane %v14597_v52, 9  ;;  %v3457_v53 = vrot.slane %v3455_v17, 4  ;;  %v3458_v3 = vrot.slane %v14667_v12, 5  ;;  %v3096_v62 = vshrl.u32 %v15078_v44, 16 }
 0x10c   : > { %v15159_v29 = vrot.slane %v3054_v14, 4  ;;  %v15161_v63 = vrot.slane %v3067_v30, 5  ;;  %v3091_v18 = vshll.u32 %v15139_v23, 16  ;;  %v3462_v33 = vrot.slane %v14616_v50, 5  ;;  %v15183_v30 = vld [vmem:[#allocation2 + $0xc4] sm:$0xf] }
 0x10d   : > { %v15167_v52 = vrot.slane %v3064_v2, 4  ;;  %v3078_v12 = vor.u32 %v3077_v49, %v3074_v43  ;;  %v3088_v10 = vor.u32 %v3087_v57, %v15141_v6  ;;  %v3099_v15 = vshll.u32 %v15078_v44, 16  ;;  %v15181_v2 = vld [vmem:[#allocation2 + $0xc0] sm:$0xf] }
 0x10e   : > { %v11711_v7 = vrot.slane %v14614_v9, 9  ;;  %v3098_v50 = vrot.slane %v3096_v62, 4  ;;  %v3105_v14 = vshll.u32 %v15086_v24, 16  ;;  %v3456_v43 = vsel %vm14430_vm9, %v11710_v31, %v3455_v17 }
 0x10f   : > { %12868 = vmatmul.mubr.msk.bf16.gmra.mxu0 %vm1454_vm11, %v14972_v42  ;;  %v20591_v42 = vcombine.low %v15038_v32, %v15044_v1  ;;  %v3459_v49 = vsel %vm14430_vm9, %v3457_v53, %v3458_v3  ;;  %v3101_v9 = vrot.slane %v3099_v15, 5  ;;  %v495_v62 = vsel %vm13915_vm6, 0, %v494_v58 }
 0x110   : > { %12871 = vmatprep.mubr.msk.bf16.mxu0 %vm1454_vm11, %v14996_v40  ;;  %v3109_v40 = vshrl.u32 %v15086_v24, 16  ;;  %v3465_v16 = vrot.slane %v14706_v46, 5  ;;  %v15192_v36 = vrot.slane %v3105_v14, 5  ;;  %496 = vst [vmem:[#allocation2 + $0xc8] sm:$0x1] %v495_v62  ;;  %v15194_v11 = vrot.slane %v3078_v12, 4 }
 0x111   : > { %12850 = vmatmul.mubr.msk.bf16.gmra.mxu1 %vm1454_vm11, %v20591_v42  ;;  %v3464_v42 = vrot.slane %v3462_v33, 4  ;;  %v3093_v45 = vrot.slane %v3091_v18, 5  ;;  %v3120_v44 = vshrl.u32 %v15181_v2, 16  ;;  %v3123_v17 = vshll.u32 %v15181_v2, 16 }
 0x112   : > { %12853 = vmatprep.mubr.msk.bf16.mxu1 %vm1454_vm11, %v11659_v37  ;;  %v3111_v37 = vrot.slane %v3109_v40, 4  ;;  %v11660_v31 = vcombine.low %v15181_v2, %v15183_v30  ;;  %v3102_v53 = vor.u32 %v3101_v9, %v3098_v50  ;;  %v3115_v58 = vshll.u32 %v15176_v26, 16  ;;  %v20593_v9 = vld [vmem:[#allocation16_spill] sm:$0xff] }
 0x113   : > { %v3089_v46 = vrot.slane %v3088_v10, 4  ;;  %v11727_v15 = vcombine.low %v3456_v43, %v3459_v49  ;;  %v3463_v14 = vsel %vm14430_vm9, %v11711_v7, %v3462_v33  ;;  %v3469_v12 = vrot.slane %v14639_v41, 5 }
 0x114   : > { %v3112_v3 = vor.u32 %v3111_v37, %v15192_v36  ;;  %v3466_v18 = vsel %vm14430_vm9, %v3464_v42, %v3465_v16  ;;  %v3129_v40 = vshll.u32 %v15183_v30, 16  ;;  %v11712_v50 = vrot.slane %v14637_v21, 9 }
 0x115   : > { %v3472_v57 = vrot.slane %v20593_v9, 5  ;;  %v3122_v10 = vrot.slane %v3120_v44, 4  ;;  %v3125_v43 = vrot.slane %v3123_v17, 5  ;;  %v3133_v33 = vshrl.u32 %v15183_v30, 16  ;;  %v20600_v9 = vld [vmem:[#allocation14_spill] sm:$0xff] }
 0x116   : > { %v3471_v41 = vrot.slane %v3469_v12, 4  ;;  %v3103_v16 = vrot.slane %v3102_v53, 4  ;;  %v3113_v7 = vrot.slane %v3112_v3, 4  ;;  %v3117_v21 = vrot.slane %v3115_v58, 5  ;;  %v20597_v53 = vld [vmem:[#allocation15_spill] sm:$0xff] }
 0x117   : > { %12872 = vmatmul.mubr.msk.bf16.gmra.mxu0 %vm1454_vm11, %v15004_v56  ;;  %v3060_v56 = vsel %vm13953_vm14, %v15159_v29, %v15091_v25  ;;  %v3084_v44 = vsel %vm13953_vm14, %v15194_v11, %v15141_v6  ;;  %v3094_v49 = vsel %vm13953_vm14, %v3089_v46, %v3093_v45  ;;  %v965_v62 = vld [vmem:[#allocation2 + $0xc8] sm:$0x1]  ;;  %v20594_v25 = vld [vmem:[#allocation13_spill] sm:$0xff]  ;;  %v11728_v42 = vcombine.low %v3463_v14, %v3466_v18 }
 0x118   : > { %12875 = vmatprep.mubr.msk.bf16.mxu0 %vm1454_vm11, %v15115_v0  ;;  %v3070_v0 = vsel %vm13953_vm14, %v15167_v52, %v15161_v63  ;;  %v3476_v29 = vrot.slane %v20594_v25, 5  ;;  %v20595_v37 = vrot.slane %v15061_v60, 4  ;;  %v3470_v63 = vsel %vm14430_vm9, %v11712_v50, %v3469_v12  ;;  %v20598_v46 = vld [vmem:[#allocation12_spill] sm:$0xff]  ;;  %v20599_v14 = vld [vmem:[#allocation17_spill] sm:$0xff] }
 0x119   : > { %12854 = vmatmul.mubr.msk.bf16.gmra.mxu1 %vm1454_vm11, %v11660_v31  ;;  %v3473_v6 = vsel %vm14430_vm9, %v3471_v41, %v3472_v57  ;;  %v3126_v11 = vor.u32 %v3125_v43, %v3122_v10  ;;  %v15240_v45 = vrot.slane %v3129_v40, 5  ;;  %v3135_v52 = vrot.slane %v3133_v33, 4  ;;  %v20603_v33 = vld [vmem:[#allocation20_spill] sm:$0xff] }
 0x11a   : > { %12893 = vmatprep.mubr.msk.bf16.mxu1 %vm1454_vm11, %v11727_v15  ;;  %v966_v31 = vsel %vm13966_vm2, %v20595_v37, %v965_v62  ;;  %v3483_v3 = vrot.slane %v20597_v53, 5  ;;  %v3108_v60 = vsel %vm13953_vm14, %v3103_v16, %v15192_v36  ;;  %v3118_v58 = vsel %vm13953_vm14, %v3113_v7, %v3117_v21  ;;  %v20604_v7 = vld [vmem:[#allocation19_spill] sm:$0xff]  ;;  %v15274_v62 = vld [vmem:[#allocation2 + $0x1c] sm:$0xf] }
 0x11b   : > { %967 = vst [vmem:[#allocation2 + $0xc8] sm:$0x1] %v966_v31  ;;  %v11713_v15 = vrot.slane %v20598_v46, 9  ;;  %v3479_v12 = vrot.slane %v20599_v14, 5  ;;  %v11729_v18 = vcombine.low %v3470_v63, %v3473_v6  ;;  %v3478_v50 = vrot.slane %v3476_v29, 4  ;;  %v20606_v6 = vld [vmem:[#allocation18_spill] sm:$0xff] }
 0x11c   : > { %v11714_v57 = vrot.slane %v20600_v9, 9  ;;  %v3490_v40 = vrot.slane %v14760_v39, 5  ;;  %v20601_v36 = vsel %vm13953_vm14, %v15119_v19, %v15121_v28  ;;  %v20602_v10 = vsel %vm13953_vm14, %v15117_v27, %v15050_v4  ;;  %v15272_v28 = vld [vmem:[#allocation2 + $0x18] sm:$0xf]  ;;  %v15295_v31 = vld [vmem:[#allocation2 + $0x30] sm:$0xf] }
 0x11d   : > { %v11689_v43 = vcombine.low %v20602_v10, %v20601_v36  ;;  %v4717_v41 = vsel %vm1503_vm0, %v20603_v33, 0  ;;  %v3485_v16 = vrot.slane %v3483_v3, 4  ;;  %v3486_v39 = vrot.slane %v20604_v7, 5  ;;  %v20607_v53 = vld [vmem:[#allocation26_spill] sm:$0xff]  ;;  %v15313_v14 = vld [vmem:[#allocation2 + $0x40] sm:$0xf] }
 0x11e   : > { %v15269_v21 = vrot.slane %v3126_v11, 4  ;;  %v3136_v19 = vor.u32 %v3135_v52, %v15240_v45  ;;  %v3497_v4 = vrot.slane %v14768_v55, 5  ;;  %v15277_v27 = vcombine.low %v3084_v44, %v3094_v49  ;;  %v15329_v33 = vld [vmem:[#allocation2 + $0x48] sm:$0xf]  ;;  %v15339_v7 = vld [vmem:[#allocation2 + $0x4c] sm:$0xf] }
 0x11f   : > { %12876 = vmatmul.mubr.msk.bf16.gmra.mxu0 %vm1454_vm11, %v15135_v35  ;;  %v11690_v35 = vcombine.low %v3060_v56, %v3070_v0  ;;  %v15280_v25 = vcombine.low %v3108_v60, %v3118_v58  ;;  %v15284_v56 = vld [vmem:[#allocation2 + $0x24] sm:$0xf]  ;;  %v15286_v0 = vld [vmem:[#allocation2 + $0x28] sm:$0xf]  ;;  %v11715_v37 = vrot.slane %v14752_v48, 9  ;;  %v3480_v55 = vsel %vm14430_vm9, %v3478_v50, %v3479_v12 }
 0x120   : > { %12879 = vmatprep.mubr.msk.bf16.mxu0 %vm1454_vm11, %v15143_v34  ;;  %v3477_v34 = vsel %vm14430_vm9, %v11713_v15, %v3476_v29  ;;  %v3484_v44 = vsel %vm14430_vm9, %v11714_v57, %v3483_v3  ;;  %v3492_v49 = vrot.slane %v3490_v40, 4  ;;  %v15297_v29 = vld [vmem:[#allocation2 + $0x34] sm:$0xf]  ;;  %v3487_v48 = vsel %vm14430_vm9, %v3485_v16, %v3486_v39  ;;  %v15311_v15 = vld [vmem:[#allocation2 + $0x3c] sm:$0xf] }
 0x121   : > { %12894 = vmatmul.mubr.msk.bf16.vlgmr.msra.gmra.mxu1 %vm1454_vm11, %v11728_v42  ;;  %v20605_v42 = vld [vmem:[#allocation24_spill] sm:$0xff]  ;;  %v11716_v11 = vrot.slane %v20606_v6, 9  ;;  %v3499_v52 = vrot.slane %v3497_v4, 4  ;;  %v3500_v60 = vrot.slane %v20607_v53, 5  ;;  %v3132_v3 = vsel %vm13953_vm14, %v15269_v21, %v15240_v45  ;;  %v15341_v39 = vld [vmem:[#allocation2 + $0x54] sm:$0xf] }
 0x122   : > { %12897 = vmatprep.mubr.msk.bf16.mxu1 %vm1454_vm11, %v11729_v18  ;;  %12960 = vmatpush3.bf16.msra.mxu1 %v4717_v41  ;;  %v3493_v17 = vrot.slane %v20605_v42, 5  ;;  %v15299_v63 = vld [vmem:[#allocation2 + $0xc8] sm:$0x1]  ;;  %v3137_v58 = vrot.slane %v3136_v19, 4  ;;  %v11760_v46 = vcombine.low %v15272_v28, %v15274_v62  ;;  %v3504_v12 = vrot.slane %v14801_v54, 5  ;;  %v20608_v19 = vld [vmem:[#allocation27_spill] sm:$0xff] }
 0x123   : > { %v3139_v18 = vshll.u32 %v15299_v63, 16  ;;  %v11730_v50 = vcombine.low %v3477_v34, %v3480_v55  ;;  %v15321_v57 = vsel %vm1503_vm0, %v15030_v20, 0  ;;  %v11731_v45 = vcombine.low %v3484_v44, %v3487_v48  ;;  %v15347_v55 = vld [vmem:[#allocation2 + $0x58] sm:$0xf]  ;;  %v20610_v42 = vld [vmem:[#allocation25_spill] sm:$0xff] }
 0x124   : > { %v3491_v36 = vsel %vm14430_vm9, %v11715_v37, %v3490_v40  ;;  %v3494_v10 = vsel %vm14430_vm9, %v3492_v49, %v3493_v17  ;;  %v3498_v41 = vsel %vm14430_vm9, %v11716_v11, %v3497_v4  ;;  %v3501_v20 = vsel %vm14430_vm9, %v3499_v52, %v3500_v60  ;;  %v20609_v4 = vld [vmem:[#allocation22_spill] sm:$0xff]  ;;  %v20611_v11 = vld [vmem:[#allocation29_spill] sm:$0xff] }
 0x125   : > { %v11717_v40 = vrot.slane %v14799_v61, 9  ;;  %v3507_v34 = vrot.slane %v20608_v19, 5  ;;  %v3511_v37 = vrot.slane %v20609_v4, 5  ;;  %v3141_v44 = vrot.slane %v3139_v18, 5  ;;  %v20612_v60 = vld [vmem:[#allocation21_spill] sm:$0xff]  ;;  %v20615_v4 = vld [vmem:[#allocation28_spill] sm:$0xff] }
 0x126   : > { %v11732_v49 = vcombine.low %v3491_v36, %v3494_v10  ;;  %v3518_v17 = vrot.slane %v20610_v42, 5  ;;  %v3525_v52 = vrot.slane %v20611_v11, 5  ;;  %v11718_v18 = vrot.slane %v20612_v60, 9  ;;  %v20616_v60 = vld [vmem:[#allocation31_spill] sm:$0xff]  ;;  %v20617_v61 = vld [vmem:[#allocation32_spill] sm:$0xff] }
 0x127   : > { %12880 = vmatmul.mubr.msk.bf16.gmra.mxu0 %vm1454_vm11, %v11689_v43  ;;  %v3506_v43 = vrot.slane %v3504_v12, 4  ;;  %v15359_v53 = vsel %vm14430_vm9, %v11717_v40, %v3504_v12  ;;  %v11720_v42 = vrot.slane %v20615_v4, 9  ;;  %v3142_v12 = vsel %vm13953_vm14, %v3137_v58, %v3141_v44 }
 0x128   : > { %12883 = vmatprep.mubr.msk.bf16.mxu0 %vm1454_vm11, %v11690_v35  ;;  %v11733_v35 = vcombine.low %v3498_v41, %v3501_v20  ;;  %v3513_v41 = vrot.slane %v3511_v37, 4  ;;  %v20614_v20 = vld [vmem:[#allocation23_spill] sm:$0xff]  ;;  %v3520_v11 = vrot.slane %v3518_v17, 4  ;;  %v3527_v10 = vrot.slane %v3525_v52, 4 }
 0x129   : > { %12898 = vmatmul.mubr.msk.bf16.gmra.mxu1 %vm1454_vm11, %v11730_v50  ;;  %v20613_v50 = vld [vmem:[#allocation30_spill] sm:$0xff]  ;;  %v11719_v19 = vrot.slane %v20614_v20, 9  ;;  %v3528_v21 = vrot.slane %v20617_v61, 5  ;;  %v15384_v58 = vsel %vm14430_vm9, %v11718_v18, %v3511_v37  ;;  %v15387_v20 = vld [vmem:[#allocation2 + $0x60] sm:$0xf]  ;;  %v3539_v4 = vrot.slane %v14964_v59, 5 }
 0x12a   : > { %12901 = vmatprep.mubr.msk.bf16.mxu1 %vm1454_vm11, %v11731_v45  ;;  %v3514_v36 = vrot.slane %v20613_v50, 5  ;;  %v15367_v45 = vsel %vm14430_vm9, %v3506_v43, %v3507_v34  ;;  %v3521_v50 = vrot.slane %v20616_v60, 5  ;;  %v3532_v43 = vrot.slane %v14947_v13, 5  ;;  %20618 = vst [vmem:[#allocation7_spill] sm:$0xff] %v15387_v20  ;;  %v15404_v18 = vld [vmem:[#allocation2 + $0x6c] sm:$0xf] }
 0x12b   : > { %v11734_v34 = vcombine.low %v15359_v53, %v15367_v45  ;;  %v11693_v13 = vcombine.low %v3132_v3, %v3142_v12  ;;  %v15396_v61 = vsel %vm14430_vm9, %v11719_v19, %v3518_v17  ;;  %v15398_v53 = vld [vmem:[#allocation2 + $0x64] sm:$0xf]  ;;  %v15402_v37 = vsel %vm14430_vm9, %v11720_v42, %v3525_v52  ;;  %20619 = vst [vmem:[#allocation16_spill] sm:$0xff] %v15404_v18  ;;  %v15406_v59 = vld [vmem:[#allocation2 + $0x70] sm:$0xf] }
 0x12c   : > { %20620 = vst [vmem:[#allocation13_spill] sm:$0xff] %v15406_v59  ;;  %v11721_v3 = vrot.slane %v14945_v51, 9  ;;  %v3534_v17 = vrot.slane %v3532_v43, 4  ;;  %v15415_v45 = vld [vmem:[#allocation2 + $0x78] sm:$0xf]  ;;  %v15420_v52 = vsel %vm14430_vm9, %v3527_v10, %v3528_v21  ;;  %v3541_v19 = vrot.slane %v3539_v4, 4 }
 0x12d   : > { %20621 = vst [vmem:[#allocation10_spill] sm:$0xff] %v15415_v45  ;;  %v3542_v42 = vrot.slane %v15095_v8, 5  ;;  %v3546_v21 = vrot.slane %v15044_v1, 5  ;;  %v11723_v1 = vrot.slane %v15038_v32, 9  ;;  %v15452_v12 = vld [vmem:[#allocation2 + $0x90] sm:$0xf]  ;;  %v15471_v32 = vpop.f32.mrf.mxu0 }
 0x12e   : > { %v15454_v10 = vld [vmem:[#allocation2 + $0x94] sm:$0xf]  ;;  %20625 = vst [vmem:[#allocation14_spill] sm:$0xff] %v15471_v32  ;;  %v3549_v44 = vrot.slane %v15139_v23, 5  ;;  %v3556_v40 = vrot.slane %v15176_v26, 5  ;;  %v11725_v16 = vrot.slane %v15181_v2, 9 }
 0x12f   : > { %12884 = vmatmul.mubr.msk.bf16.gmra.mxu0 %vm1454_vm11, %v15277_v27  ;;  %v3515_v27 = vsel %vm14430_vm9, %v3513_v41, %v3514_v36  ;;  %v3535_v36 = vrot.slane %v15059_v47, 5  ;;  %v15422_v41 = vld [vmem:[#allocation2 + $0x7c] sm:$0xf]  ;;  %20624 = vst [vmem:[#allocation17_spill] sm:$0xff] %v15454_v10  ;;  %v3548_v60 = vrot.slane %v3546_v21, 4  ;;  %v4238_v47 = vshll.u32 %v15272_v28, 16 }
 0x130   : > { %12887 = vmatprep.mubr.msk.bf16.mxu0 %vm1454_vm11, %v15280_v25  ;;  %v15411_v25 = vsel %vm14430_vm9, %v3520_v11, %v3521_v50  ;;  %20622 = vst [vmem:[#allocation15_spill] sm:$0xff] %v15422_v41  ;;  %v11735_v51 = vcombine.low %v15384_v58, %v3515_v27  ;;  %v15433_v11 = vld [vmem:[#allocation2 + $0x88] sm:$0xf]  ;;  %v15445_v58 = vsel %vm14430_vm9, %v11721_v3, %v3532_v43  ;;  %v20628_v3 = vld [vmem:[#allocation33_spill] sm:$0xff]  ;;  %v3563_v6 = vrot.slane %v15299_v63, 5 }
 0x131   : > { %12902 = vmatmul.mubr.msk.bf16.gmra.mxu1 %vm1454_vm11, %v11732_v49  ;;  %v11722_v49 = vrot.slane %v14958_v5, 9  ;;  %20623 = vst [vmem:[#allocation12_spill] sm:$0xff] %v15433_v11  ;;  %v15449_v27 = vsel %vm14430_vm9, %v3534_v17, %v3535_v36  ;;  %v15464_v43 = vsel %vm14430_vm9, %v3541_v19, %v3542_v42  ;;  %v15468_v17 = vld [vmem:[#allocation2 + $0x9c] sm:$0xf]  ;;  %v15482_v19 = vpop.f32.mrf.mxu1  ;;  %v11724_v48 = vrot.slane %v20628_v3, 9 }
 0x132   : > { %12905 = vmatprep.mubr.msk.bf16.mxu1 %vm1454_vm11, %v11733_v35  ;;  %v15431_v35 = vld [vmem:[#allocation2 + $0x84] sm:$0xf]  ;;  %20627 = vst [vmem:[#allocation19_spill] sm:$0xff] %v15482_v19  ;;  %v3560_v42 = vrot.slane %v15183_v30, 5  ;;  %v15503_v23 = vld [vmem:[#allocation2 + $0xa8] sm:$0xf]  ;;  %v20635_v19 = vcombine.low %v15284_v56, %v15286_v0 }
 0x133   : > { %v15460_v8 = vsel %vm14430_vm9, %v11722_v49, %v3539_v4  ;;  %v3553_v4 = vrot.slane %v15086_v24, 5  ;;  %v15476_v49 = vld [vmem:[#allocation2 + $0xa0] sm:$0xf]  ;;  %20629 = vst [vmem:[#allocation24_spill] sm:$0xff] %v15503_v23  ;;  %v15507_v24 = vpop.f32.mrf.mxu0  ;;  %v4248_v3 = vshrl.u32 %v15274_v62, 16  ;;  %v15517_v30 = vpop.f32.mrf.mxu1  ;;  %v4240_v5 = vrot.slane %v4238_v47, 5 }
 0x134   : > { %20626 = vst [vmem:[#allocation20_spill] sm:$0xff] %v15476_v49  ;;  %20630 = vst [vmem:[#allocation18_spill] sm:$0xff] %v15507_v24  ;;  %v15523_v50 = vld [vmem:[#allocation2 + $0xb4] sm:$0xf]  ;;  %v15536_v2 = vld [vmem:[#allocation2 + $0x20] sm:$0x1] }
 0x135   : > { %v3555_v26 = vrot.slane %v3553_v4, 4  ;;  %20632 = vst [vmem:[#allocation27_spill] sm:$0xff] %v15517_v30  ;;  %20633 = vst [vmem:[#allocation22_spill] sm:$0xff] %v15523_v50  ;;  %v4250_v9 = vrot.slane %v4248_v3, 4  ;;  %v15533_v36 = vsel %vm14430_vm9, %v11724_v48, %v3553_v4  ;;  %v15542_v47 = vpop.f32.mrf.mxu0  ;;  %v4259_v4 = vshrl.u32 %v15284_v56, 16 }
 0x136   : > { %20636 = vst [vmem:[#allocation29_spill] sm:$0xff] %v15542_v47  ;;  %v4262_v63 = vshll.u32 %v15284_v56, 16  ;;  %v15562_v3 = vld [vmem:[#allocation2 + $0x2c] sm:$0x1]  ;;  %v4268_v48 = vshll.u32 %v15286_v0, 16  ;;  %v4272_v30 = vshrl.u32 %v15286_v0, 16  ;;  %v20640_v47 = vcombine.low %v15402_v37, %v15420_v52 }
 0x137   : > { %12888 = vmatmul.mubr.msk.bf16.gmra.mxu0 %vm1454_vm11, %v11693_v13  ;;  %v3562_v13 = vrot.slane %v3560_v42, 4  ;;  %v15591_v37 = vld [vmem:[#allocation2 + $0xc0] sm:$0xf]  ;;  %v15593_v52 = vld [vmem:[#allocation2 + $0xcc] sm:$0xf]  ;;  %vm6466_vm6 = vcmask 1043456  }
 0x138   : > { %12927 = vmatprep.mubr.msk.bf16.mxu0 %vm1454_vm11, %v11760_v46  ;;  %v15495_v46 = vsel %vm14430_vm9, %v11723_v1, %v3546_v21  ;;  %v15511_v21 = vsel %vm14430_vm9, %v3548_v60, %v3549_v44  ;;  %v15513_v1 = vld [vmem:[#allocation2 + $0xac] sm:$0xf]  ;;  %v15525_v44 = vld [vmem:[#allocation2 + $0xb8] sm:$0xf]  ;;  %v15604_v50 = vld [vmem:[#allocation2 + $0xd0] sm:$0xf] }
 0x139   : > { %12906 = vmatmul.mubr.msk.bf16.gmra.mxu1 %vm1454_vm11, %v11734_v34  ;;  %v4235_v34 = vshrl.u32 %v15272_v28, 16  ;;  %20631 = vst [vmem:[#allocation26_spill] sm:$0xff] %v15513_v1  ;;  %20634 = vst [vmem:[#allocation25_spill] sm:$0xff] %v15525_v44  ;;  %v20645_v1 = vcombine.low %v15311_v15, %v15313_v14  ;;  %vm6417_vm8 = vcmask 64512  }
 0x13a   : > { %12909 = vmatprep.mubr.msk.bf16.mxu1 %vm1454_vm11, %v11735_v51  ;;  %v4244_v51 = vshll.u32 %v15274_v62, 16  ;;  %20644 = vst [vmem:[#allocation31_spill] sm:$0xff] %v15604_v50 }
 0x13b   : > { %v4237_v60 = vrot.slane %v4235_v34, 4  ;;  %v15546_v34 = vsel %vm14430_vm9, %v3555_v26, %v3556_v40  ;;  %v4254_v26 = vshll.u32 %v15536_v2, 16 }
 0x13c   : > { %v15527_v54 = vrot.slane %v4244_v51, 5  ;;  %v20637_v51 = vcombine.low %v15295_v31, %v15297_v29 }
 0x13d   : > { %v4256_v44 = vrot.slane %v4254_v26, 5  ;;  %v15618_v26 = vld [vmem:[#allocation2 + $0x38] sm:$0x1] }
 0x13e   : > { %v4251_v40 = vor.u32 %v4250_v9, %v15527_v54  ;;  %v4261_v9 = vrot.slane %v4259_v4, 4  ;;  %v4292_v4 = vshll.u32 %v15297_v29, 16 }
 0x13f   : > { %12928 = vmatmul.mubr.msk.bf16.vlgmr.msra.gmra.mxu0 %vm1454_vm11, %v20635_v19  ;;  %v15557_v19 = vpop.f32.mrf.mxu1 }
 0x140   : > { %12994 = vmatpush3.bf16.msra.mxu0 %v15321_v57  ;;  %12931 = vmatprep.mubr.msk.bf16.mxu0 %vm1454_vm11, %v20637_v51  ;;  %20638 = vst [vmem:[#allocation21_spill] sm:$0xff] %v15557_v19  ;;  %v20639_v57 = vcombine.low %v15396_v61, %v15411_v25  ;;  %v15572_v51 = vsel %vm14430_vm9, %v11725_v16, %v3560_v42  ;;  %v4264_v42 = vrot.slane %v4262_v63, 5  ;;  %v15600_v16 = vld [vmem:[#allocation2 + $0xc4] sm:$0xf]  ;;  %v4286_v25 = vshll.u32 %v15295_v31, 16 }
 0x141   : > { %v4241_v19 = vor.u32 %v4240_v5, %v4237_v60  ;;  %v15584_v61 = vsel %vm14430_vm9, %v3562_v13, %v3563_v6  ;;  %v15588_v5 = vpop.f32.mrf.mxu0  ;;  %v4278_v60 = vshll.u32 %v15562_v3, 16  ;;  %v15598_v6 = vrot.slane %v4268_v48, 5  ;;  %20643 = vst [vmem:[#allocation28_spill] sm:$0xff] %v15600_v16 }
 0x142   : > { %12910 = vmatmul.mubr.msk.bf16.gmra.mxu1 %vm1454_vm11, %v20639_v57  ;;  %20641 = vst [vmem:[#allocation30_spill] sm:$0xff] %v15588_v5  ;;  %v15596_v57 = vpop.f32.mrf.mxu1  ;;  %v4274_v13 = vrot.slane %v4272_v30, 4  ;;  %v4252_v24 = vrot.slane %v4251_v40, 4  ;;  %v4296_v5 = vshrl.u32 %v15297_v29, 16  ;;  %v4288_v30 = vrot.slane %v4286_v25, 5 }
 0x143   : > { %12913 = vmatprep.mubr.msk.bf16.mxu1 %vm1454_vm11, %v20640_v47  ;;  %v4283_v47 = vshrl.u32 %v15295_v31, 16  ;;  %20642 = vst [vmem:[#allocation23_spill] sm:$0xff] %v15596_v57  ;;  %v4242_v63 = vrot.slane %v4241_v19, 4  ;;  %v15614_v23 = vpop.f32.mrf.mxu0  ;;  %v4265_v19 = vor.u32 %v4264_v42, %v4261_v9  ;;  %v15620_v49 = vrot.slane %v4292_v4, 5 }
 0x144   : > { %20646 = vst [vmem:[#allocation32_spill] sm:$0xff] %v15614_v23  ;;  %v4298_v32 = vrot.slane %v4296_v5, 4  ;;  %v15626_v25 = vpop.f32.mrf.mxu1  ;;  %v4280_v48 = vrot.slane %v4278_v60, 5  ;;  %v4316_v42 = vshll.u32 %v15313_v14, 16  ;;  %v20649_v4 = vcombine.low %v15445_v58, %v15449_v27 }
 0x145   : > { %v4285_v57 = vrot.slane %v4283_v47, 4  ;;  %v20647_v47 = vcombine.low %v15329_v33, %v15339_v7  ;;  %20648 = vst [vmem:[#allocation33_spill] sm:$0xff] %v15626_v25  ;;  %v4247_v5 = vsel %vm13953_vm14, %v4242_v63, %v15527_v54  ;;  %v20651_v40 = vshll.u32 %v15311_v15, 16  ;;  %v15656_v63 = vpop.f32.mrf.mxu0 }
 0x146   : > { %v20652_v25 = vcombine.low %v15460_v8, %v15464_v43  ;;  %v4302_v27 = vshll.u32 %v15618_v26, 16  ;;  %v15652_v54 = vrot.slane %v4316_v42, 5  ;;  %20654 = vst [vmem:[#allocation34_spill] sm:$0xff] %v15656_v63  ;;  %v4299_v8 = vor.u32 %v4298_v32, %v15620_v49  ;;  %v15661_v43 = vpop.f32.mrf.mxu1 }
 0x147   : > { %12932 = vmatmul.mubr.msk.bf16.gmra.mxu0 %vm1454_vm11, %v20645_v1  ;;  %v4275_v1 = vor.u32 %v4274_v13, %v15598_v6  ;;  %v20650_v13 = vshrl.u32 %v15311_v15, 16  ;;  %v4312_v9 = vrot.slane %v20651_v40, 5  ;;  %v4289_v58 = vor.u32 %v4288_v30, %v4285_v57  ;;  %20655 = vst [vmem:[#allocation35_spill] sm:$0xff] %v15661_v43  ;;  %v15676_v30 = vpop.f32.mrf.mxu0 }
 0x148   : > { %12935 = vmatprep.mubr.msk.bf16.mxu0 %vm1454_vm11, %v20647_v47  ;;  %v4257_v47 = vsel %vm13953_vm14, %v4252_v24, %v4256_v44  ;;  %v20653_v24 = vshrl.u32 %v15313_v14, 16  ;;  %v4334_v42 = vshll.u32 %v15329_v33, 16  ;;  %v4340_v40 = vshll.u32 %v15339_v7, 16  ;;  %20657 = vst [vmem:[#allocation36_spill] sm:$0xff] %v15676_v30  ;;  %v15698_v30 = vld [vmem:[#allocation2 + $0x50] sm:$0x1] }
 0x149   : > { %v4309_v60 = vrot.slane %v20650_v13, 4  ;;  %v4266_v13 = vrot.slane %v4265_v19, 4  ;;  %v4276_v57 = vrot.slane %v4275_v1, 4  ;;  %v15666_v16 = vcombine.low %v4247_v5, %v4257_v47 }
 0x14a   : > { %12914 = vmatmul.mubr.msk.bf16.gmra.mxu1 %vm1454_vm11, %v20649_v4  ;;  %v15650_v4 = vld [vmem:[#allocation2 + $0x44] sm:$0x1]  ;;  %v4322_v44 = vrot.slane %v20653_v24, 4  ;;  %v4290_v63 = vrot.slane %v4289_v58, 4  ;;  %v4304_v23 = vrot.slane %v4302_v27, 5  ;;  %v4930_v43 = vrot.slane %v15274_v62, 5  ;;  %v15683_v27 = vpop.f32.mrf.mxu1 }
 0x14b   : > { %12917 = vmatprep.mubr.msk.bf16.mxu1 %vm1454_vm11, %v20652_v25  ;;  %v4331_v25 = vshrl.u32 %v15329_v33, 16  ;;  %v4313_v24 = vor.u32 %v4312_v9, %v4309_v60  ;;  %v4326_v19 = vshll.u32 %v15650_v4, 16  ;;  %v20656_v1 = vcombine.low %v15341_v39, %v15347_v55  ;;  %20659 = vst [vmem:[#allocation37_spill] sm:$0xff] %v15683_v27 }
 0x14c   : > { %v4323_v32 = vor.u32 %v4322_v44, %v15652_v54  ;;  %v4300_v5 = vrot.slane %v4299_v8, 4  ;;  %v4336_v9 = vrot.slane %v4334_v42, 5  ;;  %v4344_v60 = vshrl.u32 %v15339_v7, 16 }
 0x14d   : > { %v4333_v47 = vrot.slane %v4331_v25, 4  ;;  %v20658_v58 = vcombine.low %v15387_v20, %v15398_v53  ;;  %v4271_v62 = vsel %vm13953_vm14, %v4266_v13, %v15598_v6  ;;  %v4281_v44 = vsel %vm13953_vm14, %v4276_v57, %v4280_v48 }
 0x14e   : > { %v11825_v8 = vrot.slane %v15272_v28, 9  ;;  %v15691_v25 = vrot.slane %v4340_v40, 5  ;;  %v20660_v42 = vcombine.low %v15495_v46, %v15511_v21  ;;  %v4933_v27 = vrot.slane %v15536_v2, 5  ;;  %v15706_v21 = vpop.f32.mrf.mxu0 }
 0x14f   : > { %12936 = vmatmul.mubr.msk.bf16.gmra.mxu0 %vm1454_vm11, %v20656_v1  ;;  %v4314_v1 = vrot.slane %v4313_v24, 4  ;;  %v4346_v50 = vrot.slane %v4344_v60, 4  ;;  %v20661_v6 = vcombine.low %v15533_v36, %v15546_v34  ;;  %v4324_v28 = vrot.slane %v4323_v32, 4  ;;  %v15715_v34 = vpop.f32.mrf.mxu1 }
 0x150   : > { %12939 = vmatprep.mubr.msk.bf16.mxu0 %vm1454_vm11, %v20658_v58  ;;  %v4328_v58 = vrot.slane %v4326_v19, 5  ;;  %v4932_v48 = vrot.slane %v4930_v43, 4  ;;  %v4937_v13 = vrot.slane %v15286_v0, 5  ;;  %v4364_v46 = vshll.u32 %v15347_v55, 16  ;;  %20662 = vst [vmem:[#allocation38_spill] sm:$0xff] %v15715_v34 }
 0x151   : > { %v15708_v40 = vcombine.low %v4271_v62, %v4281_v44  ;;  %v4295_v2 = vsel %vm13953_vm14, %v4290_v63, %v15620_v49  ;;  %v4305_v57 = vsel %vm13953_vm14, %v4300_v5, %v4304_v23  ;;  %v4337_v36 = vor.u32 %v4336_v9, %v4333_v47  ;;  %v15730_v63 = vld [vmem:[#allocation2 + $0x5c] sm:$0x1] }
 0x152   : > { %12918 = vmatmul.mubr.msk.bf16.gmra.mxu1 %vm1454_vm11, %v20660_v42  ;;  %v4347_v24 = vor.u32 %v4346_v50, %v15691_v25  ;;  %v4350_v0 = vshll.u32 %v15698_v30, 16  ;;  %v20663_v19 = vshrl.u32 %v15341_v39, 16  ;;  %v20664_v60 = vshll.u32 %v15341_v39, 16 }
 0x153   : > { %12921 = vmatprep.mubr.msk.bf16.mxu1 %vm1454_vm11, %v20661_v6  ;;  %v4319_v49 = vsel %vm13953_vm14, %v4314_v1, %v15652_v54  ;;  %v15728_v23 = vsel %vm14430_vm9, %v11825_v8, %v4930_v43  ;;  %v15732_v5 = vrot.slane %v4364_v46, 5  ;;  %v20665_v50 = vshrl.u32 %v15347_v55, 16  ;;  %v15747_v8 = vpop.f32.mrf.mxu0 }
 0x154   : > { %v4357_v32 = vrot.slane %v20663_v19, 4  ;;  %v4360_v62 = vrot.slane %v20664_v60, 5  ;;  %v4329_v9 = vsel %vm13953_vm14, %v4324_v28, %v4328_v58  ;;  %v15740_v44 = vsel %vm14430_vm9, %v4932_v48, %v4933_v27 }
 0x155   : > { %v4370_v47 = vrot.slane %v20665_v50, 4  ;;  %v11826_v54 = vrot.slane %v15284_v56, 9  ;;  %v4939_v42 = vrot.slane %v4937_v13, 4  ;;  %v20666_v43 = vcombine.low %v15404_v18, %v15406_v59 }
 0x156   : > { %v11795_v1 = vcombine.low %v4295_v2, %v4305_v57  ;;  %v4338_v6 = vrot.slane %v4337_v36, 4  ;;  %v4379_v46 = vshrl.u32 %v15387_v20, 16  ;;  %v4382_v58 = vshll.u32 %v15387_v20, 16 }
 0x157   : > { %12940 = vmatmul.mubr.msk.bf16.gmra.mxu0 %vm1454_vm11, %v20666_v43  ;;  %v20667_v27 = vcombine.low %v15415_v45, %v15422_v41  ;;  %v15755_v56 = vpop.f32.mrf.mxu1  ;;  %v4348_v28 = vrot.slane %v4347_v24, 4  ;;  %v4352_v48 = vrot.slane %v4350_v0, 5  ;;  %v4361_v19 = vor.u32 %v4360_v62, %v4357_v32  ;;  %v15784_v62 = vpop.f32.mrf.mxu0 }
 0x158   : > { %20668 = vst [vmem:[#allocation39_spill] sm:$0xff] %v15755_v56  ;;  %v4374_v60 = vshll.u32 %v15730_v63, 16  ;;  %v20669_v2 = vcombine.low %v15572_v51, %v15584_v61  ;;  %v15762_v57 = vcombine.low %v4319_v49, %v4329_v9  ;;  %v4371_v50 = vor.u32 %v4370_v47, %v15732_v5 }
 0x159   : > { %12943 = vmatprep.mubr.msk.bf16.mxu0 %vm1454_vm11, %v20667_v27  ;;  %v4388_v43 = vshll.u32 %v15398_v53, 16  ;;  %v15768_v27 = vpop.f32.mrf.mxu1  ;;  %v15774_v24 = vsel %vm14430_vm9, %v11826_v54, %v4937_v13  ;;  %v20671_v51 = vrot.slane %v15562_v3, 5  ;;  %v4944_v0 = vrot.slane %v15297_v29, 5 }
 0x15a   : > { %12922 = vmatmul.mubr.msk.bf16.gmra.mxu1 %vm1454_vm11, %v20669_v2  ;;  %20670 = vst [vmem:[#allocation40_spill] sm:$0xff] %v15768_v27  ;;  %v4392_v32 = vshrl.u32 %v15398_v53, 16  ;;  %v11827_v49 = vrot.slane %v15295_v31, 9  ;;  %v4381_v13 = vrot.slane %v4379_v46, 4  ;;  %v4384_v47 = vrot.slane %v4382_v58, 5 }
 0x15b   : > { %12961 = vmatprep.mubr.msk.bf16.mxu1 %vm1454_vm11, %v15666_v16  ;;  %v15780_v61 = vsel %vm14430_vm9, %v4939_v42, %v20671_v51  ;;  %v4343_v16 = vsel %vm13953_vm14, %v4338_v6, %v15691_v25  ;;  %v15790_v9 = vpop.f32.mrf.mxu1  ;;  %v4353_v3 = vsel %vm13953_vm14, %v4348_v28, %v4352_v48  ;;  %v15794_v54 = vrot.slane %v4361_v19, 4  ;;  %v15798_v42 = vld [vmem:[#allocation2 + $0x68] sm:$0x1] }
 0x15c   : > { %20672 = vst [vmem:[#allocation41_spill] sm:$0xff] %v15790_v9  ;;  %v15796_v29 = vrot.slane %v4374_v60, 5  ;;  %20673 = vst [vmem:[#allocation42_spill] sm:$0xff] %v15798_v42  ;;  %v4951_v2 = vrot.slane %v15313_v14, 5  ;;  %v15801_v51 = vrot.slane %v4371_v50, 4  ;;  %v4947_v25 = vrot.slane %v15618_v26, 5  ;;  %v15817_v26 = vpop.f32.mrf.mxu0 }
 0x15d   : > { %v15804_v31 = vrot.slane %v4388_v43, 5  ;;  %v4394_v6 = vrot.slane %v4392_v32, 4  ;;  %v15806_v46 = vpop.f32.mrf.mxu1  ;;  %v4946_v58 = vrot.slane %v4944_v0, 4  ;;  %v20675_v28 = vshrl.u32 %v15404_v18, 16 }
 0x15e   : > { %20674 = vst [vmem:[#allocation43_spill] sm:$0xff] %v15806_v46  ;;  %v20676_v19 = vshll.u32 %v15404_v18, 16  ;;  %v4412_v36 = vshll.u32 %v15406_v59, 16  ;;  %v20677_v14 = vcombine.low %v15431_v35, %v15433_v11  ;;  %v11797_v50 = vcombine.low %v4343_v16, %v4353_v3  ;;  %v15820_v46 = vld [vmem:[#allocation2 + $0x74] sm:$0x1]  ;;  %v20684_v18 = vld [vmem:[#allocation24_spill] sm:$0xff] }
 0x15f   : > { %v4405_v48 = vrot.slane %v20675_v28, 4  ;;  %v4385_v43 = vor.u32 %v4384_v47, %v4381_v13  ;;  %v4398_v32 = vshll.u32 %v15798_v42, 16  ;;  %20678 = vst [vmem:[#allocation44_spill] sm:$0xff] %v15820_v46  ;;  %v20679_v28 = vshrl.u32 %v15406_v59, 16 }
 0x160   : > { %v4408_v60 = vrot.slane %v20676_v19, 5  ;;  %12944 = vmatmul.mubr.msk.bf16.gmra.mxu0 %vm1454_vm11, %v20677_v14  ;;  %v20680_v19 = vcombine.low %v15452_v12, %v15454_v10  ;;  %v11828_v27 = vrot.slane %v15311_v15, 9  ;;  %v4953_v14 = vrot.slane %v4951_v2, 4 }
 0x161   : > { %v4418_v34 = vrot.slane %v20679_v28, 4  ;;  %v12759_v9 = vpop.f32.mrf.mxu1  ;;  %v4954_v56 = vrot.slane %v15650_v4, 5  ;;  %v15830_v16 = vrot.slane %v4412_v36, 5  ;;  %v4367_v13 = vsel %vm13953_vm14, %v15794_v54, %v15732_v5  ;;  %v15854_v28 = vpop.f32.mrf.mxu0 }
 0x162   : > { %12947 = vmatprep.mubr.msk.bf16.mxu0 %vm1454_vm11, %v20680_v19  ;;  %12962 = vmatmul.mubr.msk.bf16.vlgmr.msra.gmra.mxu1 %vm1454_vm11, %v15708_v40  ;;  %v4377_v47 = vsel %vm13953_vm14, %v15801_v51, %v15796_v29  ;;  %v15844_v15 = vsel %vm14430_vm9, %v11827_v49, %v4944_v0  ;;  %v4395_v4 = vor.u32 %v4394_v6, %v15804_v31  ;;  %v4422_v5 = vshll.u32 %v15820_v46, 16 }
 0x163   : > { %v1833_v36 = vpop.f32.mrf.mxu1  ;;  %12965 = vmatprep.mubr.msk.bf16.mxu1 %vm1454_vm11, %v11795_v1  ;;  %v15850_v40 = vsel %vm14430_vm9, %v4946_v58, %v4947_v25  ;;  %v4409_v3 = vor.u32 %v4408_v60, %v4405_v48  ;;  %v4427_v54 = vshrl.u32 %v15415_v45, 16  ;;  %v4386_v29 = vrot.slane %v4385_v43, 4 }
 0x164   : > { %v4400_v51 = vrot.slane %v4398_v32, 5  ;;  %v4419_v0 = vor.u32 %v4418_v34, %v15830_v16  ;;  %v4958_v49 = vrot.slane %v15339_v7, 5  ;;  %v15860_v1 = vsel %vm14430_vm9, %v11828_v27, %v4951_v2  ;;  %v15871_v2 = vld [vmem:[#allocation2 + $0x80] sm:$0x1] }
 0x165   : > { %v12760_v6 = vpop.f32.mrf.mxu1  ;;  %v15864_v25 = vsel %vm14430_vm9, %v4953_v14, %v4954_v56  ;;  %v4429_v58 = vrot.slane %v4427_v54, 4  ;;  %v4430_v48 = vshll.u32 %v15415_v45, 16  ;;  %v4396_v60 = vrot.slane %v4395_v4, 4  ;;  %20681 = vst [vmem:[#allocation45_spill] sm:$0xff] %v15871_v2  ;;  %v20682_v56 = vld [vmem:[#allocation20_spill] sm:$0xff] }
 0x166   : > { %v11829_v43 = vrot.slane %v15329_v33, 9  ;;  %v4436_v32 = vshll.u32 %v15422_v41, 16  ;;  %v4440_v34 = vshrl.u32 %v15422_v41, 16  ;;  %v4410_v19 = vrot.slane %v4409_v3, 4  ;;  %v20685_v3 = vld [vmem:[#allocation26_spill] sm:$0xff] }
 0x167   : > { %v1836_v7 = vpop.f32.mrf.mxu1  ;;  %v4424_v46 = vrot.slane %v4422_v5, 5  ;;  %v4961_v27 = vrot.slane %v15698_v30, 5  ;;  %v4432_v59 = vrot.slane %v4430_v48, 5  ;;  %v20683_v14 = vcombine.low %v15468_v17, %v20682_v56  ;;  %v15877_v4 = vpop.f32.mrf.mxu0  ;;  %v20687_v48 = vld [vmem:[#allocation14_spill] sm:$0xff] }
 0x168   : > { %v4420_v33 = vrot.slane %v4419_v0, 4  ;;  %v4960_v54 = vrot.slane %v4958_v49, 4  ;;  %v15879_v45 = vrot.slane %v4436_v32, 5  ;;  %v4442_v41 = vrot.slane %v4440_v34, 4 }
 0x169   : > { %12948 = vmatmul.mubr.msk.bf16.gmra.mxu0 %vm1454_vm11, %v20683_v14  ;;  %v20686_v5 = vcombine.low %v20684_v18, %v20685_v3  ;;  %v12763_v30 = vpop.f32.mrf.mxu1  ;;  %v11798_v42 = vcombine.low %v4367_v13, %v4377_v47  ;;  %v4433_v20 = vor.u32 %v4432_v59, %v4429_v58  ;;  %v4391_v0 = vsel %vm13953_vm14, %v4386_v29, %v15804_v31  ;;  %v20688_v58 = vld [vmem:[#allocation18_spill] sm:$0xff] }
 0x16a   : > { %12966 = vmatmul.mubr.msk.bf16.gmra.mxu1 %vm1454_vm11, %v15762_v57  ;;  %v4401_v32 = vsel %vm13953_vm14, %v4396_v60, %v4400_v51  ;;  %v4443_v34 = vor.u32 %v4442_v41, %v15879_v45  ;;  %v15899_v13 = vadd.f32 %v12759_v9, %v20687_v48  ;;  %v4415_v57 = vsel %vm13953_vm14, %v4410_v19, %v15830_v16  ;;  %v15913_v41 = vpop.f32.mrf.mxu0 }
 0x16b   : > { %12951 = vmatprep.mubr.msk.bf16.mxu0 %vm1454_vm11, %v20686_v5  ;;  %v4446_v5 = vshll.u32 %v15871_v2, 16  ;;  %v15901_v47 = vpop.f32.mrf.mxu1  ;;  %12969 = vmatprep.mubr.msk.bf16.mxu1 %vm1454_vm11, %v11797_v50  ;;  %v15911_v31 = vsel %vm14430_vm9, %v11829_v43, %v4958_v49  ;;  %v4425_v9 = vsel %vm13953_vm14, %v4420_v33, %v4424_v46  ;;  %v15919_v29 = vsel %vm14430_vm9, %v4960_v54, %v4961_v27  ;;  %v20692_v54 = vld [vmem:[#allocation29_spill] sm:$0xff] }
 0x16c   : > { %v4434_v50 = vrot.slane %v4433_v20, 4  ;;  %v4460_v51 = vshll.u32 %v15433_v11, 16  ;;  %v15923_v60 = vadd.f32 %v1833_v36, %v20688_v58  ;;  %v11799_v19 = vcombine.low %v4391_v0, %v4401_v32  ;;  %v20693_v36 = vld [vmem:[#allocation30_spill] sm:$0xff] }
 0x16d   : > { %v15925_v16 = vpop.f32.mrf.mxu1  ;;  %v20689_v49 = vshrl.u32 %v15431_v35, 16  ;;  %v20690_v48 = vshll.u32 %v15431_v35, 16  ;;  %v4444_v46 = vrot.slane %v4443_v34, 4  ;;  %v4448_v33 = vrot.slane %v4446_v5, 5  ;;  %v15943_v35 = vld [vmem:[#allocation2 + $0x8c] sm:$0x1] }
 0x16e   : > { %v15931_v14 = vrot.slane %v4460_v51, 5  ;;  %v20691_v20 = vshrl.u32 %v15433_v11, 16  ;;  %v15936_v2 = vadd.f32 %v12760_v6, %v20692_v54  ;;  %v15939_v58 = vadd.f32 %v1836_v7, %v20693_v36  ;;  %20694 = vst [vmem:[#allocation20_spill] sm:$0xff] %v15943_v35  ;;  %v20695_v34 = vld [vmem:[#allocation22_spill] sm:$0xff]  ;;  %v20696_v5 = vld [vmem:[#allocation25_spill] sm:$0xff] }
 0x16f   : > { %v4453_v43 = vrot.slane %v20689_v49, 4  ;;  %v4456_v59 = vrot.slane %v20690_v48, 5  ;;  %v1852_v0 = vpop.f32.mrf.mxu1  ;;  %v11800_v32 = vcombine.low %v4415_v57, %v4425_v9  ;;  %v20697_v51 = vcombine.low %v20695_v34, %v20696_v5  ;;  %v15949_v48 = vpop.f32.mrf.mxu0  ;;  %v15963_v49 = vld [vmem:[#allocation2 + $0x98] sm:$0x1] }
 0x170   : > { %v4466_v27 = vrot.slane %v20691_v20, 4  ;;  %v15952_v6 = vadd.f32 %v1852_v0, %v15706_v21  ;;  %v4439_v7 = vsel %vm13953_vm14, %v4434_v50, %v15879_v45  ;;  %v11830_v57 = vrot.slane %v15341_v39, 9  ;;  %v20699_v20 = vld [vmem:[#allocation28_spill] sm:$0xff]  ;;  %20701 = vst [vmem:[#allocation26_spill] sm:$0xff] %v15963_v49 }
 0x171   : > { %12952 = vmatmul.mubr.msk.bf16.gmra.mxu0 %vm1454_vm11, %v20697_v51  ;;  %v4965_v9 = vrot.slane %v15347_v55, 5  ;;  %v20700_v54 = vcombine.low %v15591_v37, %v20699_v20  ;;  %v12767_v36 = vpop.f32.mrf.mxu1  ;;  %v4457_v51 = vor.u32 %v4456_v59, %v4453_v43  ;;  %v4475_v21 = vshrl.u32 %v15452_v12, 16  ;;  %v15978_v20 = vpop.f32.mrf.mxu0 }
 0x172   : > { %20698 = vst [vmem:[#allocation24_spill] sm:$0xff] %v15952_v6  ;;  %v4478_v0 = vshll.u32 %v15452_v12, 16  ;;  %v4484_v11 = vshll.u32 %v15454_v10, 16  ;;  %v15969_v45 = vadd.f32 %v12767_v36, %v15747_v8  ;;  %12970 = vmatmul.mubr.msk.bf16.gmra.mxu1 %vm1454_vm11, %v11798_v42  ;;  %v4449_v39 = vsel %vm13953_vm14, %v4444_v46, %v4448_v33  ;;  %v20703_v8 = vld [vmem:[#allocation32_spill] sm:$0xff] }
 0x173   : > { %12955 = vmatprep.mubr.msk.bf16.mxu0 %vm1454_vm11, %v20700_v54  ;;  %v4467_v55 = vor.u32 %v4466_v27, %v15931_v14  ;;  %v4470_v59 = vshll.u32 %v15943_v35, 16  ;;  %v1865_v50 = vpop.f32.mrf.mxu1  ;;  %12973 = vmatprep.mubr.msk.bf16.mxu1 %vm1454_vm11, %v11799_v19  ;;  %v4477_v43 = vrot.slane %v4475_v21, 4  ;;  %v4488_v6 = vshrl.u32 %v15454_v10, 16 }
 0x174   : > { %20702 = vst [vmem:[#allocation14_spill] sm:$0xff] %v15969_v45  ;;  %v4480_v54 = vrot.slane %v4478_v0, 5  ;;  %v4486_v12 = vrot.slane %v4484_v11, 5  ;;  %v15981_v36 = vadd.f32 %v12763_v30, %v20703_v8  ;;  %v15984_v42 = vadd.f32 %v1865_v50, %v15784_v62 }
 0x175   : > { %v4968_v46 = vrot.slane %v15730_v63, 5  ;;  %v4494_v33 = vshll.u32 %v15963_v49, 16  ;;  %v12768_v27 = vpop.f32.mrf.mxu1  ;;  %v11801_v35 = vcombine.low %v4439_v7, %v4449_v39  ;;  %v15990_v19 = vsel %vm14430_vm9, %v11830_v57, %v4965_v9  ;;  %v20706_v57 = vld [vmem:[#allocation31_spill] sm:$0xff] }
 0x176   : > { %20704 = vst [vmem:[#allocation18_spill] sm:$0xff] %v15984_v42  ;;  %v4481_v11 = vor.u32 %v4480_v54, %v4477_v43  ;;  %v4490_v21 = vrot.slane %v4488_v6, 4  ;;  %v15993_v0 = vadd.f32 %v12768_v27, %v15817_v26  ;;  %v4458_v30 = vrot.slane %v4457_v51, 4  ;;  %v20708_v6 = vld [vmem:[#allocation34_spill] sm:$0xff] }
 0x177   : > { %v4468_v8 = vrot.slane %v4467_v55, 4  ;;  %v4472_v45 = vrot.slane %v4470_v59, 5  ;;  %v1868_v62 = vpop.f32.mrf.mxu1  ;;  %v4496_v63 = vrot.slane %v4494_v33, 5  ;;  %v20705_v49 = vshrl.u32 %v15468_v17, 16  ;;  %v15997_v7 = vpop.f32.mrf.mxu0  ;;  %v16010_v59 = vld [vmem:[#allocation2 + $0xa4] sm:$0x1] }
 0x178   : > { %v4482_v50 = vrot.slane %v4481_v11, 4  ;;  %v4491_v42 = vor.u32 %v4490_v21, %v4486_v12  ;;  %v20707_v39 = vcombine.low %v15593_v52, %v20706_v57  ;;  %v16005_v26 = vadd.f32 %v15901_v47, %v20708_v6 }
 0x179   : > { %v4501_v10 = vrot.slane %v20705_v49, 4  ;;  %v16008_v51 = vadd.f32 %v1868_v62, %v15854_v28  ;;  %v4967_v55 = vrot.slane %v4965_v9, 4  ;;  %v20709_v43 = vshll.u32 %v15468_v17, 16  ;;  %v12771_v33 = vpop.f32.mrf.mxu1  ;;  %v16022_v9 = vpop.f32.mrf.mxu0 }
 0x17a   : > { %12956 = vmatmul.mubr.msk.bf16.gmra.mxu0 %vm1454_vm11, %v20707_v39  ;;  %v20710_v54 = vcombine.low %v15728_v23, %v15740_v44  ;;  %v4972_v27 = vrot.slane %v15398_v53, 5  ;;  %v4492_v11 = vrot.slane %v4491_v42, 4  ;;  %v4508_v47 = vshll.u32 %v20682_v56, 16  ;;  %12974 = vmatmul.mubr.msk.bf16.gmra.mxu1 %vm1454_vm11, %v11800_v32 }
 0x17b   : > { %v4504_v49 = vrot.slane %v20709_v43, 5  ;;  %v20711_v28 = vshrl.u32 %v20682_v56, 16  ;;  %v16025_v62 = vadd.f32 %v12771_v33, %v15877_v4  ;;  %v4463_v17 = vsel %vm13953_vm14, %v4458_v30, %v15931_v14  ;;  %v1881_v44 = vpop.f32.mrf.mxu1  ;;  %12977 = vmatprep.mubr.msk.bf16.mxu1 %vm1454_vm11, %v11801_v35  ;;  %v12742_v39 = vpop.f32.mrf.mxu0  ;;  %v20713_v30 = vld [vmem:[#allocation42_spill] sm:$0xff]  ;;  %v16054_v33 = vld [vmem:[#allocation2 + $0xb0] sm:$0x1] }
 0x17c   : > { %12995 = vmatprep.mubr.msk.bf16.mxu0 %vm1454_vm11, %v20710_v54  ;;  %v4473_v53 = vsel %vm13953_vm14, %v4468_v8, %v4472_v45  ;;  %v4487_v23 = vsel %vm13953_vm14, %v4482_v50, %v4486_v12  ;;  %v4497_v56 = vsel %vm13953_vm14, %v4492_v11, %v4496_v63  ;;  %v4510_v42 = vrot.slane %v4508_v47, 5  ;;  %v20712_v45 = vld [vmem:[#allocation7_spill] sm:$0xff] }
 0x17d   : > { %v4514_v21 = vrot.slane %v20711_v28, 4  ;;  %v4505_v4 = vor.u32 %v4504_v49, %v4501_v10  ;;  %v4518_v32 = vshll.u32 %v16010_v59, 16  ;;  %v16040_v6 = vadd.f32 %v1881_v44, %v15913_v41  ;;  %v12772_v35 = vpop.f32.mrf.mxu1  ;;  %v16049_v49 = vpop.f32.mrf.mxu0 }
 0x17e   : > { %v16044_v14 = vsel %vm14430_vm9, %v4967_v55, %v4968_v46  ;;  %v11831_v12 = vrot.slane %v20712_v45, 9  ;;  %v4975_v8 = vrot.slane %v20713_v30, 5  ;;  %v11802_v50 = vcombine.low %v4463_v17, %v4473_v53  ;;  %v20715_v45 = vld [vmem:[#allocation36_spill] sm:$0xff] }
 0x17f   : > { %v4974_v43 = vrot.slane %v4972_v27, 4  ;;  %v4515_v63 = vor.u32 %v4514_v21, %v4510_v42  ;;  %v4523_v10 = vshrl.u32 %v20684_v18, 16  ;;  %v16052_v54 = vadd.f32 %v12772_v35, %v15949_v48  ;;  %v1884_v11 = vpop.f32.mrf.mxu1  ;;  %v12793_v21 = vpop.f32.mrf.mxu0 }
 0x180   : > { %v11803_v41 = vcombine.low %v4487_v23, %v4497_v56  ;;  %v4526_v46 = vshll.u32 %v20684_v18, 16  ;;  %v4532_v55 = vshll.u32 %v20685_v3, 16  ;;  %v4506_v47 = vrot.slane %v4505_v4, 4 }
 0x181   : > { %v4516_v28 = vrot.slane %v4515_v63, 4  ;;  %v4520_v17 = vrot.slane %v4518_v32, 5  ;;  %v4525_v53 = vrot.slane %v4523_v10, 4  ;;  %v20714_v44 = vcombine.low %v15774_v24, %v15780_v61  ;;  %v20718_v10 = vld [vmem:[#allocation13_spill] sm:$0xff] }
 0x182   : > { %v16063_v48 = vadd.f32 %v1884_v11, %v15978_v20  ;;  %v4528_v23 = vrot.slane %v4526_v46, 5  ;;  %v4534_v56 = vrot.slane %v4532_v55, 5  ;;  %v4536_v18 = vshrl.u32 %v20685_v3, 16  ;;  %v2226_v20 = vpop.f32.mrf.mxu0  ;;  %v12775_v3 = vpop.f32.mrf.mxu1  ;;  %12978 = vmatmul.mubr.msk.bf16.gmra.mxu1 %vm1454_vm11, %v11802_v50 }
 0x183   : > { %12996 = vmatmul.mubr.msk.bf16.vlgmr.msra.gmra.mxu0 %vm1454_vm11, %v20714_v44  ;;  %v16068_v30 = vadd.f32 %v15925_v16, %v20715_v45  ;;  %v16071_v4 = vadd.f32 %v12793_v21, %v15899_v13  ;;  %v20716_v32 = vcombine.low %v15844_v15, %v15850_v40  ;;  %v16079_v24 = vsel %vm14430_vm9, %v11831_v12, %v4972_v27  ;;  %v20717_v13 = vld [vmem:[#allocation16_spill] sm:$0xff] }
 0x184   : > { %v4542_v61 = vshll.u32 %v16054_v33, 16  ;;  %v16085_v16 = vsel %vm14430_vm9, %v4974_v43, %v4975_v8  ;;  %v11832_v35 = vrot.slane %v20717_v13, 9  ;;  %v4529_v63 = vor.u32 %v4528_v23, %v4525_v53  ;;  %12981 = vmatprep.mubr.msk.bf16.mxu1 %vm1454_vm11, %v11803_v41  ;;  %v12794_v8 = vpop.f32.mrf.mxu0  ;;  %v1897_v43 = vpop.f32.mrf.mxu1  ;;  %v16106_v41 = vld [vmem:[#allocation2 + $0xbc] sm:$0x1] }
 0x185   : > { %12999 = vmatprep.mubr.msk.bf16.mxu0 %vm1454_vm11, %v20716_v32  ;;  %v4538_v15 = vrot.slane %v4536_v18, 4  ;;  %v16089_v40 = vadd.f32 %v2226_v20, %v15923_v60  ;;  %v16092_v27 = vadd.f32 %v12775_v3, %v15997_v7  ;;  %v4511_v12 = vsel %vm13953_vm14, %v4506_v47, %v4510_v42  ;;  %v20721_v18 = vld [vmem:[#allocation15_spill] sm:$0xff] }
 0x186   : > { %v4521_v50 = vsel %vm13953_vm14, %v4516_v28, %v4520_v17  ;;  %v4979_v46 = vrot.slane %v20718_v10, 5  ;;  %v4530_v55 = vrot.slane %v4529_v63, 4  ;;  %v4544_v53 = vrot.slane %v4542_v61, 5  ;;  %v2229_v21 = vpop.f32.mrf.mxu0  ;;  %v12776_v44 = vpop.f32.mrf.mxu1 }
 0x187   : > { %v4539_v11 = vor.u32 %v4538_v15, %v4534_v56  ;;  %v16101_v60 = vadd.f32 %v12794_v8, %v15936_v2  ;;  %v16104_v7 = vadd.f32 %v1897_v43, %v16022_v9  ;;  %v20719_v42 = vshrl.u32 %v20695_v34, 16  ;;  %v20723_v15 = vld [vmem:[#allocation44_spill] sm:$0xff]  ;;  %v20726_v43 = vld [vmem:[#allocation10_spill] sm:$0xff] }
 0x188   : > { %v20720_v28 = vshll.u32 %v20695_v34, 16  ;;  %v11804_v23 = vcombine.low %v4511_v12, %v4521_v50  ;;  %v4986_v45 = vrot.slane %v20721_v18, 5  ;;  %v4535_v2 = vsel %vm13953_vm14, %v4530_v55, %v4534_v56  ;;  %v12797_v13 = vpop.f32.mrf.mxu0  ;;  %v16125_v63 = vpop.f32.mrf.mxu1 }
 0x189   : > { %v4549_v47 = vrot.slane %v20719_v42, 4  ;;  %v4540_v32 = vrot.slane %v4539_v11, 4  ;;  %v16116_v9 = vadd.f32 %v2229_v21, %v15939_v58  ;;  %v16118_v61 = vadd.f32 %v12776_v44, %v12742_v39 }
 0x18a   : > { %v4552_v17 = vrot.slane %v20720_v28, 5  ;;  %v4556_v3 = vshll.u32 %v20696_v5, 16  ;;  %v20722_v34 = vcombine.low %v15860_v1, %v15864_v25  ;;  %v4982_v12 = vrot.slane %v20723_v15, 5  ;;  %v2242_v11 = vpop.f32.mrf.mxu0  ;;  %v16145_v42 = vpop.f32.mrf.mxu1  ;;  %12982 = vmatmul.mubr.msk.bf16.gmra.mxu1 %vm1454_vm11, %v11804_v23 }
 0x18b   : > { %v4545_v56 = vsel %vm13953_vm14, %v4540_v32, %v4544_v53  ;;  %v20724_v58 = vshrl.u32 %v20696_v5, 16  ;;  %v4566_v50 = vshll.u32 %v16106_v41, 16  ;;  %v16134_v8 = vadd.f32 %v12797_v13, %v15981_v36 }
 0x18c   : > { %v4553_v20 = vor.u32 %v4552_v17, %v4549_v47  ;;  %13000 = vmatmul.mubr.msk.bf16.gmra.mxu0 %vm1454_vm11, %v20722_v34  ;;  %v20725_v1 = vcombine.low %v15911_v31, %v15919_v29  ;;  %v4981_v25 = vrot.slane %v4979_v46, 4  ;;  %v11833_v10 = vrot.slane %v20726_v43, 9  ;;  %v20727_v17 = vld [vmem:[#allocation45_spill] sm:$0xff] }
 0x18d   : > { %v4562_v39 = vrot.slane %v20724_v58, 4  ;;  %v11805_v55 = vcombine.low %v4535_v2, %v4545_v56  ;;  %v11847_v53 = vcombine.low %v15990_v19, %v16044_v14  ;;  %v11848_v5 = vcombine.low %v16079_v24, %v16085_v16  ;;  %v12798_v19 = vpop.f32.mrf.mxu0  ;;  %v16157_v14 = vpop.f32.mrf.mxu1  ;;  %v20730_v56 = vld [vmem:[#allocation12_spill] sm:$0xff]  ;;  %v20731_v43 = vld [vmem:[#allocation17_spill] sm:$0xff] }
 0x18e   : > { %13003 = vmatprep.mubr.msk.bf16.mxu0 %vm1454_vm11, %v20725_v1  ;;  %v4554_v36 = vrot.slane %v4553_v20, 4  ;;  %v4558_v47 = vrot.slane %v4556_v3, 5  ;;  %v16149_v31 = vadd.f32 %v2242_v11, %v16005_v26  ;;  %v16153_v29 = vsel %vm14430_vm9, %v11832_v35, %v4979_v46  ;;  %v16181_v58 = vld [vmem:[#allocation2 + $0xc8] sm:$0x1] }
 0x18f   : > { %v4988_v28 = vrot.slane %v4986_v45, 4  ;;  %v4989_v21 = vrot.slane %v20727_v17, 5  ;;  %12985 = vmatprep.mubr.msk.bf16.mxu1 %vm1454_vm11, %v11805_v55  ;;  %v4568_v16 = vrot.slane %v4566_v50, 5  ;;  %v4571_v44 = vshrl.u32 %v15591_v37, 16  ;;  %v2245_v2 = vpop.f32.mrf.mxu0  ;;  %v16172_v32 = vpop.f32.mrf.mxu1 }
 0x190   : > { %v4563_v24 = vor.u32 %v4562_v39, %v4558_v47  ;;  %v4574_v23 = vshll.u32 %v15591_v37, 16  ;;  %v16162_v26 = vadd.f32 %v12798_v19, %v16068_v30  ;;  %v4983_v35 = vsel %vm14430_vm9, %v4981_v25, %v4982_v12  ;;  %v20728_v37 = vld [vmem:[#allocation28_spill] sm:$0xff] }
 0x191   : > { %v16168_v46 = vsel %vm14430_vm9, %v11833_v10, %v4986_v45  ;;  %v4559_v18 = vsel %vm13953_vm14, %v4554_v36, %v4558_v47  ;;  %v4573_v3 = vrot.slane %v4571_v44, 4  ;;  %v4580_v34 = vshll.u32 %v20728_v37, 16  ;;  %v20729_v30 = vld [vmem:[#allocation24_spill] sm:$0xff]  ;;  %v12801_v50 = vpop.f32.mrf.mxu0  ;;  %v16185_v1 = vpop.f32.mrf.mxu1  ;;  %v20732_v36 = vld [vmem:[#allocation14_spill] sm:$0xff] }
 0x192   : > { %v4564_v20 = vrot.slane %v4563_v24, 4  ;;  %v4576_v13 = vrot.slane %v4574_v23, 5  ;;  %v16176_v15 = vadd.f32 %v2245_v2, %v20729_v30  ;;  %v4990_v12 = vsel %vm14430_vm9, %v4988_v28, %v4989_v21  ;;  %v13656_v24 = vld [vmem:[#allocation2 + $0x84] sm:$0xf] }
 0x193   : > { %v4993_v45 = vrot.slane %v20730_v56, 5  ;;  %v4584_v39 = vshrl.u32 %v20728_v37, 16  ;;  %v5000_v10 = vrot.slane %v20731_v43, 5  ;;  %v4582_v11 = vrot.slane %v4580_v34, 5  ;;  %v2258_v19 = vpop.f32.mrf.mxu0  ;;  %v16196_v23 = vpop.f32.mrf.mxu1  ;;  %v20734_v34 = vld [vmem:[#allocation20_spill] sm:$0xff]  ;;  %v20735_v56 = vld [vmem:[#allocation26_spill] sm:$0xff] }
 0x194   : > { %13004 = vmatmul.mubr.msk.bf16.gmra.mxu0 %vm1454_vm11, %v11847_v53  ;;  %v4569_v25 = vsel %vm13953_vm14, %v4564_v20, %v4568_v16  ;;  %v4577_v55 = vor.u32 %v4576_v13, %v4573_v3  ;;  %v16191_v47 = vadd.f32 %v12801_v50, %v20732_v36  ;;  %v11849_v28 = vcombine.low %v16153_v29, %v4983_v35  ;;  %v20733_v20 = vld [vmem:[#allocation18_spill] sm:$0xff]  ;;  %v16212_v36 = vld [vmem:[#allocation2 + $0xd4] sm:$0x1] }
 0x195   : > { %13007 = vmatprep.mubr.msk.bf16.mxu0 %vm1454_vm11, %v11848_v5  ;;  %v11806_v17 = vcombine.low %v4559_v18, %v4569_v25  ;;  %v4586_v21 = vrot.slane %v4584_v39, 4  ;;  %v11850_v53 = vcombine.low %v16168_v46, %v4990_v12  ;;  %v11834_v44 = vrot.slane %v13656_v24, 9  ;;  %v12802_v35 = vpop.f32.mrf.mxu0  ;;  %v16204_v18 = vpop.f32.mrf.mxu1  ;;  %v13657_v46 = vld [vmem:[#allocation2 + $0x90] sm:$0xf] }
 0x196   : > { %v4578_v16 = vrot.slane %v4577_v55, 4  ;;  %v4590_v2 = vshll.u32 %v16181_v58, 16  ;;  %v16200_v3 = vadd.f32 %v2258_v19, %v20733_v20  ;;  %v4995_v13 = vrot.slane %v4993_v45, 4 }
 0x197   : > { %v4996_v5 = vrot.slane %v20734_v34, 5  ;;  %12986 = vmatmul.mubr.msk.bf16.gmra.mxu1 %vm1454_vm11, %v11806_v17  ;;  %v4587_v29 = vor.u32 %v4586_v21, %v4582_v11  ;;  %v11835_v30 = vrot.slane %v13657_v46, 9  ;;  %v5002_v12 = vrot.slane %v5000_v10, 4  ;;  %v2261_v19 = vpop.f32.mrf.mxu0  ;;  %v16216_v24 = vpop.f32.mrf.mxu1 }
 0x198   : > { %v5003_v39 = vrot.slane %v20735_v56, 5  ;;  %v4592_v50 = vrot.slane %v4590_v2, 5  ;;  %v16208_v25 = vadd.f32 %v12802_v35, %v15993_v0  ;;  %v4583_v43 = vsel %vm13953_vm14, %v4578_v16, %v4582_v11 }
 0x199   : > { %v4588_v55 = vrot.slane %v4587_v29, 4  ;;  %v20736_v17 = vshrl.u32 %v15593_v52, 16  ;;  %v20737_v20 = vshll.u32 %v15593_v52, 16  ;;  %v4604_v2 = vshll.u32 %v20706_v57, 16  ;;  %v12805_v56 = vpop.f32.mrf.mxu0  ;;  %v16233_v52 = vpop.f32.mrf.mxu1 }
 0x19a   : > { %v20738_v0 = vshrl.u32 %v20706_v57, 16  ;;  %v16224_v46 = vadd.f32 %v2261_v19, %v16008_v51  ;;  %v4994_v11 = vsel %vm14430_vm9, %v11834_v44, %v4993_v45  ;;  %v4997_v16 = vsel %vm14430_vm9, %v4995_v13, %v4996_v5  ;;  %v13658_v13 = vld [vmem:[#allocation2 + $0xa0] sm:$0xf] }
 0x19b   : > { %v4597_v21 = vrot.slane %v20736_v17, 4  ;;  %v4600_v34 = vrot.slane %v20737_v20, 5  ;;  %v4593_v29 = vsel %vm13953_vm14, %v4588_v55, %v4592_v50  ;;  %v4606_v20 = vrot.slane %v4604_v2, 5  ;;  %v2274_v5 = vpop.f32.mrf.mxu0  ;;  %v12787_v50 = vpop.f32.mrf.mxu1 }
 0x19c   : > { %v4610_v35 = vrot.slane %v20738_v0, 4  ;;  %13008 = vmatmul.mubr.msk.bf16.gmra.mxu0 %vm1454_vm11, %v11849_v28  ;;  %v11807_v17 = vcombine.low %v4583_v43, %v4593_v29  ;;  %v4614_v51 = vshll.u32 %v16212_v36, 16  ;;  %v16237_v19 = vadd.f32 %v12805_v56, %v16025_v62  ;;  %v20739_v0 = vld [vmem:[#allocation39_spill] sm:$0xff] }
 0x19d   : > { %v4601_v57 = vor.u32 %v4600_v34, %v4597_v21  ;;  %13011 = vmatprep.mubr.msk.bf16.mxu0 %vm1454_vm11, %v11850_v53  ;;  %v5001_v45 = vsel %vm14430_vm9, %v11835_v30, %v5000_v10  ;;  %v5004_v44 = vsel %vm14430_vm9, %v5002_v12, %v5003_v39  ;;  %v5007_v28 = vrot.slane %v13658_v13, 5  ;;  %v13659_v34 = vld [vmem:[#allocation2 + $0xac] sm:$0xf]  ;;  %v12806_v30 = vpop.f32.mrf.mxu0  ;;  %v13660_v39 = vld [vmem:[#allocation2 + $0x9c] sm:$0xf] }
 0x19e   : > { %12989 = vmatprep.mubr.msk.bf16.mxu1 %vm1454_vm11, %v11807_v17  ;;  %v4611_v55 = vor.u32 %v4610_v35, %v4606_v20  ;;  %v4616_v21 = vrot.slane %v4614_v51, 5  ;;  %v5014_v62 = vrot.slane %v13659_v34, 5  ;;  %v16246_v2 = vadd.f32 %v2274_v5, %v16040_v6  ;;  %v20740_v13 = vld [vmem:[#allocation40_spill] sm:$0xff] }
 0x19f   : > { %v4602_v43 = vrot.slane %v4601_v57, 4  ;;  %v11851_v53 = vcombine.low %v4994_v11, %v4997_v16  ;;  %v16249_v10 = vadd.f32 %v12787_v50, %v20739_v0  ;;  %v11852_v12 = vcombine.low %v5001_v45, %v5004_v44  ;;  %v1945_v57 = vpop.f32.mrf.mxu1  ;;  %v2277_v16 = vpop.f32.mrf.mxu0  ;;  %v13661_v5 = vld [vmem:[#allocation2 + $0xa8] sm:$0xf] }
 0x1a0   : > { %v11836_v29 = vrot.slane %v13660_v39, 9  ;;  %v4612_v17 = vrot.slane %v4611_v55, 4  ;;  %v16254_v35 = vadd.f32 %v12806_v30, %v16052_v54  ;;  %v5009_v51 = vrot.slane %v5007_v28, 4  ;;  %v20741_v55 = vld [vmem:[#allocation41_spill] sm:$0xff]  ;;  %v13662_v39 = vld [vmem:[#allocation2 + $0xb8] sm:$0xf] }
 0x1a1   : > { %v4607_v56 = vsel %vm13953_vm14, %v4602_v43, %v4606_v20  ;;  %v5010_v6 = vrot.slane %v16010_v59, 5  ;;  %v16258_v11 = vadd.f32 %v1945_v57, %v20740_v13  ;;  %v12788_v44 = vpop.f32.mrf.mxu1  ;;  %v11837_v50 = vrot.slane %v13661_v5, 9  ;;  %v12809_v59 = vpop.f32.mrf.mxu0 }
 0x1a2   : > { %v4617_v45 = vsel %vm13953_vm14, %v4612_v17, %v4616_v21  ;;  %v5016_v34 = vrot.slane %v5014_v62, 4  ;;  %v5017_v20 = vrot.slane %v16054_v33, 5  ;;  %v16264_v43 = vadd.f32 %v2277_v16, %v16063_v48 }
 0x1a3   : > { %v11808_v54 = vcombine.low %v4607_v56, %v4617_v45  ;;  %v16267_v0 = vadd.f32 %v12788_v44, %v20741_v55  ;;  %v16270_v30 = vpop.f32.mrf.mxu1  ;;  %v16273_v21 = vadd.f32 %v12809_v59, %v16092_v27  ;;  %v5008_v33 = vsel %vm14430_vm9, %v11836_v29, %v5007_v28  ;;  %v2290_v17 = vpop.f32.mrf.mxu0  ;;  %v20742_v59 = vld [vmem:[#allocation19_spill] sm:$0xff] }
 0x1a4   : > { %13012 = vmatmul.mubr.msk.bf16.gmra.mxu0 %vm1454_vm11, %v11851_v53  ;;  %v5011_v48 = vsel %vm14430_vm9, %v5009_v51, %v5010_v6  ;;  %v5021_v56 = vrot.slane %v13662_v39, 5  ;;  %v5015_v53 = vsel %vm14430_vm9, %v11837_v50, %v5014_v62  ;;  %v5018_v27 = vsel %vm14430_vm9, %v5016_v34, %v5017_v20  ;;  %v13663_v6 = vld [vmem:[#allocation2 + $0xb4] sm:$0xf] }
 0x1a5   : > { %13015 = vmatprep.mubr.msk.bf16.mxu0 %vm1454_vm11, %v11852_v12  ;;  %12990 = vmatmul.mubr.msk.bf16.gmra.mxu1 %vm1454_vm11, %v11808_v54  ;;  %v12827_v57 = vpop.f32.mrf.mxu1  ;;  %v5028_v12 = vrot.slane %v20728_v37, 5  ;;  %v16287_v13 = vadd.f32 %v2290_v17, %v16104_v7  ;;  %v12810_v29 = vpop.f32.mrf.mxu0  ;;  %v11853_v51 = vcombine.low %v5008_v33, %v5011_v48  ;;  %v11838_v16 = vrot.slane %v13663_v6, 9  ;;  %v20744_v6 = vld [vmem:[#allocation21_spill] sm:$0xff] }
 0x1a6   : > { %v16290_v28 = vadd.f32 %v12827_v57, %v16071_v4  ;;  %v5024_v45 = vrot.slane %v16106_v41, 5  ;;  %v16294_v62 = vadd.f32 %v12810_v29, %v16118_v61  ;;  %v11854_v5 = vcombine.low %v5015_v53, %v5018_v27  ;;  %v13664_v4 = vld [vmem:[#allocation2 + $0xc0] sm:$0xf] }
 0x1a7   : > { %v2600_v44 = vpop.f32.mrf.mxu1  ;;  %v5023_v50 = vrot.slane %v5021_v56, 4  ;;  %v16299_v7 = vpop.f32.mrf.mxu0  ;;  %v11839_v20 = vrot.slane %v13664_v4, 9  ;;  %v5030_v54 = vrot.slane %v5028_v12, 4  ;;  %v5031_v55 = vrot.slane %v16181_v58, 5  ;;  %v20743_v61 = vld [vmem:[#allocation27_spill] sm:$0xff] }
 0x1a8   : > { %v16297_v37 = vadd.f32 %v2600_v44, %v16089_v40  ;;  %v1922_v41 = vadd.f32 %v16145_v42, %v20742_v59  ;;  %v1914_v48 = vadd.f32 %v16157_v14, %v20743_v61  ;;  %v5022_v40 = vsel %vm14430_vm9, %v11838_v16, %v5021_v56  ;;  %v11907_v14 = vld [vmem:[%s20354_s3 + $0x4] sm:$0xf] }
 0x1a9   : > { %v12828_v34 = vpop.f32.mrf.mxu1  ;;  %v12813_v39 = vpop.f32.mrf.mxu0  ;;  %v5025_v42 = vsel %vm14430_vm9, %v5023_v50, %v5024_v45  ;;  %v5029_v56 = vsel %vm14430_vm9, %v11839_v20, %v5028_v12  ;;  %v5032_v57 = vsel %vm14430_vm9, %v5030_v54, %v5031_v55  ;;  %13453 = vmatprep.subr.msk.bf16.mxu1 %vm6466_vm6, %v11907_v14  ;;  %v1925_v16 = vadd.f32 %v16172_v32, %v20744_v6  ;;  %v13666_v12 = vld [vmem:[#allocation2 + $0xcc] sm:$0xf] }
 0x1aa   : > { %v16305_v33 = vadd.f32 %v12828_v34, %v16101_v60  ;;  %v16314_v53 = vadd.f32 %v12813_v39, %v1922_v41  ;;  %v13665_v60 = vld [vmem:[#allocation2 + $0xd0] sm:$0xf]  ;;  %v11855_v50 = vcombine.low %v5022_v40, %v5025_v42  ;;  %v11840_v34 = vrot.slane %v13666_v12, 9 }
 0x1ab   : > { %v16312_v17 = vpop.f32.mrf.mxu1  ;;  %v5035_v58 = vrot.slane %v13665_v60, 5  ;;  %v2306_v27 = vpop.f32.mrf.mxu0  ;;  %v5038_v4 = vrot.slane %v16212_v36, 5  ;;  %v11856_v55 = vcombine.low %v5029_v56, %v5032_v57  ;;  %v20746_v36 = vld [vmem:[#allocation35_spill] sm:$0xff]  ;;  %v20747_v56 = vld [vmem:[#allocation37_spill] sm:$0xff] }
 0x1ac   : > { %13016 = vmatmul.mubr.msk.bf16.gmra.mxu0 %vm1454_vm11, %v11853_v51  ;;  %v6468_v51 = vsel %vm6466_vm6, %v11907_v14, 0  ;;  %v16330_v45 = vadd.f32 %v2306_v27, %v1914_v48  ;;  %v20745_v48 = vld [vmem:[#allocation33_spill] sm:$0xff]  ;;  %v1930_v60 = vadd.f32 %v16204_v18, %v20746_v36  ;;  %v1941_v57 = vadd.f32 %v16216_v24, %v20747_v56 }
 0x1ad   : > { %13019 = vmatprep.mubr.msk.bf16.mxu0 %vm1454_vm11, %v11854_v5  ;;  %v12831_v29 = vpop.f32.mrf.mxu1  ;;  %13028 = vmatpush3.bf16.msra.mxu1 %v6468_v51  ;;  %v12814_v5 = vpop.f32.mrf.mxu0  ;;  %v5037_v59 = vrot.slane %v5035_v58, 4 }
 0x1ae   : > { %v16333_v44 = vadd.f32 %v12831_v29, %v16134_v8  ;;  %v16336_v54 = vadd.f32 %v12814_v5, %v1925_v16  ;;  %v1938_v8 = vadd.f32 %v16196_v23, %v20745_v48 }
 0x1af   : > { %v2616_v20 = vpop.f32.mrf.mxu1  ;;  %v16339_v32 = vpop.f32.mrf.mxu0  ;;  %v5039_v23 = vsel %vm14430_vm9, %v5037_v59, %v5038_v4 }
 0x1b0   : > { %v2731_v41 = vadd.f32 %v2616_v20, %v16149_v31  ;;  %v5036_v31 = vsel %vm14430_vm9, %v11840_v34, %v5035_v58 }
 0x1b1   : > { %v12832_v61 = vpop.f32.mrf.mxu1  ;;  %v12817_v40 = vpop.f32.mrf.mxu0  ;;  %v11857_v6 = vcombine.low %v5036_v31, %v5039_v23 }
 0x1b2   : > { %v2734_v39 = vadd.f32 %v12832_v61, %v16162_v26  ;;  %v16349_v14 = vadd.f32 %v12817_v40, %v1938_v8 }
 0x1b3   : > { %v16345_v42 = vpop.f32.mrf.mxu1  ;;  %v2322_v27 = vpop.f32.mrf.mxu0 }
 0x1b4   : > { %13020 = vmatmul.mubr.msk.bf16.gmra.mxu0 %vm1454_vm11, %v11855_v50  ;;  %v16358_v29 = vadd.f32 %v2322_v27, %v1930_v60 }
 0x1b5   : > { %13023 = vmatprep.mubr.msk.bf16.mxu0 %vm1454_vm11, %v11856_v55  ;;  %v12835_v26 = vpop.f32.mrf.mxu1  ;;  %v12818_v18 = vpop.f32.mrf.mxu0 }
 0x1b6   : > { %v2737_v51 = vadd.f32 %v12835_v26, %v16191_v47  ;;  %v2380_v5 = vadd.f32 %v12818_v18, %v1941_v57 }
 0x1b7   : > { %v2632_v16 = vpop.f32.mrf.mxu1  ;;  %v16362_v12 = vpop.f32.mrf.mxu0 }
 0x1b8   : > { %v2735_v50 = vadd.f32 %v2632_v16, %v16200_v3 }
 0x1b9   : > { %v12836_v58 = vpop.f32.mrf.mxu1  ;;  %v12821_v4 = vpop.f32.mrf.mxu0 }
 0x1ba   : > { %v2738_v34 = vadd.f32 %v12836_v58, %v16208_v25  ;;  %v2383_v24 = vadd.f32 %v12821_v4, %v16249_v10 }
 0x1bb   : > { %v16366_v20 = vpop.f32.mrf.mxu1  ;;  %v2338_v55 = vpop.f32.mrf.mxu0 }
 0x1bc   : > { %13024 = vmatmul.mubr.msk.bf16.gmra.mxu0 %vm1454_vm11, %v11857_v6  ;;  %v2381_v59 = vadd.f32 %v2338_v55, %v16258_v11 }
 0x1bd   : > { %v12839_v47 = vpop.f32.mrf.mxu1  ;;  %v12822_v48 = vpop.f32.mrf.mxu0 }
 0x1be   : > { %v2741_v61 = vadd.f32 %v12839_v47, %v16237_v19  ;;  %v2384_v8 = vadd.f32 %v12822_v48, %v16267_v0 }
 0x1bf   : > { %v2648_v3 = vpop.f32.mrf.mxu1  ;;  %v16373_v25 = vpop.f32.mrf.mxu0 }
 0x1c0   : > { %v2739_v40 = vadd.f32 %v2648_v3, %v16246_v2 }
 0x1c1   : > { %v12840_v36 = vpop.f32.mrf.mxu1  ;;  %v12861_v31 = vpop.f32.mrf.mxu0 }
 0x1c2   : > { %v2742_v60 = vadd.f32 %v12840_v36, %v16254_v35  ;;  %v16379_v10 = vadd.f32 %v12861_v31, %v16290_v28 }
 0x1c3   : > { %v16376_v23 = vpop.f32.mrf.mxu1  ;;  %v3278_v11 = vpop.f32.mrf.mxu0 }
 0x1c4   : > { %20748 = vst [vmem:[#allocation29_spill] sm:$0xff] %v16379_v10  ;;  %v16382_v19 = vadd.f32 %v3278_v11, %v16297_v37  ;;  %v5936_v10 = vld [vmem:[#allocation2 + $0x8] sm:$0x1] }
 0x1c5   : > { %v12843_v27 = vpop.f32.mrf.mxu1  ;;  %v12862_v26 = vpop.f32.mrf.mxu0 }
 0x1c6   : > { %20749 = vst [vmem:[#allocation30_spill] sm:$0xff] %v16382_v19  ;;  %v2745_v0 = vadd.f32 %v12843_v27, %v16273_v21  ;;  %v16386_v56 = vadd.f32 %v12862_v26, %v16305_v33 }
 0x1c7   : > { %v2664_v2 = vpop.f32.mrf.mxu1  ;;  %v16389_v57 = vpop.f32.mrf.mxu0 }
 0x1c8   : > { %20750 = vst [vmem:[#allocation22_spill] sm:$0xff] %v16386_v56  ;;  %v2743_v35 = vadd.f32 %v2664_v2, %v16287_v13 }
 0x1c9   : > { %v12844_v18 = vpop.f32.mrf.mxu1  ;;  %v12865_v6 = vpop.f32.mrf.mxu0 }
 0x1ca   : > { %v2746_v28 = vadd.f32 %v12844_v18, %v16294_v62  ;;  %v16395_v37 = vadd.f32 %v12865_v6, %v16333_v44 }
 0x1cb   : > { %v16392_v16 = vpop.f32.mrf.mxu1  ;;  %v3294_v58 = vpop.f32.mrf.mxu0 }
 0x1cc   : > { %20751 = vst [vmem:[#allocation25_spill] sm:$0xff] %v16395_v37  ;;  %v16397_v4 = vadd.f32 %v3294_v58, %v2731_v41 }
 0x1cd   : > { %v12847_v21 = vpop.f32.mrf.mxu1  ;;  %v12866_v55 = vpop.f32.mrf.mxu0 }
 0x1ce   : > { %v2749_v33 = vadd.f32 %v12847_v21, %v16314_v53  ;;  %v16400_v13 = vadd.f32 %v12866_v55, %v2734_v39 }
 0x1cf   : > { %v2680_v47 = vpop.f32.mrf.mxu1  ;;  %v16403_v3 = vpop.f32.mrf.mxu0 }
 0x1d0   : > { %20752 = vst [vmem:[#allocation32_spill] sm:$0xff] %v16400_v13  ;;  %v2747_v48 = vadd.f32 %v2680_v47, %v16330_v45 }
 0x1d1   : > { %v12848_v62 = vpop.f32.mrf.mxu1  ;;  %v12869_v31 = vpop.f32.mrf.mxu0 }
 0x1d2   : > { %v2750_v36 = vadd.f32 %v12848_v62, %v16336_v54  ;;  %v16408_v11 = vadd.f32 %v12869_v31, %v2737_v51 }
 0x1d3   : > { %v16406_v44 = vpop.f32.mrf.mxu1  ;;  %v3310_v41 = vpop.f32.mrf.mxu0 }
 0x1d4   : > { %v16410_v26 = vadd.f32 %v3310_v41, %v2735_v50 }
 0x1d5   : > { %v12851_v27 = vpop.f32.mrf.mxu1  ;;  %v12870_v39 = vpop.f32.mrf.mxu0 }
 0x1d6   : > { %v2753_v53 = vadd.f32 %v12851_v27, %v16349_v14  ;;  %v16413_v18 = vadd.f32 %v12870_v39, %v2738_v34 }
 0x1d7   : > { %v2696_v2 = vpop.f32.mrf.mxu1  ;;  %v16416_v6 = vpop.f32.mrf.mxu0 }
 0x1d8   : > { %v2751_v45 = vadd.f32 %v2696_v2, %v16358_v29 }
 0x1d9   : > { %v12852_v54 = vpop.f32.mrf.mxu1  ;;  %v12873_v21 = vpop.f32.mrf.mxu0 }
 0x1da   : > { %v2754_v58 = vadd.f32 %v12852_v54, %v2380_v5  ;;  %v16420_v51 = vadd.f32 %v12873_v21, %v2741_v61 }
 0x1db   : > { %v16418_v55 = vpop.f32.mrf.mxu1  ;;  %v3326_v47 = vpop.f32.mrf.mxu0 }
 0x1dc   : > { %v16422_v62 = vadd.f32 %v3326_v47, %v2739_v40 }
 0x1dd   : > { %v12855_v50 = vpop.f32.mrf.mxu1  ;;  %v12874_v31 = vpop.f32.mrf.mxu0 }
 0x1de   : > { %v2757_v14 = vadd.f32 %v12855_v50, %v2383_v24  ;;  %v16424_v34 = vadd.f32 %v12874_v31, %v2742_v60 }
 0x1df   : > { %v2712_v41 = vpop.f32.mrf.mxu1  ;;  %v16428_v29 = vpop.f32.mrf.mxu0 }
 0x1e0   : > { %v16426_v27 = vadd.f32 %v2712_v41, %v2381_v59  ;;  %20753 = vst [vmem:[#allocation31_spill] sm:$0xff] %v16428_v29 }
 0x1e1   : > { %v12856_v39 = vpop.f32.mrf.mxu1  ;;  %v12877_v2 = vpop.f32.mrf.mxu0 }
 0x1e2   : > { %v16430_v5 = vadd.f32 %v12856_v39, %v2384_v8  ;;  %v16434_v61 = vadd.f32 %v12877_v2, %v2745_v0  ;;  %v5982_v8 = vld [vmem:[%s20354_s3] sm:$0xf]  ;;  %v5935_v2 = vld [vmem:[#allocation2 + $0x4] sm:$0xf] }
 0x1e3   : > { %v16432_v54 = vpop.f32.mrf.mxu1  ;;  %v3342_v21 = vpop.f32.mrf.mxu0  ;;  %13454 = vmatprep.subr.msk.bf16.mxu0 %vm6466_vm6, %v5982_v8  ;;  %v6760_v0 = vsel %vm6466_vm6, %v5982_v8, 0 }
 0x1e4   : > { %20754 = vst [vmem:[#allocation34_spill] sm:$0xff] %v16432_v54  ;;  %v16438_v24 = vadd.f32 %v3342_v21, %v2743_v35  ;;  %13062 = vmatpush3.bf16.msra.mxu0 %v6760_v0 }
 0x1e5   : > { %v16436_v40 = vpop.f32.mrf.mxu1  ;;  %v12878_v47 = vpop.f32.mrf.mxu0 }
 0x1e6   : > { %20755 = vst [vmem:[#allocation7_spill] sm:$0xff] %v16436_v40  ;;  %v16442_v59 = vadd.f32 %v12878_v47, %v2746_v28  ;;  %v5934_v28 = vld [vmem:[#allocation2] sm:$0xf] }
 0x1e7   : > { %v16440_v60 = vpop.f32.mrf.mxu1  ;;  %v16444_v50 = vpop.f32.mrf.mxu0  ;;  %v11940_v22 = vcombine.low %v5934_v28, %v5935_v2 }
 0x1e8   : > { %20756 = vst [vmem:[#allocation42_spill] sm:$0xff] %v16440_v60  ;;  %20757 = vst [vmem:[#allocation36_spill] sm:$0xff] %v16444_v50 }
 0x1e9   : > { %v16446_v31 = vpop.f32.mrf.mxu1  ;;  %v12881_v41 = vpop.f32.mrf.mxu0  ;;  %13063 = vmatprep.mubr.msk.bf16.mxu0 %vm6417_vm8, %v11940_v22 }
 0x1ea   : > { %20758 = vst [vmem:[#allocation16_spill] sm:$0xff] %v16446_v31  ;;  %v16455_v39 = vadd.f32 %v12881_v41, %v2749_v33 }
 0x1eb   : > { %v16453_v35 = vpop.f32.mrf.mxu1  ;;  %v3358_v21 = vpop.f32.mrf.mxu0 }
 0x1ec   : > { %20759 = vst [vmem:[#allocation13_spill] sm:$0xff] %v16453_v35  ;;  %v16459_v13 = vadd.f32 %v3358_v21, %v2747_v48 }
 0x1ed   : > { %v16457_v47 = vpop.f32.mrf.mxu1  ;;  %v12882_v37 = vpop.f32.mrf.mxu0 }
 0x1ee   : > { %20760 = vst [vmem:[#allocation15_spill] sm:$0xff] %v16457_v47  ;;  %v16462_v8 = vadd.f32 %v12882_v37, %v2750_v36 }
 0x1ef   : > { %v3716_v31 = vpop.f32.mrf.mxu1  ;;  %v16467_v33 = vpop.f32.mrf.mxu0 }
 0x1f0   : > { %v16465_v35 = vadd.f32 %v3716_v31, %v16397_v4  ;;  %20761 = vst [vmem:[#allocation44_spill] sm:$0xff] %v16467_v33 }
 0x1f1   : > { %v16469_v0 = vpop.f32.mrf.mxu1  ;;  %v12885_v41 = vpop.f32.mrf.mxu0 }
 0x1f2   : > { %20762 = vst [vmem:[#allocation10_spill] sm:$0xff] %v16469_v0  ;;  %v16473_v47 = vadd.f32 %v12885_v41, %v2753_v53  ;;  %v5987_v53 = vshll.u32 %v5934_v28, 16  ;;  %v5997_v41 = vshrl.u32 %v5935_v2, 16 }
 0x1f3   : > { %v16471_v56 = vpop.f32.mrf.mxu1  ;;  %v3374_v48 = vpop.f32.mrf.mxu0 }
 0x1f4   : > { %20763 = vst [vmem:[#allocation45_spill] sm:$0xff] %v16471_v56  ;;  %v16475_v60 = vadd.f32 %v3374_v48, %v2751_v45  ;;  %v5984_v56 = vshrl.u32 %v5934_v28, 16  ;;  %v5999_v40 = vrot.slane %v5997_v41, 4 }
 0x1f5   : > { %v12903_v21 = vpop.f32.mrf.mxu1  ;;  %v12886_v37 = vpop.f32.mrf.mxu0 }
 0x1f6   : > { %v16478_v22 = vadd.f32 %v12903_v21, %v16408_v11  ;;  %v16480_v4 = vadd.f32 %v12886_v37, %v2754_v58  ;;  %v5993_v11 = vshll.u32 %v5935_v2, 16  ;;  %v5986_v50 = vrot.slane %v5984_v56, 4 }
 0x1f7   : > { %v3732_v36 = vpop.f32.mrf.mxu1  ;;  %v16485_v0 = vpop.f32.mrf.mxu0 }
 0x1f8   : > { %v16483_v31 = vadd.f32 %v3732_v36, %v16410_v26  ;;  %20764 = vst [vmem:[#allocation28_spill] sm:$0xff] %v16485_v0  ;;  %v5989_v26 = vrot.slane %v5987_v53, 5  ;;  %v5995_v36 = vrot.slane %v5993_v11, 5 }
 0x1f9   : > { %v12904_v33 = vpop.f32.mrf.mxu1  ;;  %v12889_v45 = vpop.f32.mrf.mxu0 }
 0x1fa   : > { %v16488_v19 = vadd.f32 %v12904_v33, %v16413_v18  ;;  %v16492_v21 = vadd.f32 %v12889_v45, %v2757_v14  ;;  %v5990_v54 = vor.u32 %v5989_v26, %v5986_v50  ;;  %v6000_v29 = vor.u32 %v5999_v40, %v5995_v36 }
 0x1fb   : > { %v16490_v48 = vpop.f32.mrf.mxu1  ;;  %v3390_v58 = vpop.f32.mrf.mxu0 }
 0x1fc   : > { %20765 = vst [vmem:[#allocation24_spill] sm:$0xff] %v16490_v48  ;;  %v16495_v0 = vadd.f32 %v3390_v58, %v16426_v27  ;;  %v6003_v48 = vshll.u32 %v5936_v10, 16  ;;  %v5991_v41 = vrot.slane %v5990_v54, 4  ;;  %v6001_v45 = vrot.slane %v6000_v29, 4 }
 0x1fd   : > { %v12907_v37 = vpop.f32.mrf.mxu1  ;;  %v12890_v18 = vpop.f32.mrf.mxu0 }
 0x1fe   : > { %v3841_v28 = vadd.f32 %v12907_v37, %v16420_v51  ;;  %v16499_v14 = vadd.f32 %v12890_v18, %v16430_v5  ;;  %v6005_v27 = vrot.slane %v6003_v48, 5  ;;  %v5996_v10 = vsel %vm13953_vm14, %v5991_v41, %v5995_v36 }
 0x1ff   : > { %v3748_v33 = vpop.f32.mrf.mxu1  ;;  %v16502_v56 = vpop.f32.mrf.mxu0 }
 0x200   : > { %v3839_v2 = vadd.f32 %v3748_v33, %v16422_v62  ;;  %v6006_v5 = vsel %vm13953_vm14, %v6001_v45, %v6005_v27 }
 0x201   : > { %v12908_v53 = vpop.f32.mrf.mxu1  ;;  %v16505_v51 = vpop.f32.mrf.mxu0  ;;  %v11908_v40 = vcombine.low %v5996_v10, %v6006_v5 }
 0x202   : > { %v3842_v11 = vadd.f32 %v12908_v53, %v16424_v34 }
 0x203   : > { %v16507_v58 = vpop.f32.mrf.mxu1  ;;  %v16513_v62 = vpop.f32.mrf.mxu0  ;;  %13029 = vmatprep.mubr.msk.bf16.mxu1 %vm6417_vm8, %v11908_v40 }
 0x205   : > { %v12911_v50 = vpop.f32.mrf.mxu1  ;;  %v16517_v29 = vpop.f32.mrf.mxu0 }
 0x206   : > { %v3845_v54 = vadd.f32 %v12911_v50, %v16434_v61  ;;  %v16530_v61 = vld [vmem:[%s20354_s3 + $0x8] sm:$0xf] }
 0x207   : > { %v3764_v34 = vpop.f32.mrf.mxu1  ;;  %v16520_v37 = vpop.f32.mrf.mxu0  ;;  %20766 = vst [vmem:[#allocation12_spill] sm:$0xff] %v16530_v61  ;;  %13455 = vmatprep.subr.msk.bf16.mxu1 %vm6466_vm6, %v16530_v61 }
 0x208   : > { %v3843_v48 = vadd.f32 %v3764_v34, %v16438_v24 }
 0x209   : > { %v12912_v26 = vpop.f32.mrf.mxu1  ;;  %v16523_v18 = vpop.f32.mrf.mxu0 }
 0x20a   : > { %v3846_v36 = vadd.f32 %v12912_v26, %v16442_v59 }
 0x20b   : > { %v16525_v33 = vpop.f32.mrf.mxu1  ;;  %v4091_v53 = vpop.f32.mrf.mxu0 }
 0x20c   : > { %v16533_v45 = vadd.f32 %v4091_v53, %v16465_v35 }
 0x20d   : > { %v12915_v41 = vpop.f32.mrf.mxu1  ;;  %v16538_v59 = vpop.f32.mrf.mxu0 }
 0x20e   : > { %20767 = vst [vmem:[#allocation17_spill] sm:$0xff] %v16533_v45  ;;  %v3849_v24 = vadd.f32 %v12915_v41, %v16455_v39 }
 0x20f   : > { %v3780_v27 = vpop.f32.mrf.mxu1  ;;  %v16541_v5 = vpop.f32.mrf.mxu0 }
 0x210   : > { %v3847_v10 = vadd.f32 %v3780_v27, %v16459_v13 }
 0x211   : > { %v12916_v40 = vpop.f32.mrf.mxu1  ;;  %v12937_v34 = vpop.f32.mrf.mxu0 }
 0x212   : > { %v3850_v50 = vadd.f32 %v12916_v40, %v16462_v8  ;;  %v16547_v35 = vadd.f32 %v12937_v34, %v16478_v22 }
 0x213   : > { %v16544_v26 = vpop.f32.mrf.mxu1  ;;  %v4107_v39 = vpop.f32.mrf.mxu0 }
 0x214   : > { %20768 = vst [vmem:[#allocation14_spill] sm:$0xff] %v16544_v26  ;;  %20769 = vst [vmem:[#allocation18_spill] sm:$0xff] %v16547_v35  ;;  %v16550_v41 = vadd.f32 %v4107_v39, %v16483_v31 }
 0x215   : > { %v12919_v53 = vpop.f32.mrf.mxu1  ;;  %v12938_v45 = vpop.f32.mrf.mxu0 }
 0x216   : > { %20770 = vst [vmem:[#allocation20_spill] sm:$0xff] %v16550_v41  ;;  %v3853_v38 = vadd.f32 %v12919_v53, %v16473_v47  ;;  %v16554_v27 = vadd.f32 %v12938_v45, %v16488_v19 }
 0x217   : > { %v3796_v13 = vpop.f32.mrf.mxu1  ;;  %v16557_v40 = vpop.f32.mrf.mxu0 }
 0x218   : > { %20771 = vst [vmem:[#allocation26_spill] sm:$0xff] %v16554_v27  ;;  %v3851_v8 = vadd.f32 %v3796_v13, %v16475_v60 }
 0x219   : > { %v12920_v26 = vpop.f32.mrf.mxu1  ;;  %v12941_v34 = vpop.f32.mrf.mxu0 }
 0x21a   : > { %v3854_v22 = vadd.f32 %v12920_v26, %v16480_v4  ;;  %v16562_v61 = vadd.f32 %v12941_v34, %v3841_v28 }
 0x21b   : > { %v16560_v35 = vpop.f32.mrf.mxu1  ;;  %v4123_v31 = vpop.f32.mrf.mxu0 }
 0x21c   : > { %20772 = vst [vmem:[#allocation39_spill] sm:$0xff] %v16562_v61  ;;  %v16564_v47 = vadd.f32 %v4123_v31, %v3839_v2 }
 0x21d   : > { %v12923_v39 = vpop.f32.mrf.mxu1  ;;  %v12942_v19 = vpop.f32.mrf.mxu0 }
 0x21e   : > { %20773 = vst [vmem:[#allocation40_spill] sm:$0xff] %v16564_v47  ;;  %v16567_v53 = vadd.f32 %v12923_v39, %v16492_v21  ;;  %v16569_v60 = vadd.f32 %v12942_v19, %v3842_v11 }
 0x21f   : > { %v3812_v45 = vpop.f32.mrf.mxu1  ;;  %v16574_v4 = vpop.f32.mrf.mxu0 }
 0x220   : > { %20774 = vst [vmem:[#allocation41_spill] sm:$0xff] %v16569_v60  ;;  %v16572_v13 = vadd.f32 %v3812_v45, %v16495_v0 }
 0x221   : > { %v12924_v26 = vpop.f32.mrf.mxu1  ;;  %v12945_v34 = vpop.f32.mrf.mxu0 }
 0x222   : > { %v16577_v28 = vadd.f32 %v12924_v26, %v16499_v14  ;;  %v16581_v2 = vadd.f32 %v12945_v34, %v3845_v54 }
 0x223   : > { %v16579_v61 = vpop.f32.mrf.mxu1  ;;  %v4139_v21 = vpop.f32.mrf.mxu0 }
 0x224   : > { %20775 = vst [vmem:[#allocation19_spill] sm:$0xff] %v16581_v2  ;;  %v16585_v39 = vadd.f32 %v4139_v21, %v3843_v48 }
 0x225   : > { %v16583_v31 = vpop.f32.mrf.mxu1  ;;  %v12946_v11 = vpop.f32.mrf.mxu0 }
 0x226   : > { %20776 = vst [vmem:[#allocation27_spill] sm:$0xff] %v16585_v39  ;;  %v16589_v0 = vadd.f32 %v12946_v11, %v3846_v36 }
 0x227   : > { %v16587_v19 = vpop.f32.mrf.mxu1  ;;  %v16591_v45 = vpop.f32.mrf.mxu0 }
 0x228   : > { %20777 = vst [vmem:[#allocation21_spill] sm:$0xff] %v16589_v0 }
 0x229   : > { %v16593_v60 = vpop.f32.mrf.mxu1  ;;  %v12949_v14 = vpop.f32.mrf.mxu0 }
 0x22a   : > { %v16597_v47 = vadd.f32 %v12949_v14, %v3849_v24 }
 0x22b   : > { %v16595_v26 = vpop.f32.mrf.mxu1  ;;  %v4155_v54 = vpop.f32.mrf.mxu0 }
 0x22c   : > { %20778 = vst [vmem:[#allocation33_spill] sm:$0xff] %v16597_v47  ;;  %v16601_v2 = vadd.f32 %v4155_v54, %v3847_v10  ;;  %v1901_v10 = vadd.f32 %v16125_v63, %v16049_v49 }
 0x22d   : > { %v16599_v34 = vpop.f32.mrf.mxu1  ;;  %v12950_v48 = vpop.f32.mrf.mxu0 }
 0x22e   : > { %20779 = vst [vmem:[#allocation35_spill] sm:$0xff] %v16601_v2  ;;  %v16605_v39 = vadd.f32 %v12950_v48, %v3850_v50  ;;  %v20784_v2 = vld [vmem:[#allocation23_spill] sm:$0xff]  ;;  %v20785_v48 = vld [vmem:[#allocation38_spill] sm:$0xff] }
 0x22f   : > { %v16603_v21 = vpop.f32.mrf.mxu1  ;;  %v16607_v36 = vpop.f32.mrf.mxu0  ;;  %v1917_v50 = vadd.f32 %v16185_v1, %v20784_v2 }
 0x230   : > { %20780 = vst [vmem:[#allocation37_spill] sm:$0xff] %v16605_v39  ;;  %v1933_v39 = vadd.f32 %v16233_v52, %v20785_v48  ;;  %v2732_v52 = vadd.f32 %v16345_v42, %v16176_v15  ;;  %v20796_v48 = vld [vmem:[#allocation13_spill] sm:$0xff] }
 0x231   : > { %v16609_v11 = vpop.f32.mrf.mxu1  ;;  %v12953_v0 = vpop.f32.mrf.mxu0  ;;  %v2374_v63 = vadd.f32 %v16339_v32, %v1917_v50 }
 0x232   : > { %20781 = vst [vmem:[#allocation46_spill] sm:$0xff] %v16609_v11  ;;  %v16613_v41 = vadd.f32 %v12953_v0, %v3853_v38  ;;  %v2370_v38 = vadd.f32 %v16299_v7, %v1901_v10  ;;  %v20786_v0 = vld [vmem:[#allocation43_spill] sm:$0xff]  ;;  %v2378_v1 = vadd.f32 %v16362_v12, %v1933_v39  ;;  %v3410_v12 = vadd.f32 %v16403_v3, %v2732_v52  ;;  %v20789_v39 = vld [vmem:[#allocation29_spill] sm:$0xff]  ;;  %v20794_v10 = vld [vmem:[#allocation22_spill] sm:$0xff] }
 0x233   : > { %v16611_v27 = vpop.f32.mrf.mxu1  ;;  %v4171_v24 = vpop.f32.mrf.mxu0  ;;  %v2748_v42 = vadd.f32 %v16406_v44, %v2374_v63 }
 0x234   : > { %20782 = vst [vmem:[#allocation47_spill] sm:$0xff] %v16613_v41  ;;  %v16619_v54 = vadd.f32 %v4171_v24, %v3851_v8  ;;  %v1949_v41 = vadd.f32 %v16270_v30, %v20786_v0  ;;  %v2736_v8 = vadd.f32 %v16366_v20, %v16224_v46  ;;  %v2744_v32 = vadd.f32 %v16392_v16, %v2370_v38  ;;  %v20790_v24 = vld [vmem:[#allocation7_spill] sm:$0xff]  ;;  %v20791_v16 = vld [vmem:[#allocation36_spill] sm:$0xff] }
 0x235   : > { %v16615_v14 = vpop.f32.mrf.mxu1  ;;  %v12954_v47 = vpop.f32.mrf.mxu0  ;;  %v2752_v46 = vadd.f32 %v16418_v55, %v2378_v1  ;;  %v20795_v55 = vld [vmem:[#allocation16_spill] sm:$0xff] }
 0x236   : > { %20783 = vst [vmem:[#allocation48_spill] sm:$0xff] %v16615_v14  ;;  %v2728_v14 = vadd.f32 %v16312_v17, %v16116_v9  ;;  %v16632_v49 = vadd.f32 %v12954_v47, %v3854_v22  ;;  %v2382_v30 = vadd.f32 %v16373_v25, %v1949_v41  ;;  %v2740_v17 = vadd.f32 %v16376_v23, %v16264_v43  ;;  %v20787_v47 = vld [vmem:[#allocation31_spill] sm:$0xff]  ;;  %v20788_v41 = vld [vmem:[#allocation34_spill] sm:$0xff]  ;;  %v20797_v1 = vld [vmem:[#allocation44_spill] sm:$0xff] }
 0x237   : > { %v16625_v11 = vpop.f32.mrf.mxu1  ;;  %v16640_v2 = vpop.f32.mrf.mxu0  ;;  %v3414_v15 = vadd.f32 %v16416_v6, %v2736_v8  ;;  %v3829_v43 = vadd.f32 %v20790_v24, %v20789_v39  ;;  %v3422_v3 = vadd.f32 %v20791_v16, %v2744_v32  ;;  %v20792_v6 = vld [vmem:[#allocation30_spill] sm:$0xff]  ;;  %v3830_v50 = vadd.f32 %v20795_v55, %v20794_v10  ;;  %v20798_v8 = vld [vmem:[#allocation25_spill] sm:$0xff] }
 0x238   : > { %v3406_v9 = vadd.f32 %v16389_v57, %v2728_v14  ;;  %v3418_v25 = vadd.f32 %v20787_v47, %v2740_v17  ;;  %v2756_v57 = vadd.f32 %v20788_v41, %v2382_v30  ;;  %v20793_v14 = vld [vmem:[#allocation42_spill] sm:$0xff]  ;;  %v3426_v52 = vadd.f32 %v20797_v1, %v2748_v42  ;;  %v20799_v30 = vld [vmem:[#allocation15_spill] sm:$0xff]  ;;  %v20800_v47 = vld [vmem:[#allocation32_spill] sm:$0xff] }
 0x239   : > { %v16642_v7 = vpop.f32.mrf.mxu1  ;;  %v3827_v44 = vadd.f32 %v20793_v14, %v20792_v6  ;;  %v3833_v17 = vadd.f32 %v20799_v30, %v20798_v8  ;;  %v20802_v41 = vld [vmem:[#allocation28_spill] sm:$0xff]  ;;  %v20803_v16 = vld [vmem:[#allocation45_spill] sm:$0xff]  ;;  %v4204_v42 = vadd.f32 %v16505_v51, %v3829_v43 }
 0x23a   : > { %v12957_v20 = vpop.f32.mrf.mxu0  ;;  %v3828_v38 = vadd.f32 %v20796_v48, %v3406_v9  ;;  %v3430_v39 = vadd.f32 %v20802_v41, %v2752_v46  ;;  %v3434_v24 = vadd.f32 %v16502_v56, %v2756_v57  ;;  %v3832_v6 = vadd.f32 %v20803_v16, %v3410_v12  ;;  %v20804_v9 = vld [vmem:[#allocation24_spill] sm:$0xff] }
 0x23b   : > { %v16653_v22 = vpop.f32.mrf.mxu1  ;;  %v16660_v23 = vadd.f32 %v12957_v20, %v16567_v53  ;;  %v20801_v53 = vld [vmem:[#allocation10_spill] sm:$0xff]  ;;  %v3836_v14 = vadd.f32 %v20804_v9, %v3414_v15  ;;  %v4202_v48 = vadd.f32 %v16513_v62, %v3827_v44  ;;  %v3840_v1 = vadd.f32 %v16507_v58, %v3418_v25  ;;  %v20805_v58 = vld [vmem:[#allocation12_spill] sm:$0xff] }
 0x23c   : > { %v4187_v0 = vpop.f32.mrf.mxu0  ;;  %v3834_v20 = vadd.f32 %v20801_v53, %v20800_v47  ;;  %v4203_v46 = vadd.f32 %v16520_v37, %v3828_v38  ;;  %v4208_v56 = vadd.f32 %v16523_v18, %v3833_v17  ;;  %v3844_v12 = vadd.f32 %v16525_v33, %v3422_v3  ;;  %v20806_v25 = vld [vmem:[#allocation14_spill] sm:$0xff]  ;;  %v20807_v38 = vld [vmem:[#allocation17_spill] sm:$0xff] }
 0x23d   : > { %v12975_v63 = vpop.f32.mrf.mxu1  ;;  %v16674_v32 = vadd.f32 %v4187_v0, %v16572_v13  ;;  %v4205_v13 = vadd.f32 %v16517_v29, %v3830_v50  ;;  %v4207_v51 = vadd.f32 %v16541_v5, %v3832_v6  ;;  %v4882_v62 = vadd.f32 %v16583_v31, %v4204_v42 }
 0x23e   : > { %v12958_v10 = vpop.f32.mrf.mxu0  ;;  %v4209_v0 = vadd.f32 %v16538_v59, %v3834_v20  ;;  %v4211_v29 = vadd.f32 %v16557_v40, %v3836_v14  ;;  %v4215_v37 = vadd.f32 %v16574_v4, %v3840_v1  ;;  %v3848_v18 = vadd.f32 %v20806_v25, %v3426_v52  ;;  %v16704_v59 = vld [vmem:[%s20353_s2] ss:$0 sm:$0xff]  ;;  %v20815_v1 = vld [vmem:[#allocation40_spill] sm:$0xff] }
 0x23f   : > { %v4801_v55 = vpop.f32.mrf.mxu1  ;;  %v16684_v8 = vadd.f32 %v12958_v10, %v16577_v28  ;;  %v16695_v28 = vsel %vm6466_vm6, %v20805_v58, 0  ;;  %v3852_v33 = vadd.f32 %v16560_v35, %v3430_v39  ;;  %v4219_v31 = vadd.f32 %v16591_v45, %v3844_v12  ;;  %v20808_v45 = vld [vmem:[#allocation46_spill] sm:$0xff] }
 0x240   : > { %v4190_v15 = vpop.f32.mrf.mxu0  ;;  %v3856_v3 = vadd.f32 %v16579_v61, %v3434_v24  ;;  %v4880_v44 = vadd.f32 %v16587_v19, %v4202_v48  ;;  %v4883_v4 = vadd.f32 %v16593_v60, %v4205_v13  ;;  %v4881_v50 = vadd.f32 %v16595_v26, %v4203_v46  ;;  %v20809_v26 = vld [vmem:[#allocation18_spill] sm:$0xff]  ;;  %v20814_v48 = vld [vmem:[#allocation39_spill] sm:$0xff] }
 0x241   : > { %v12976_v57 = vpop.f32.mrf.mxu1  ;;  %v4886_v35 = vadd.f32 %v16599_v34, %v4208_v56  ;;  %v4884_v52 = vadd.f32 %v16603_v21, %v20807_v38  ;;  %v16715_v47 = vadd.f32 %v16607_v36, %v3848_v18  ;;  %v4887_v53 = vadd.f32 %v20808_v45, %v4209_v0  ;;  %v20810_v34 = vld [vmem:[#allocation48_spill] sm:$0xff] }
 0x242   : > { %v16720_v20 = vadd.f32 %v16640_v2, %v3852_v33  ;;  %v16723_v60 = vadd.f32 %v16611_v27, %v4207_v51  ;;  %v16727_v41 = vadd.f32 %v20810_v34, %v20809_v26  ;;  %v20811_v21 = vld [vmem:[#allocation20_spill] sm:$0xff]  ;;  %v20813_v2 = vld [vmem:[#allocation26_spill] sm:$0xff]  ;;  %v16740_v27 = vadd.f32 %v4190_v15, %v3856_v3  ;;  %v20817_v51 = vld [vmem:[#allocation41_spill] sm:$0xff] }
 0x243   : > { %v12997_v43 = vpop.f32.mrf.mxu0  ;;  %v4804_v5 = vpop.f32.mrf.mxu1  ;;  %v16731_v39 = vadd.f32 %v16625_v11, %v20811_v21  ;;  %v16738_v14 = vadd.f32 %v16642_v7, %v20813_v2  ;;  %v16743_v42 = vadd.f32 %v16653_v22, %v4211_v29  ;;  %v16746_v11 = vadd.f32 %v12975_v63, %v20814_v48  ;;  %v20818_v63 = vld [vmem:[#allocation19_spill] sm:$0xff]  ;;  %v20821_v3 = vld [vmem:[#allocation21_spill] sm:$0xff] }
 0x244   : > { %v5304_v40 = vadd.f32 %v12997_v43, %v4882_v62  ;;  %v16749_v13 = vadd.f32 %v4801_v55, %v20815_v1  ;;  %v16757_v62 = vadd.f32 %v12976_v57, %v20817_v51  ;;  %v16759_v22 = vadd.f32 %v4804_v5, %v4215_v37  ;;  %v20819_v55 = vld [vmem:[#allocation27_spill] sm:$0xff] }
 0x245   : > { %v5175_v30 = vpop.f32.mrf.mxu0  ;;  %v12979_v17 = vpop.f32.mrf.mxu1 }
 0x246   : > { %v5343_v61 = vadd.f32 %v16704_v59, %v5304_v40  ;;  %v5302_v19 = vadd.f32 %v5175_v30, %v4880_v44  ;;  %v16762_v58 = vadd.f32 %v12979_v17, %v20818_v63  ;;  %v5882_v17 = vld [vmem:[#allocation2 + $0x74] sm:$0x1] }
 0x247   : > { %v12998_v36 = vpop.f32.mrf.mxu0  ;;  %v4817_v24 = vpop.f32.mrf.mxu1 }
 0x248   : > { %v16733_v16 = vmax.f32 %v5343_v61, 0.0  ;;  %v5341_v6 = vadd.f32 %v16704_v59, %v5302_v19  ;;  %v5305_v9 = vadd.f32 %v12998_v36, %v4883_v4  ;;  %v16765_v29 = vadd.f32 %v4817_v24, %v20819_v55  ;;  %v5829_v61 = vld [vmem:[#allocation2 + $0x18] sm:$0xf]  ;;  %v13667_v55 = vld [vmem:[#allocation2 + $0xc] sm:$0xf] }
 0x249   : > { %v5178_v10 = vpop.f32.mrf.mxu0  ;;  %v12980_v46 = vpop.f32.mrf.mxu1 }
 0x24a   : > { %20812 = vst [vmem:[#allocation23_spill] sm:$0xff] %v16733_v16  ;;  %v12329_v56 = vpack.c.bf16 %v16733_v16, %v16733_v16  ;;  %v16753_v12 = vmax.f32 %v5341_v6, 0.0  ;;  %v5344_v7 = vadd.f32 %v16704_v59, %v5305_v9  ;;  %v5303_v15 = vadd.f32 %v5178_v10, %v4881_v50 }
 0x24b   : > { %v4820_v25 = vpop.f32.mrf.mxu1  ;;  %v16772_v44 = vadd.f32 %v12980_v46, %v20821_v3 }
 0x24c   : > { %20816 = vst [vmem:[#allocation38_spill] sm:$0xff] %v16753_v12  ;;  %v13001_v0 = vpop.f32.mrf.mxu0  ;;  %v5519_v18 = vshrl.u32 %v12329_v56, 16  ;;  %v12327_v33 = vpack.c.bf16 %v16753_v12, %v16753_v12  ;;  %v16769_v43 = vmax.f32 %v5344_v7, 0.0  ;;  %v5522_v57 = vshll.u32 %v12329_v56, 16  ;;  %v13671_v12 = vld [vmem:[#allocation2 + $0x4] sm:$0xf] }
 0x24d   : > { %v5342_v37 = vadd.f32 %v16704_v59, %v5303_v15  ;;  %v5308_v5 = vadd.f32 %v13001_v0, %v4886_v35  ;;  %v16775_v4 = vadd.f32 %v4820_v25, %v4219_v31 }
 0x24e   : > { %20820 = vst [vmem:[#allocation43_spill] sm:$0xff] %v16769_v43  ;;  %v5191_v40 = vpop.f32.mrf.mxu0  ;;  %v5521_v50 = vrot.slane %v5519_v18, 7  ;;  %v5502_v38 = vshrl.u32 %v12327_v33, 16  ;;  %v5505_v30 = vshll.u32 %v12327_v33, 16  ;;  %v12330_v19 = vpack.c.bf16 %v16769_v43, %v16769_v43  ;;  %v5833_v18 = vld [vmem:[#allocation2 + $0x20] sm:$0x1] }
 0x24f   : > { %v16787_v35 = vmax.f32 %v5342_v37, 0.0  ;;  %v5347_v31 = vadd.f32 %v16704_v59, %v5308_v5  ;;  %v5306_v26 = vadd.f32 %v5191_v40, %v4884_v52 }
 0x250   : > { %v13002_v34 = vpop.f32.mrf.mxu0  ;;  %v5524_v21 = vor.u32 %v5522_v57, %v5521_v50  ;;  %v5525_v36 = vrot.slane %v5521_v50, 4  ;;  %v5504_v24 = vrot.slane %v5502_v38, 7  ;;  %v5527_v9 = vshrl.u32 %v12330_v19, 16 }
 0x251   : > { %20824 = vst [vmem:[#allocation31_spill] sm:$0xff] %v16787_v35  ;;  %v5309_v6 = vadd.f32 %v13002_v34, %v4887_v53  ;;  %v5530_v2 = vshll.u32 %v12330_v19, 16  ;;  %v12328_v48 = vpack.c.bf16 %v16787_v35, %v16787_v35  ;;  %v16796_v52 = vmax.f32 %v5347_v31, 0.0 }
 0x252   : > { %v5194_v1 = vpop.f32.mrf.mxu0  ;;  %v5830_v46 = vsel %vm16781_vm10, %v5524_v21, %v5829_v61  ;;  %v5507_v56 = vor.u32 %v5505_v30, %v5504_v24  ;;  %v5508_v7 = vrot.slane %v5504_v24, 4  ;;  %v5529_v15 = vrot.slane %v5527_v9, 7  ;;  %v5826_v30 = vld [vmem:[#allocation2 + $0x14] sm:$0x1] }
 0x253   : > { %20825 = vst [vmem:[#allocation34_spill] sm:$0xff] %v16796_v52  ;;  %5831 = vst [vmem:[#allocation2 + $0x18] sm:$0xf] %v5830_v46  ;;  %v5510_v0 = vshrl.u32 %v12328_v48, 16  ;;  %v5513_v53 = vshll.u32 %v12328_v48, 16  ;;  %v5345_v51 = vadd.f32 %v16704_v59, %v5306_v26  ;;  %v12333_v33 = vpack.c.bf16 %v16796_v52, %v16796_v52 }
 0x254   : > { %v13005_v63 = vpop.f32.mrf.mxu0  ;;  %v5823_v25 = vsel %vm16781_vm10, %v5507_v56, %v13667_v55  ;;  %v5348_v3 = vadd.f32 %v16704_v59, %v5309_v6  ;;  %v5307_v57 = vadd.f32 %v5194_v1, %v16723_v60  ;;  %v5532_v37 = vor.u32 %v5530_v2, %v5529_v15 }
 0x255   : > { %5824 = vst [vmem:[#allocation2 + $0xc] sm:$0xf] %v5823_v25  ;;  %v5534_v5 = vrot.slane %v5529_v15, 4  ;;  %v5512_v40 = vrot.slane %v5510_v0, 7  ;;  %v16805_v50 = vmax.f32 %v5345_v51, 0.0  ;;  %v5553_v61 = vshrl.u32 %v12333_v33, 16 }
 0x256   : > { %v5207_v38 = vpop.f32.mrf.mxu0  ;;  %v5556_v19 = vshll.u32 %v12333_v33, 16  ;;  %v16807_v31 = vmax.f32 %v5348_v3, 0.0  ;;  %v5346_v26 = vadd.f32 %v16704_v59, %v5307_v57  ;;  %v5533_v21 = vsel %vm13960_vm15, %v5525_v36, %v5532_v37  ;;  %v5843_v0 = vld [vmem:[#allocation2 + $0x30] sm:$0xf] }
 0x257   : > { %20826 = vst [vmem:[#allocation29_spill] sm:$0xff] %v16805_v50  ;;  %v5834_v60 = vsel %vm13908_vm5, %v5534_v5, %v5833_v18  ;;  %v5515_v6 = vor.u32 %v5513_v53, %v5512_v40  ;;  %v5517_v9 = vrot.slane %v5512_v40, 4  ;;  %5832 = vst.msk [vmem:[#allocation2 + $0x1c] sm:$0xf] %vm386_vm1, %v5533_v21  ;;  %v5555_v48 = vrot.slane %v5553_v61, 7 }
 0x258   : > { %20827 = vst [vmem:[#allocation7_spill] sm:$0xff] %v16807_v31  ;;  %v13006_v2 = vpop.f32.mrf.mxu0  ;;  %5835 = vst [vmem:[#allocation2 + $0x20] sm:$0x1] %v5834_v60  ;;  %v12331_v1 = vpack.c.bf16 %v16805_v50, %v16805_v50  ;;  %v12334_v56 = vpack.c.bf16 %v16807_v31, %v16807_v31  ;;  %v16825_v53 = vmax.f32 %v5346_v26, 0.0  ;;  %v5312_v51 = vadd.f32 %v13005_v63, %v16727_v41 }
 0x259   : > { %v5516_v36 = vsel %vm13960_vm15, %v5508_v7, %v5515_v6  ;;  %v5827_v15 = vsel %vm13908_vm5, %v5517_v9, %v5826_v30  ;;  %v5558_v25 = vor.u32 %v5556_v19, %v5555_v48  ;;  %v5559_v18 = vrot.slane %v5555_v48, 4  ;;  %v5836_v19 = vld [vmem:[#allocation2 + $0x24] sm:$0xf]  ;;  %v12983_v9 = vpop.f32.mrf.mxu1 }
 0x25a   : > { %20830 = vst [vmem:[#allocation36_spill] sm:$0xff] %v16825_v53  ;;  %v5210_v55 = vpop.f32.mrf.mxu0  ;;  %5825 = vst.msk [vmem:[#allocation2 + $0x10] sm:$0xf] %vm386_vm1, %v5516_v36  ;;  %v5536_v33 = vshrl.u32 %v12331_v1, 16  ;;  %v5539_v3 = vshll.u32 %v12331_v1, 16  ;;  %v5561_v57 = vshrl.u32 %v12334_v56, 16  ;;  %v12332_v5 = vpack.c.bf16 %v16825_v53, %v16825_v53 }
 0x25b   : > { %5828 = vst [vmem:[#allocation2 + $0x14] sm:$0x1] %v5827_v15  ;;  %v5564_v37 = vshll.u32 %v12334_v56, 16  ;;  %v5844_v41 = vsel %vm16781_vm10, %v5558_v25, %v5843_v0  ;;  %v5351_v30 = vadd.f32 %v16704_v59, %v5312_v51  ;;  %v5310_v61 = vadd.f32 %v5207_v38, %v16731_v39  ;;  %v5847_v56 = vld [vmem:[#allocation2 + $0x38] sm:$0x1] }
 0x25c   : > { %v13009_v40 = vpop.f32.mrf.mxu0  ;;  %v5538_v63 = vrot.slane %v5536_v33, 7  ;;  %5845 = vst [vmem:[#allocation2 + $0x30] sm:$0xf] %v5844_v41  ;;  %v5563_v26 = vrot.slane %v5561_v57, 7  ;;  %v5544_v21 = vshrl.u32 %v12332_v5, 16  ;;  %v5547_v60 = vshll.u32 %v12332_v5, 16 }
 0x25d   : > { %v5313_v6 = vadd.f32 %v13006_v2, %v16738_v14  ;;  %v16838_v36 = vmax.f32 %v5351_v30, 0.0  ;;  %v5349_v15 = vadd.f32 %v16704_v59, %v5310_v61  ;;  %v5840_v57 = vld [vmem:[#allocation2 + $0x2c] sm:$0x1]  ;;  %v4833_v30 = vpop.f32.mrf.mxu1  ;;  %v6941_v35 = vrot.slane %v13671_v12, 5 }
 0x25e   : > { %v5541_v48 = vor.u32 %v5539_v3, %v5538_v63  ;;  %v5542_v1 = vrot.slane %v5538_v63, 4  ;;  %v5566_v0 = vor.u32 %v5564_v37, %v5563_v26  ;;  %v5568_v25 = vrot.slane %v5563_v26, 4  ;;  %v5223_v38 = vpop.f32.mrf.mxu0 }
 0x25f   : > { %20831 = vst [vmem:[#allocation30_spill] sm:$0xff] %v16838_v36  ;;  %v5546_v51 = vrot.slane %v5544_v21, 7  ;;  %v5352_v39 = vadd.f32 %v16704_v59, %v5313_v6  ;;  %v12337_v14 = vpack.c.bf16 %v16838_v36, %v16838_v36  ;;  %v16846_v2 = vmax.f32 %v5349_v15, 0.0 }
 0x260   : > { %v5837_v33 = vsel %vm16781_vm10, %v5541_v48, %v5836_v19  ;;  %v5311_v3 = vadd.f32 %v5210_v55, %v16743_v42  ;;  %v5567_v37 = vsel %vm13960_vm15, %v5559_v18, %v5566_v0  ;;  %v5848_v5 = vsel %vm13908_vm5, %v5568_v25, %v5847_v56  ;;  %v13010_v6 = vpop.f32.mrf.mxu0  ;;  %v5857_v25 = vld [vmem:[#allocation2 + $0x48] sm:$0xf] }
 0x261   : > { %20832 = vst [vmem:[#allocation42_spill] sm:$0xff] %v16846_v2  ;;  %5838 = vst [vmem:[#allocation2 + $0x24] sm:$0xf] %v5837_v33  ;;  %v5549_v41 = vor.u32 %v5547_v60, %v5546_v51  ;;  %v5551_v63 = vrot.slane %v5546_v51, 4  ;;  %v5587_v61 = vshrl.u32 %v12337_v14, 16  ;;  %v5590_v19 = vshll.u32 %v12337_v14, 16 }
 0x262   : > { %5846 = vst.msk [vmem:[#allocation2 + $0x34] sm:$0xf] %vm386_vm1, %v5567_v37  ;;  %5849 = vst [vmem:[#allocation2 + $0x38] sm:$0x1] %v5848_v5  ;;  %v12335_v26 = vpack.c.bf16 %v16846_v2, %v16846_v2  ;;  %v16856_v21 = vmax.f32 %v5352_v39, 0.0  ;;  %v5350_v18 = vadd.f32 %v16704_v59, %v5311_v3  ;;  %v5316_v60 = vadd.f32 %v13009_v40, %v16746_v11  ;;  %v20835_v33 = vld [vmem:[#allocation33_spill] sm:$0xff]  ;;  %v12984_v40 = vpop.f32.mrf.mxu1 }
 0x263   : > { %v5550_v42 = vsel %vm13960_vm15, %v5542_v1, %v5549_v41  ;;  %v5841_v55 = vsel %vm13908_vm5, %v5551_v63, %v5840_v57  ;;  %v5589_v48 = vrot.slane %v5587_v61, 7  ;;  %v16873_v11 = vadd.f32 %v12983_v9, %v20835_v33  ;;  %v5850_v5 = vld [vmem:[#allocation2 + $0x3c] sm:$0xf]  ;;  %v5861_v33 = vld [vmem:[#allocation2 + $0x50] sm:$0x1]  ;;  %v20837_v61 = vld [vmem:[#allocation35_spill] sm:$0xff] }
 0x264   : > { %20833 = vst [vmem:[#allocation22_spill] sm:$0xff] %v16856_v21  ;;  %5839 = vst.msk [vmem:[#allocation2 + $0x28] sm:$0xf] %vm386_vm1, %v5550_v42  ;;  %v5570_v56 = vshrl.u32 %v12335_v26, 16  ;;  %v5573_v15 = vshll.u32 %v12335_v26, 16  ;;  %v12338_v1 = vpack.c.bf16 %v16856_v21, %v16856_v21  ;;  %v16869_v51 = vmax.f32 %v5350_v18, 0.0  ;;  %v5226_v42 = vpop.f32.mrf.mxu0 }
 0x265   : > { %5842 = vst [vmem:[#allocation2 + $0x2c] sm:$0x1] %v5841_v55  ;;  %v5355_v39 = vadd.f32 %v16704_v59, %v5316_v60  ;;  %v5592_v57 = vor.u32 %v5590_v19, %v5589_v48  ;;  %v5593_v14 = vrot.slane %v5589_v48, 4  ;;  %v5314_v37 = vadd.f32 %v5223_v38, %v16749_v13  ;;  %v17048_v36 = vld [vmem:[#allocation2 + $0x30] sm:$0xf] }
 0x266   : > { %20834 = vst [vmem:[#allocation16_spill] sm:$0xff] %v16869_v51  ;;  %v5572_v3 = vrot.slane %v5570_v56, 7  ;;  %v5595_v41 = vshrl.u32 %v12338_v1, 16  ;;  %v5598_v63 = vshll.u32 %v12338_v1, 16  ;;  %v12336_v26 = vpack.c.bf16 %v16869_v51, %v16869_v51  ;;  %v4836_v56 = vpop.f32.mrf.mxu1  ;;  %v17559_v16 = vld [vmem:[#allocation2 + $0x30] sm:$0xf] }
 0x267   : > { %v5858_v9 = vsel %vm16781_vm10, %v5592_v57, %v5857_v25  ;;  %v16882_v19 = vmax.f32 %v5355_v39, 0.0  ;;  %v5353_v48 = vadd.f32 %v16704_v59, %v5314_v37  ;;  %v16890_v25 = vadd.f32 %v4833_v30, %v20837_v61  ;;  %v13013_v37 = vpop.f32.mrf.mxu0  ;;  %v12021_v30 = vld [vmem:[%s20354_s3 + $0xc] sm:$0xf] }
 0x268   : > { %v5575_v55 = vor.u32 %v5573_v15, %v5572_v3  ;;  %v5576_v18 = vrot.slane %v5572_v3, 4  ;;  %5859 = vst [vmem:[#allocation2 + $0x48] sm:$0xf] %v5858_v9  ;;  %v5597_v60 = vrot.slane %v5595_v41, 7  ;;  %v5578_v13 = vshrl.u32 %v12336_v26, 16  ;;  %13456 = vmatprep.subr.msk.bf16.mxu0 %vm6466_vm6, %v12021_v30 }
 0x269   : > { %20836 = vst [vmem:[#allocation13_spill] sm:$0xff] %v16882_v19  ;;  %v5581_v38 = vshll.u32 %v12336_v26, 16  ;;  %v12341_v0 = vpack.c.bf16 %v16882_v19, %v16882_v19  ;;  %v5317_v15 = vadd.f32 %v13010_v6, %v16757_v62  ;;  %v16893_v41 = vmax.f32 %v5353_v48, 0.0  ;;  %v5854_v26 = vld [vmem:[#allocation2 + $0x44] sm:$0x1] }
 0x26a   : > { %v5851_v1 = vsel %vm16781_vm10, %v5575_v55, %v5850_v5  ;;  %v5600_v39 = vor.u32 %v5598_v63, %v5597_v60  ;;  %v5602_v57 = vrot.slane %v5597_v60, 4  ;;  %v5580_v3 = vrot.slane %v5578_v13, 7  ;;  %v20839_v55 = vld [vmem:[#allocation37_spill] sm:$0xff]  ;;  %v12987_v60 = vpop.f32.mrf.mxu1 }
 0x26b   : > { %5852 = vst [vmem:[#allocation2 + $0x3c] sm:$0xf] %v5851_v1  ;;  %20838 = vst [vmem:[#allocation44_spill] sm:$0xff] %v16893_v41  ;;  %v5621_v9 = vshrl.u32 %v12341_v0, 16  ;;  %v5624_v46 = vshll.u32 %v12341_v0, 16  ;;  %v5356_v5 = vadd.f32 %v16704_v59, %v5317_v15  ;;  %v16897_v7 = vadd.f32 %v12984_v40, %v20839_v55 }
 0x26c   : > { %v5601_v62 = vsel %vm13960_vm15, %v5593_v14, %v5600_v39  ;;  %v5862_v6 = vsel %vm13908_vm5, %v5602_v57, %v5861_v33  ;;  %v5583_v63 = vor.u32 %v5581_v38, %v5580_v3  ;;  %v5585_v61 = vrot.slane %v5580_v3, 4  ;;  %v5871_v1 = vld [vmem:[#allocation2 + $0x60] sm:$0xf]  ;;  %v16923_v39 = vld [vmem:[#allocation2 + $0xc] sm:$0xf]  ;;  %v5239_v57 = vpop.f32.mrf.mxu0 }
 0x26d   : > { %5860 = vst.msk [vmem:[#allocation2 + $0x4c] sm:$0xf] %vm386_vm1, %v5601_v62  ;;  %5863 = vst [vmem:[#allocation2 + $0x50] sm:$0x1] %v5862_v6  ;;  %v16908_v0 = vrot.slane %v5621_v9, 7  ;;  %v12339_v40 = vpack.c.bf16 %v16893_v41, %v16893_v41  ;;  %v16912_v13 = vmax.f32 %v5356_v5, 0.0  ;;  %v5315_v14 = vadd.f32 %v5226_v42, %v16759_v22  ;;  %v4849_v9 = vpop.f32.mrf.mxu1 }
 0x26e   : > { %v5584_v48 = vsel %vm13960_vm15, %v5576_v18, %v5583_v63  ;;  %v5855_v38 = vsel %vm13908_vm5, %v5585_v61, %v5854_v26  ;;  %v16920_v33 = vadd.f32 %v4836_v56, %v16715_v47  ;;  %v5320_v15 = vadd.f32 %v13013_v37, %v16762_v58  ;;  %v16934_v37 = vld [vmem:[#allocation2 + $0x10] sm:$0xf]  ;;  %v5864_v55 = vld [vmem:[#allocation2 + $0x54] sm:$0xf]  ;;  %v20843_v26 = vld [vmem:[#allocation47_spill] sm:$0xff] }
 0x26f   : > { %20840 = vst [vmem:[#allocation25_spill] sm:$0xff] %v16912_v13  ;;  %5853 = vst.msk [vmem:[#allocation2 + $0x40] sm:$0xf] %vm386_vm1, %v5584_v48  ;;  %v5626_v22 = vor.u32 %v5624_v46, %v16908_v0  ;;  %v5627_v42 = vrot.slane %v16908_v0, 4  ;;  %v5604_v18 = vshrl.u32 %v12339_v40, 16  ;;  %v5607_v3 = vshll.u32 %v12339_v40, 16 }
 0x270   : > { %5856 = vst [vmem:[#allocation2 + $0x44] sm:$0x1] %v5855_v38  ;;  %v12342_v47 = vpack.c.bf16 %v16912_v13, %v16912_v13  ;;  %v5354_v58 = vadd.f32 %v16704_v59, %v5315_v14  ;;  %v5359_v56 = vadd.f32 %v16704_v59, %v5320_v15  ;;  %v16946_v40 = vld [vmem:[#allocation2 + $0x18] sm:$0xf]  ;;  %v13014_v14 = vpop.f32.mrf.mxu0  ;;  %v11941_v15 = vcombine.low %v16923_v39, %v16934_v37 }
 0x271   : > { %v5872_v46 = vsel %vm16781_vm10, %v5626_v22, %v5871_v1  ;;  %v16938_v5 = vrot.slane %v5604_v18, 7 }
 0x272   : > { %5873 = vst [vmem:[#allocation2 + $0x60] sm:$0xf] %v5872_v46  ;;  %v5629_v6 = vshrl.u32 %v12342_v47, 16  ;;  %v5632_v63 = vshll.u32 %v12342_v47, 16  ;;  %v16942_v61 = vmax.f32 %v5354_v58, 0.0  ;;  %v16944_v0 = vmax.f32 %v5359_v56, 0.0  ;;  %13064 = vmatmul.mubr.msk.bf16.vlgmr.msra.gmra.mxu0 %vm6417_vm8, %v11941_v15  ;;  %v5242_v19 = vpop.f32.mrf.mxu0 }
 0x273   : > { %v5609_v48 = vor.u32 %v5607_v3, %v16938_v5  ;;  %v5610_v38 = vrot.slane %v16938_v5, 4  ;;  %v16959_v56 = vld [vmem:[#allocation2 + $0x1c] sm:$0xf]  ;;  %v12988_v3 = vpop.f32.mrf.mxu1  ;;  %v5875_v5 = vld [vmem:[#allocation2 + $0x68] sm:$0x1] }
 0x274   : > { %20841 = vst [vmem:[#allocation15_spill] sm:$0xff] %v16942_v61  ;;  %20842 = vst [vmem:[#allocation32_spill] sm:$0xff] %v16944_v0  ;;  %v5631_v22 = vrot.slane %v5629_v6, 7  ;;  %v12340_v47 = vpack.c.bf16 %v16942_v61, %v16942_v61  ;;  %v12345_v58 = vpack.c.bf16 %v16944_v0, %v16944_v0  ;;  %v16965_v6 = vadd.f32 %v12987_v60, %v20843_v26 }
 0x275   : > { %v5865_v46 = vsel %vm16781_vm10, %v5609_v48, %v5864_v55  ;;  %v11942_v48 = vcombine.low %v16946_v40, %v16959_v56 }
 0x276   : > { %5866 = vst [vmem:[#allocation2 + $0x54] sm:$0xf] %v5865_v46  ;;  %v5634_v10 = vor.u32 %v5632_v63, %v5631_v22  ;;  %v5636_v1 = vrot.slane %v5631_v22, 4  ;;  %v5612_v62 = vshrl.u32 %v12340_v47, 16  ;;  %v5615_v30 = vshll.u32 %v12340_v47, 16  ;;  %v4852_v22 = vpop.f32.mrf.mxu1 }
 0x277   : > { %v5655_v13 = vshrl.u32 %v12345_v58, 16  ;;  %v5658_v41 = vshll.u32 %v12345_v58, 16  ;;  %v5318_v63 = vadd.f32 %v5239_v57, %v16765_v29  ;;  %v5868_v47 = vld [vmem:[#allocation2 + $0x5c] sm:$0x1]  ;;  %13067 = vmatprep.mubr.msk.bf16.mxu0 %vm6417_vm8, %v11942_v48  ;;  %v16982_v46 = vadd.f32 %v4849_v9, %v16619_v54  ;;  %v5885_v29 = vld [vmem:[#allocation2 + $0x78] sm:$0xf] }
 0x278   : > { %v5635_v60 = vsel %vm13960_vm15, %v5627_v42, %v5634_v10  ;;  %v5876_v26 = vsel %vm13908_vm5, %v5636_v1, %v5875_v5  ;;  %v5614_v15 = vrot.slane %v5612_v62, 7  ;;  %v5321_v10 = vadd.f32 %v13014_v14, %v16772_v44 }
 0x279   : > { %5874 = vst.msk [vmem:[#allocation2 + $0x64] sm:$0xf] %vm386_vm1, %v5635_v60  ;;  %5877 = vst [vmem:[#allocation2 + $0x68] sm:$0x1] %v5876_v26  ;;  %v16978_v58 = vrot.slane %v5655_v13, 7  ;;  %v16986_v42 = vadd.f32 %v12988_v3, %v16632_v49  ;;  %v5357_v57 = vadd.f32 %v16704_v59, %v5318_v63  ;;  %v5319_v5 = vadd.f32 %v5242_v19, %v16775_v4  ;;  %v13017_v60 = vpop.f32.mrf.mxu0 }
 0x27a   : > { %v5617_v62 = vor.u32 %v5615_v30, %v5614_v15  ;;  %v5619_v1 = vrot.slane %v5614_v15, 4  ;;  %v16990_v13 = vld [vmem:[#allocation2 + $0x24] sm:$0xf]  ;;  %v5360_v9 = vadd.f32 %v16704_v59, %v5321_v10  ;;  %v16996_v44 = vadd.f32 %v4852_v22, %v16720_v20  ;;  %v16998_v49 = vld [vmem:[#allocation2 + $0x28] sm:$0xf] }
 0x27b   : > { %v5660_v48 = vor.u32 %v5658_v41, %v16978_v58  ;;  %v17004_v19 = vmax.f32 %v5357_v57, 0.0  ;;  %v5358_v14 = vadd.f32 %v16704_v59, %v5319_v5  ;;  %v5324_v3 = vadd.f32 %v13017_v60, %v16873_v11  ;;  %v5255_v5 = vpop.f32.mrf.mxu0  ;;  %v5889_v26 = vld [vmem:[#allocation2 + $0x80] sm:$0x1] }
 0x27c   : > { %v5618_v30 = vsel %vm13960_vm15, %v5610_v38, %v5617_v62  ;;  %v5869_v4 = vsel %vm13908_vm5, %v5619_v1, %v5868_v47  ;;  %v17010_v20 = vmax.f32 %v5360_v9, 0.0  ;;  %v12991_v47 = vpop.f32.mrf.mxu1  ;;  %v11943_v1 = vcombine.low %v16990_v13, %v16998_v49 }
 0x27d   : > { %20844 = vst [vmem:[#allocation10_spill] sm:$0xff] %v17004_v19  ;;  %5867 = vst.msk [vmem:[#allocation2 + $0x58] sm:$0xf] %vm386_vm1, %v5618_v30  ;;  %v5886_v41 = vsel %vm16781_vm10, %v5660_v48, %v5885_v29  ;;  %v12343_v38 = vpack.c.bf16 %v17004_v19, %v17004_v19  ;;  %v17016_v15 = vmax.f32 %v5358_v14, 0.0  ;;  %v5363_v11 = vadd.f32 %v16704_v59, %v5324_v3 }
 0x27e   : > { %5870 = vst [vmem:[#allocation2 + $0x5c] sm:$0x1] %v5869_v4  ;;  %20845 = vst [vmem:[#allocation28_spill] sm:$0xff] %v17010_v20  ;;  %v12346_v62 = vpack.c.bf16 %v17010_v20, %v17010_v20  ;;  %13068 = vmatmul.mubr.msk.bf16.gmra.mxu0 %vm6417_vm8, %v11943_v1  ;;  %v17035_v4 = vadd.f32 %v12991_v47, %v16660_v23  ;;  %v6017_v1 = vshll.u32 %v16934_v37, 16  ;;  %v5939_v20 = vld [vmem:[#allocation2 + $0x14] sm:$0x1]  ;;  %v4865_v19 = vpop.f32.mrf.mxu1 }
 0x27f   : > { %5887 = vst [vmem:[#allocation2 + $0x78] sm:$0xf] %v5886_v41  ;;  %20846 = vst [vmem:[#allocation45_spill] sm:$0xff] %v17016_v15  ;;  %v5638_v29 = vshrl.u32 %v12343_v38, 16  ;;  %v5641_v57 = vshll.u32 %v12343_v38, 16  ;;  %v12344_v60 = vpack.c.bf16 %v17016_v15, %v17016_v15  ;;  %v17031_v30 = vmax.f32 %v5363_v11, 0.0 }
 0x280   : > { %v5663_v48 = vshrl.u32 %v12346_v62, 16  ;;  %v5666_v9 = vshll.u32 %v12346_v62, 16  ;;  %v5878_v41 = vld [vmem:[#allocation2 + $0x6c] sm:$0xf]  ;;  %v20848_v38 = vshrl.u32 %v16923_v39, 16  ;;  %v20849_v11 = vshll.u32 %v16923_v39, 16 }
 0x281   : > { %20847 = vst [vmem:[#allocation24_spill] sm:$0xff] %v17031_v30  ;;  %v5640_v14 = vrot.slane %v5638_v29, 7  ;;  %v5646_v3 = vshrl.u32 %v12344_v60, 16  ;;  %v5649_v10 = vshll.u32 %v12344_v60, 16  ;;  %v12349_v62 = vpack.c.bf16 %v17031_v30, %v17031_v30 }
 0x282   : > { %v6010_v22 = vrot.slane %v20848_v38, 4  ;;  %v5665_v63 = vrot.slane %v5663_v48, 7  ;;  %v6013_v55 = vrot.slane %v20849_v11, 5  ;;  %v20850_v60 = vshrl.u32 %v16934_v37, 16 }
 0x283   : > { %v5643_v23 = vor.u32 %v5641_v57, %v5640_v14  ;;  %v5644_v47 = vrot.slane %v5640_v14, 4  ;;  %v5648_v29 = vrot.slane %v5646_v3, 7  ;;  %v5689_v0 = vshrl.u32 %v12349_v62, 16  ;;  %v13018_v57 = vpop.f32.mrf.mxu0 }
 0x284   : > { %v6023_v18 = vrot.slane %v20850_v60, 4  ;;  %v5668_v54 = vor.u32 %v5666_v9, %v5665_v63  ;;  %v5670_v38 = vrot.slane %v5665_v63, 4  ;;  %v5692_v48 = vshll.u32 %v12349_v62, 16  ;;  %v17058_v62 = vld [vmem:[#allocation2 + $0x34] sm:$0xf] }
 0x285   : > { %v5879_v15 = vsel %vm16781_vm10, %v5643_v23, %v5878_v41  ;;  %v5651_v39 = vor.u32 %v5649_v10, %v5648_v29  ;;  %v5653_v11 = vrot.slane %v5648_v29, 4  ;;  %v6014_v61 = vor.u32 %v6013_v55, %v6010_v22  ;;  %v5258_v60 = vpop.f32.mrf.mxu0  ;;  %v17161_v41 = vld [vmem:[#allocation2 + $0x48] sm:$0xf] }
 0x286   : > { %5880 = vst [vmem:[#allocation2 + $0x6c] sm:$0xf] %v5879_v15  ;;  %v20851_v14 = vrot.slane %v16978_v58, 4  ;;  %v5890_v63 = vsel %vm13908_vm5, %v5670_v38, %v5889_v26  ;;  %v17056_v9 = vrot.slane %v5689_v0, 7  ;;  %v6019_v3 = vrot.slane %v6017_v1, 5  ;;  %v12992_v1 = vpop.f32.mrf.mxu1 }
 0x287   : > { %5891 = vst [vmem:[#allocation2 + $0x80] sm:$0x1] %v5890_v63  ;;  %v5652_v55 = vsel %vm13960_vm15, %v5644_v47, %v5651_v39  ;;  %v5883_v58 = vsel %vm13908_vm5, %v5653_v11, %v5882_v17  ;;  %v5899_v15 = vld [vmem:[#allocation2 + $0x90] sm:$0xf]  ;;  %v6015_v22 = vrot.slane %v6014_v61, 4  ;;  %v5322_v39 = vadd.f32 %v5255_v5, %v16890_v25 }
 0x288   : > { %v5669_v37 = vsel %vm13960_vm15, %v20851_v14, %v5668_v54  ;;  %v6027_v54 = vshll.u32 %v5939_v20, 16  ;;  %5881 = vst.msk [vmem:[#allocation2 + $0x70] sm:$0xf] %vm386_vm1, %v5652_v55  ;;  %5884 = vst [vmem:[#allocation2 + $0x74] sm:$0x1] %v5883_v58  ;;  %v5694_v0 = vor.u32 %v5692_v48, %v17056_v9  ;;  %v5695_v26 = vrot.slane %v17056_v9, 4 }
 0x289   : > { %5888 = vst.msk [vmem:[#allocation2 + $0x7c] sm:$0xf] %vm386_vm1, %v5669_v37  ;;  %v6024_v10 = vor.u32 %v6023_v18, %v6019_v3  ;;  %v6020_v47 = vsel %vm13953_vm14, %v6015_v22, %v6019_v3  ;;  %v5942_v20 = vld [vmem:[#allocation2 + $0x20] sm:$0x1]  ;;  %v11944_v18 = vcombine.low %v17048_v36, %v17058_v62  ;;  %v20853_v11 = vshrl.u32 %v16946_v40, 16 }
 0x28a   : > { %v6029_v29 = vrot.slane %v6027_v54, 5  ;;  %v5900_v38 = vsel %vm16781_vm10, %v5694_v0, %v5899_v15  ;;  %v20854_v37 = vshll.u32 %v16946_v40, 16  ;;  %v6041_v3 = vshll.u32 %v16959_v56, 16  ;;  %v4868_v54 = vpop.f32.mrf.mxu1 }
 0x28b   : > { %v6025_v48 = vrot.slane %v6024_v10, 4  ;;  %5901 = vst [vmem:[#allocation2 + $0x90] sm:$0xf] %v5900_v38  ;;  %v6034_v14 = vrot.slane %v20853_v11, 4  ;;  %v20855_v55 = vshrl.u32 %v16959_v56, 16  ;;  %13071 = vmatprep.mubr.msk.bf16.mxu0 %vm6417_vm8, %v11944_v18  ;;  %v5361_v22 = vadd.f32 %v16704_v59, %v5322_v39  ;;  %v13021_v11 = vpop.f32.mrf.mxu0 }
 0x28c   : > { %v6037_v63 = vrot.slane %v20854_v37, 5  ;;  %v6051_v25 = vshll.u32 %v5942_v20, 16  ;;  %v17090_v5 = vadd.f32 %v4865_v19, %v16674_v32  ;;  %v6043_v10 = vrot.slane %v6041_v3, 5  ;;  %v17093_v56 = vld [vmem:[#allocation2 + $0x3c] sm:$0xf] }
 0x28d   : > { %v6047_v58 = vrot.slane %v20855_v55, 4  ;;  %v6030_v15 = vsel %vm13953_vm14, %v6025_v48, %v6029_v29  ;;  %v5325_v38 = vadd.f32 %v13018_v57, %v16897_v7  ;;  %v17095_v37 = vmax.f32 %v5361_v22, 0.0  ;;  %v17104_v32 = vld [vmem:[%s20354_s3 + $0x10] sm:$0xf] }
 0x28e   : > { %v11909_v0 = vcombine.low %v6020_v47, %v6030_v15  ;;  %v6038_v40 = vor.u32 %v6037_v63, %v6034_v14  ;;  %v6053_v29 = vrot.slane %v6051_v25, 5  ;;  %v17098_v48 = vadd.f32 %v12992_v1, %v16684_v8 }
 0x28f   : > { %20856 = vst [vmem:[#allocation12_spill] sm:$0xff] %v17095_v37  ;;  %v5323_v20 = vadd.f32 %v5258_v60, %v16920_v33  ;;  %v6048_v7 = vor.u32 %v6047_v58, %v6043_v10  ;;  %v5364_v57 = vadd.f32 %v16704_v59, %v5325_v38  ;;  %v17109_v47 = vadd.f32 %v4868_v54, %v16740_v27  ;;  %v17116_v60 = vld [vmem:[#allocation2 + $0x40] sm:$0xf]  ;;  %v17136_v54 = vpop.f32.mrf.mxu0  ;;  %v5892_v38 = vld [vmem:[#allocation2 + $0x84] sm:$0xf] }
 0x290   : > { %13030 = vmatmul.mubr.msk.bf16.vlgmr.msra.gmra.mxu1 %vm6417_vm8, %v11909_v0  ;;  %v6039_v19 = vrot.slane %v6038_v40, 4  ;;  %v12347_v8 = vpack.c.bf16 %v17095_v37, %v17095_v37  ;;  %v5328_v1 = vadd.f32 %v13021_v11, %v16965_v6  ;;  %v5896_v27 = vld [vmem:[#allocation2 + $0x8c] sm:$0x1] }
 0x291   : > { %13096 = vmatpush3.bf16.msra.mxu1 %v16695_v28  ;;  %v5362_v33 = vadd.f32 %v16704_v59, %v5323_v20  ;;  %v6049_v14 = vrot.slane %v6048_v7, 4  ;;  %v17121_v63 = vmax.f32 %v5364_v57, 0.0  ;;  %v13022_v15 = vpop.f32.mrf.mxu0 }
 0x292   : > { %v6044_v39 = vsel %vm13953_vm14, %v6039_v19, %v6043_v10  ;;  %13457 = vmatprep.subr.msk.bf16.mxu1 %vm6466_vm6, %v17104_v32  ;;  %v5672_v28 = vshrl.u32 %v12347_v8, 16  ;;  %v5675_v3 = vshll.u32 %v12347_v8, 16  ;;  %v5367_v6 = vadd.f32 %v16704_v59, %v5328_v1 }
 0x293   : > { %20857 = vst [vmem:[#allocation14_spill] sm:$0xff] %v17121_v63  ;;  %v17126_v55 = vmax.f32 %v5362_v33, 0.0  ;;  %v6054_v58 = vsel %vm13953_vm14, %v6049_v14, %v6053_v29  ;;  %v12350_v22 = vpack.c.bf16 %v17121_v63, %v17121_v63  ;;  %v11945_v19 = vcombine.low %v17093_v56, %v17116_v60 }
 0x294   : > { %v5674_v0 = vrot.slane %v5672_v28, 7  ;;  %v11910_v40 = vcombine.low %v6044_v39, %v6054_v58  ;;  %v17142_v20 = vmax.f32 %v5367_v6, 0.0  ;;  %v5903_v39 = vld [vmem:[#allocation2 + $0x98] sm:$0x1]  ;;  %v20860_v28 = vshrl.u32 %v16990_v13, 16 }
 0x295   : > { %20858 = vst [vmem:[#allocation17_spill] sm:$0xff] %v17126_v55  ;;  %v12348_v59 = vpack.c.bf16 %v17126_v55, %v17126_v55  ;;  %v5697_v11 = vshrl.u32 %v12350_v22, 16  ;;  %v5700_v29 = vshll.u32 %v12350_v22, 16  ;;  %13072 = vmatmul.mubr.msk.bf16.gmra.mxu0 %vm6417_vm8, %v11945_v19  ;;  %v20861_v58 = vshll.u32 %v16990_v13, 16 }
 0x296   : > { %20859 = vst [vmem:[#allocation46_spill] sm:$0xff] %v17142_v20  ;;  %v5677_v7 = vor.u32 %v5675_v3, %v5674_v0  ;;  %v5678_v57 = vrot.slane %v5674_v0, 4  ;;  %13033 = vmatprep.mubr.msk.bf16.mxu1 %vm6417_vm8, %v11910_v40  ;;  %v12353_v14 = vpack.c.bf16 %v17142_v20, %v17142_v20  ;;  %v6058_v6 = vrot.slane %v20860_v28, 4  ;;  %v17156_v40 = vld [vmem:[#allocation2 + $0x2c] sm:$0x1] }
 0x297   : > { %v5680_v8 = vshrl.u32 %v12348_v59, 16  ;;  %v5683_v33 = vshll.u32 %v12348_v59, 16  ;;  %v5699_v1 = vrot.slane %v5697_v11, 7  ;;  %v6061_v22 = vrot.slane %v20861_v58, 5  ;;  %v17424_v20 = vld [vmem:[#allocation2 + $0x80] sm:$0x1] }
 0x298   : > { %v5893_v3 = vsel %vm16781_vm10, %v5677_v7, %v5892_v38  ;;  %v6065_v59 = vshll.u32 %v16998_v49, 16  ;;  %v20862_v11 = vshrl.u32 %v16998_v49, 16  ;;  %v5723_v28 = vshrl.u32 %v12353_v14, 16 }
 0x299   : > { %v5682_v0 = vrot.slane %v5680_v8, 7  ;;  %5894 = vst [vmem:[#allocation2 + $0x84] sm:$0xf] %v5893_v3  ;;  %v5702_v19 = vor.u32 %v5700_v29, %v5699_v1  ;;  %v5704_v25 = vrot.slane %v5699_v1, 4  ;;  %v5726_v18 = vshll.u32 %v12353_v14, 16 }
 0x29a   : > { %v6071_v10 = vrot.slane %v20862_v11, 4  ;;  %v6062_v61 = vor.u32 %v6061_v22, %v6058_v6  ;;  %v6067_v17 = vrot.slane %v6065_v59, 5  ;;  %v17169_v7 = vrot.slane %v5723_v28, 7  ;;  %v17172_v8 = vld [vmem:[#allocation2 + $0x4c] sm:$0xf] }
 0x29b   : > { %v5685_v13 = vor.u32 %v5683_v33, %v5682_v0  ;;  %v5687_v58 = vrot.slane %v5682_v0, 4  ;;  %v5703_v38 = vsel %vm13960_vm15, %v5695_v26, %v5702_v19  ;;  %v5904_v49 = vsel %vm13908_vm5, %v5704_v25, %v5903_v39  ;;  %v5274_v33 = vpop.f32.mrf.mxu0  ;;  %v5913_v26 = vld [vmem:[#allocation2 + $0xa8] sm:$0xf] }
 0x29c   : > { %v6075_v29 = vshll.u32 %v17156_v40, 16  ;;  %5902 = vst.msk [vmem:[#allocation2 + $0x94] sm:$0xf] %vm386_vm1, %v5703_v38  ;;  %5905 = vst [vmem:[#allocation2 + $0x98] sm:$0x1] %v5904_v49  ;;  %v6063_v14 = vrot.slane %v6062_v61, 4  ;;  %v6072_v6 = vor.u32 %v6071_v10, %v6067_v17  ;;  %v5728_v25 = vor.u32 %v5726_v18, %v17169_v7 }
 0x29d   : > { %v5686_v1 = vsel %vm13960_vm15, %v5678_v57, %v5685_v13  ;;  %v5897_v9 = vsel %vm13908_vm5, %v5687_v58, %v5896_v27  ;;  %v5729_v39 = vrot.slane %v17169_v7, 4  ;;  %v17187_v61 = vld [vmem:[#allocation2 + $0x38] sm:$0x1]  ;;  %v11946_v18 = vcombine.low %v17161_v41, %v17172_v8 }
 0x29e   : > { %5895 = vst.msk [vmem:[#allocation2 + $0x88] sm:$0xf] %vm386_vm1, %v5686_v1  ;;  %5898 = vst [vmem:[#allocation2 + $0x8c] sm:$0x1] %v5897_v9  ;;  %v6077_v22 = vrot.slane %v6075_v29, 5  ;;  %v6068_v0 = vsel %vm13953_vm14, %v6063_v14, %v6067_v17  ;;  %v6073_v57 = vrot.slane %v6072_v6, 4  ;;  %v5914_v10 = vsel %vm16781_vm10, %v5728_v25, %v5913_v26  ;;  %v13025_v17 = vpop.f32.mrf.mxu0 }
 0x29f   : > { %v5326_v11 = vadd.f32 %v17136_v54, %v16982_v46  ;;  %v20863_v19 = vshrl.u32 %v17048_v36, 16  ;;  %5915 = vst [vmem:[#allocation2 + $0xa8] sm:$0xf] %v5914_v10  ;;  %v20864_v58 = vshll.u32 %v17048_v36, 16  ;;  %v6089_v49 = vshll.u32 %v17058_v62, 16  ;;  %13075 = vmatprep.mubr.msk.bf16.mxu0 %vm6417_vm8, %v11946_v18 }
 0x2a0   : > { %v6078_v13 = vsel %vm13953_vm14, %v6073_v57, %v6077_v22  ;;  %v20865_v29 = vshrl.u32 %v17058_v62, 16  ;;  %v17204_v9 = vld [vmem:[#allocation2 + $0x54] sm:$0xf]  ;;  %v17210_v46 = vld [vmem:[%s20353_s2] ss:$0 sm:$0xff]  ;;  %v6099_v36 = vshll.u32 %v17187_v61, 16  ;;  %v5329_v14 = vadd.f32 %v13022_v15, %v16986_v42 }
 0x2a1   : > { %v6082_v28 = vrot.slane %v20863_v19, 4  ;;  %v6085_v38 = vrot.slane %v20864_v58, 5  ;;  %v11911_v26 = vcombine.low %v6068_v0, %v6078_v13  ;;  %v5365_v54 = vadd.f32 %v17210_v46, %v5326_v11  ;;  %v17217_v0 = vld [vmem:[#allocation2 + $0x58] sm:$0xf]  ;;  %v5917_v11 = vld [vmem:[#allocation2 + $0xb0] sm:$0x1] }
 0x2a2   : > { %v6095_v1 = vrot.slane %v20865_v29, 4  ;;  %v6091_v25 = vrot.slane %v6089_v49, 5  ;;  %v5327_v62 = vadd.f32 %v5274_v33, %v16996_v44  ;;  %v5332_v22 = vadd.f32 %v13025_v17, %v17035_v4 }
 0x2a3   : > { %v6086_v6 = vor.u32 %v6085_v38, %v6082_v28  ;;  %13034 = vmatmul.mubr.msk.bf16.gmra.mxu1 %vm6417_vm8, %v11911_v26  ;;  %v17220_v57 = vmax.f32 %v5365_v54, 0.0  ;;  %v6101_v10 = vrot.slane %v6099_v36, 5  ;;  %v5368_v18 = vadd.f32 %v17210_v46, %v5329_v14  ;;  %v5287_v28 = vpop.f32.mrf.mxu0 }
 0x2a4   : > { %v6096_v13 = vor.u32 %v6095_v1, %v6091_v25  ;;  %v5366_v42 = vadd.f32 %v17210_v46, %v5327_v62  ;;  %v5371_v15 = vadd.f32 %v17210_v46, %v5332_v22  ;;  %v11947_v33 = vcombine.low %v17204_v9, %v17217_v0 }
 0x2a5   : > { %20866 = vst [vmem:[#allocation18_spill] sm:$0xff] %v17220_v57  ;;  %v6087_v19 = vrot.slane %v6086_v6, 4  ;;  %v12351_v44 = vpack.c.bf16 %v17220_v57, %v17220_v57  ;;  %v17228_v4 = vmax.f32 %v5368_v18, 0.0  ;;  %v6113_v59 = vshll.u32 %v17116_v60, 16 }
 0x2a6   : > { %v6097_v58 = vrot.slane %v6096_v13, 4  ;;  %v17234_v38 = vmax.f32 %v5366_v42, 0.0  ;;  %v17236_v49 = vmax.f32 %v5371_v15, 0.0  ;;  %v5906_v13 = vld [vmem:[#allocation2 + $0x9c] sm:$0xf]  ;;  %13076 = vmatmul.mubr.msk.bf16.gmra.mxu0 %vm6417_vm8, %v11947_v33  ;;  %v6243_v63 = vshll.u32 %v17424_v20, 16 }
 0x2a7   : > { %20867 = vst [vmem:[#allocation48_spill] sm:$0xff] %v17228_v4  ;;  %v6092_v17 = vsel %vm13953_vm14, %v6087_v19, %v6091_v25  ;;  %v5706_v29 = vshrl.u32 %v12351_v44, 16  ;;  %v5709_v1 = vshll.u32 %v12351_v44, 16  ;;  %v12354_v54 = vpack.c.bf16 %v17228_v4, %v17228_v4 }
 0x2a8   : > { %20868 = vst [vmem:[#allocation20_spill] sm:$0xff] %v17234_v38  ;;  %20869 = vst [vmem:[#allocation26_spill] sm:$0xff] %v17236_v49  ;;  %v6102_v36 = vsel %vm13953_vm14, %v6097_v58, %v6101_v10  ;;  %v12352_v6 = vpack.c.bf16 %v17234_v38, %v17234_v38  ;;  %v12357_v25 = vpack.c.bf16 %v17236_v49, %v17236_v49 }
 0x2a9   : > { %v5708_v62 = vrot.slane %v5706_v29, 7  ;;  %v11912_v22 = vcombine.low %v6092_v17, %v6102_v36  ;;  %v5731_v18 = vshrl.u32 %v12354_v54, 16  ;;  %v5734_v19 = vshll.u32 %v12354_v54, 16 }
 0x2aa   : > { %v5714_v42 = vshrl.u32 %v12352_v6, 16  ;;  %v5717_v15 = vshll.u32 %v12352_v6, 16  ;;  %v5757_v44 = vshrl.u32 %v12357_v25, 16  ;;  %v5760_v26 = vshll.u32 %v12357_v25, 16 }
 0x2ab   : > { %v5711_v10 = vor.u32 %v5709_v1, %v5708_v62  ;;  %v5712_v58 = vrot.slane %v5708_v62, 4  ;;  %13037 = vmatprep.mubr.msk.bf16.mxu1 %vm6417_vm8, %v11912_v22  ;;  %v5733_v14 = vrot.slane %v5731_v18, 7  ;;  %v20870_v17 = vshrl.u32 %v17093_v56, 16  ;;  %v5910_v22 = vld [vmem:[#allocation2 + $0xa4] sm:$0x1] }
 0x2ac   : > { %v5716_v27 = vrot.slane %v5714_v42, 7  ;;  %v17253_v29 = vrot.slane %v5757_v44, 7  ;;  %v20871_v36 = vshll.u32 %v17093_v56, 16  ;;  %v5927_v18 = vld [vmem:[#allocation2 + $0xc0] sm:$0xf] }
 0x2ad   : > { %v6106_v54 = vrot.slane %v20870_v17, 4  ;;  %v5907_v1 = vsel %vm16781_vm10, %v5711_v10, %v5906_v13  ;;  %v5736_v25 = vor.u32 %v5734_v19, %v5733_v14  ;;  %v5738_v62 = vrot.slane %v5733_v14, 4  ;;  %v17265_v56 = vld [vmem:[#allocation2 + $0x44] sm:$0x1]  ;;  %v13026_v13 = vpop.f32.mrf.mxu0 }
 0x2ae   : > { %v6109_v6 = vrot.slane %v20871_v36, 5  ;;  %5908 = vst [vmem:[#allocation2 + $0x9c] sm:$0xf] %v5907_v1  ;;  %v5719_v42 = vor.u32 %v5717_v15, %v5716_v27  ;;  %v5721_v44 = vrot.slane %v5716_v27, 4  ;;  %v5762_v3 = vor.u32 %v5760_v26, %v17253_v29  ;;  %v17267_v36 = vld [vmem:[#allocation2 + $0x60] sm:$0xf] }
 0x2af   : > { %v5737_v14 = vsel %vm13960_vm15, %v5729_v39, %v5736_v25  ;;  %v5918_v33 = vsel %vm13908_vm5, %v5738_v62, %v5917_v11  ;;  %v6115_v15 = vrot.slane %v6113_v59, 5  ;;  %v17275_v27 = vld [vmem:[#allocation2 + $0x64] sm:$0xf]  ;;  %v20872_v39 = vshrl.u32 %v17116_v60, 16  ;;  %v17294_v62 = vld [vmem:[#allocation2 + $0x50] sm:$0x1] }
 0x2b0   : > { %v6110_v19 = vor.u32 %v6109_v6, %v6106_v54  ;;  %5916 = vst.msk [vmem:[#allocation2 + $0xac] sm:$0xf] %vm386_vm1, %v5737_v14  ;;  %5919 = vst [vmem:[#allocation2 + $0xb0] sm:$0x1] %v5918_v33  ;;  %v5720_v26 = vsel %vm13960_vm15, %v5712_v58, %v5719_v42  ;;  %v5911_v10 = vsel %vm13908_vm5, %v5721_v44, %v5910_v22  ;;  %v6123_v11 = vshll.u32 %v17265_v56, 16  ;;  %v5290_v22 = vpop.f32.mrf.mxu0 }
 0x2b1   : > { %v5928_v7 = vsel %vm16781_vm10, %v5762_v3, %v5927_v18  ;;  %v6119_v1 = vrot.slane %v20872_v39, 4  ;;  %5909 = vst.msk [vmem:[#allocation2 + $0xa0] sm:$0xf] %vm386_vm1, %v5720_v26  ;;  %5912 = vst [vmem:[#allocation2 + $0xa4] sm:$0x1] %v5911_v10  ;;  %v11948_v3 = vcombine.low %v17267_v36, %v17275_v27  ;;  %v5330_v60 = vadd.f32 %v5287_v28, %v17090_v5 }
 0x2b2   : > { %5929 = vst [vmem:[#allocation2 + $0xc0] sm:$0xf] %v5928_v7  ;;  %v6111_v59 = vrot.slane %v6110_v19, 4  ;;  %v6125_v42 = vrot.slane %v6123_v11, 5  ;;  %v20873_v44 = vshrl.u32 %v17161_v41, 16  ;;  %v20874_v33 = vshll.u32 %v17161_v41, 16 }
 0x2b3   : > { %v6120_v6 = vor.u32 %v6119_v1, %v6115_v15  ;;  %v17302_v26 = vld [vmem:[#allocation2 + $0x6c] sm:$0xf]  ;;  %13079 = vmatprep.mubr.msk.bf16.mxu0 %vm6417_vm8, %v11948_v3  ;;  %v5369_v5 = vadd.f32 %v17210_v46, %v5330_v60  ;;  %v6137_v28 = vshll.u32 %v17172_v8, 16  ;;  %v20875_v7 = vshrl.u32 %v17172_v8, 16 }
 0x2b4   : > { %v6116_v18 = vsel %vm13953_vm14, %v6111_v59, %v6115_v15  ;;  %v6130_v14 = vrot.slane %v20873_v44, 4  ;;  %v6133_v19 = vrot.slane %v20874_v33, 5  ;;  %v6147_v1 = vshll.u32 %v17294_v62, 16  ;;  %v17316_v33 = vld [vmem:[#allocation2 + $0x70] sm:$0xf] }
 0x2b5   : > { %v6121_v10 = vrot.slane %v6120_v6, 4  ;;  %v6143_v39 = vrot.slane %v20875_v7, 4  ;;  %v5333_v59 = vadd.f32 %v13026_v13, %v17098_v48  ;;  %v5331_v11 = vadd.f32 %v5290_v22, %v17109_v47  ;;  %v17351_v22 = vld [vmem:[#allocation2 + $0x78] sm:$0xf]  ;;  %v17430_v57 = vld [vmem:[#allocation2 + $0x9c] sm:$0xf] }
 0x2b6   : > { %v6134_v15 = vor.u32 %v6133_v19, %v6130_v14  ;;  %v17314_v6 = vmax.f32 %v5369_v5, 0.0  ;;  %v6139_v3 = vrot.slane %v6137_v28, 5  ;;  %v6149_v7 = vrot.slane %v6147_v1, 5 }
 0x2b7   : > { %v6126_v44 = vsel %vm13953_vm14, %v6121_v10, %v6125_v42  ;;  %v5372_v14 = vadd.f32 %v17210_v46, %v5333_v59  ;;  %v5370_v47 = vadd.f32 %v17210_v46, %v5331_v11  ;;  %v11949_v10 = vcombine.low %v17302_v26, %v17316_v33 }
 0x2b8   : > { %20876 = vst [vmem:[#allocation39_spill] sm:$0xff] %v17314_v6  ;;  %v11913_v25 = vcombine.low %v6116_v18, %v6126_v44  ;;  %v6135_v58 = vrot.slane %v6134_v15, 4  ;;  %v12355_v48 = vpack.c.bf16 %v17314_v6, %v17314_v6  ;;  %v6144_v13 = vor.u32 %v6143_v39, %v6139_v3  ;;  %v17349_v18 = vld [vmem:[#allocation2 + $0x5c] sm:$0x1] }
 0x2b9   : > { %v17327_v19 = vmax.f32 %v5372_v14, 0.0  ;;  %v17332_v39 = vmax.f32 %v5370_v47, 0.0  ;;  %13080 = vmatmul.mubr.msk.bf16.gmra.mxu0 %vm6417_vm8, %v11949_v10  ;;  %v20880_v59 = vshll.u32 %v17204_v9, 16  ;;  %v20881_v17 = vshrl.u32 %v17217_v0, 16 }
 0x2ba   : > { %13038 = vmatmul.mubr.msk.bf16.gmra.mxu1 %vm6417_vm8, %v11913_v25  ;;  %v6140_v42 = vsel %vm13953_vm14, %v6135_v58, %v6139_v3  ;;  %v5740_v5 = vshrl.u32 %v12355_v48, 16  ;;  %v5743_v28 = vshll.u32 %v12355_v48, 16  ;;  %v6145_v15 = vrot.slane %v6144_v13, 4  ;;  %v5920_v3 = vld [vmem:[#allocation2 + $0xb4] sm:$0xf] }
 0x2bb   : > { %20877 = vst [vmem:[#allocation40_spill] sm:$0xff] %v17327_v19  ;;  %20878 = vst [vmem:[#allocation41_spill] sm:$0xff] %v17332_v39  ;;  %v12358_v25 = vpack.c.bf16 %v17327_v19, %v17327_v19  ;;  %v20879_v58 = vshrl.u32 %v17204_v9, 16  ;;  %v6157_v11 = vrot.slane %v20880_v59, 5  ;;  %v12356_v13 = vpack.c.bf16 %v17332_v39, %v17332_v39 }
 0x2bc   : > { %v5742_v44 = vrot.slane %v5740_v5, 7  ;;  %v6150_v14 = vsel %vm13953_vm14, %v6145_v15, %v6149_v7  ;;  %v6161_v48 = vshll.u32 %v17217_v0, 16  ;;  %v6227_v49 = vshll.u32 %v17351_v22, 16 }
 0x2bd   : > { %v6154_v1 = vrot.slane %v20879_v58, 4  ;;  %v11914_v47 = vcombine.low %v6140_v42, %v6150_v14  ;;  %v5765_v46 = vshrl.u32 %v12358_v25, 16  ;;  %v5768_v10 = vshll.u32 %v12358_v25, 16  ;;  %v17357_v14 = vld [vmem:[#allocation2 + $0x7c] sm:$0xf] }
 0x2be   : > { %v5745_v59 = vor.u32 %v5743_v28, %v5742_v44  ;;  %v5746_v5 = vrot.slane %v5742_v44, 4  ;;  %v5748_v60 = vshrl.u32 %v12356_v13, 16  ;;  %v5751_v54 = vshll.u32 %v12356_v13, 16  ;;  %v17411_v44 = vld [vmem:[#allocation2 + $0x94] sm:$0xf] }
 0x2bf   : > { %v6158_v58 = vor.u32 %v6157_v11, %v6154_v1  ;;  %13041 = vmatprep.mubr.msk.bf16.mxu1 %vm6417_vm8, %v11914_v47  ;;  %v5767_v7 = vrot.slane %v5765_v46, 7  ;;  %v6167_v42 = vrot.slane %v20881_v17, 4  ;;  %v5931_v1 = vld [vmem:[#allocation2 + $0xc8] sm:$0x1]  ;;  %v6171_v28 = vshll.u32 %v17349_v18, 16 }
 0x2c0   : > { %v5921_v25 = vsel %vm16781_vm10, %v5745_v59, %v5920_v3  ;;  %v5750_v11 = vrot.slane %v5748_v60, 7  ;;  %v5924_v47 = vld [vmem:[#allocation2 + $0xbc] sm:$0x1]  ;;  %v20882_v45 = vrot.slane %v17253_v29, 4  ;;  %v20885_v34 = vshrl.u32 %v17275_v27, 16 }
 0x2c1   : > { %v6159_v15 = vrot.slane %v6158_v58, 4  ;;  %5922 = vst [vmem:[#allocation2 + $0xb4] sm:$0xf] %v5921_v25  ;;  %v5770_v13 = vor.u32 %v5768_v10, %v5767_v7  ;;  %v5772_v46 = vrot.slane %v5767_v7, 4  ;;  %v6163_v58 = vrot.slane %v6161_v48, 5 }
 0x2c2   : > { %v5753_v19 = vor.u32 %v5751_v54, %v5750_v11  ;;  %v5755_v17 = vrot.slane %v5750_v11, 4  ;;  %v6173_v6 = vrot.slane %v6171_v28, 5  ;;  %v17373_v48 = vld [vmem:[#allocation2 + $0x68] sm:$0x1]  ;;  %v17375_v7 = vld [vmem:[#allocation2 + $0x84] sm:$0xf] }
 0x2c3   : > { %v5771_v60 = vsel %vm13960_vm15, %v20882_v45, %v5770_v13  ;;  %v5932_v3 = vsel %vm13908_vm5, %v5772_v46, %v5931_v1  ;;  %v6164_v10 = vsel %vm13953_vm14, %v6159_v15, %v6163_v58  ;;  %v6168_v59 = vor.u32 %v6167_v42, %v6163_v58  ;;  %v17377_v54 = vld [vmem:[#allocation2 + $0x88] sm:$0xf] }
 0x2c4   : > { %5930 = vst.msk [vmem:[#allocation2 + $0xc4] sm:$0xf] %vm386_vm1, %v5771_v60  ;;  %5933 = vst [vmem:[#allocation2 + $0xc8] sm:$0x1] %v5932_v3  ;;  %v5754_v29 = vsel %vm13960_vm15, %v5746_v5, %v5753_v19  ;;  %v5925_v25 = vsel %vm13908_vm5, %v5755_v17, %v5924_v47  ;;  %v11950_v1 = vcombine.low %v17351_v22, %v17357_v14  ;;  %v20883_v15 = vshrl.u32 %v17267_v36, 16 }
 0x2c5   : > { %5923 = vst.msk [vmem:[#allocation2 + $0xb8] sm:$0xf] %vm386_vm1, %v5754_v29  ;;  %5926 = vst [vmem:[#allocation2 + $0xbc] sm:$0x1] %v5925_v25  ;;  %v6169_v11 = vrot.slane %v6168_v59, 4  ;;  %v20884_v28 = vshll.u32 %v17267_v36, 16  ;;  %v11951_v3 = vcombine.low %v17375_v7, %v17377_v54 }
 0x2c6   : > { %v6178_v42 = vrot.slane %v20883_v15, 4  ;;  %v6185_v46 = vshll.u32 %v17275_v27, 16  ;;  %v6191_v19 = vrot.slane %v20885_v34, 4  ;;  %13083 = vmatprep.mubr.msk.bf16.mxu0 %vm6417_vm8, %v11950_v1  ;;  %v6195_v24 = vshll.u32 %v17373_v48, 16  ;;  %v17403_v59 = vld [vmem:[#allocation2 + $0x74] sm:$0x1] }
 0x2c7   : > { %v6181_v13 = vrot.slane %v20884_v28, 5  ;;  %v6248_v5 = vshrl.u32 %v17375_v7, 16  ;;  %v6251_v47 = vshll.u32 %v17375_v7, 16  ;;  %v6261_v58 = vshrl.u32 %v17377_v54, 16  ;;  %v17405_v29 = vld [vmem:[#allocation2 + $0x90] sm:$0xf]  ;;  %13084 = vmatmul.mubr.msk.bf16.gmra.mxu0 %vm6417_vm8, %v11951_v3 }
 0x2c8   : > { %v6174_v17 = vsel %vm13953_vm14, %v6169_v11, %v6173_v6  ;;  %v6187_v60 = vrot.slane %v6185_v46, 5  ;;  %v6197_v1 = vrot.slane %v6195_v24, 5  ;;  %v20886_v15 = vshrl.u32 %v17302_v26, 16 }
 0x2c9   : > { %v6182_v45 = vor.u32 %v6181_v13, %v6178_v42  ;;  %v11915_v25 = vcombine.low %v6164_v10, %v6174_v17  ;;  %v20887_v34 = vshll.u32 %v17302_v26, 16  ;;  %v6209_v11 = vshll.u32 %v17316_v33, 16 }
 0x2ca   : > { %v6202_v28 = vrot.slane %v20886_v15, 4  ;;  %v6192_v42 = vor.u32 %v6191_v19, %v6187_v60  ;;  %v20888_v13 = vshrl.u32 %v17316_v33, 16  ;;  %v6219_v24 = vshll.u32 %v17403_v59, 16 }
 0x2cb   : > { %v6205_v39 = vrot.slane %v20887_v34, 5  ;;  %v6183_v6 = vrot.slane %v6182_v45, 4  ;;  %13042 = vmatmul.mubr.msk.bf16.gmra.mxu1 %vm6417_vm8, %v11915_v25  ;;  %v6272_v17 = vshrl.u32 %v17405_v29, 16  ;;  %v6275_v15 = vshll.u32 %v17405_v29, 16 }
 0x2cc   : > { %v6215_v46 = vrot.slane %v20888_v13, 4  ;;  %v6193_v19 = vrot.slane %v6192_v42, 4  ;;  %v6211_v34 = vrot.slane %v6209_v11, 5  ;;  %v6285_v3 = vshrl.u32 %v17411_v44, 16  ;;  %v17435_v11 = vld [vmem:[#allocation2 + $0xa0] sm:$0xf] }
 0x2cd   : > { %v6206_v10 = vor.u32 %v6205_v39, %v6202_v28  ;;  %v6188_v45 = vsel %vm13953_vm14, %v6183_v6, %v6187_v60  ;;  %v6221_v13 = vrot.slane %v6219_v24, 5  ;;  %v11952_v39 = vcombine.low %v17405_v29, %v17411_v44 }
 0x2ce   : > { %v20889_v25 = vshrl.u32 %v17351_v22, 16  ;;  %v6198_v38 = vsel %vm13953_vm14, %v6193_v19, %v6197_v1  ;;  %v6216_v60 = vor.u32 %v6215_v46, %v6211_v34  ;;  %v6229_v6 = vrot.slane %v6227_v49, 5  ;;  %v17444_v46 = vld [vmem:[#allocation2 + $0x8c] sm:$0x1] }
 0x2cf   : > { %v6207_v4 = vrot.slane %v6206_v10, 4  ;;  %v6233_v42 = vshll.u32 %v17357_v14, 16  ;;  %v11916_v30 = vcombine.low %v6188_v45, %v6198_v38  ;;  %13087 = vmatprep.mubr.msk.bf16.mxu0 %vm6417_vm8, %v11952_v39  ;;  %v20890_v24 = vshrl.u32 %v17357_v14, 16 }
 0x2d0   : > { %v6226_v28 = vrot.slane %v20889_v25, 4  ;;  %v6217_v37 = vrot.slane %v6216_v60, 4  ;;  %v6296_v49 = vshrl.u32 %v17430_v57, 16  ;;  %v6245_v38 = vrot.slane %v6243_v63, 5 }
 0x2d1   : > { %v6212_v10 = vsel %vm13953_vm14, %v6207_v4, %v6211_v34  ;;  %v6239_v25 = vrot.slane %v20890_v24, 4  ;;  %v6235_v1 = vrot.slane %v6233_v42, 5  ;;  %13045 = vmatprep.mubr.msk.bf16.mxu1 %vm6417_vm8, %v11916_v30  ;;  %v6299_v45 = vshll.u32 %v17430_v57, 16  ;;  %v17451_v34 = vld [vmem:[#allocation2 + $0xa8] sm:$0xf] }
 0x2d2   : > { %v6230_v55 = vor.u32 %v6229_v6, %v6226_v28  ;;  %v6309_v4 = vshrl.u32 %v17435_v11, 16  ;;  %v11953_v19 = vcombine.low %v17430_v57, %v17435_v11  ;;  %v6222_v39 = vsel %vm13953_vm14, %v6217_v37, %v6221_v13  ;;  %v17455_v42 = vld [vmem:[#allocation2 + $0xac] sm:$0xf] }
 0x2d3   : > { %v6240_v60 = vor.u32 %v6239_v25, %v6235_v1  ;;  %v6250_v6 = vrot.slane %v6248_v5, 4  ;;  %v11917_v24 = vcombine.low %v6212_v10, %v6222_v39  ;;  %v6253_v30 = vrot.slane %v6251_v47, 5  ;;  %v17468_v25 = vld [vmem:[#allocation2 + $0xb4] sm:$0xf] }
 0x2d4   : > { %v6231_v28 = vrot.slane %v6230_v55, 4  ;;  %13088 = vmatmul.mubr.msk.bf16.gmra.mxu0 %vm6417_vm8, %v11953_v19  ;;  %v6257_v63 = vshll.u32 %v17377_v54, 16  ;;  %v6263_v21 = vrot.slane %v6261_v58, 4  ;;  %v6267_v52 = vshll.u32 %v17444_v46, 16  ;;  %v17463_v55 = vld [vmem:[#allocation2 + $0x98] sm:$0x1] }
 0x2d5   : > { %v6241_v51 = vrot.slane %v6240_v60, 4  ;;  %v6320_v37 = vshrl.u32 %v17451_v34, 16  ;;  %13046 = vmatmul.mubr.msk.bf16.gmra.mxu1 %vm6417_vm8, %v11917_v24  ;;  %v6254_v5 = vor.u32 %v6253_v30, %v6250_v6  ;;  %v6323_v10 = vshll.u32 %v17451_v34, 16  ;;  %v17474_v6 = vld [vmem:[#allocation2 + $0xb8] sm:$0xf] }
 0x2d6   : > { %v6236_v2 = vsel %vm13953_vm14, %v6231_v28, %v6235_v1  ;;  %v6259_v13 = vrot.slane %v6257_v63, 5  ;;  %v6333_v47 = vshrl.u32 %v17455_v42, 16  ;;  %v6269_v1 = vrot.slane %v6267_v52, 5  ;;  %20891 = vst [vmem:[#allocation19_spill] sm:$0xff] %v17474_v6 }
 0x2d7   : > { %v6246_v58 = vsel %vm13953_vm14, %v6241_v51, %v6245_v38  ;;  %v11954_v19 = vcombine.low %v17451_v34, %v17455_v42  ;;  %v6274_v39 = vrot.slane %v6272_v17, 4  ;;  %v6255_v60 = vrot.slane %v6254_v5, 4 }
 0x2d8   : > { %v11918_v28 = vcombine.low %v6236_v2, %v6246_v58  ;;  %v6264_v31 = vor.u32 %v6263_v21, %v6259_v13  ;;  %v6277_v24 = vrot.slane %v6275_v15, 5  ;;  %v6281_v30 = vshll.u32 %v17411_v44, 16  ;;  %v17484_v15 = vld [vmem:[#allocation2 + $0x10] sm:$0xf] }
 0x2d9   : > { %13091 = vmatprep.mubr.msk.bf16.mxu0 %vm6417_vm8, %v11954_v19  ;;  %v6287_v63 = vrot.slane %v6285_v3, 4  ;;  %v6291_v50 = vshll.u32 %v17463_v55, 16  ;;  %v6260_v52 = vsel %vm13953_vm14, %v6255_v60, %v6259_v13  ;;  %v11955_v3 = vcombine.low %v17468_v25, %v17474_v6  ;;  %v17489_v19 = vld [vmem:[#allocation2 + $0xa4] sm:$0x1] }
 0x2da   : > { %13049 = vmatprep.mubr.msk.bf16.mxu1 %vm6417_vm8, %v11918_v28  ;;  %v6265_v2 = vrot.slane %v6264_v31, 4  ;;  %v6278_v17 = vor.u32 %v6277_v24, %v6274_v39  ;;  %v6283_v38 = vrot.slane %v6281_v30, 5  ;;  %v6298_v13 = vrot.slane %v6296_v49, 4  ;;  %v17493_v39 = vld [vmem:[#allocation2 + $0xc] sm:$0xf] }
 0x2db   : > { %v6293_v5 = vrot.slane %v6291_v50, 5  ;;  %v6301_v31 = vrot.slane %v6299_v45, 5  ;;  %v6305_v50 = vshll.u32 %v17435_v11, 16  ;;  %v6311_v30 = vrot.slane %v6309_v4, 4 }
 0x2dc   : > { %v6270_v28 = vsel %vm13953_vm14, %v6265_v2, %v6269_v1  ;;  %v6279_v51 = vrot.slane %v6278_v17, 4  ;;  %v6288_v24 = vor.u32 %v6287_v63, %v6283_v38  ;;  %13092 = vmatmul.mubr.msk.bf16.gmra.mxu0 %vm6417_vm8, %v11955_v3  ;;  %v6315_v53 = vshll.u32 %v17489_v19, 16  ;;  %v17505_v2 = vld [vmem:[#allocation2 + $0xb0] sm:$0x1] }
 0x2dd   : > { %v11919_v60 = vcombine.low %v6260_v52, %v6270_v28  ;;  %v6302_v21 = vor.u32 %v6301_v31, %v6298_v13  ;;  %v12022_v1 = vcombine.low %v17493_v39, %v17484_v15  ;;  %v6307_v45 = vrot.slane %v6305_v50, 5 }
 0x2de   : > { %v6284_v58 = vsel %vm13953_vm14, %v6279_v51, %v6283_v38  ;;  %v6289_v49 = vrot.slane %v6288_v24, 4  ;;  %v6317_v17 = vrot.slane %v6315_v53, 5  ;;  %v6322_v38 = vrot.slane %v6320_v37, 4  ;;  %v17514_v24 = vld [vmem:[#allocation2 + $0x1c] sm:$0xf] }
 0x2df   : > { %13050 = vmatmul.mubr.msk.bf16.gmra.mxu1 %vm6417_vm8, %v11919_v60  ;;  %v6303_v4 = vrot.slane %v6302_v21, 4  ;;  %13131 = vmatprep.mubr.msk.bf16.mxu0 %vm6417_vm8, %v12022_v1  ;;  %v6312_v28 = vor.u32 %v6311_v30, %v6307_v45  ;;  %v6325_v13 = vrot.slane %v6323_v10, 5  ;;  %v6329_v31 = vshll.u32 %v17455_v42, 16  ;;  %v17512_v60 = vld [vmem:[#allocation2 + $0x18] sm:$0xf] }
 0x2e0   : > { %v6294_v3 = vsel %vm13953_vm14, %v6289_v49, %v6293_v5  ;;  %v6335_v21 = vrot.slane %v6333_v47, 4  ;;  %v6339_v1 = vshll.u32 %v17505_v2, 16  ;;  %v17522_v37 = vld [vmem:[%s20354_s3 + $0x14] sm:$0xf]  ;;  %v13669_v49 = vld [vmem:[%s20354_s3 + $0xc] sm:$0xf]  ;;  %v12023_v47 = vcombine.low %v17512_v60, %v17514_v24 }
 0x2e1   : > { %v11920_v50 = vcombine.low %v6284_v58, %v6294_v3  ;;  %v6308_v53 = vsel %vm13953_vm14, %v6303_v4, %v6307_v45  ;;  %v6313_v5 = vrot.slane %v6312_v28, 4  ;;  %v6326_v10 = vor.u32 %v6325_v13, %v6322_v38  ;;  %v17533_v28 = vld [vmem:[#allocation2 + $0xbc] sm:$0x1]  ;;  %v17538_v51 = vld [vmem:[#allocation2 + $0x24] sm:$0xf] }
 0x2e2   : > { %v6331_v30 = vrot.slane %v6329_v31, 5  ;;  %v7524_v58 = vsel %vm6466_vm6, %v13669_v49, 0  ;;  %v6341_v45 = vrot.slane %v6339_v1, 5  ;;  %20892 = vst [vmem:[#allocation27_spill] sm:$0xff] %v17533_v28  ;;  %20893 = vst [vmem:[#allocation21_spill] sm:$0xff] %v17538_v51  ;;  %v20896_v4 = vshll.u32 %v17468_v25, 16 }
 0x2e3   : > { %13053 = vmatprep.mubr.msk.bf16.mxu1 %vm6417_vm8, %v11920_v50  ;;  %13130 = vmatpush3.bf16.msra.mxu0 %v7524_v58  ;;  %v6318_v38 = vsel %vm13953_vm14, %v6313_v5, %v6317_v17  ;;  %v6327_v13 = vrot.slane %v6326_v10, 4  ;;  %v17540_v50 = vld [vmem:[#allocation2 + $0x28] sm:$0xf]  ;;  %v20895_v58 = vshrl.u32 %v17468_v25, 16  ;;  %v6353_v17 = vshll.u32 %v17474_v6, 16 }
 0x2e4   : > { %v6336_v31 = vor.u32 %v6335_v21, %v6331_v30  ;;  %20894 = vst [vmem:[#allocation9_spill] sm:$0xff] %v17540_v50  ;;  %13458 = vmatprep.subr.msk.bf16.mxu0 %vm6466_vm6, %v17522_v37  ;;  %v11921_v1 = vcombine.low %v6308_v53, %v6318_v38  ;;  %v6349_v52 = vrot.slane %v20896_v4, 5  ;;  %v20897_v10 = vshrl.u32 %v17474_v6, 16 }
 0x2e5   : > { %v6346_v3 = vrot.slane %v20895_v58, 4  ;;  %v6332_v21 = vsel %vm13953_vm14, %v6327_v13, %v6331_v30  ;;  %v6363_v63 = vshll.u32 %v17533_v28, 16  ;;  %v6355_v38 = vrot.slane %v6353_v17, 5  ;;  %v17561_v30 = vld [vmem:[#allocation2 + $0x34] sm:$0xf] }
 0x2e6   : > { %v6337_v5 = vrot.slane %v6336_v31, 4  ;;  %13132 = vmatmul.mubr.msk.bf16.vlgmr.msra.gmra.mxu0 %vm6417_vm8, %v12023_v47  ;;  %v6359_v49 = vrot.slane %v20897_v10, 4  ;;  %v12024_v4 = vcombine.low %v17538_v51, %v17540_v50  ;;  %v13670_v17 = vld [vmem:[#allocation2] sm:$0xf]  ;;  %v17568_v58 = vld [vmem:[#allocation2 + $0x3c] sm:$0xf] }
 0x2e7   : > { %13054 = vmatmul.mubr.msk.bf16.gmra.mxu1 %vm6417_vm8, %v11921_v1  ;;  %v6350_v53 = vor.u32 %v6349_v52, %v6346_v3  ;;  %v6365_v13 = vrot.slane %v6363_v63, 5  ;;  %v11972_v43 = vrot.slane %v13670_v17, 9  ;;  %20898 = vst [vmem:[#allocation6_spill] sm:$0xff] %v17568_v58  ;;  %v13672_v28 = vld [vmem:[#allocation2 + $0x8] sm:$0x1]  ;;  %v12025_v63 = vcombine.low %v17559_v16, %v17561_v30 }
 0x2e8   : > { %v6342_v47 = vsel %vm13953_vm14, %v6337_v5, %v6341_v45  ;;  %v6360_v3 = vor.u32 %v6359_v49, %v6355_v38  ;;  %13135 = vmatprep.mubr.msk.bf16.mxu0 %vm6417_vm8, %v12024_v4  ;;  %v6944_v6 = vrot.slane %v13672_v28, 5  ;;  %v17573_v5 = vld [vmem:[#allocation2 + $0x40] sm:$0xf]  ;;  %v13673_v17 = vld [vmem:[#allocation2 + $0xc] sm:$0xf]  ;;  %vm11202_vm1 = vcmask 130048  }
 0x2e9   : > { %v11922_v1 = vcombine.low %v6332_v21, %v6342_v47  ;;  %v6351_v52 = vrot.slane %v6350_v53, 4  ;;  %20899 = vst [vmem:[#allocation33_spill] sm:$0xff] %v17573_v5  ;;  %v6942_v28 = vsel %vm14430_vm9, %v11972_v43, %v6941_v35  ;;  %v6943_v47 = vrot.slane %v6941_v35, 4  ;;  %v13674_v31 = vld [vmem:[#allocation2 + $0x10] sm:$0xf] }
 0x2ea   : > { %v6361_v21 = vrot.slane %v6360_v3, 4  ;;  %v11973_v10 = vrot.slane %v13673_v17, 9  ;;  %v6948_v45 = vrot.slane %v13674_v31, 5  ;;  %v17592_v31 = vld [vmem:[#allocation2 + $0x48] sm:$0xf] }
 0x2eb   : > { %13057 = vmatprep.mubr.msk.bf16.mxu1 %vm6417_vm8, %v11922_v1  ;;  %v6356_v49 = vsel %vm13953_vm14, %v6351_v52, %v6355_v38  ;;  %v13675_v1 = vld [vmem:[#allocation2 + $0x14] sm:$0x1]  ;;  %v12026_v38 = vcombine.low %v17568_v58, %v17573_v5  ;;  %v6945_v4 = vsel %vm14430_vm9, %v6943_v47, %v6944_v6  ;;  %20901 = vst [vmem:[#allocation35_spill] sm:$0xff] %v17592_v31  ;;  %v8202_v6 = vsel %vm6466_vm6, %v17104_v32, 0  ;;  %v13677_v47 = vld [vmem:[#allocation2 + $0x1c] sm:$0xf] }
 0x2ec   : > { %v6366_v50 = vsel %vm13953_vm14, %v6361_v21, %v6365_v13  ;;  %v6951_v51 = vrot.slane %v13675_v1, 5  ;;  %v6949_v43 = vsel %vm14430_vm9, %v11973_v10, %v6948_v45  ;;  %v6950_v35 = vrot.slane %v6948_v45, 4  ;;  %v17594_v13 = vld [vmem:[#allocation2 + $0x4c] sm:$0xf]  ;;  %v17616_v52 = vld [vmem:[#allocation2 + $0x60] sm:$0xf] }
 0x2ed   : > { %v11923_v3 = vcombine.low %v6356_v49, %v6366_v50  ;;  %20902 = vst [vmem:[#allocation37_spill] sm:$0xff] %v17594_v13  ;;  %v11989_v21 = vcombine.low %v6942_v28, %v6945_v4  ;;  %v17601_v49 = vld [vmem:[#allocation2 + $0x54] sm:$0xf]  ;;  %v6955_v4 = vrot.slane %v13677_v47, 5  ;;  %v13678_v28 = vld [vmem:[#allocation2 + $0x20] sm:$0x1]  ;;  %v12027_v32 = vcombine.low %v17592_v31, %v17594_v13 }
 0x2ee   : > { %13136 = vmatmul.mubr.msk.bf16.gmra.mxu0 %vm6417_vm8, %v12025_v63  ;;  %v6952_v10 = vsel %vm14430_vm9, %v6950_v35, %v6951_v51  ;;  %v13676_v63 = vld [vmem:[#allocation2 + $0x18] sm:$0xf]  ;;  %v6958_v1 = vrot.slane %v13678_v28, 5  ;;  %v13679_v47 = vld [vmem:[#allocation2 + $0x24] sm:$0xf] }
 0x2ef   : > { %13139 = vmatprep.mubr.msk.bf16.mxu0 %vm6417_vm8, %v12026_v38  ;;  %13058 = vmatmul.mubr.msk.bf16.gmra.mxu1 %vm6417_vm8, %v11923_v3  ;;  %v11974_v45 = vrot.slane %v13676_v63, 9  ;;  %v17606_v38 = vld [vmem:[#allocation2 + $0x58] sm:$0xf]  ;;  %v11990_v50 = vcombine.low %v6949_v43, %v6952_v10  ;;  %v6957_v35 = vrot.slane %v6955_v4, 4  ;;  %v11975_v28 = vrot.slane %v13679_v47, 9 }
 0x2f0   : > { %13097 = vmatprep.mubr.msk.bf16.mxu1 %vm6417_vm8, %v11989_v21  ;;  %v13680_v53 = vld [vmem:[#allocation2 + $0x28] sm:$0xf]  ;;  %v6965_v43 = vrot.slane %v17156_v40, 5  ;;  %v12028_v10 = vcombine.low %v17601_v49, %v17606_v38  ;;  %v17622_v3 = vld [vmem:[#allocation2 + $0x64] sm:$0xf] }
 0x2f1   : > { %v6956_v51 = vsel %vm14430_vm9, %v11974_v45, %v6955_v4  ;;  %v6962_v21 = vrot.slane %v13680_v53, 5  ;;  %v6959_v45 = vsel %vm14430_vm9, %v6957_v35, %v6958_v1  ;;  %v13681_v63 = vld [vmem:[#allocation2 + $0x30] sm:$0xf]  ;;  %v13682_v5 = vld [vmem:[#allocation2 + $0x34] sm:$0xf]  ;;  %v6972_v1 = vrot.slane %v17187_v61, 5 }
 0x2f2   : > { %v11976_v13 = vrot.slane %v13681_v63, 9  ;;  %v11991_v31 = vcombine.low %v6956_v51, %v6959_v45  ;;  %v6969_v58 = vrot.slane %v13682_v5, 5  ;;  %v17632_v17 = vld [vmem:[#allocation2 + $0x6c] sm:$0xf]  ;;  %v12029_v35 = vcombine.low %v17616_v52, %v17622_v3  ;;  %v17640_v63 = vld [vmem:[#allocation2 + $0x70] sm:$0xf] }
 0x2f3   : > { %v17630_v40 = vsel %vm14430_vm9, %v11975_v28, %v6962_v21  ;;  %v6964_v53 = vrot.slane %v6962_v21, 4  ;;  %20903 = vst [vmem:[#allocation47_spill] sm:$0xff] %v17640_v63  ;;  %v17651_v21 = vld [vmem:[%s20354_s3 + $0x18] sm:$0xf]  ;;  %v13683_v51 = vld [vmem:[#allocation2 + $0x3c] sm:$0xf] }
 0x2f4   : > { %v6970_v5 = vsel %vm14430_vm9, %v11976_v13, %v6969_v58  ;;  %v11977_v47 = vrot.slane %v13683_v51, 9  ;;  %v17656_v4 = vld [vmem:[#allocation2 + $0x7c] sm:$0xf]  ;;  %v12030_v13 = vcombine.low %v17632_v17, %v17640_v63  ;;  %v17665_v51 = vld [vmem:[#allocation2 + $0x78] sm:$0xf]  ;;  %v11979_v61 = vrot.slane %v17204_v9, 9 }
 0x2f5   : > { %v6966_v28 = vsel %vm14430_vm9, %v6964_v53, %v6965_v43  ;;  %v13684_v43 = vld [vmem:[#allocation2 + $0x40] sm:$0xf]  ;;  %v17697_v63 = vld [vmem:[#allocation2 + $0x90] sm:$0xf] }
 0x2f6   : > { %13140 = vmatmul.mubr.msk.bf16.gmra.mxu0 %vm6417_vm8, %v12027_v32  ;;  %v6971_v32 = vrot.slane %v6969_v58, 4  ;;  %v11992_v45 = vcombine.low %v17630_v40, %v6966_v28  ;;  %v6976_v53 = vrot.slane %v13684_v43, 5  ;;  %v17672_v43 = vld [vmem:[#allocation2 + $0x84] sm:$0xf]  ;;  %v6986_v40 = vrot.slane %v17294_v62, 5 }
 0x2f7   : > { %13143 = vmatprep.mubr.msk.bf16.mxu0 %vm6417_vm8, %v12028_v10  ;;  %13098 = vmatmul.mubr.msk.bf16.vlgmr.msra.gmra.mxu1 %vm6417_vm8, %v11990_v50  ;;  %v6979_v10 = vrot.slane %v17265_v56, 5 }
 0x2f8   : > { %13164 = vmatpush3.bf16.msra.mxu1 %v8202_v6  ;;  %13101 = vmatprep.mubr.msk.bf16.mxu1 %vm6417_vm8, %v11991_v31  ;;  %v6973_v58 = vsel %vm14430_vm9, %v6971_v32, %v6972_v1  ;;  %v17669_v56 = vsel %vm14430_vm9, %v11977_v47, %v6976_v53  ;;  %v6978_v6 = vrot.slane %v6976_v53, 4  ;;  %v11978_v1 = vrot.slane %v17161_v41, 9  ;;  %v17720_v31 = vld [vmem:[#allocation2 + $0x9c] sm:$0xf] }
 0x2f9   : > { %v11993_v28 = vcombine.low %v6970_v5, %v6973_v58  ;;  %13459 = vmatprep.subr.msk.bf16.mxu1 %vm6466_vm6, %v17651_v21  ;;  %v6983_v32 = vrot.slane %v17172_v8, 5  ;;  %v12031_v5 = vcombine.low %v17665_v51, %v17656_v4  ;;  %v17681_v58 = vld [vmem:[#allocation2 + $0x88] sm:$0xf]  ;;  %v7025_v53 = vrot.slane %v17411_v44, 5 }
 0x2fa   : > { %v17685_v47 = vsel %vm14430_vm9, %v6978_v6, %v6979_v10  ;;  %v6990_v10 = vrot.slane %v17217_v0, 5  ;;  %v6993_v6 = vrot.slane %v17349_v18, 5  ;;  %v12032_v50 = vcombine.low %v17672_v43, %v17681_v58 }
 0x2fb   : > { %v11994_v41 = vcombine.low %v17669_v56, %v17685_v47  ;;  %v17694_v8 = vsel %vm14430_vm9, %v11978_v1, %v6983_v32  ;;  %v6985_v62 = vrot.slane %v6983_v32, 4  ;;  %v17705_v47 = vld [vmem:[#allocation2 + $0x94] sm:$0xf]  ;;  %v11980_v0 = vrot.slane %v17267_v36, 9 }
 0x2fc   : > { %v17717_v32 = vsel %vm14430_vm9, %v11979_v61, %v6990_v10  ;;  %v6992_v56 = vrot.slane %v6990_v10, 4  ;;  %v12033_v36 = vcombine.low %v17697_v63, %v17705_v47  ;;  %v7014_v1 = vrot.slane %v17424_v20, 5 }
 0x2fd   : > { %v6987_v9 = vsel %vm14430_vm9, %v6985_v62, %v6986_v40  ;;  %v7000_v40 = vrot.slane %v17373_v48, 5  ;;  %v17728_v62 = vld [vmem:[#allocation2 + $0xa0] sm:$0xf]  ;;  %v17754_v48 = vld [vmem:[#allocation2 + $0xa8] sm:$0xf]  ;;  %v7028_v20 = vrot.slane %v17463_v55, 5 }
 0x2fe   : > { %13144 = vmatmul.mubr.msk.bf16.gmra.mxu0 %vm6417_vm8, %v12029_v35  ;;  %v11995_v18 = vcombine.low %v17694_v8, %v6987_v9  ;;  %v17732_v61 = vsel %vm14430_vm9, %v6992_v56, %v6993_v6  ;;  %v11981_v9 = vrot.slane %v17302_v26, 9  ;;  %v7004_v8 = vrot.slane %v17316_v33, 5  ;;  %v17744_v35 = vld [vmem:[#allocation2 + $0xac] sm:$0xf] }
 0x2ff   : > { %13147 = vmatprep.mubr.msk.bf16.mxu0 %vm6417_vm8, %v12030_v13  ;;  %13102 = vmatmul.mubr.msk.bf16.gmra.mxu1 %vm6417_vm8, %v11992_v45  ;;  %v6997_v13 = vrot.slane %v17275_v27, 5  ;;  %v11996_v10 = vcombine.low %v17717_v32, %v17732_v61  ;;  %v7007_v45 = vrot.slane %v17403_v59, 5  ;;  %v12034_v56 = vcombine.low %v17720_v31, %v17728_v62 }
 0x300   : > { %13105 = vmatprep.mubr.msk.bf16.mxu1 %vm6417_vm8, %v11993_v28  ;;  %v17760_v33 = vsel %vm14430_vm9, %v11981_v9, %v7004_v8  ;;  %v7006_v59 = vrot.slane %v7004_v8, 4  ;;  %v17797_v9 = vld [vmem:[#allocation2 + $0xc4] sm:$0xf]  ;;  %v7027_v44 = vrot.slane %v7025_v53, 4  ;;  %v8415_v55 = vrot.slane %v17484_v15, 5 }
 0x301   : > { %v17736_v27 = vsel %vm14430_vm9, %v11980_v0, %v6997_v13  ;;  %v6999_v28 = vrot.slane %v6997_v13, 4  ;;  %v11982_v0 = vrot.slane %v17351_v22, 9  ;;  %v7011_v13 = vrot.slane %v17357_v14, 5 }
 0x302   : > { %v17776_v8 = vsel %vm14430_vm9, %v7006_v59, %v7007_v45  ;;  %v17789_v45 = vld [vmem:[#allocation2 + $0xc0] sm:$0xf]  ;;  %v7018_v59 = vrot.slane %v17377_v54, 5  ;;  %v7021_v22 = vrot.slane %v17444_v46, 5  ;;  %v8417_v32 = vrot.slane %v8415_v55, 4 }
 0x303   : > { %v17748_v6 = vsel %vm14430_vm9, %v6999_v28, %v7000_v40  ;;  %v17763_v28 = vld [vmem:[#allocation2 + $0xb4] sm:$0xf]  ;;  %v17786_v14 = vsel %vm14430_vm9, %v11982_v0, %v7011_v13  ;;  %v11983_v40 = vrot.slane %v17375_v7, 9  ;;  %v7039_v61 = vrot.slane %v17455_v42, 5 }
 0x304   : > { %v11997_v26 = vcombine.low %v17736_v27, %v17748_v6  ;;  %20904 = vst [vmem:[#allocation8_spill] sm:$0xff] %v17763_v28  ;;  %v12035_v27 = vcombine.low %v17754_v48, %v17744_v35  ;;  %v17771_v6 = vld [vmem:[#allocation2 + $0xb8] sm:$0xf]  ;;  %v20912_v42 = vshrl.u32 %v17493_v39, 16 }
 0x305   : > { %20905 = vst [vmem:[#allocation11_spill] sm:$0xff] %v17771_v6  ;;  %v17810_v46 = vsel %vm14430_vm9, %v11983_v40, %v7018_v59 }
 0x306   : > { %13148 = vmatmul.mubr.msk.bf16.gmra.mxu0 %vm6417_vm8, %v12031_v5  ;;  %v7020_v5 = vrot.slane %v7018_v59, 4  ;;  %v17893_v59 = vld [vmem:[#allocation2 + $0x2c] sm:$0x1] }
 0x307   : > { %13151 = vmatprep.mubr.msk.bf16.mxu0 %vm6417_vm8, %v12032_v50  ;;  %13106 = vmatmul.mubr.msk.bf16.gmra.mxu1 %vm6417_vm8, %v11994_v41  ;;  %v7013_v50 = vrot.slane %v7011_v13, 4  ;;  %v12036_v41 = vcombine.low %v17763_v28, %v17771_v6  ;;  %v11985_v13 = vrot.slane %v17430_v57, 9 }
 0x308   : > { %13109 = vmatprep.mubr.msk.bf16.mxu1 %vm6417_vm8, %v11995_v18  ;;  %v11984_v18 = vrot.slane %v17405_v29, 9  ;;  %v17818_v29 = vld [vmem:[#allocation2 + $0x14] sm:$0x1]  ;;  %v17822_v7 = vsel %vm14430_vm9, %v7020_v5, %v7021_v22  ;;  %v7032_v5 = vrot.slane %v17435_v11, 5  ;;  %v7035_v22 = vrot.slane %v17489_v19, 5 }
 0x309   : > { %v17801_v0 = vsel %vm14430_vm9, %v7013_v50, %v7014_v1  ;;  %v7041_v50 = vrot.slane %v7039_v61, 4  ;;  %v20913_v1 = vshll.u32 %v17493_v39, 16 }
 0x30a   : > { %v11999_v54 = vcombine.low %v17786_v14, %v17801_v0  ;;  %v17826_v40 = vsel %vm14430_vm9, %v11984_v18, %v7025_v53  ;;  %v17841_v53 = vsel %vm14430_vm9, %v7027_v44, %v7028_v20  ;;  %v12087_v18 = vrot.slane %v17493_v39, 9  ;;  %v17857_v20 = vld [vmem:[#allocation2 + $0x20] sm:$0x1] }
 0x30b   : > { %v17854_v11 = vsel %vm14430_vm9, %v11985_v13, %v7032_v5  ;;  %v7034_v19 = vrot.slane %v7032_v5, 4  ;;  %v17869_v13 = vld [vmem:[%s20354_s3 + $0x1c] sm:$0xf]  ;;  %v12088_v5 = vrot.slane %v17512_v60, 9  ;;  %v8425_v57 = vrot.slane %v17857_v20, 5 }
 0x30c   : > { %v17862_v44 = vsel %vm14430_vm9, %v12087_v18, %v8415_v55  ;;  %20906 = vst [vmem:[#allocation49_spill] sm:$0xff] %v17869_v13  ;;  %v8422_v55 = vrot.slane %v17514_v24, 5  ;;  %v20916_v39 = vshll.u32 %v17512_v60, 16 }
 0x30e   : > { %13152 = vmatmul.mubr.msk.bf16.gmra.mxu0 %vm6417_vm8, %v12033_v36  ;;  %v8418_v36 = vrot.slane %v17818_v29, 5  ;;  %v7749_v6 = vrot.slane %v20916_v39, 5  ;;  %v17979_v39 = vld [vmem:[#allocation2 + $0x44] sm:$0x1] }
 0x30f   : > { %13155 = vmatprep.mubr.msk.bf16.mxu0 %vm6417_vm8, %v12034_v56  ;;  %13110 = vmatmul.mubr.msk.bf16.gmra.mxu1 %vm6417_vm8, %v11996_v10  ;;  %v11986_v56 = vrot.slane %v17451_v34, 9  ;;  %v7042_v10 = vrot.slane %v17505_v2, 5  ;;  %v17873_v34 = vsel %vm14430_vm9, %v7034_v19, %v7035_v22  ;;  %v8424_v19 = vrot.slane %v8422_v55, 4 }
 0x310   : > { %13113 = vmatprep.mubr.msk.bf16.mxu1 %vm6417_vm8, %v11997_v26  ;;  %v8624_v26 = vsel %vm6466_vm6, %v17522_v37, 0  ;;  %v8419_v2 = vsel %vm14430_vm9, %v8417_v32, %v8418_v36  ;;  %v17890_v37 = vsel %vm14430_vm9, %v12088_v5, %v8422_v55  ;;  %v20907_v32 = vld [vmem:[#allocation19_spill] sm:$0xff] }
 0x311   : > { %v17885_v18 = vsel %vm14430_vm9, %v11986_v56, %v7039_v61  ;;  %13198 = vmatpush3.bf16.msra.mxu0 %v8624_v26  ;;  %v12104_v22 = vcombine.low %v17862_v44, %v8419_v2  ;;  %v17899_v36 = vsel %vm14430_vm9, %v7041_v50, %v7042_v10  ;;  %v11987_v56 = vrot.slane %v17468_v25, 9  ;;  %v20908_v61 = vld [vmem:[#allocation27_spill] sm:$0xff]  ;;  %v20909_v50 = vld [vmem:[#allocation21_spill] sm:$0xff] }
 0x312   : > { %13460 = vmatprep.subr.msk.bf16.mxu0 %vm6466_vm6, %v17869_v13  ;;  %v7046_v44 = vrot.slane %v20907_v32, 5  ;;  %v7049_v26 = vrot.slane %v20908_v61, 5  ;;  %v17912_v55 = vsel %vm14430_vm9, %v8424_v19, %v8425_v57  ;;  %v12089_v10 = vrot.slane %v20909_v50, 9  ;;  %v20910_v2 = vld [vmem:[#allocation9_spill] sm:$0xff] }
 0x313   : > { %v8429_v25 = vrot.slane %v20910_v2, 5  ;;  %v8432_v57 = vrot.slane %v17893_v59, 5  ;;  %v20911_v19 = vcombine.low %v17760_v33, %v17776_v8  ;;  %v7722_v32 = vrot.slane %v20912_v42, 4  ;;  %v17951_v42 = vld [vmem:[#allocation2 + $0x38] sm:$0x1] }
 0x314   : > { %v7048_v61 = vrot.slane %v7046_v44, 4  ;;  %v7729_v8 = vshll.u32 %v17484_v15, 16 }
 0x315   : > { %v17933_v5 = vsel %vm14430_vm9, %v12089_v10, %v8429_v25 }
 0x316   : > { %13156 = vmatmul.mubr.msk.bf16.gmra.mxu0 %vm6417_vm8, %v12035_v27  ;;  %v17924_v27 = vsel %vm14430_vm9, %v11987_v56, %v7046_v44  ;;  %v7725_v56 = vrot.slane %v20913_v1, 5  ;;  %v17945_v33 = vsel %vm14430_vm9, %v7048_v61, %v7049_v26  ;;  %v20914_v44 = vshrl.u32 %v17484_v15, 16 }
 0x317   : > { %13159 = vmatprep.mubr.msk.bf16.mxu0 %vm6417_vm8, %v12036_v41  ;;  %13114 = vmatmul.mubr.msk.bf16.gmra.mxu1 %vm6417_vm8, %v20911_v19  ;;  %v8431_v41 = vrot.slane %v8429_v25, 4  ;;  %v7739_v25 = vshll.u32 %v17818_v29, 16  ;;  %v7731_v26 = vrot.slane %v7729_v8, 5  ;;  %v8436_v15 = vrot.slane %v17561_v30, 5 }
 0x318   : > { %13117 = vmatprep.mubr.msk.bf16.mxu1 %vm6417_vm8, %v11999_v54  ;;  %v7735_v10 = vrot.slane %v20914_v44, 4  ;;  %v7726_v0 = vor.u32 %v7725_v56, %v7722_v32  ;;  %v12090_v54 = vrot.slane %v17559_v16, 9  ;;  %v8439_v29 = vrot.slane %v17951_v42, 5 }
 0x319   : > { %v8433_v14 = vsel %vm14430_vm9, %v8431_v41, %v8432_v57  ;;  %v7741_v61 = vrot.slane %v7739_v25, 5  ;;  %v20915_v44 = vshrl.u32 %v17512_v60, 16  ;;  %v8438_v57 = vrot.slane %v8436_v15, 4 }
 0x31a   : > { %v12106_v1 = vcombine.low %v17933_v5, %v8433_v14  ;;  %v7727_v19 = vrot.slane %v7726_v0, 4  ;;  %v7736_v28 = vor.u32 %v7735_v10, %v7731_v26  ;;  %v17967_v32 = vsel %vm14430_vm9, %v12090_v54, %v8436_v15  ;;  %v20919_v15 = vld [vmem:[#allocation6_spill] sm:$0xff] }
 0x31b   : > { %v7746_v13 = vrot.slane %v20915_v44, 4  ;;  %v7753_v5 = vshll.u32 %v17514_v24, 16  ;;  %v20917_v41 = vcombine.low %v17789_v45, %v17797_v9  ;;  %v20918_v60 = vshrl.u32 %v17514_v24, 16 }
 0x31c   : > { %v7732_v56 = vsel %vm13953_vm14, %v7727_v19, %v7731_v26  ;;  %v7763_v10 = vshll.u32 %v17857_v20, 16  ;;  %v7737_v14 = vrot.slane %v7736_v28, 4  ;;  %v17984_v0 = vsel %vm14430_vm9, %v8438_v57, %v8439_v29  ;;  %v20921_v26 = vld [vmem:[#allocation33_spill] sm:$0xff] }
 0x31d   : > { %v7750_v8 = vor.u32 %v7749_v6, %v7746_v13  ;;  %v7759_v25 = vrot.slane %v20918_v60, 4  ;;  %v7755_v54 = vrot.slane %v7753_v5, 5  ;;  %v12091_v44 = vrot.slane %v20919_v15, 9 }
 0x31e   : > { %13160 = vmatmul.mubr.msk.bf16.gmra.mxu0 %vm6417_vm8, %v20917_v41  ;;  %v20920_v6 = vcombine.low %v17810_v46, %v17822_v7  ;;  %v12107_v24 = vcombine.low %v17967_v32, %v17984_v0  ;;  %v7765_v13 = vrot.slane %v7763_v10, 5  ;;  %v20922_v28 = vcombine.low %v17826_v40, %v17841_v53 }
 0x31f   : > { %13199 = vmatprep.mubr.msk.bf16.mxu0 %vm6417_vm8, %v12104_v22  ;;  %v7751_v20 = vrot.slane %v7750_v8, 4  ;;  %v8443_v22 = vrot.slane %v20921_v26, 5  ;;  %v7742_v19 = vsel %vm13953_vm14, %v7737_v14, %v7741_v61  ;;  %v7760_v29 = vor.u32 %v7759_v25, %v7755_v54 }
 0x320   : > { %13118 = vmatmul.mubr.msk.bf16.gmra.mxu1 %vm6417_vm8, %v20920_v6  ;;  %v8446_v7 = vrot.slane %v17979_v39, 5  ;;  %v18003_v46 = vsel %vm6466_vm6, %v17651_v21, 0  ;;  %v18005_v57 = vcombine.low %v7732_v56, %v7742_v19  ;;  %v20923_v8 = vshrl.u32 %v20909_v50, 16  ;;  %v18016_v21 = vld [vmem:[#allocation2 + $0x50] sm:$0x1]  ;;  %v20926_v6 = vld [vmem:[#allocation35_spill] sm:$0xff] }
 0x321   : > { %13121 = vmatprep.mubr.msk.bf16.mxu1 %vm6417_vm8, %v20922_v28  ;;  %v7756_v5 = vsel %vm13953_vm14, %v7751_v20, %v7755_v54  ;;  %v8444_v40 = vsel %vm14430_vm9, %v12091_v44, %v8443_v22  ;;  %v8445_v53 = vrot.slane %v8443_v22, 4  ;;  %v7761_v41 = vrot.slane %v7760_v29, 4 }
 0x322   : > { %v7770_v61 = vrot.slane %v20923_v8, 4  ;;  %v20924_v60 = vshll.u32 %v20909_v50, 16  ;;  %v7777_v10 = vshll.u32 %v20910_v2, 16  ;;  %v20925_v14 = vshrl.u32 %v20910_v2, 16  ;;  %v20928_v2 = vld [vmem:[#allocation37_spill] sm:$0xff] }
 0x323   : > { %v8447_v56 = vsel %vm14430_vm9, %v8445_v53, %v8446_v7  ;;  %v7787_v44 = vshll.u32 %v17893_v59, 16  ;;  %v12092_v20 = vrot.slane %v20926_v6, 9  ;;  %v7766_v22 = vsel %vm13953_vm14, %v7761_v41, %v7765_v13 }
 0x324   : > { %v7773_v25 = vrot.slane %v20924_v60, 5  ;;  %v7783_v54 = vrot.slane %v20925_v14, 4  ;;  %v12108_v28 = vcombine.low %v8444_v40, %v8447_v56  ;;  %v7779_v19 = vrot.slane %v7777_v10, 5 }
 0x325   : > { %v20927_v29 = vcombine.low %v17890_v37, %v17912_v55  ;;  %v18030_v8 = vcombine.low %v7756_v5, %v7766_v22  ;;  %v7789_v7 = vrot.slane %v7787_v44, 5  ;;  %v8450_v53 = vrot.slane %v20928_v2, 5  ;;  %v18059_v22 = vld [vmem:[#allocation2 + $0x5c] sm:$0x1] }
 0x326   : > { %v7774_v50 = vor.u32 %v7773_v25, %v7770_v61  ;;  %v8453_v59 = vrot.slane %v18016_v21, 5  ;;  %v7784_v14 = vor.u32 %v7783_v54, %v7779_v19  ;;  %v20929_v13 = vshrl.u32 %v17559_v16, 16 }
 0x327   : > { %13200 = vmatmul.mubr.msk.bf16.vlgmr.msra.gmra.mxu0 %vm6417_vm8, %v20927_v29  ;;  %v20930_v41 = vshll.u32 %v17559_v16, 16  ;;  %v20931_v37 = vcombine.low %v17854_v11, %v17873_v34  ;;  %v18045_v55 = vsel %vm14430_vm9, %v12092_v20, %v8450_v53  ;;  %v8452_v5 = vrot.slane %v8450_v53, 4 }
 0x328   : > { %13203 = vmatprep.mubr.msk.bf16.mxu0 %vm6417_vm8, %v12106_v1  ;;  %v7775_v60 = vrot.slane %v7774_v50, 4  ;;  %v7794_v40 = vrot.slane %v20929_v13, 4  ;;  %v7801_v1 = vshll.u32 %v17561_v30, 16  ;;  %v20932_v25 = vshrl.u32 %v17561_v30, 16 }
 0x329   : > { %v7797_v61 = vrot.slane %v20930_v41, 5  ;;  %13122 = vmatmul.mubr.msk.bf16.gmra.mxu1 %vm6417_vm8, %v20931_v37  ;;  %v20933_v56 = vcombine.low %v17885_v18, %v17899_v36  ;;  %v7785_v11 = vrot.slane %v7784_v14, 4  ;;  %v7811_v54 = vshll.u32 %v17951_v42, 16 }
 0x32a   : > { %v7807_v10 = vrot.slane %v20932_v25, 4  ;;  %v7780_v16 = vsel %vm13953_vm14, %v7775_v60, %v7779_v19  ;;  %v8454_v44 = vsel %vm14430_vm9, %v8452_v5, %v8453_v59  ;;  %v7803_v20 = vrot.slane %v7801_v1, 5 }
 0x32b   : > { %13125 = vmatprep.mubr.msk.bf16.mxu1 %vm6417_vm8, %v20933_v56  ;;  %v7798_v34 = vor.u32 %v7797_v61, %v7794_v40  ;;  %v12093_v30 = vrot.slane %v17601_v49, 9  ;;  %v8457_v50 = vrot.slane %v17606_v38, 5  ;;  %v7790_v18 = vsel %vm13953_vm14, %v7785_v11, %v7789_v7  ;;  %v18088_v56 = vld [vmem:[#allocation2 + $0x68] sm:$0x1] }
 0x32c   : > { %v12109_v36 = vcombine.low %v18045_v55, %v8454_v44  ;;  %v7813_v29 = vrot.slane %v7811_v54, 5  ;;  %v18066_v53 = vcombine.low %v7780_v16, %v7790_v18  ;;  %v7808_v42 = vor.u32 %v7807_v10, %v7803_v20 }
 0x32d   : > { %v7799_v19 = vrot.slane %v7798_v34, 4  ;;  %v8458_v59 = vsel %vm14430_vm9, %v12093_v30, %v8457_v50  ;;  %v8459_v60 = vrot.slane %v8457_v50, 4  ;;  %v8460_v13 = vrot.slane %v18059_v22, 5 }
 0x32e   : > { %v20934_v40 = vshrl.u32 %v20919_v15, 16  ;;  %v20935_v7 = vshll.u32 %v20919_v15, 16  ;;  %v7809_v37 = vrot.slane %v7808_v42, 4  ;;  %v7825_v55 = vshll.u32 %v20921_v26, 16 }
 0x32f   : > { %v7804_v14 = vsel %vm13953_vm14, %v7799_v19, %v7803_v20  ;;  %13204 = vmatmul.mubr.msk.bf16.gmra.mxu0 %vm6417_vm8, %v12107_v24  ;;  %v20936_v5 = vshrl.u32 %v20921_v26, 16  ;;  %v7835_v25 = vshll.u32 %v17979_v39, 16  ;;  %v8461_v10 = vsel %vm14430_vm9, %v8459_v60, %v8460_v13  ;;  %v18115_v60 = vld [vmem:[#allocation2 + $0x74] sm:$0x1] }
 0x330   : > { %v7818_v41 = vrot.slane %v20934_v40, 4  ;;  %v7821_v61 = vrot.slane %v20935_v7, 5  ;;  %13207 = vmatprep.mubr.msk.bf16.mxu0 %vm6417_vm8, %v12108_v28  ;;  %v12094_v32 = vrot.slane %v17616_v52, 9  ;;  %v8464_v0 = vrot.slane %v17622_v3, 5 }
 0x331   : > { %v7831_v1 = vrot.slane %v20936_v5, 4  ;;  %v20937_v24 = vcombine.low %v17924_v27, %v17945_v33  ;;  %v7814_v39 = vsel %vm13953_vm14, %v7809_v37, %v7813_v29  ;;  %v12110_v26 = vcombine.low %v8458_v59, %v8461_v10  ;;  %v20941_v37 = vld [vmem:[#allocation47_spill] sm:$0xff] }
 0x332   : > { %v7822_v15 = vor.u32 %v7821_v61, %v7818_v41  ;;  %v7827_v28 = vrot.slane %v7825_v55, 5  ;;  %v7837_v16 = vrot.slane %v7835_v25, 5  ;;  %v18100_v11 = vcombine.low %v7804_v14, %v7814_v39 }
 0x333   : > { %13126 = vmatmul.mubr.msk.bf16.gmra.mxu1 %vm6417_vm8, %v20937_v24  ;;  %v8465_v54 = vsel %vm14430_vm9, %v12094_v32, %v8464_v0  ;;  %v8466_v44 = vrot.slane %v8464_v0, 4  ;;  %v8467_v27 = vrot.slane %v18088_v56, 5  ;;  %v20938_v33 = vshrl.u32 %v20926_v6, 16 }
 0x334   : > { %13165 = vmatprep.mubr.msk.bf16.mxu1 %vm6417_vm8, %v18005_v57  ;;  %v7823_v34 = vrot.slane %v7822_v15, 4  ;;  %v7832_v20 = vor.u32 %v7831_v1, %v7827_v28  ;;  %v20939_v50 = vshll.u32 %v20926_v6, 16  ;;  %v7849_v57 = vshll.u32 %v20928_v2, 16 }
 0x335   : > { %v7842_v30 = vrot.slane %v20938_v33, 4  ;;  %v20940_v29 = vshrl.u32 %v20928_v2, 16  ;;  %v7859_v59 = vshll.u32 %v18016_v21, 16  ;;  %v8468_v13 = vsel %vm14430_vm9, %v8466_v44, %v8467_v27 }
 0x336   : > { %v7845_v18 = vrot.slane %v20939_v50, 5  ;;  %v7828_v19 = vsel %vm13953_vm14, %v7823_v34, %v7827_v28  ;;  %v7833_v14 = vrot.slane %v7832_v20, 4  ;;  %v12095_v6 = vrot.slane %v17632_v17, 9 }
 0x337   : > { %v7855_v42 = vrot.slane %v20940_v29, 4  ;;  %v12111_v41 = vcombine.low %v8465_v54, %v8468_v13  ;;  %v7851_v7 = vrot.slane %v7849_v57, 5  ;;  %v7861_v61 = vrot.slane %v7859_v59, 5  ;;  %13208 = vmatmul.mubr.msk.bf16.gmra.mxu0 %vm6417_vm8, %v12109_v36  ;;  %v18133_v36 = vld [vmem:[%s20354_s3 + $0x20] sm:$0xf] }
 0x338   : > { %v7846_v40 = vor.u32 %v7845_v18, %v7842_v30  ;;  %v8471_v55 = vrot.slane %v20941_v37, 5  ;;  %v7838_v2 = vsel %vm13953_vm14, %v7833_v14, %v7837_v16  ;;  %v8474_v5 = vrot.slane %v18115_v60, 5  ;;  %13211 = vmatprep.mubr.msk.bf16.mxu0 %vm6417_vm8, %v12110_v26  ;;  %v18144_v54 = vld [vmem:[#allocation2 + $0x80] sm:$0x1] }
 0x339   : > { %v20942_v1 = vshrl.u32 %v17601_v49, 16  ;;  %v12059_v10 = vcombine.low %v7828_v19, %v7838_v2  ;;  %v7856_v15 = vor.u32 %v7855_v42, %v7851_v7  ;;  %v20943_v39 = vshll.u32 %v17601_v49, 16 }
 0x33a   : > { %v7847_v21 = vrot.slane %v7846_v40, 4  ;;  %v8472_v32 = vsel %vm14430_vm9, %v12095_v6, %v8471_v55  ;;  %v8473_v0 = vrot.slane %v8471_v55, 4  ;;  %v7873_v28 = vshll.u32 %v17606_v38, 16 }
 0x33b   : > { %v7866_v25 = vrot.slane %v20942_v1, 4  ;;  %13166 = vmatmul.mubr.msk.bf16.vlgmr.msra.gmra.mxu1 %vm6417_vm8, %v18030_v8  ;;  %v7869_v26 = vrot.slane %v20943_v39, 5  ;;  %v20944_v16 = vshrl.u32 %v17606_v38, 16  ;;  %v7857_v44 = vrot.slane %v7856_v15, 4  ;;  %v18175_v1 = vpop.f32.mrf.mxu0 }
 0x33c   : > { %v7852_v24 = vsel %vm13953_vm14, %v7847_v21, %v7851_v7  ;;  %13232 = vmatpush3.bf16.msra.mxu1 %v18003_v46  ;;  %13169 = vmatprep.mubr.msk.bf16.mxu1 %vm6417_vm8, %v18066_v53  ;;  %v8475_v8 = vsel %vm14430_vm9, %v8473_v0, %v8474_v5  ;;  %v7883_v20 = vshll.u32 %v18059_v22, 16  ;;  %v12096_v49 = vrot.slane %v17665_v51, 9 }
 0x33d   : > { %v7879_v34 = vrot.slane %v20944_v16, 4  ;;  %v12112_v27 = vcombine.low %v8472_v32, %v8475_v8  ;;  %v7870_v33 = vor.u32 %v7869_v26, %v7866_v25  ;;  %v7875_v30 = vrot.slane %v7873_v28, 5  ;;  %13461 = vmatprep.subr.msk.bf16.mxu1 %vm6466_vm6, %v18133_v36 }
 0x33e   : > { %v8478_v38 = vrot.slane %v17656_v4, 5  ;;  %v7862_v46 = vsel %vm13953_vm14, %v7857_v44, %v7861_v61  ;;  %v7885_v53 = vrot.slane %v7883_v20, 5  ;;  %v8481_v50 = vrot.slane %v18144_v54, 5  ;;  %v18168_v61 = vld [vmem:[#allocation2 + $0x8c] sm:$0x1] }
 0x33f   : > { %v20945_v18 = vshrl.u32 %v17616_v52, 16  ;;  %v12060_v22 = vcombine.low %v7852_v24, %v7862_v46  ;;  %v7871_v57 = vrot.slane %v7870_v33, 4  ;;  %v7880_v29 = vor.u32 %v7879_v34, %v7875_v30  ;;  %13212 = vmatmul.mubr.msk.bf16.gmra.mxu0 %vm6417_vm8, %v12111_v41  ;;  %v18201_v46 = vld [vmem:[#allocation2 + $0x98] sm:$0x1] }
 0x340   : > { %v8479_v42 = vsel %vm14430_vm9, %v12096_v49, %v8478_v38  ;;  %v8480_v59 = vrot.slane %v8478_v38, 4  ;;  %v20946_v14 = vshll.u32 %v17616_v52, 16  ;;  %v7897_v40 = vshll.u32 %v17622_v3, 16  ;;  %13215 = vmatprep.mubr.msk.bf16.mxu0 %vm6417_vm8, %v12112_v27  ;;  %v18194_v49 = vpop.f32.mrf.mxu0 }
 0x341   : > { %v7890_v19 = vrot.slane %v20945_v18, 4  ;;  %v20947_v6 = vshrl.u32 %v17622_v3, 16  ;;  %v7876_v55 = vsel %vm13953_vm14, %v7871_v57, %v7875_v30  ;;  %v7881_v2 = vrot.slane %v7880_v29, 4 }
 0x342   : > { %v7893_v13 = vrot.slane %v20946_v14, 5  ;;  %v7907_v21 = vshll.u32 %v18088_v56, 16  ;;  %v12097_v5 = vrot.slane %v17672_v43, 9  ;;  %v8482_v52 = vsel %vm14430_vm9, %v8480_v59, %v8481_v50 }
 0x343   : > { %v7903_v7 = vrot.slane %v20947_v6, 4  ;;  %v7899_v25 = vrot.slane %v7897_v40, 5  ;;  %v8485_v15 = vrot.slane %v17681_v58, 5  ;;  %13170 = vmatmul.mubr.msk.bf16.gmra.mxu1 %vm6417_vm8, %v18100_v11  ;;  %v7886_v41 = vsel %vm13953_vm14, %v7881_v2, %v7885_v53 }
 0x344   : > { %v7894_v3 = vor.u32 %v7893_v13, %v7890_v19  ;;  %v12113_v56 = vcombine.low %v8479_v42, %v8482_v52  ;;  %v7909_v32 = vrot.slane %v7907_v21, 5  ;;  %v8488_v0 = vrot.slane %v18168_v61, 5  ;;  %13173 = vmatprep.mubr.msk.bf16.mxu1 %vm6417_vm8, %v12059_v10  ;;  %v18211_v13 = vpop.f32.mrf.mxu0 }
 0x345   : > { %v12061_v24 = vcombine.low %v7876_v55, %v7886_v41  ;;  %v7904_v26 = vor.u32 %v7903_v7, %v7899_v25  ;;  %v8486_v28 = vsel %vm14430_vm9, %v12097_v5, %v8485_v15  ;;  %v8487_v16 = vrot.slane %v8485_v15, 4  ;;  %v18226_v41 = vld [vmem:[#allocation2 + $0xa4] sm:$0x1] }
 0x346   : > { %v7895_v39 = vrot.slane %v7894_v3, 4  ;;  %v20948_v34 = vshrl.u32 %v17632_v17, 16  ;;  %v20949_v11 = vshll.u32 %v17632_v17, 16  ;;  %v7921_v20 = vshll.u32 %v20941_v37, 16 }
 0x347   : > { %v7905_v27 = vrot.slane %v7904_v26, 4  ;;  %v20950_v33 = vshrl.u32 %v20941_v37, 16  ;;  %v7931_v38 = vshll.u32 %v18115_v60, 16  ;;  %v8489_v53 = vsel %vm14430_vm9, %v8487_v16, %v8488_v0  ;;  %13216 = vmatmul.mubr.msk.bf16.gmra.mxu0 %vm6417_vm8, %v12113_v56 }
 0x348   : > { %v7914_v44 = vrot.slane %v20948_v34, 4  ;;  %v7917_v8 = vrot.slane %v20949_v11, 5  ;;  %v7900_v10 = vsel %vm13953_vm14, %v7895_v39, %v7899_v25  ;;  %v7923_v50 = vrot.slane %v7921_v20, 5 }
 0x349   : > { %v7927_v30 = vrot.slane %v20950_v33, 4  ;;  %v12098_v18 = vrot.slane %v17697_v63, 9  ;;  %v7910_v19 = vsel %vm13953_vm14, %v7905_v27, %v7909_v32  ;;  %v12114_v57 = vcombine.low %v8486_v28, %v8489_v53  ;;  %v18236_v28 = vpop.f32.mrf.mxu0 }
 0x34a   : > { %v7918_v17 = vor.u32 %v7917_v8, %v7914_v44  ;;  %v7933_v29 = vrot.slane %v7931_v38, 5  ;;  %v8492_v42 = vrot.slane %v17705_v47, 5  ;;  %v12062_v37 = vcombine.low %v7900_v10, %v7910_v19 }
 0x34b   : > { %v7928_v59 = vor.u32 %v7927_v30, %v7923_v50  ;;  %v8495_v14 = vrot.slane %v18201_v46, 5  ;;  %13219 = vmatprep.mubr.msk.bf16.mxu0 %vm6417_vm8, %v12114_v57  ;;  %v20951_v7 = vshrl.u32 %v17665_v51, 16  ;;  %v20952_v2 = vshll.u32 %v17665_v51, 16  ;;  %13174 = vmatmul.mubr.msk.bf16.gmra.mxu1 %vm6417_vm8, %v12060_v22 }
 0x34c   : > { %v7919_v60 = vrot.slane %v7918_v17, 4  ;;  %v8493_v40 = vsel %vm14430_vm9, %v12098_v18, %v8492_v42  ;;  %v8494_v6 = vrot.slane %v8492_v42, 4  ;;  %v7945_v3 = vshll.u32 %v17656_v4, 16  ;;  %13177 = vmatprep.mubr.msk.bf16.mxu1 %vm6417_vm8, %v12061_v24  ;;  %v18257_v42 = vpop.f32.mrf.mxu0 }
 0x34d   : > { %v7938_v55 = vrot.slane %v20951_v7, 4  ;;  %v7941_v21 = vrot.slane %v20952_v2, 5  ;;  %v7929_v52 = vrot.slane %v7928_v59, 4  ;;  %v20953_v25 = vshrl.u32 %v17656_v4, 16 }
 0x34e   : > { %v7924_v5 = vsel %vm13953_vm14, %v7919_v60, %v7923_v50  ;;  %v8496_v56 = vsel %vm14430_vm9, %v8494_v6, %v8495_v14  ;;  %v7955_v32 = vshll.u32 %v18144_v54, 16  ;;  %v12099_v22 = vrot.slane %v17720_v31, 9  ;;  %v18250_v50 = vld [vmem:[#allocation2 + $0xb0] sm:$0x1] }
 0x34f   : > { %v7951_v15 = vrot.slane %v20953_v25, 4  ;;  %v7942_v51 = vor.u32 %v7941_v21, %v7938_v55  ;;  %v7934_v0 = vsel %vm13953_vm14, %v7929_v52, %v7933_v29  ;;  %v12115_v39 = vcombine.low %v8493_v40, %v8496_v56 }
 0x350   : > { %v7947_v26 = vrot.slane %v7945_v3, 5  ;;  %v8499_v4 = vrot.slane %v17728_v62, 5  ;;  %v12063_v16 = vcombine.low %v7924_v5, %v7934_v0  ;;  %v7957_v24 = vrot.slane %v7955_v32, 5  ;;  %v18277_v32 = vpop.f32.mrf.mxu0 }
 0x351   : > { %v7943_v34 = vrot.slane %v7942_v51, 4  ;;  %v8502_v44 = vrot.slane %v18226_v41, 5  ;;  %v20954_v20 = vshrl.u32 %v17672_v43, 16  ;;  %v20955_v33 = vshll.u32 %v17672_v43, 16  ;;  %13220 = vmatmul.mubr.msk.bf16.gmra.mxu0 %vm6417_vm8, %v12115_v39  ;;  %v18275_v51 = vld [vmem:[#allocation2 + $0xbc] sm:$0x1] }
 0x352   : > { %v7952_v11 = vor.u32 %v7951_v15, %v7947_v26  ;;  %v8500_v54 = vsel %vm14430_vm9, %v12099_v22, %v8499_v4  ;;  %v8501_v8 = vrot.slane %v8499_v4, 4  ;;  %v7969_v38 = vshll.u32 %v17681_v58, 16 }
 0x353   : > { %v7962_v10 = vrot.slane %v20954_v20, 4  ;;  %v7948_v27 = vsel %vm13953_vm14, %v7943_v34, %v7947_v26  ;;  %v7965_v30 = vrot.slane %v20955_v33, 5  ;;  %v20956_v53 = vshrl.u32 %v17681_v58, 16  ;;  %13178 = vmatmul.mubr.msk.bf16.gmra.mxu1 %vm6417_vm8, %v12062_v37  ;;  %v20960_v26 = vld [vmem:[#allocation8_spill] sm:$0xff]  ;;  %v18291_v33 = vpop.f32.mrf.mxu0 }
 0x354   : > { %v7953_v18 = vrot.slane %v7952_v11, 4  ;;  %v8503_v19 = vsel %vm14430_vm9, %v8501_v8, %v8502_v44  ;;  %v7979_v57 = vshll.u32 %v18168_v61, 16  ;;  %v12100_v29 = vrot.slane %v17754_v48, 9  ;;  %13181 = vmatprep.mubr.msk.bf16.mxu1 %vm6417_vm8, %v12063_v16 }
 0x355   : > { %v7975_v17 = vrot.slane %v20956_v53, 4  ;;  %v12116_v43 = vcombine.low %v8500_v54, %v8503_v19  ;;  %v7966_v60 = vor.u32 %v7965_v30, %v7962_v10  ;;  %v7971_v59 = vrot.slane %v7969_v38, 5 }
 0x356   : > { %v8506_v58 = vrot.slane %v17744_v35, 5  ;;  %v7958_v14 = vsel %vm13953_vm14, %v7953_v18, %v7957_v24  ;;  %v7981_v40 = vrot.slane %v7979_v57, 5  ;;  %v8509_v6 = vrot.slane %v18250_v50, 5  ;;  %v20961_v24 = vld [vmem:[#allocation11_spill] sm:$0xff] }
 0x357   : > { %v20957_v7 = vshrl.u32 %v17697_v63, 16  ;;  %v12064_v55 = vcombine.low %v7948_v27, %v7958_v14  ;;  %13223 = vmatprep.mubr.msk.bf16.mxu0 %vm6417_vm8, %v12116_v43  ;;  %v7967_v2 = vrot.slane %v7966_v60, 4  ;;  %v7976_v21 = vor.u32 %v7975_v17, %v7971_v59 }
 0x358   : > { %v8507_v5 = vsel %vm14430_vm9, %v12100_v29, %v8506_v58  ;;  %v8508_v37 = vrot.slane %v8506_v58, 4  ;;  %v20958_v52 = vshll.u32 %v17697_v63, 16  ;;  %v7993_v25 = vshll.u32 %v17705_v47, 16  ;;  %v18305_v58 = vld [vmem:[#allocation2 + $0xc8] sm:$0x1] }
 0x359   : > { %v7986_v61 = vrot.slane %v20957_v7, 4  ;;  %v20959_v15 = vshrl.u32 %v17705_v47, 16  ;;  %v7972_v22 = vsel %vm13953_vm14, %v7967_v2, %v7971_v59  ;;  %v7977_v0 = vrot.slane %v7976_v21, 4  ;;  %v18314_v2 = vpop.f32.mrf.mxu0 }
 0x35a   : > { %v7989_v3 = vrot.slane %v20958_v52, 5  ;;  %v8003_v39 = vshll.u32 %v18201_v46, 16  ;;  %v12101_v4 = vrot.slane %v20960_v26, 9  ;;  %v8510_v63 = vsel %vm14430_vm9, %v8508_v37, %v8509_v6  ;;  %v18317_v52 = vld [vmem:[#allocation2 + $0x18] sm:$0xf] }
 0x35b   : > { %v7999_v56 = vrot.slane %v20959_v15, 4  ;;  %v7995_v34 = vrot.slane %v7993_v25, 5  ;;  %v8513_v47 = vrot.slane %v20961_v24, 5  ;;  %v7982_v44 = vsel %vm13953_vm14, %v7977_v0, %v7981_v40  ;;  %13182 = vmatmul.mubr.msk.bf16.gmra.mxu1 %vm6417_vm8, %v12064_v55 }
 0x35c   : > { %v7990_v16 = vor.u32 %v7989_v3, %v7986_v61  ;;  %v12117_v11 = vcombine.low %v8507_v5, %v8510_v63  ;;  %v8005_v54 = vrot.slane %v8003_v39, 5  ;;  %v8516_v8 = vrot.slane %v18275_v51, 5  ;;  %v18319_v3 = vpop.f32.mrf.mxu1 }
 0x35d   : > { %v12065_v20 = vcombine.low %v7972_v22, %v7982_v44  ;;  %v8000_v27 = vor.u32 %v7999_v56, %v7995_v34  ;;  %v8514_v46 = vsel %vm14430_vm9, %v12101_v4, %v8513_v47  ;;  %v8515_v30 = vrot.slane %v8513_v47, 4 }
 0x35e   : > { %v7991_v10 = vrot.slane %v7990_v16, 4  ;;  %13224 = vmatmul.mubr.msk.bf16.gmra.mxu0 %vm6417_vm8, %v12117_v11  ;;  %v20962_v38 = vshrl.u32 %v17720_v31, 16  ;;  %v20963_v17 = vshll.u32 %v17720_v31, 16  ;;  %v8017_v19 = vshll.u32 %v17728_v62, 16 }
 0x35f   : > { %v8001_v29 = vrot.slane %v8000_v27, 4  ;;  %v20964_v43 = vshrl.u32 %v17728_v62, 16  ;;  %v8027_v59 = vshll.u32 %v18226_v41, 16  ;;  %13185 = vmatprep.mubr.msk.bf16.mxu1 %vm6417_vm8, %v12065_v20  ;;  %v8517_v31 = vsel %vm14430_vm9, %v8515_v30, %v8516_v8  ;;  %v18336_v8 = vld [vmem:[#allocation2 + $0x1c] sm:$0xf]  ;;  %v18339_v20 = vpop.f32.mrf.mxu0 }
 0x360   : > { %v8010_v53 = vrot.slane %v20962_v38, 4  ;;  %v8013_v18 = vrot.slane %v20963_v17, 5  ;;  %v7996_v57 = vsel %vm13953_vm14, %v7991_v10, %v7995_v34  ;;  %v8019_v40 = vrot.slane %v8017_v19, 5  ;;  %v18343_v30 = vld [vmem:[#allocation2 + $0x20] sm:$0x1]  ;;  %v18346_v38 = vpop.f32.mrf.mxu1 }
 0x361   : > { %v8023_v60 = vrot.slane %v20964_v43, 4  ;;  %v12102_v6 = vrot.slane %v17789_v45, 9  ;;  %v8006_v7 = vsel %vm13953_vm14, %v8001_v29, %v8005_v54  ;;  %v12118_v61 = vcombine.low %v8514_v46, %v8517_v31 }
 0x362   : > { %v8014_v14 = vor.u32 %v8013_v18, %v8010_v53  ;;  %v8029_v55 = vrot.slane %v8027_v59, 5  ;;  %v8520_v62 = vrot.slane %v17797_v9, 5  ;;  %v12066_v41 = vcombine.low %v7996_v57, %v8006_v7  ;;  %v18360_v7 = vpop.f32.mrf.mxu0 }
 0x363   : > { %v8024_v5 = vor.u32 %v8023_v60, %v8019_v40  ;;  %v8523_v37 = vrot.slane %v18305_v58, 5  ;;  %13227 = vmatprep.mubr.msk.bf16.mxu0 %vm6417_vm8, %v12118_v61  ;;  %v20965_v56 = vshrl.u32 %v17754_v48, 16  ;;  %v20966_v0 = vshll.u32 %v17754_v48, 16 }
 0x364   : > { %v8015_v21 = vrot.slane %v8014_v14, 4  ;;  %v8521_v25 = vsel %vm14430_vm9, %v12102_v6, %v8520_v62  ;;  %v8522_v15 = vrot.slane %v8520_v62, 4  ;;  %v8041_v16 = vshll.u32 %v17744_v35, 16  ;;  %13186 = vmatmul.mubr.msk.bf16.gmra.mxu1 %vm6417_vm8, %v12066_v41 }
 0x365   : > { %v8034_v22 = vrot.slane %v20965_v56, 4  ;;  %v8037_v39 = vrot.slane %v20966_v0, 5  ;;  %v8025_v63 = vrot.slane %v8024_v5, 4  ;;  %v20967_v34 = vshrl.u32 %v17744_v35, 16 }
 0x366   : > { %v8020_v4 = vsel %vm13953_vm14, %v8015_v21, %v8019_v40  ;;  %v8524_v44 = vsel %vm14430_vm9, %v8522_v15, %v8523_v37  ;;  %v8051_v54 = vshll.u32 %v18250_v50, 16  ;;  %v9194_v48 = vshrl.u32 %v18317_v52, 16  ;;  %v18362_v21 = vpop.f32.mrf.mxu1 }
 0x367   : > { %v8047_v47 = vrot.slane %v20967_v34, 4  ;;  %v8038_v11 = vor.u32 %v8037_v39, %v8034_v22  ;;  %v8030_v10 = vsel %vm13953_vm14, %v8025_v63, %v8029_v55  ;;  %v12119_v27 = vcombine.low %v8521_v25, %v8524_v44  ;;  %v18367_v22 = vld [vmem:[#allocation2 + $0x24] sm:$0xf]  ;;  %v18372_v63 = vld [vmem:[#allocation2 + $0x28] sm:$0xf]  ;;  %v20971_v44 = vld [vmem:[#allocation49_spill] sm:$0xff] }
 0x368   : > { %v8043_v46 = vrot.slane %v8041_v16, 5  ;;  %v9197_v35 = vshll.u32 %v18317_v52, 16  ;;  %v12067_v50 = vcombine.low %v8020_v4, %v8030_v10  ;;  %v8053_v17 = vrot.slane %v8051_v54, 5  ;;  %v18377_v16 = vld [vmem:[%s20357_s6] sm:$0xf] }
 0x369   : > { %v8039_v53 = vrot.slane %v8038_v11, 4  ;;  %v9196_v18 = vrot.slane %v9194_v48, 4  ;;  %13228 = vmatmul.mubr.msk.bf16.gmra.mxu0 %vm6417_vm8, %v12119_v27  ;;  %v9203_v29 = vshll.u32 %v18336_v8, 16  ;;  %v9207_v43 = vshrl.u32 %v18336_v8, 16  ;;  %v18381_v54 = vld [vmem:[#allocation2 + $0x2c] sm:$0x1]  ;;  %v18383_v48 = vpop.f32.mrf.mxu0 }
 0x36a   : > { %v8048_v19 = vor.u32 %v8047_v47, %v8043_v46  ;;  %v9199_v57 = vrot.slane %v9197_v35, 5  ;;  %13189 = vmatprep.mubr.msk.bf16.mxu1 %vm6417_vm8, %v12067_v50  ;;  %v9213_v59 = vshll.u32 %v18343_v30, 16  ;;  %v20968_v31 = vshrl.u32 %v20960_v26, 16  ;;  %v18388_v35 = vpop.f32.mrf.mxu1 }
 0x36b   : > { %v8044_v60 = vsel %vm13953_vm14, %v8039_v53, %v8043_v46  ;;  %v20969_v40 = vshll.u32 %v20960_v26, 16  ;;  %v9205_v62 = vrot.slane %v9203_v29, 5  ;;  %v9209_v41 = vrot.slane %v9207_v43, 4 }
 0x36c   : > { %v8058_v14 = vrot.slane %v20968_v31, 4  ;;  %v8049_v61 = vrot.slane %v8048_v19, 4  ;;  %v9200_v55 = vor.u32 %v9199_v57, %v9196_v18  ;;  %v9215_v5 = vrot.slane %v9213_v59, 5 }
 0x36d   : > { %v8061_v6 = vrot.slane %v20969_v40, 5  ;;  %v8065_v25 = vshll.u32 %v20961_v24, 16  ;;  %v20970_v15 = vshrl.u32 %v20961_v24, 16  ;;  %v9210_v39 = vor.u32 %v9209_v41, %v9205_v62  ;;  %v18401_v40 = vpop.f32.mrf.mxu0 }
 0x36e   : > { %v8054_v26 = vsel %vm13953_vm14, %v8049_v61, %v8053_v17  ;;  %v9201_v0 = vrot.slane %v9200_v55, 4  ;;  %v8075_v4 = vshll.u32 %v18275_v51, 16  ;;  %v9676_v11 = vsel %vm6466_vm6, %v20971_v44, 0 }
 0x36f   : > { %v8062_v37 = vor.u32 %v8061_v6, %v8058_v14  ;;  %v8071_v56 = vrot.slane %v20970_v15, 4  ;;  %v12068_v34 = vcombine.low %v8044_v60, %v8054_v26  ;;  %v8067_v24 = vrot.slane %v8065_v25, 5  ;;  %13266 = vmatpush3.bf16.msra.mxu0 %v9676_v11  ;;  %v18409_v25 = vpop.f32.mrf.mxu1 }
 0x370   : > { %v9206_v51 = vsel %vm13953_vm14, %v9201_v0, %v9205_v62  ;;  %v9211_v10 = vrot.slane %v9210_v39, 4  ;;  %v8077_v27 = vrot.slane %v8075_v4, 5  ;;  %v9218_v46 = vshrl.u32 %v18367_v22, 16  ;;  %13462 = vmatprep.subr.msk.bf16.mxu0 %vm6466_vm6, %v18377_v16  ;;  %v18417_v4 = vld [vmem:[#allocation2 + $0x34] sm:$0xf] }
 0x371   : > { %v8063_v47 = vrot.slane %v8062_v37, 4  ;;  %13190 = vmatmul.mubr.msk.bf16.gmra.mxu1 %vm6417_vm8, %v12068_v34  ;;  %v8072_v53 = vor.u32 %v8071_v56, %v8067_v24  ;;  %v9221_v17 = vshll.u32 %v18367_v22, 16  ;;  %v9227_v18 = vshll.u32 %v18372_v63, 16 }
 0x372   : > { %v9216_v19 = vsel %vm13953_vm14, %v9211_v10, %v9215_v5  ;;  %v9220_v57 = vrot.slane %v9218_v46, 4  ;;  %v9231_v29 = vshrl.u32 %v18372_v63, 16  ;;  %v9237_v43 = vshll.u32 %v18381_v54, 16  ;;  %v18407_v5 = vld [vmem:[#allocation2 + $0x30] sm:$0xf] }
 0x373   : > { %v8068_v50 = vsel %vm13953_vm14, %v8063_v47, %v8067_v24  ;;  %v12170_v60 = vcombine.low %v9206_v51, %v9216_v19  ;;  %v8073_v59 = vrot.slane %v8072_v53, 4  ;;  %v9223_v31 = vrot.slane %v9221_v17, 5  ;;  %v18425_v17 = vld [vmem:[#allocation2 + $0x38] sm:$0x1] }
 0x374   : > { %v9229_v14 = vrot.slane %v9227_v18, 5  ;;  %v9233_v6 = vrot.slane %v9231_v29, 4  ;;  %v9239_v61 = vrot.slane %v9237_v43, 5  ;;  %v20972_v55 = vshrl.u32 %v17789_v45, 16  ;;  %v18428_v18 = vpop.f32.mrf.mxu1  ;;  %v18432_v43 = vld [vmem:[#allocation2 + $0x3c] sm:$0xf] }
 0x375   : > { %v20973_v41 = vshll.u32 %v17789_v45, 16  ;;  %13267 = vmatprep.mubr.msk.bf16.mxu0 %vm6417_vm8, %v12170_v60  ;;  %v8078_v15 = vsel %vm13953_vm14, %v8073_v59, %v8077_v27  ;;  %v9224_v56 = vor.u32 %v9223_v31, %v9220_v57  ;;  %v8089_v26 = vshll.u32 %v17797_v9, 16  ;;  %v18422_v27 = vpop.f32.mrf.mxu0 }
 0x376   : > { %v8082_v62 = vrot.slane %v20972_v55, 4  ;;  %v20974_v0 = vshrl.u32 %v17797_v9, 16  ;;  %v12069_v34 = vcombine.low %v8068_v50, %v8078_v15  ;;  %v9234_v45 = vor.u32 %v9233_v6, %v9229_v14 }
 0x377   : > { %v8085_v37 = vrot.slane %v20973_v41, 5  ;;  %v8099_v24 = vshll.u32 %v18305_v58, 16  ;;  %v9225_v44 = vrot.slane %v9224_v56, 4  ;;  %v8091_v11 = vrot.slane %v8089_v26, 5  ;;  %v18434_v60 = vpop.f32.mrf.mxu0 }
 0x378   : > { %v8095_v39 = vrot.slane %v20974_v0, 4  ;;  %v9242_v51 = vshrl.u32 %v18407_v5, 16  ;;  %v9245_v10 = vshll.u32 %v18407_v5, 16  ;;  %13193 = vmatprep.mubr.msk.bf16.mxu1 %vm6417_vm8, %v12069_v34  ;;  %v9235_v46 = vrot.slane %v9234_v45, 4  ;;  %v18446_v0 = vld [vmem:[#allocation2 + $0x44] sm:$0x1]  ;;  %v18450_v34 = vpop.f32.mrf.mxu1 }
 0x379   : > { %v8086_v47 = vor.u32 %v8085_v37, %v8082_v62  ;;  %v8101_v53 = vrot.slane %v8099_v24, 5  ;;  %v9251_v50 = vshll.u32 %v18417_v4, 16  ;;  %v9230_v58 = vsel %vm13953_vm14, %v9225_v44, %v9229_v14  ;;  %v18441_v62 = vld [vmem:[#allocation2 + $0x40] sm:$0xf]  ;;  %20976 = vst [vmem:[#allocation27_spill] sm:$0xff] %v18446_v0 }
 0x37a   : > { %v8096_v19 = vor.u32 %v8095_v39, %v8091_v11  ;;  %v9244_v57 = vrot.slane %v9242_v51, 4  ;;  %v9247_v29 = vrot.slane %v9245_v10, 5  ;;  %v9240_v59 = vsel %vm13953_vm14, %v9235_v46, %v9239_v61  ;;  %20975 = vst [vmem:[#allocation19_spill] sm:$0xff] %v18441_v62 }
 0x37b   : > { %v8087_v9 = vrot.slane %v8086_v47, 4  ;;  %v9253_v6 = vrot.slane %v9251_v50, 5  ;;  %v9255_v55 = vshrl.u32 %v18417_v4, 16  ;;  %v12171_v41 = vcombine.low %v9230_v58, %v9240_v59 }
 0x37c   : > { %v8097_v14 = vrot.slane %v8096_v19, 4  ;;  %v9248_v37 = vor.u32 %v9247_v29, %v9244_v57  ;;  %v9261_v15 = vshll.u32 %v18425_v17, 16  ;;  %v12137_v26 = vcombine.low %v18317_v52, %v18336_v8  ;;  %v18464_v57 = vld [vmem:[#allocation2 + $0x4c] sm:$0xf] }
 0x37d   : > { %v8092_v31 = vsel %vm13953_vm14, %v8087_v9, %v8091_v11  ;;  %v9257_v56 = vrot.slane %v9255_v55, 4  ;;  %v9266_v61 = vshrl.u32 %v18432_v43, 16  ;;  %v9269_v39 = vshll.u32 %v18432_v43, 16  ;;  %13268 = vmatmul.mubr.msk.bf16.vlgmr.msra.gmra.mxu0 %vm6417_vm8, %v12171_v41  ;;  %v18456_v11 = vpop.f32.mrf.mxu0  ;;  %v18458_v9 = vld [vmem:[#allocation2 + $0x48] sm:$0xf]  ;;  %20977 = vst [vmem:[#allocation21_spill] sm:$0xff] %v18464_v57  ;;  %v18473_v41 = vpop.f32.mrf.mxu1 }
 0x37e   : > { %v8102_v45 = vsel %vm13953_vm14, %v8097_v14, %v8101_v53  ;;  %v9249_v47 = vrot.slane %v9248_v37, 4  ;;  %v9263_v24 = vrot.slane %v9261_v15, 5  ;;  %v9275_v44 = vshll.u32 %v18441_v62, 16  ;;  %v18476_v37 = vld [vmem:[#allocation2 + $0x50] sm:$0x1] }
 0x37f   : > { %v12070_v52 = vcombine.low %v8092_v31, %v8102_v45  ;;  %v9258_v51 = vor.u32 %v9257_v56, %v9253_v6  ;;  %v9268_v10 = vrot.slane %v9266_v61, 4  ;;  %v9271_v46 = vrot.slane %v9269_v39, 5  ;;  %20978 = vst [vmem:[#allocation9_spill] sm:$0xff] %v18476_v37  ;;  %v18480_v61 = vpop.f32.mrf.mxu0 }
 0x380   : > { %v9254_v50 = vsel %vm13953_vm14, %v9249_v47, %v9253_v6  ;;  %v9277_v58 = vrot.slane %v9275_v44, 5  ;;  %v9279_v19 = vshrl.u32 %v18441_v62, 16  ;;  %v9285_v53 = vshll.u32 %v18446_v0, 16  ;;  %v18491_v0 = vpop.f32.mrf.mxu1 }
 0x381   : > { %13194 = vmatmul.mubr.msk.bf16.gmra.mxu1 %vm6417_vm8, %v12070_v52  ;;  %v9259_v29 = vrot.slane %v9258_v51, 4  ;;  %v9272_v59 = vor.u32 %v9271_v46, %v9268_v10  ;;  %v18469_v31 = vadd.f32 %v18175_v1, %v18319_v3  ;;  %v12138_v55 = vcombine.low %v18367_v22, %v18372_v63 }
 0x382   : > { %13233 = vmatprep.mubr.msk.bf16.mxu1 %vm6417_vm8, %v12137_v26  ;;  %v9281_v6 = vrot.slane %v9279_v19, 4  ;;  %v9287_v14 = vrot.slane %v9285_v53, 5  ;;  %v9290_v15 = vshrl.u32 %v18458_v9, 16  ;;  %v9293_v56 = vshll.u32 %v18458_v9, 16  ;;  %v18489_v53 = vld [vmem:[#allocation2 + $0x54] sm:$0xf] }
 0x383   : > { %v9264_v1 = vsel %vm13953_vm14, %v9259_v29, %v9263_v24  ;;  %v9273_v3 = vrot.slane %v9272_v59, 4  ;;  %v9299_v39 = vshll.u32 %v18464_v57, 16  ;;  %v9303_v45 = vshrl.u32 %v18464_v57, 16  ;;  %20979 = vst [vmem:[#allocation6_spill] sm:$0xff] %v18489_v53 }
 0x384   : > { %v12172_v47 = vcombine.low %v9254_v50, %v9264_v1  ;;  %v9282_v26 = vor.u32 %v9281_v6, %v9277_v58  ;;  %v9292_v44 = vrot.slane %v9290_v15, 4  ;;  %v9295_v52 = vrot.slane %v9293_v56, 5  ;;  %v18498_v6 = vld [vmem:[#allocation2 + $0x58] sm:$0xf] }
 0x385   : > { %v9278_v51 = vsel %vm13953_vm14, %v9273_v3, %v9277_v58  ;;  %v9301_v10 = vrot.slane %v9299_v39, 5  ;;  %v9305_v46 = vrot.slane %v9303_v45, 4  ;;  %v9309_v19 = vshll.u32 %v18476_v37, 16  ;;  %20980 = vst [vmem:[#allocation33_spill] sm:$0xff] %v18498_v6  ;;  %v18500_v58 = vpop.f32.mrf.mxu0  ;;  %v18510_v39 = vld [vmem:[#allocation2 + $0x5c] sm:$0x1] }
 0x386   : > { %13271 = vmatprep.mubr.msk.bf16.mxu0 %vm6417_vm8, %v12172_v47  ;;  %v9283_v24 = vrot.slane %v9282_v26, 4  ;;  %v9296_v29 = vor.u32 %v9295_v52, %v9292_v44  ;;  %v10098_v50 = vsel %vm6466_vm6, %v18133_v36, 0  ;;  %v12139_v59 = vcombine.low %v18407_v5, %v18417_v4  ;;  %20981 = vst [vmem:[#allocation35_spill] sm:$0xff] %v18510_v39  ;;  %v18529_v52 = vld [vmem:[#allocation2 + $0x60] sm:$0xf] }
 0x387   : > { %v9306_v15 = vor.u32 %v9305_v46, %v9301_v10  ;;  %v9311_v56 = vrot.slane %v9309_v19, 5  ;;  %v18504_v1 = vadd.f32 %v18194_v49, %v18346_v38  ;;  %v18508_v3 = vadd.f32 %v18211_v13, %v18362_v21  ;;  %v18519_v44 = vpop.f32.mrf.mxu0  ;;  %v18524_v49 = vld [vmem:[%s20356_s5] sm:$0x3]  ;;  %20984 = vst [vmem:[#allocation8_spill] sm:$0xff] %v18529_v52  ;;  %v18538_v19 = vld [vmem:[#allocation2 + $0x64] sm:$0xf] }
 0x388   : > { %v9288_v36 = vsel %vm13953_vm14, %v9283_v24, %v9287_v14  ;;  %v9297_v45 = vrot.slane %v9296_v29, 4  ;;  %v18516_v47 = vadd.f32 %v18236_v28, %v18388_v35  ;;  %v9314_v26 = vshrl.u32 %v18489_v53, 16  ;;  %20983 = vst [vmem:[#allocation47_spill] sm:$0xff] %v18524_v49  ;;  %v18531_v28 = vpop.f32.mrf.mxu1  ;;  %20985 = vst [vmem:[#allocation11_spill] sm:$0xff] %v18538_v19 }
 0x389   : > { %v12173_v13 = vcombine.low %v9278_v51, %v9288_v36  ;;  %13234 = vmatmul.mubr.msk.bf16.vlgmr.msra.gmra.mxu1 %vm6417_vm8, %v12138_v55  ;;  %v9307_v38 = vrot.slane %v9306_v15, 4  ;;  %v9317_v21 = vshll.u32 %v18489_v53, 16  ;;  %v9323_v14 = vshll.u32 %v18498_v6, 16 }
 0x38a   : > { %20982 = vst [vmem:[#allocation37_spill] sm:$0xff] %v18516_v47  ;;  %v9302_v35 = vsel %vm13953_vm14, %v9297_v45, %v9301_v10  ;;  %13300 = vmatpush3.bf16.msra.mxu1 %v10098_v50  ;;  %13237 = vmatprep.mubr.msk.bf16.mxu1 %vm6417_vm8, %v12139_v59  ;;  %v9316_v46 = vrot.slane %v9314_v26, 4  ;;  %v9327_v51 = vshrl.u32 %v18498_v6, 16  ;;  %v9333_v55 = vshll.u32 %v18510_v39, 16  ;;  %v18547_v50 = vld [vmem:[#allocation2 + $0x68] sm:$0x1] }
 0x38b   : > { %13272 = vmatmul.mubr.msk.bf16.gmra.mxu0 %vm6417_vm8, %v12173_v13  ;;  %v9312_v24 = vsel %vm13953_vm14, %v9307_v38, %v9311_v56  ;;  %v9319_v29 = vrot.slane %v9317_v21, 5  ;;  %v9325_v15 = vrot.slane %v9323_v14, 5  ;;  %v18545_v10 = vadd.f32 %v18257_v42, %v18409_v25  ;;  %20987 = vst [vmem:[#allocation50_spill] sm:$0xff] %v18547_v50  ;;  %13463 = vmatprep.subr.msk.bf16.mxu1 %vm1503_vm0, %v18524_v49  ;;  %v18553_v13 = vpop.f32.mrf.mxu0  ;;  %v18558_v25 = vpop.f32.mrf.mxu1  ;;  %v18565_v39 = vld [vmem:[#allocation2 + $0x6c] sm:$0xf] }
 0x38c   : > { %v12174_v59 = vcombine.low %v9302_v35, %v9312_v24  ;;  %v9329_v36 = vrot.slane %v9327_v51, 4  ;;  %v9335_v45 = vrot.slane %v9333_v55, 5  ;;  %v12140_v26 = vcombine.low %v18432_v43, %v18441_v62  ;;  %20988 = vst [vmem:[#allocation51_spill] sm:$0xff] %v18565_v39 }
 0x38d   : > { %20986 = vst [vmem:[#allocation49_spill] sm:$0xff] %v18545_v10  ;;  %v9320_v56 = vor.u32 %v9319_v29, %v9316_v46  ;;  %v9338_v38 = vshrl.u32 %v18529_v52, 16  ;;  %v9341_v21 = vshll.u32 %v18529_v52, 16  ;;  %v9347_v42 = vshll.u32 %v18538_v19, 16  ;;  %v18573_v62 = vpop.f32.mrf.mxu0 }
 0x38e   : > { %13275 = vmatprep.mubr.msk.bf16.mxu0 %vm6417_vm8, %v12174_v59  ;;  %v9330_v14 = vor.u32 %v9329_v36, %v9325_v15  ;;  %v9351_v35 = vshrl.u32 %v18538_v19, 16  ;;  %v9357_v51 = vshll.u32 %v18547_v50, 16  ;;  %v12141_v55 = vcombine.low %v18458_v9, %v18464_v57  ;;  %v18571_v36 = vld [vmem:[#allocation2 + $0x70] sm:$0xf] }
 0x38f   : > { %v9321_v24 = vrot.slane %v9320_v56, 4  ;;  %v9340_v46 = vrot.slane %v9338_v38, 4  ;;  %v9343_v29 = vrot.slane %v9341_v21, 5  ;;  %v9349_v49 = vrot.slane %v9347_v42, 5  ;;  %20990 = vst [vmem:[#allocation53_spill] sm:$0xff] %v18571_v36 }
 0x390   : > { %v9331_v37 = vrot.slane %v9330_v14, 4  ;;  %v9353_v10 = vrot.slane %v9351_v35, 4  ;;  %v9359_v47 = vrot.slane %v9357_v51, 5  ;;  %v18569_v59 = vadd.f32 %v18277_v32, %v18428_v18  ;;  %v18586_v32 = vld [vmem:[#allocation2 + $0x74] sm:$0x1]  ;;  %v6539_v18 = vpop.f32.mrf.mxu1 }
 0x391   : > { %v9326_v50 = vsel %vm13953_vm14, %v9321_v24, %v9325_v15  ;;  %13238 = vmatmul.mubr.msk.bf16.gmra.mxu1 %vm6417_vm8, %v12140_v26  ;;  %v9344_v56 = vor.u32 %v9343_v29, %v9340_v46  ;;  %v18580_v38 = vadd.f32 %v18291_v33, %v18450_v34  ;;  %v18584_v21 = vadd.f32 %v18314_v2, %v18473_v41  ;;  %v18596_v29 = vld [vmem:[#allocation2 + $0x78] sm:$0xf] }
 0x392   : > { %20989 = vst [vmem:[#allocation52_spill] sm:$0xff] %v18569_v59  ;;  %20993 = vst [vmem:[#allocation56_spill] sm:$0xff] %v18586_v32  ;;  %v9336_v42 = vsel %vm13953_vm14, %v9331_v37, %v9335_v45  ;;  %v9354_v14 = vor.u32 %v9353_v10, %v9349_v49  ;;  %13241 = vmatprep.mubr.msk.bf16.mxu1 %vm6417_vm8, %v12141_v55  ;;  %v9362_v15 = vshrl.u32 %v18565_v39, 16  ;;  %v9365_v26 = vshll.u32 %v18565_v39, 16  ;;  %v18598_v37 = vpop.f32.mrf.mxu0 }
 0x393   : > { %20991 = vst [vmem:[#allocation54_spill] sm:$0xff] %v18580_v38  ;;  %20992 = vst [vmem:[#allocation55_spill] sm:$0xff] %v18584_v21  ;;  %v12175_v35 = vcombine.low %v9326_v50, %v9336_v42  ;;  %v9345_v33 = vrot.slane %v9344_v56, 4  ;;  %v9371_v34 = vshll.u32 %v18571_v36, 16  ;;  %v9375_v2 = vshrl.u32 %v18571_v36, 16 }
 0x394   : > { %v9355_v41 = vrot.slane %v9354_v14, 4  ;;  %v9364_v51 = vrot.slane %v9362_v15, 4  ;;  %v9367_v24 = vrot.slane %v9365_v26, 5  ;;  %v9381_v46 = vshll.u32 %v18586_v32, 16  ;;  %20994 = vst [vmem:[#allocation57_spill] sm:$0xff] %v18596_v29  ;;  %v13043_v14 = vpop.f32.mrf.mxu1 }
 0x395   : > { %13276 = vmatmul.mubr.msk.bf16.gmra.mxu0 %vm6417_vm8, %v12175_v35  ;;  %v9350_v10 = vsel %vm13953_vm14, %v9345_v33, %v9349_v49  ;;  %v9373_v50 = vrot.slane %v9371_v34, 5  ;;  %v9377_v45 = vrot.slane %v9375_v2, 4  ;;  %v18605_v55 = vadd.f32 %v18339_v20, %v18491_v0  ;;  %v18607_v56 = vld [vmem:[#allocation2 + $0x7c] sm:$0xf]  ;;  %v18609_v42 = vld [vmem:[#allocation2 + $0x80] sm:$0x1]  ;;  %v18615_v49 = vpop.f32.mrf.mxu0 }
 0x396   : > { %20996 = vst [vmem:[#allocation59_spill] sm:$0xff] %v18607_v56  ;;  %20997 = vst [vmem:[#allocation60_spill] sm:$0xff] %v18609_v42  ;;  %v9360_v15 = vsel %vm13953_vm14, %v9355_v41, %v9359_v47  ;;  %v9368_v26 = vor.u32 %v9367_v24, %v9364_v51  ;;  %v9383_v32 = vrot.slane %v9381_v46, 5  ;;  %v12142_v35 = vcombine.low %v18489_v53, %v18498_v6  ;;  %v18619_v2 = vpop.f32.mrf.mxu1  ;;  %v18636_v53 = vld [vmem:[#allocation2 + $0x88] sm:$0xf] }
 0x397   : > { %20995 = vst [vmem:[#allocation58_spill] sm:$0xff] %v18605_v55  ;;  %v12176_v33 = vcombine.low %v9350_v10, %v9360_v15  ;;  %v9378_v34 = vor.u32 %v9377_v45, %v9373_v50  ;;  %v9386_v20 = vshrl.u32 %v18596_v29, 16  ;;  %v9389_v0 = vshll.u32 %v18596_v29, 16  ;;  %v18624_v51 = vpop.f32.mrf.mxu0  ;;  %v18630_v15 = vld [vmem:[#allocation2 + $0x84] sm:$0xf]  ;;  %20999 = vst [vmem:[#allocation62_spill] sm:$0xff] %v18636_v53 }
 0x398   : > { %v9369_v55 = vrot.slane %v9368_v26, 4  ;;  %v9395_v21 = vshll.u32 %v18607_v56, 16  ;;  %v9399_v47 = vshrl.u32 %v18607_v56, 16  ;;  %v9405_v41 = vshll.u32 %v18609_v42, 16  ;;  %20998 = vst [vmem:[#allocation61_spill] sm:$0xff] %v18630_v15  ;;  %v18632_v26 = vpop.f32.mrf.mxu1 }
 0x399   : > { %13279 = vmatprep.mubr.msk.bf16.mxu0 %vm6417_vm8, %v12176_v33  ;;  %v9379_v24 = vrot.slane %v9378_v34, 4  ;;  %13242 = vmatmul.mubr.msk.bf16.gmra.mxu1 %vm6417_vm8, %v12142_v35  ;;  %v9388_v46 = vrot.slane %v9386_v20, 4  ;;  %v9391_v10 = vrot.slane %v9389_v0, 5  ;;  %v12143_v45 = vcombine.low %v18529_v52, %v18538_v19  ;;  %v18638_v33 = vpop.f32.mrf.mxu0  ;;  %v18768_v52 = vld [vmem:[#allocation2 + $0xb8] sm:$0xf] }
 0x39a   : > { %v9374_v38 = vsel %vm13953_vm14, %v9369_v55, %v9373_v50  ;;  %v9397_v42 = vrot.slane %v9395_v21, 5  ;;  %v9401_v59 = vrot.slane %v9399_v47, 4  ;;  %v9407_v6 = vrot.slane %v9405_v41, 5  ;;  %v18651_v21 = vld [vmem:[#allocation2 + $0x8c] sm:$0x1]  ;;  %v6555_v55 = vpop.f32.mrf.mxu1 }
 0x39b   : > { %v9384_v35 = vsel %vm13953_vm14, %v9379_v24, %v9383_v32  ;;  %v9392_v34 = vor.u32 %v9391_v10, %v9388_v46  ;;  %13245 = vmatprep.mubr.msk.bf16.mxu1 %vm6417_vm8, %v12143_v45  ;;  %v18645_v20 = vadd.f32 %v18360_v7, %v18531_v28  ;;  %v18649_v50 = vadd.f32 %v18383_v48, %v18558_v25  ;;  %v18660_v10 = vld [vmem:[#allocation2 + $0x90] sm:$0xf]  ;;  %v18662_v48 = vpop.f32.mrf.mxu0 }
 0x39c   : > { %21002 = vst [vmem:[#allocation65_spill] sm:$0xff] %v18651_v21  ;;  %v12177_v0 = vcombine.low %v9374_v38, %v9384_v35  ;;  %v9402_v47 = vor.u32 %v9401_v59, %v9397_v42  ;;  %v18654_v41 = vadd.f32 %v18401_v40, %v6539_v18  ;;  %v9410_v32 = vshrl.u32 %v18630_v15, 16  ;;  %v18669_v18 = vld [vmem:[#allocation2 + $0x94] sm:$0xf] }
 0x39d   : > { %21000 = vst [vmem:[#allocation63_spill] sm:$0xff] %v18645_v20  ;;  %21001 = vst [vmem:[#allocation64_spill] sm:$0xff] %v18649_v50  ;;  %v9393_v24 = vrot.slane %v9392_v34, 4  ;;  %v9413_v46 = vshll.u32 %v18630_v15, 16  ;;  %v9419_v7 = vshll.u32 %v18636_v53, 16  ;;  %v9423_v28 = vshrl.u32 %v18636_v53, 16  ;;  %v13047_v20 = vpop.f32.mrf.mxu1  ;;  %v18675_v19 = vpop.f32.mrf.mxu0 }
 0x39e   : > { %21003 = vst [vmem:[#allocation66_spill] sm:$0xff] %v18654_v41  ;;  %13280 = vmatmul.mubr.msk.bf16.gmra.mxu0 %vm6417_vm8, %v12177_v0  ;;  %v9403_v25 = vrot.slane %v9402_v47, 4  ;;  %v9412_v59 = vrot.slane %v9410_v32, 4  ;;  %v9429_v40 = vshll.u32 %v18651_v21, 16  ;;  %v18667_v38 = vadd.f32 %v18422_v27, %v13043_v14  ;;  %v18673_v50 = vld [vmem:[#allocation2 + $0x98] sm:$0x1] }
 0x39f   : > { %v9398_v45 = vsel %vm13953_vm14, %v9393_v24, %v9397_v42  ;;  %v9415_v35 = vrot.slane %v9413_v46, 5  ;;  %v9421_v34 = vrot.slane %v9419_v7, 5  ;;  %v9425_v41 = vrot.slane %v9423_v28, 4  ;;  %21005 = vst [vmem:[#allocation68_spill] sm:$0xff] %v18673_v50  ;;  %v18683_v46 = vpop.f32.mrf.mxu1  ;;  %v18685_v7 = vpop.f32.mrf.mxu0 }
 0x3a0   : > { %21004 = vst [vmem:[#allocation67_spill] sm:$0xff] %v18667_v38  ;;  %v9408_v0 = vsel %vm13953_vm14, %v9403_v25, %v9407_v6  ;;  %v9431_v47 = vrot.slane %v9429_v40, 5  ;;  %v12144_v27 = vcombine.low %v18565_v39, %v18571_v36  ;;  %v9434_v14 = vshrl.u32 %v18660_v10, 16 }
 0x3a1   : > { %v12178_v32 = vcombine.low %v9398_v45, %v9408_v0  ;;  %v9416_v38 = vor.u32 %v9415_v35, %v9412_v59  ;;  %v9426_v42 = vor.u32 %v9425_v41, %v9421_v34  ;;  %v9437_v24 = vshll.u32 %v18660_v10, 16  ;;  %v18694_v0 = vld [vmem:[#allocation2 + $0x9c] sm:$0xf]  ;;  %v18696_v21 = vpop.f32.mrf.mxu1 }
 0x3a2   : > { %13246 = vmatmul.mubr.msk.bf16.gmra.mxu1 %vm6417_vm8, %v12144_v27  ;;  %v9436_v28 = vrot.slane %v9434_v14, 4  ;;  %v9443_v6 = vshll.u32 %v18669_v18, 16  ;;  %v9447_v25 = vshrl.u32 %v18669_v18, 16  ;;  %v9453_v40 = vshll.u32 %v18673_v50, 16  ;;  %v18698_v27 = vpop.f32.mrf.mxu0 }
 0x3a3   : > { %13283 = vmatprep.mubr.msk.bf16.mxu0 %vm6417_vm8, %v12178_v32  ;;  %v9417_v45 = vrot.slane %v9416_v38, 4  ;;  %v9427_v59 = vrot.slane %v9426_v42, 4  ;;  %v9439_v41 = vrot.slane %v9437_v24, 5  ;;  %v12145_v35 = vcombine.low %v18596_v29, %v18607_v56  ;;  %v18704_v32 = vld [vmem:[#allocation2 + $0xa0] sm:$0xf] }
 0x3a4   : > { %v9445_v14 = vrot.slane %v9443_v6, 5  ;;  %v9449_v36 = vrot.slane %v9447_v25, 4  ;;  %v9455_v39 = vrot.slane %v9453_v40, 5  ;;  %v18702_v50 = vadd.f32 %v18434_v60, %v18619_v2  ;;  %21007 = vst [vmem:[#allocation70_spill] sm:$0xff] %v18704_v32  ;;  %v18715_v25 = vld [vmem:[#allocation2 + $0xa4] sm:$0x1]  ;;  %v6571_v40 = vpop.f32.mrf.mxu1 }
 0x3a5   : > { %v9422_v38 = vsel %vm13953_vm14, %v9417_v45, %v9421_v34  ;;  %v9432_v42 = vsel %vm13953_vm14, %v9427_v59, %v9431_v47  ;;  %v9440_v24 = vor.u32 %v9439_v41, %v9436_v28  ;;  %13249 = vmatprep.mubr.msk.bf16.mxu1 %vm6417_vm8, %v12145_v35  ;;  %v18713_v6 = vadd.f32 %v18456_v11, %v18632_v26  ;;  %v18721_v45 = vpop.f32.mrf.mxu0  ;;  %v18726_v26 = vld [vmem:[#allocation2 + $0xa8] sm:$0xf]  ;;  %v18733_v35 = vld [vmem:[#allocation2 + $0xac] sm:$0xf]  ;;  %v18739_v29 = vld [vmem:[#allocation2 + $0xb0] sm:$0x1] }
 0x3a6   : > { %21006 = vst [vmem:[#allocation69_spill] sm:$0xff] %v18702_v50  ;;  %21009 = vst [vmem:[#allocation72_spill] sm:$0xff] %v18715_v25  ;;  %v12179_v60 = vcombine.low %v9422_v38, %v9432_v42  ;;  %v9450_v2 = vor.u32 %v9449_v36, %v9445_v14  ;;  %v18718_v50 = vadd.f32 %v18480_v61, %v6555_v55  ;;  %v9458_v34 = vshrl.u32 %v18694_v0, 16  ;;  %v13051_v38 = vpop.f32.mrf.mxu1 }
 0x3a7   : > { %21008 = vst [vmem:[#allocation71_spill] sm:$0xff] %v18713_v6  ;;  %v9441_v47 = vrot.slane %v9440_v24, 4  ;;  %v9461_v28 = vshll.u32 %v18694_v0, 16  ;;  %v9467_v59 = vshll.u32 %v18704_v32, 16  ;;  %v9471_v11 = vshrl.u32 %v18704_v32, 16  ;;  %v18735_v42 = vpop.f32.mrf.mxu0  ;;  %21012 = vst [vmem:[#allocation75_spill] sm:$0xff] %v18739_v29 }
 0x3a8   : > { %21010 = vst [vmem:[#allocation73_spill] sm:$0xff] %v18718_v50  ;;  %13284 = vmatmul.mubr.msk.bf16.gmra.mxu0 %vm6417_vm8, %v12179_v60  ;;  %v9451_v41 = vrot.slane %v9450_v2, 4  ;;  %v9460_v36 = vrot.slane %v9458_v34, 4  ;;  %v9477_v61 = vshll.u32 %v18715_v25, 16  ;;  %v18731_v55 = vadd.f32 %v18500_v58, %v13047_v20  ;;  %v18746_v34 = vpop.f32.mrf.mxu1 }
 0x3a9   : > { %v9446_v24 = vsel %vm13953_vm14, %v9441_v47, %v9445_v14  ;;  %v9463_v50 = vrot.slane %v9461_v28, 5  ;;  %v9469_v6 = vrot.slane %v9467_v59, 5  ;;  %v9473_v56 = vrot.slane %v9471_v11, 4 }
 0x3aa   : > { %21011 = vst [vmem:[#allocation74_spill] sm:$0xff] %v18731_v55  ;;  %v9456_v60 = vsel %vm13953_vm14, %v9451_v41, %v9455_v39  ;;  %v9479_v2 = vrot.slane %v9477_v61, 5  ;;  %v12146_v58 = vcombine.low %v18630_v15, %v18636_v53  ;;  %v9482_v20 = vshrl.u32 %v18726_v26, 16  ;;  %v18748_v55 = vpop.f32.mrf.mxu0  ;;  %v18755_v61 = vpop.f32.mrf.mxu1 }
 0x3ab   : > { %v12180_v25 = vcombine.low %v9446_v24, %v9456_v60  ;;  %v9464_v14 = vor.u32 %v9463_v50, %v9460_v36  ;;  %v9474_v47 = vor.u32 %v9473_v56, %v9469_v6  ;;  %v9485_v28 = vshll.u32 %v18726_v26, 16  ;;  %v18762_v60 = vld [vmem:[#allocation2 + $0xb4] sm:$0xf] }
 0x3ac   : > { %13250 = vmatmul.mubr.msk.bf16.gmra.mxu1 %vm6417_vm8, %v12146_v58  ;;  %v9484_v59 = vrot.slane %v9482_v20, 4  ;;  %v9491_v39 = vshll.u32 %v18733_v35, 16  ;;  %v9495_v11 = vshrl.u32 %v18733_v35, 16  ;;  %v9501_v41 = vshll.u32 %v18739_v29, 16  ;;  %v18757_v53 = vpop.f32.mrf.mxu0  ;;  %v18770_v57 = vpop.f32.mrf.mxu1 }
 0x3ad   : > { %13287 = vmatprep.mubr.msk.bf16.mxu0 %vm6417_vm8, %v12180_v25  ;;  %v9465_v24 = vrot.slane %v9464_v14, 4  ;;  %v9475_v50 = vrot.slane %v9474_v47, 4  ;;  %v9487_v56 = vrot.slane %v9485_v28, 5  ;;  %v12147_v36 = vcombine.low %v18660_v10, %v18669_v18 }
 0x3ae   : > { %v9493_v58 = vrot.slane %v9491_v39, 5  ;;  %v9497_v20 = vrot.slane %v9495_v11, 4  ;;  %v9503_v15 = vrot.slane %v9501_v41, 5  ;;  %v18766_v29 = vadd.f32 %v18519_v44, %v18683_v46  ;;  %v18781_v39 = vld [vmem:[#allocation2 + $0xbc] sm:$0x1] }
 0x3af   : > { %v9470_v25 = vsel %vm13953_vm14, %v9465_v24, %v9469_v6  ;;  %v9480_v14 = vsel %vm13953_vm14, %v9475_v50, %v9479_v2  ;;  %v9488_v47 = vor.u32 %v9487_v56, %v9484_v59  ;;  %13253 = vmatprep.mubr.msk.bf16.mxu1 %vm6417_vm8, %v12147_v36  ;;  %v18779_v28 = vadd.f32 %v18553_v13, %v18696_v21  ;;  %v18787_v6 = vpop.f32.mrf.mxu0  ;;  %v18792_v13 = vld [vmem:[#allocation2 + $0xc0] sm:$0xf]  ;;  %v18794_v21 = vpop.f32.mrf.mxu1 }
 0x3b0   : > { %21013 = vst [vmem:[#allocation76_spill] sm:$0xff] %v18766_v29  ;;  %21015 = vst [vmem:[#allocation78_spill] sm:$0xff] %v18781_v39  ;;  %v12181_v44 = vcombine.low %v9470_v25, %v9480_v14  ;;  %v9498_v46 = vor.u32 %v9497_v20, %v9493_v58  ;;  %v18784_v11 = vadd.f32 %v18573_v62, %v6571_v40  ;;  %v9506_v41 = vshrl.u32 %v18762_v60, 16  ;;  %v18801_v20 = vld [vmem:[#allocation2 + $0xc4] sm:$0xf] }
 0x3b1   : > { %21014 = vst [vmem:[#allocation77_spill] sm:$0xff] %v18779_v28  ;;  %21017 = vst [vmem:[#allocation80_spill] sm:$0xff] %v18787_v6  ;;  %v9489_v24 = vrot.slane %v9488_v47, 4  ;;  %v9509_v2 = vshll.u32 %v18762_v60, 16  ;;  %v9515_v59 = vshll.u32 %v18768_v52, 16  ;;  %v9519_v50 = vshrl.u32 %v18768_v52, 16  ;;  %v18803_v25 = vpop.f32.mrf.mxu0 }
 0x3b2   : > { %21016 = vst [vmem:[#allocation79_spill] sm:$0xff] %v18784_v11  ;;  %13288 = vmatmul.mubr.msk.bf16.gmra.mxu0 %vm6417_vm8, %v12181_v44  ;;  %v9499_v56 = vrot.slane %v9498_v46, 4  ;;  %v9508_v62 = vrot.slane %v9506_v41, 4  ;;  %v9525_v40 = vshll.u32 %v18781_v39, 16  ;;  %v18799_v36 = vadd.f32 %v18598_v37, %v13051_v38  ;;  %21019 = vst [vmem:[#allocation82_spill] sm:$0xff] %v18803_v25  ;;  %v18809_v44 = vpop.f32.mrf.mxu1 }
 0x3b3   : > { %v9494_v14 = vsel %vm13953_vm14, %v9489_v24, %v9493_v58  ;;  %v9511_v47 = vrot.slane %v9509_v2, 5  ;;  %v9517_v11 = vrot.slane %v9515_v59, 5  ;;  %v9521_v28 = vrot.slane %v9519_v50, 4  ;;  %v18807_v29 = vld [vmem:[#allocation2 + $0xc8] sm:$0x1] }
 0x3b4   : > { %21018 = vst [vmem:[#allocation81_spill] sm:$0xff] %v18799_v36  ;;  %21020 = vst [vmem:[#allocation83_spill] sm:$0xff] %v18807_v29  ;;  %v9504_v46 = vsel %vm13953_vm14, %v9499_v56, %v9503_v15  ;;  %v9527_v41 = vrot.slane %v9525_v40, 5  ;;  %v12148_v37 = vcombine.low %v18694_v0, %v18704_v32  ;;  %v9530_v38 = vshrl.u32 %v18792_v13, 16  ;;  %v18816_v36 = vpop.f32.mrf.mxu0  ;;  %v13056_v59 = vpop.f32.mrf.mxu1 }
 0x3b5   : > { %21021 = vst [vmem:[#allocation84_spill] sm:$0xff] %v18816_v36  ;;  %v12182_v25 = vcombine.low %v9494_v14, %v9504_v46  ;;  %v9512_v58 = vor.u32 %v9511_v47, %v9508_v62  ;;  %v9522_v24 = vor.u32 %v9521_v28, %v9517_v11  ;;  %v9533_v2 = vshll.u32 %v18792_v13, 16  ;;  %v18828_v47 = vld [vmem:[#allocation2 + $0xcc] sm:$0xf] }
 0x3b6   : > { %13254 = vmatmul.mubr.msk.bf16.gmra.mxu1 %vm6417_vm8, %v12148_v37  ;;  %v9532_v50 = vrot.slane %v9530_v38, 4  ;;  %v9539_v6 = vshll.u32 %v18801_v20, 16  ;;  %v9543_v15 = vshrl.u32 %v18801_v20, 16  ;;  %v9549_v56 = vshll.u32 %v18807_v29, 16  ;;  %v18823_v40 = vpop.f32.mrf.mxu0  ;;  %v6603_v46 = vpop.f32.mrf.mxu1  ;;  %v18834_v29 = vld [vmem:[#allocation2 + $0xd0] sm:$0xf] }
 0x3b7   : > { %21022 = vst [vmem:[#allocation85_spill] sm:$0xff] %v18823_v40  ;;  %13291 = vmatprep.mubr.msk.bf16.mxu0 %vm6417_vm8, %v12182_v25  ;;  %v9513_v36 = vrot.slane %v9512_v58, 4  ;;  %v9523_v14 = vrot.slane %v9522_v24, 4  ;;  %v9535_v62 = vrot.slane %v9533_v2, 5  ;;  %v12149_v28 = vcombine.low %v18726_v26, %v18733_v35  ;;  %v18847_v2 = vld [vmem:[#allocation2 + $0xd4] sm:$0x1] }
 0x3b8   : > { %v9541_v37 = vrot.slane %v9539_v6, 5  ;;  %v9545_v38 = vrot.slane %v9543_v15, 4  ;;  %v9551_v39 = vrot.slane %v9549_v56, 5  ;;  %v18832_v32 = vadd.f32 %v18615_v49, %v18746_v34  ;;  %v18836_v40 = vpop.f32.mrf.mxu0 }
 0x3b9   : > { %v9518_v25 = vsel %vm13953_vm14, %v9513_v36, %v9517_v11  ;;  %v9528_v58 = vsel %vm13953_vm14, %v9523_v14, %v9527_v41  ;;  %v9536_v24 = vor.u32 %v9535_v62, %v9532_v50  ;;  %13257 = vmatprep.mubr.msk.bf16.mxu1 %vm6417_vm8, %v12149_v28  ;;  %v18845_v6 = vadd.f32 %v18624_v51, %v18755_v61  ;;  %v13059_v36 = vpop.f32.mrf.mxu1 }
 0x3ba   : > { %21023 = vst [vmem:[#allocation86_spill] sm:$0xff] %v18832_v32  ;;  %v12183_v49 = vcombine.low %v9518_v25, %v9528_v58  ;;  %v9546_v34 = vor.u32 %v9545_v38, %v9541_v37  ;;  %v18851_v15 = vadd.f32 %v18638_v33, %v18770_v57  ;;  %v9554_v11 = vshrl.u32 %v18828_v47, 16  ;;  %v18854_v56 = vpop.f32.mrf.mxu0 }
 0x3bb   : > { %21024 = vst [vmem:[#allocation87_spill] sm:$0xff] %v18845_v6  ;;  %v9537_v41 = vrot.slane %v9536_v24, 4  ;;  %v9557_v50 = vshll.u32 %v18828_v47, 16  ;;  %v9563_v14 = vshll.u32 %v18834_v29, 16  ;;  %v9567_v51 = vshrl.u32 %v18834_v29, 16  ;;  %v6616_v33 = vpop.f32.mrf.mxu1 }
 0x3bc   : > { %21025 = vst [vmem:[#allocation88_spill] sm:$0xff] %v18851_v15  ;;  %13292 = vmatmul.mubr.msk.bf16.gmra.mxu0 %vm6417_vm8, %v12183_v49  ;;  %v9547_v61 = vrot.slane %v9546_v34, 4  ;;  %v9556_v62 = vrot.slane %v9554_v11, 4  ;;  %v9573_v28 = vshll.u32 %v18847_v2, 16  ;;  %v18863_v57 = vadd.f32 %v18662_v48, %v18794_v21  ;;  %v18865_v38 = vpop.f32.mrf.mxu0 }
 0x3bd   : > { %21027 = vst [vmem:[#allocation90_spill] sm:$0xff] %v18865_v38  ;;  %v9542_v25 = vsel %vm13953_vm14, %v9537_v41, %v9541_v37  ;;  %v9559_v58 = vrot.slane %v9557_v50, 5  ;;  %v9565_v24 = vrot.slane %v9563_v14, 5  ;;  %v9569_v15 = vrot.slane %v9567_v51, 4  ;;  %v13060_v21 = vpop.f32.mrf.mxu1 }
 0x3be   : > { %21026 = vst [vmem:[#allocation89_spill] sm:$0xff] %v18863_v57  ;;  %v9552_v49 = vsel %vm13953_vm14, %v9547_v61, %v9551_v39  ;;  %v9575_v34 = vrot.slane %v9573_v28, 5  ;;  %v12150_v11 = vcombine.low %v18762_v60, %v18768_v52  ;;  %v12151_v48 = vcombine.low %v18792_v13, %v18801_v20  ;;  %v18875_v57 = vpop.f32.mrf.mxu0 }
 0x3bf   : > { %v12184_v6 = vcombine.low %v9542_v25, %v9552_v49  ;;  %v9560_v32 = vor.u32 %v9559_v58, %v9556_v62  ;;  %v9570_v38 = vor.u32 %v9569_v15, %v9565_v24  ;;  %v18879_v37 = vadd.f32 %v18675_v19, %v18809_v44  ;;  %v6619_v51 = vpop.f32.mrf.mxu1 }
 0x3c0   : > { %13258 = vmatmul.mubr.msk.bf16.gmra.mxu1 %vm6417_vm8, %v12150_v11  ;;  %v18883_v39 = vadd.f32 %v18685_v7, %v13056_v59  ;;  %v10431_v41 = vsel %vm6466_vm6, %v18377_v16, 0  ;;  %v18888_v50 = vadd.f32 %v18698_v27, %v6603_v46  ;;  %v18891_v14 = vadd.f32 %v18721_v45, %v13059_v36  ;;  %v18893_v15 = vpop.f32.mrf.mxu0  ;;  %v13685_v59 = vld [vmem:[#allocation2 + $0x18] sm:$0xf] }
 0x3c1   : > { %21028 = vst [vmem:[#allocation91_spill] sm:$0xff] %v18879_v37  ;;  %13295 = vmatprep.mubr.msk.bf16.mxu0 %vm6417_vm8, %v12184_v6  ;;  %v9561_v19 = vrot.slane %v9560_v32, 4  ;;  %v9571_v44 = vrot.slane %v9570_v38, 4  ;;  %13261 = vmatprep.mubr.msk.bf16.mxu1 %vm6417_vm8, %v12151_v48  ;;  %v12152_v7 = vcombine.low %v18828_v47, %v18834_v29  ;;  %v12202_v16 = vrot.slane %v13685_v59, 9  ;;  %v13099_v32 = vpop.f32.mrf.mxu1  ;;  %v21036_v48 = vld [vmem:[#allocation38_spill] sm:$0xff]  ;;  %v21039_v59 = vld [vmem:[#allocation27_spill] sm:$0xff] }
 0x3c2   : > { %21029 = vst [vmem:[#allocation92_spill] sm:$0xff] %v18883_v39  ;;  %21030 = vst [vmem:[#allocation93_spill] sm:$0xff] %v18888_v50  ;;  %13334 = vmatpush3.bf16.msra.mxu0 %v10431_v41  ;;  %v9889_v27 = vrot.slane %v18336_v8, 5  ;;  %v9892_v45 = vrot.slane %v18343_v30, 5  ;;  %v18902_v46 = vadd.f32 %v18735_v42, %v6616_v33  ;;  %v18905_v36 = vadd.f32 %v18748_v55, %v13060_v21  ;;  %v18907_v6 = vpop.f32.mrf.mxu0 }
 0x3c3   : > { %21031 = vst [vmem:[#allocation94_spill] sm:$0xff] %v18891_v14  ;;  %v9566_v61 = vsel %vm13953_vm14, %v9561_v19, %v9565_v24  ;;  %v9576_v62 = vsel %vm13953_vm14, %v9571_v44, %v9575_v34  ;;  %v18914_v28 = vadd.f32 %v18757_v53, %v6619_v51  ;;  %v18917_v8 = vadd.f32 %v13099_v32, %v18469_v31  ;;  %v7186_v38 = vpop.f32.mrf.mxu1  ;;  %v21038_v19 = vld [vmem:[#allocation19_spill] sm:$0xff]  ;;  %v21040_v32 = vld [vmem:[#allocation37_spill] sm:$0xff]  ;;  %v21071_v14 = vld [vmem:[#allocation34_spill] sm:$0xff] }
 0x3c4   : > { %21032 = vst [vmem:[#allocation95_spill] sm:$0xff] %v18902_v46  ;;  %21033 = vst [vmem:[#allocation96_spill] sm:$0xff] %v18905_v36  ;;  %v12185_v30 = vcombine.low %v9566_v61, %v9576_v62  ;;  %v9890_v55 = vsel %vm14430_vm9, %v12202_v16, %v9889_v27  ;;  %v9891_v42 = vrot.slane %v9889_v27, 4  ;;  %v12203_v33 = vrot.slane %v18367_v22, 9  ;;  %v18922_v25 = vpop.f32.mrf.mxu0  ;;  %v21041_v62 = vld [vmem:[#allocation21_spill] sm:$0xff]  ;;  %v21068_v36 = vld [vmem:[#allocation63_spill] sm:$0xff] }
 0x3c5   : > { %21034 = vst [vmem:[#allocation97_spill] sm:$0xff] %v18914_v28  ;;  %v9896_v58 = vrot.slane %v18372_v63, 5  ;;  %v9899_v23 = vrot.slane %v18381_v54, 5  ;;  %v12204_v53 = vrot.slane %v18407_v5, 9  ;;  %v9903_v24 = vrot.slane %v18417_v4, 5  ;;  %v13100_v34 = vpop.f32.mrf.mxu1  ;;  %v21035_v54 = vld [vmem:[#allocation31_spill] sm:$0xff] }
 0x3c6   : > { %13296 = vmatmul.mubr.msk.bf16.gmra.mxu0 %vm6417_vm8, %v12185_v30  ;;  %v9893_v31 = vsel %vm14430_vm9, %v9891_v42, %v9892_v45  ;;  %v9906_v49 = vrot.slane %v18425_v17, 5  ;;  %v18933_v22 = vadd.f32 %v7186_v38, %v18504_v1  ;;  %v12205_v11 = vrot.slane %v18432_v43, 9  ;;  %v18936_v63 = vpop.f32.mrf.mxu0 }
 0x3c7   : > { %v21037_v5 = vpack.c.bf16 %v21035_v54, %v21036_v48  ;;  %v12219_v4 = vcombine.low %v9890_v55, %v9893_v31  ;;  %v9897_v21 = vsel %vm14430_vm9, %v12203_v33, %v9896_v58  ;;  %v9898_v41 = vrot.slane %v9896_v58, 4  ;;  %v7189_v51 = vpop.f32.mrf.mxu1  ;;  %v21044_v48 = vld [vmem:[#allocation6_spill] sm:$0xff] }
 0x3c8   : > { %v9904_v17 = vsel %vm14430_vm9, %v12204_v53, %v9903_v24  ;;  %13262 = vmatmul.mubr.msk.bf16.gmra.mxu1 %vm6417_vm8, %v12152_v7  ;;  %v9905_v1 = vrot.slane %v9903_v24, 4  ;;  %v18948_v43 = vadd.f32 %v13100_v34, %v18508_v3  ;;  %v9910_v44 = vrot.slane %v21038_v19, 5  ;;  %v18952_v27 = vpop.f32.mrf.mxu0  ;;  %v21042_v53 = vld [vmem:[#allocation49_spill] sm:$0xff]  ;;  %v21047_v19 = vld [vmem:[#allocation35_spill] sm:$0xff] }
 0x3c9   : > { %13335 = vmatprep.mubr.msk.bf16.mxu0 %vm6417_vm8, %v21037_v5  ;;  %v9913_v16 = vrot.slane %v21039_v59, 5  ;;  %13301 = vmatprep.mubr.msk.bf16.mxu1 %vm6417_vm8, %v12219_v4  ;;  %v9900_v45 = vsel %vm14430_vm9, %v9898_v41, %v9899_v23  ;;  %v18958_v61 = vadd.f32 %v7189_v51, %v21040_v32  ;;  %v12206_v7 = vrot.slane %v18458_v9, 9  ;;  %v13103_v42 = vpop.f32.mrf.mxu1  ;;  %v21043_v34 = vld [vmem:[#allocation9_spill] sm:$0xff]  ;;  %v21048_v59 = vld [vmem:[#allocation8_spill] sm:$0xff]  ;;  %v21050_v32 = vld [vmem:[#allocation23_spill] sm:$0xff] }
 0x3ca   : > { %v9917_v3 = vrot.slane %v21041_v62, 5  ;;  %v12220_v30 = vcombine.low %v9897_v21, %v9900_v45  ;;  %v9907_v55 = vsel %vm14430_vm9, %v9905_v1, %v9906_v49  ;;  %v18966_v33 = vsel %vm14430_vm9, %v12205_v11, %v9910_v44  ;;  %v18968_v58 = vpop.f32.mrf.mxu0  ;;  %v21045_v4 = vld [vmem:[#allocation33_spill] sm:$0xff]  ;;  %v21046_v1 = vld [vmem:[#allocation52_spill] sm:$0xff]  ;;  %v21049_v45 = vld [vmem:[#allocation43_spill] sm:$0xff] }
 0x3cb   : > { %v9912_v38 = vrot.slane %v9910_v44, 4  ;;  %v12221_v23 = vcombine.low %v9904_v17, %v9907_v55  ;;  %v18971_v24 = vadd.f32 %v13103_v42, %v21042_v53  ;;  %v9920_v54 = vrot.slane %v21043_v34, 5  ;;  %v7202_v11 = vpop.f32.mrf.mxu1  ;;  %v21054_v34 = vld [vmem:[#allocation29_spill] sm:$0xff] }
 0x3cc   : > { %v18975_v9 = vsel %vm14430_vm9, %v12206_v7, %v9917_v3  ;;  %v9919_v31 = vrot.slane %v9917_v3, 4  ;;  %v12207_v5 = vrot.slane %v21044_v48, 9  ;;  %v9924_v21 = vrot.slane %v21045_v4, 5  ;;  %v18984_v41 = vpop.f32.mrf.mxu0  ;;  %v21057_v4 = vld [vmem:[#allocation50_spill] sm:$0xff] }
 0x3cd   : > { %v18979_v49 = vsel %vm14430_vm9, %v9912_v38, %v9913_v16  ;;  %v18989_v51 = vadd.f32 %v7202_v11, %v21046_v1  ;;  %v9927_v44 = vrot.slane %v21047_v19, 5  ;;  %v12208_v16 = vrot.slane %v21048_v59, 9  ;;  %v13104_v3 = vpop.f32.mrf.mxu1 }
 0x3ce   : > { %v12222_v17 = vcombine.low %v18966_v33, %v18979_v49  ;;  %v21051_v7 = vpack.c.bf16 %v21049_v45, %v21050_v32  ;;  %v18999_v62 = vsel %vm14430_vm9, %v9919_v31, %v9920_v54  ;;  %v19003_v55 = vsel %vm14430_vm9, %v12207_v5, %v9924_v21  ;;  %v21052_v33 = vld [vmem:[#allocation11_spill] sm:$0xff]  ;;  %v19006_v53 = vpop.f32.mrf.mxu0  ;;  %v21053_v49 = vld [vmem:[#allocation36_spill] sm:$0xff]  ;;  %v21056_v31 = vld [vmem:[#allocation54_spill] sm:$0xff] }
 0x3cf   : > { %v9926_v42 = vrot.slane %v9924_v21, 4  ;;  %v9931_v38 = vrot.slane %v21052_v33, 5  ;;  %v21055_v11 = vpack.c.bf16 %v21053_v49, %v21054_v34  ;;  %v12223_v48 = vcombine.low %v18975_v9, %v18999_v62  ;;  %v21058_v5 = vld [vmem:[#allocation51_spill] sm:$0xff]  ;;  %v7205_v21 = vpop.f32.mrf.mxu1  ;;  %v21061_v49 = vld [vmem:[#allocation56_spill] sm:$0xff] }
 0x3d0   : > { %13336 = vmatmul.mubr.msk.bf16.vlgmr.msra.gmra.mxu0 %vm6417_vm8, %v21051_v7  ;;  %v19015_v54 = vadd.f32 %v13104_v3, %v21056_v31  ;;  %v9934_v1 = vrot.slane %v21057_v4, 5  ;;  %v12209_v19 = vrot.slane %v21058_v5, 9  ;;  %13302 = vmatmul.mubr.msk.bf16.vlgmr.msra.gmra.mxu1 %vm6417_vm8, %v12220_v30  ;;  %v19028_v9 = vpop.f32.mrf.mxu0  ;;  %v21059_v7 = vld [vmem:[#allocation53_spill] sm:$0xff]  ;;  %v21060_v3 = vld [vmem:[#allocation55_spill] sm:$0xff]  ;;  %v19253_v12 = vadd.f32 %v18836_v40, %v18971_v24 }
 0x3d1   : > { %13339 = vmatprep.mubr.msk.bf16.mxu0 %vm6417_vm8, %v21055_v11  ;;  %v19022_v59 = vsel %vm14430_vm9, %v9926_v42, %v9927_v44  ;;  %v19026_v45 = vsel %vm14430_vm9, %v12208_v16, %v9931_v38  ;;  %v9933_v32 = vrot.slane %v9931_v38, 4  ;;  %v9938_v62 = vrot.slane %v21059_v7, 5  ;;  %13305 = vmatprep.mubr.msk.bf16.mxu1 %vm6417_vm8, %v12221_v23  ;;  %v21062_v42 = vld [vmem:[#allocation57_spill] sm:$0xff]  ;;  %v13107_v11 = vpop.f32.mrf.mxu1  ;;  %v21063_v4 = vld [vmem:[#allocation59_spill] sm:$0xff] }
 0x3d2   : > { %v19033_v33 = vadd.f32 %v7205_v21, %v21060_v3  ;;  %v9941_v44 = vrot.slane %v21061_v49, 5  ;;  %v12210_v34 = vrot.slane %v21062_v42, 9  ;;  %v19047_v31 = vpop.f32.mrf.mxu0  ;;  %v9945_v5 = vrot.slane %v21063_v4, 5  ;;  %v21064_v21 = vld [vmem:[#allocation58_spill] sm:$0xff]  ;;  %v21065_v49 = vld [vmem:[#allocation60_spill] sm:$0xff]  ;;  %v21066_v30 = vld [vmem:[#allocation61_spill] sm:$0xff] }
 0x3d3   : > { %v19041_v16 = vsel %vm14430_vm9, %v9933_v32, %v9934_v1  ;;  %v19045_v38 = vsel %vm14430_vm9, %v12209_v19, %v9938_v62  ;;  %v9940_v23 = vrot.slane %v9938_v62, 4  ;;  %v19051_v7 = vadd.f32 %v13107_v11, %v21064_v21  ;;  %v7218_v32 = vpop.f32.mrf.mxu1  ;;  %v21067_v11 = vld [vmem:[#allocation62_spill] sm:$0xff]  ;;  %v21114_v24 = vld [vmem:[#allocation45_spill] sm:$0xff] }
 0x3d4   : > { %v9948_v42 = vrot.slane %v21065_v49, 5  ;;  %v12211_v1 = vrot.slane %v21066_v30, 9  ;;  %v19063_v62 = vsel %vm14430_vm9, %v12210_v34, %v9945_v5  ;;  %v9947_v4 = vrot.slane %v9945_v5, 4  ;;  %v19065_v28 = vpop.f32.mrf.mxu0  ;;  %v21069_v49 = vld [vmem:[#allocation65_spill] sm:$0xff]  ;;  %v21076_v30 = vld [vmem:[#allocation42_spill] sm:$0xff] }
 0x3d5   : > { %v19059_v19 = vsel %vm14430_vm9, %v9940_v23, %v9941_v44  ;;  %v9952_v21 = vrot.slane %v21067_v11, 5  ;;  %v19069_v3 = vadd.f32 %v7218_v32, %v21068_v36  ;;  %v9955_v46 = vrot.slane %v21069_v49, 5  ;;  %v21070_v23 = vld [vmem:[#allocation7_spill] sm:$0xff]  ;;  %v13108_v34 = vpop.f32.mrf.mxu1 }
 0x3d6   : > { %v12212_v44 = vrot.slane %v18660_v10, 9  ;;  %v21072_v50 = vpack.c.bf16 %v21070_v23, %v21071_v14  ;;  %v19081_v5 = vsel %vm14430_vm9, %v9947_v4, %v9948_v42  ;;  %v19083_v11 = vpop.f32.mrf.mxu0  ;;  %v9959_v49 = vrot.slane %v18669_v18, 5  ;;  %v21075_v10 = vld [vmem:[#allocation16_spill] sm:$0xff] }
 0x3d7   : > { %21073 = vst [vmem:[#allocation31_spill] sm:$0xff] %v19083_v11  ;;  %v19087_v36 = vsel %vm14430_vm9, %v12211_v1, %v9952_v21  ;;  %v9954_v32 = vrot.slane %v9952_v21, 4  ;;  %v21077_v39 = vpack.c.bf16 %v21075_v10, %v21076_v30  ;;  %v21079_v4 = vld [vmem:[#allocation68_spill] sm:$0xff]  ;;  %v12213_v11 = vrot.slane %v18694_v0, 9  ;;  %v7221_v1 = vpop.f32.mrf.mxu1 }
 0x3d8   : > { %13340 = vmatmul.mubr.msk.bf16.gmra.mxu0 %vm6417_vm8, %v21072_v50  ;;  %21074 = vst [vmem:[#allocation38_spill] sm:$0xff] %v19087_v36  ;;  %v21078_v50 = vld [vmem:[#allocation64_spill] sm:$0xff]  ;;  %v9962_v23 = vrot.slane %v21079_v4, 5  ;;  %13306 = vmatmul.mubr.msk.bf16.gmra.mxu1 %vm6417_vm8, %v12222_v17  ;;  %v19102_v21 = vpop.f32.mrf.mxu0  ;;  %v9961_v30 = vrot.slane %v9959_v49, 4  ;;  %v19271_v40 = vadd.f32 %v18875_v57, %v19033_v33  ;;  %v19288_v57 = vadd.f32 %v18907_v6, %v19069_v3 }
 0x3d9   : > { %13343 = vmatprep.mubr.msk.bf16.mxu0 %vm6417_vm8, %v21077_v39  ;;  %v19095_v14 = vadd.f32 %v13108_v34, %v21078_v50  ;;  %v19106_v18 = vsel %vm14430_vm9, %v9954_v32, %v9955_v46  ;;  %v19110_v39 = vsel %vm14430_vm9, %v12212_v44, %v9959_v49  ;;  %v21082_v34 = vld [vmem:[#allocation70_spill] sm:$0xff]  ;;  %13309 = vmatprep.mubr.msk.bf16.mxu1 %vm6417_vm8, %v12223_v48  ;;  %v21084_v4 = vld [vmem:[#allocation72_spill] sm:$0xff]  ;;  %v12214_v46 = vrot.slane %v18726_v26, 9  ;;  %v13111_v32 = vpop.f32.mrf.mxu1 }
 0x3da   : > { %21080 = vst [vmem:[#allocation19_spill] sm:$0xff] %v19106_v18  ;;  %21081 = vst [vmem:[#allocation27_spill] sm:$0xff] %v19110_v39  ;;  %v9966_v10 = vrot.slane %v21082_v34, 5  ;;  %v21083_v50 = vld [vmem:[#allocation66_spill] sm:$0xff]  ;;  %v9969_v42 = vrot.slane %v21084_v4, 5  ;;  %v19121_v37 = vpop.f32.mrf.mxu0  ;;  %v19125_v44 = vsel %vm14430_vm9, %v9961_v30, %v9962_v23  ;;  %v21086_v34 = vld [vmem:[#allocation67_spill] sm:$0xff] }
 0x3db   : > { %v19115_v0 = vadd.f32 %v7221_v1, %v21083_v50  ;;  %21085 = vst [vmem:[#allocation37_spill] sm:$0xff] %v19125_v44  ;;  %v9973_v1 = vrot.slane %v18733_v35, 5  ;;  %v19133_v50 = vadd.f32 %v13111_v32, %v21086_v34  ;;  %v21087_v4 = vld [vmem:[#allocation75_spill] sm:$0xff]  ;;  %v12215_v18 = vrot.slane %v18762_v60, 9  ;;  %v7234_v36 = vpop.f32.mrf.mxu1  ;;  %v21089_v32 = vld [vmem:[#allocation69_spill] sm:$0xff]  ;;  %v21091_v44 = vld [vmem:[#allocation22_spill] sm:$0xff] }
 0x3dc   : > { %v19129_v48 = vsel %vm14430_vm9, %v12213_v11, %v9966_v10  ;;  %v9968_v49 = vrot.slane %v9966_v10, 4  ;;  %v9976_v17 = vrot.slane %v21087_v4, 5  ;;  %v19139_v23 = vpop.f32.mrf.mxu0  ;;  %v9980_v10 = vrot.slane %v18768_v52, 5  ;;  %v21090_v4 = vld [vmem:[#allocation78_spill] sm:$0xff] }
 0x3dd   : > { %21088 = vst [vmem:[#allocation21_spill] sm:$0xff] %v19139_v23  ;;  %v19147_v35 = vsel %vm14430_vm9, %v12214_v46, %v9973_v1  ;;  %v9975_v30 = vrot.slane %v9973_v1, 4  ;;  %v19151_v34 = vadd.f32 %v7234_v36, %v21089_v32  ;;  %v9983_v26 = vrot.slane %v21090_v4, 5  ;;  %v13112_v46 = vpop.f32.mrf.mxu1  ;;  %v21096_v4 = vld [vmem:[#allocation44_spill] sm:$0xff] }
 0x3de   : > { %v19143_v11 = vsel %vm14430_vm9, %v9968_v49, %v9969_v42  ;;  %v12216_v23 = vrot.slane %v18792_v13, 9  ;;  %v21092_v42 = vld [vmem:[#allocation30_spill] sm:$0xff]  ;;  %v19161_v39 = vpop.f32.mrf.mxu0  ;;  %v19169_v36 = vsel %vm14430_vm9, %v12215_v18, %v9980_v10  ;;  %v9982_v1 = vrot.slane %v9980_v10, 4  ;;  %v19175_v13 = vld [vmem:[%s20358_s7] sm:$0xf] }
 0x3df   : > { %v21093_v49 = vpack.c.bf16 %v21091_v44, %v21092_v42  ;;  %21094 = vst [vmem:[#allocation49_spill] sm:$0xff] %v19161_v39  ;;  %v19165_v52 = vsel %vm14430_vm9, %v9975_v30, %v9976_v17  ;;  %v9987_v32 = vrot.slane %v18801_v20, 5  ;;  %v21095_v44 = vld [vmem:[#allocation15_spill] sm:$0xff]  ;;  %v12217_v10 = vrot.slane %v18828_v47, 9  ;;  %13464 = vmatprep.subr.msk.bf16.mxu0 %vm6466_vm6, %v19175_v13 }
 0x3e0   : > { %v21097_v42 = vpack.c.bf16 %v21095_v44, %v21096_v4  ;;  %v21099_v18 = vld [vmem:[#allocation83_spill] sm:$0xff]  ;;  %v21100_v20 = vcombine.low %v19003_v55, %v19022_v59  ;;  %v7237_v44 = vpop.f32.mrf.mxu1  ;;  %v19192_v4 = vpop.f32.mrf.mxu0  ;;  %v21102_v55 = vld [vmem:[#allocation73_spill] sm:$0xff]  ;;  %v19292_v33 = vadd.f32 %v18922_v25, %v19095_v14  ;;  %v19307_v6 = vadd.f32 %v18952_v27, %v19133_v50 }
 0x3e1   : > { %13344 = vmatmul.mubr.msk.bf16.gmra.mxu0 %vm6417_vm8, %v21093_v49  ;;  %v21098_v49 = vld [vmem:[#allocation71_spill] sm:$0xff]  ;;  %v9990_v60 = vrot.slane %v21099_v18, 5  ;;  %v9989_v47 = vrot.slane %v9987_v32, 4  ;;  %v21101_v18 = vcombine.low %v19026_v45, %v19041_v16  ;;  %v7326_v59 = vadd.f32 %v7237_v44, %v21102_v55  ;;  %v21121_v14 = vld [vmem:[#allocation81_spill] sm:$0xff] }
 0x3e2   : > { %13347 = vmatprep.mubr.msk.bf16.mxu0 %vm6417_vm8, %v21097_v42  ;;  %v7328_v17 = vadd.f32 %v13112_v46, %v21098_v49  ;;  %13310 = vmatmul.mubr.msk.bf16.gmra.mxu1 %vm6417_vm8, %v21100_v20  ;;  %v19196_v46 = vsel %vm14430_vm9, %v9982_v1, %v9983_v26  ;;  %v19200_v42 = vsel %vm14430_vm9, %v12216_v23, %v9987_v32  ;;  %v9994_v49 = vrot.slane %v18834_v29, 5  ;;  %v21103_v1 = vld [vmem:[#allocation47_spill] sm:$0xff]  ;;  %v13115_v23 = vpop.f32.mrf.mxu1  ;;  %v19213_v39 = vpop.f32.mrf.mxu0  ;;  %v21104_v32 = vld [vmem:[#allocation74_spill] sm:$0xff] }
 0x3e3   : > { %13313 = vmatprep.mubr.msk.bf16.mxu1 %vm6417_vm8, %v21101_v18  ;;  %v9997_v26 = vrot.slane %v18847_v2, 5  ;;  %v10723_v30 = vsel %vm1503_vm0, %v21103_v1, 0  ;;  %v19217_v29 = vsel %vm14430_vm9, %v9989_v47, %v9990_v60  ;;  %v7331_v44 = vadd.f32 %v13115_v23, %v21104_v32  ;;  %v21105_v18 = vld [vmem:[#allocation80_spill] sm:$0xff]  ;;  %v21108_v23 = vld [vmem:[#allocation85_spill] sm:$0xff] }
 0x3e4   : > { %v19221_v45 = vsel %vm14430_vm9, %v12217_v10, %v9994_v49  ;;  %v9996_v16 = vrot.slane %v9994_v49, 4  ;;  %13368 = vmatpush3.bf16.msra.mxu1 %v10723_v30  ;;  %v19228_v55 = vadd.f32 %v21105_v18, %v18917_v8  ;;  %v7250_v1 = vpop.f32.mrf.mxu1  ;;  %v19230_v20 = vpop.f32.mrf.mxu0  ;;  %v21106_v10 = vld [vmem:[#allocation82_spill] sm:$0xff]  ;;  %v21107_v30 = vld [vmem:[#allocation84_spill] sm:$0xff]  ;;  %v19246_v32 = vadd.f32 %v21108_v23, %v18958_v61 }
 0x3e5   : > { %v19238_v47 = vadd.f32 %v21106_v10, %v18933_v22  ;;  %v19242_v49 = vadd.f32 %v21107_v30, %v18948_v43  ;;  %v21109_v8 = vld [vmem:[#allocation76_spill] sm:$0xff]  ;;  %v21111_v22 = vld [vmem:[#allocation13_spill] sm:$0xff]  ;;  %v19263_v61 = vadd.f32 %v18854_v56, %v18989_v51  ;;  %v21115_v23 = vld [vmem:[#allocation10_spill] sm:$0xff]  ;;  %v21118_v56 = vcombine.low %v19045_v38, %v19059_v19 }
 0x3e6   : > { %v19234_v60 = vsel %vm14430_vm9, %v9996_v16, %v9997_v26  ;;  %v7329_v18 = vadd.f32 %v7250_v1, %v21109_v8  ;;  %v21110_v26 = vld [vmem:[#allocation25_spill] sm:$0xff]  ;;  %v13116_v43 = vpop.f32.mrf.mxu1  ;;  %v19259_v10 = vpop.f32.mrf.mxu0  ;;  %v21113_v1 = vld [vmem:[#allocation90_spill] sm:$0xff]  ;;  %v21116_v8 = vpack.c.bf16 %v21114_v24, %v21115_v23  ;;  %v21120_v38 = vld [vmem:[#allocation79_spill] sm:$0xff]  ;;  %v19311_v25 = vadd.f32 %v18968_v58, %v19151_v34 }
 0x3e7   : > { %v12234_v2 = vcombine.low %v19221_v45, %v19234_v60  ;;  %v21112_v16 = vpack.c.bf16 %v21110_v26, %v21111_v22  ;;  %v19267_v30 = vadd.f32 %v21113_v1, %v19015_v54  ;;  %v21117_v26 = vld [vmem:[#allocation77_spill] sm:$0xff]  ;;  %v21122_v1 = vld [vmem:[#allocation86_spill] sm:$0xff]  ;;  %vm13782_vm0 = vmmov 0  }
 0x3e8   : > { %v7332_v22 = vadd.f32 %v13116_v43, %v21117_v26  ;;  %v7253_v51 = vpop.f32.mrf.mxu1  ;;  %v13161_v54 = vpop.f32.mrf.mxu0  ;;  %v19296_v43 = vadd.f32 %v18936_v63, %v19115_v0  ;;  %v19314_v63 = vadd.f32 %v18984_v41, %v7328_v17  ;;  %v19324_v27 = vadd.f32 %v19047_v31, %v7329_v18  ;;  %v21124_v17 = vld [vmem:[#allocation32_spill] sm:$0xff]  ;;  %v13690_v45 = vld [vmem:[%s13938_s24 + $0x10] sm:$0xf] }
 0x3e9   : > { %13348 = vmatmul.mubr.msk.bf16.gmra.mxu0 %vm6417_vm8, %v21112_v16  ;;  %v19280_v16 = vadd.f32 %v18893_v15, %v19051_v7  ;;  %v21119_v15 = vcombine.low %v19063_v62, %v19081_v5  ;;  %v19303_v7 = vadd.f32 %v7253_v51, %v21120_v38  ;;  %v19317_v62 = vadd.f32 %v19006_v53, %v7326_v59  ;;  %v21123_v53 = vld [vmem:[#allocation28_spill] sm:$0xff] }
 0x3ea   : > { %13351 = vmatprep.mubr.msk.bf16.mxu0 %vm6417_vm8, %v21116_v8  ;;  %13314 = vmatmul.mubr.msk.bf16.gmra.mxu1 %vm6417_vm8, %v21118_v56  ;;  %v13119_v3 = vpop.f32.mrf.mxu1  ;;  %v7672_v19 = vpop.f32.mrf.mxu0  ;;  %v19320_v5 = vadd.f32 %v19028_v9, %v7331_v44  ;;  %v19327_v50 = vadd.f32 %v19065_v28, %v7332_v22  ;;  %v21125_v59 = vpack.c.bf16 %v21123_v53, %v21124_v17  ;;  %v10936_v31 = vsel %vm6466_vm6, %v19175_v13, 0  ;;  %v21126_v28 = vld [vmem:[#allocation17_spill] sm:$0xff]  ;;  %v21127_v18 = vld [vmem:[#allocation12_spill] sm:$0xff]  ;;  %v21129_v8 = vld [vmem:[#allocation87_spill] sm:$0xff] }
 0x3eb   : > { %13317 = vmatprep.mubr.msk.bf16.mxu1 %vm6417_vm8, %v21119_v15  ;;  %v7335_v0 = vadd.f32 %v13119_v3, %v21121_v14  ;;  %v21128_v23 = vpack.c.bf16 %v21126_v28, %v21127_v18  ;;  %13402 = vmatpush3.bf16.msra.mxu0 %v10936_v31  ;;  %v21130_v22 = vld [vmem:[#allocation38_spill] sm:$0xff]  ;;  %v21131_v56 = vld [vmem:[#allocation19_spill] sm:$0xff]  ;;  %v21134_v13 = vld [vmem:[#allocation37_spill] sm:$0xff] }
 0x3ec   : > { %v7266_v58 = vpop.f32.mrf.mxu1  ;;  %v13162_v34 = vpop.f32.mrf.mxu0  ;;  %v21132_v51 = vcombine.low %v21130_v22, %v21131_v56  ;;  %v21133_v3 = vld [vmem:[#allocation27_spill] sm:$0xff]  ;;  %v21138_v17 = vld [vmem:[#allocation89_spill] sm:$0xff]  ;;  %v21141_v22 = vld [vmem:[#allocation24_spill] sm:$0xff] }
 0x3ed   : > { %v7333_v24 = vadd.f32 %v7266_v58, %v21122_v1  ;;  %v19331_v41 = vadd.f32 %v19102_v21, %v7335_v0  ;;  %v21135_v14 = vcombine.low %v21133_v3, %v21134_v13  ;;  %v21136_v0 = vld [vmem:[#allocation88_spill] sm:$0xff]  ;;  %v21137_v1 = vld [vmem:[#allocation21_spill] sm:$0xff]  ;;  %v21139_v28 = vld [vmem:[#allocation91_spill] sm:$0xff] }
 0x3ee   : > { %v13120_v9 = vpop.f32.mrf.mxu1  ;;  %v19337_v44 = vpop.f32.mrf.mxu0  ;;  %v21144_v3 = vld [vmem:[#allocation18_spill] sm:$0xff] }
 0x3ef   : > { %v7336_v26 = vadd.f32 %v13120_v9, %v21129_v8  ;;  %v19347_v21 = vadd.f32 %v19121_v37, %v7333_v24  ;;  %v21140_v8 = vld [vmem:[#allocation14_spill] sm:$0xff] }
 0x3f0   : > { %v7269_v15 = vpop.f32.mrf.mxu1  ;;  %v13201_v38 = vpop.f32.mrf.mxu0  ;;  %v21142_v56 = vpack.c.bf16 %v21140_v8, %v21141_v22  ;;  %v21150_v22 = vld [vmem:[#allocation94_spill] sm:$0xff] }
 0x3f1   : > { %13352 = vmatmul.mubr.msk.bf16.gmra.mxu0 %vm6417_vm8, %v21125_v59  ;;  %v19358_v58 = vadd.f32 %v7269_v15, %v21136_v0  ;;  %v19361_v53 = vadd.f32 %v21137_v1, %v7336_v26  ;;  %v21143_v15 = vld [vmem:[#allocation20_spill] sm:$0xff] }
 0x3f2   : > { %13355 = vmatprep.mubr.msk.bf16.mxu0 %vm6417_vm8, %v21128_v23  ;;  %13318 = vmatmul.mubr.msk.bf16.gmra.mxu1 %vm6417_vm8, %v21132_v51  ;;  %v13123_v37 = vpop.f32.mrf.mxu1  ;;  %v8660_v24 = vpop.f32.mrf.mxu0  ;;  %v21145_v13 = vpack.c.bf16 %v21143_v15, %v21144_v3 }
 0x3f3   : > { %13321 = vmatprep.mubr.msk.bf16.mxu1 %vm6417_vm8, %v21135_v14  ;;  %v7339_v59 = vadd.f32 %v13123_v37, %v21138_v17  ;;  %v21146_v14 = vld [vmem:[#allocation92_spill] sm:$0xff] }
 0x3f4   : > { %v7282_v9 = vpop.f32.mrf.mxu1  ;;  %v19364_v31 = vpop.f32.mrf.mxu0 }
 0x3f5   : > { %v7337_v18 = vadd.f32 %v7282_v9, %v21139_v28  ;;  %v19368_v23 = vadd.f32 %v19192_v4, %v7339_v59  ;;  %v21147_v4 = vcombine.low %v19129_v48, %v19143_v11  ;;  %v21148_v59 = vcombine.low %v19147_v35, %v19165_v52  ;;  %v21149_v9 = vld [vmem:[#allocation93_spill] sm:$0xff]  ;;  %v21152_v35 = vld [vmem:[#allocation48_spill] sm:$0xff]  ;;  %v21153_v52 = vld [vmem:[#allocation46_spill] sm:$0xff] }
 0x3f6   : > { %v13124_v51 = vpop.f32.mrf.mxu1  ;;  %v19374_v26 = vpop.f32.mrf.mxu0 }
 0x3f7   : > { %v7340_v0 = vadd.f32 %v13124_v51, %v21146_v14  ;;  %v19382_v1 = vadd.f32 %v19213_v39, %v7337_v18  ;;  %v21151_v51 = vld [vmem:[#allocation95_spill] sm:$0xff] }
 0x3f8   : > { %v7285_v37 = vpop.f32.mrf.mxu1  ;;  %v13205_v17 = vpop.f32.mrf.mxu0 }
 0x3f9   : > { %13356 = vmatmul.mubr.msk.bf16.gmra.mxu0 %vm6417_vm8, %v21142_v56  ;;  %v19393_v28 = vadd.f32 %v7285_v37, %v21149_v9  ;;  %v19396_v8 = vadd.f32 %v19230_v20, %v7340_v0  ;;  %v21155_v0 = vld [vmem:[#allocation41_spill] sm:$0xff] }
 0x3fa   : > { %13359 = vmatprep.mubr.msk.bf16.mxu0 %vm6417_vm8, %v21145_v13  ;;  %13322 = vmatmul.mubr.msk.bf16.gmra.mxu1 %vm6417_vm8, %v21147_v4  ;;  %v13127_v39 = vpop.f32.mrf.mxu1  ;;  %v8676_v18 = vpop.f32.mrf.mxu0  ;;  %v21154_v13 = vpack.c.bf16 %v21152_v35, %v21153_v52  ;;  %v21156_v4 = vld [vmem:[#allocation39_spill] sm:$0xff] }
 0x3fb   : > { %13325 = vmatprep.mubr.msk.bf16.mxu1 %vm6417_vm8, %v21148_v59  ;;  %v7343_v56 = vadd.f32 %v13127_v39, %v21150_v22  ;;  %v21157_v37 = vpack.c.bf16 %v21155_v0, %v21156_v4  ;;  %v21158_v59 = vld [vmem:[#allocation96_spill] sm:$0xff]  ;;  %v13687_v0 = vld [vmem:[%s13938_s24 + $0x4] sm:$0xf] }
 0x3fc   : > { %v7298_v48 = vpop.f32.mrf.mxu1  ;;  %v19399_v11 = vpop.f32.mrf.mxu0 }
 0x3fd   : > { %v7341_v15 = vadd.f32 %v7298_v48, %v21151_v51  ;;  %v19402_v3 = vadd.f32 %v13161_v54, %v7343_v56  ;;  %v21159_v54 = vcombine.low %v19169_v36, %v19196_v46  ;;  %v21160_v48 = vcombine.low %v19200_v42, %v19217_v29  ;;  %v21161_v51 = vld [vmem:[#allocation97_spill] sm:$0xff]  ;;  %v13686_v46 = vld [vmem:[%s13938_s24] sm:$0xf] }
 0x3fe   : > { %v13128_v14 = vpop.f32.mrf.mxu1  ;;  %v19408_v20 = vpop.f32.mrf.mxu0  ;;  %v12268_v4 = vcombine.low %v13686_v46, %v13687_v0 }
 0x3ff   : > { %v7344_v9 = vadd.f32 %v13128_v14, %v21158_v59  ;;  %v19415_v39 = vadd.f32 %v7672_v19, %v7341_v15  ;;  %v21163_v59 = vld [vmem:[#allocation26_spill] sm:$0xff] }
 0x400   : > { %v7301_v22 = vpop.f32.mrf.mxu1  ;;  %v13209_v56 = vpop.f32.mrf.mxu0 }
 0x401   : > { %13360 = vmatmul.mubr.msk.bf16.gmra.mxu0 %vm6417_vm8, %v21154_v13  ;;  %v19426_v35 = vadd.f32 %v7301_v22, %v21161_v51  ;;  %v19428_v52 = vadd.f32 %v13162_v34, %v7344_v9 }
 0x402   : > { %13363 = vmatprep.mubr.msk.bf16.mxu0 %vm6417_vm8, %v21157_v37  ;;  %13326 = vmatmul.mubr.msk.bf16.gmra.mxu1 %vm6417_vm8, %v21159_v54  ;;  %v13167_v13 = vpop.f32.mrf.mxu1  ;;  %v8692_v19 = vpop.f32.mrf.mxu0  ;;  %v21162_v37 = vld [vmem:[#allocation40_spill] sm:$0xff] }
 0x403   : > { %13329 = vmatprep.mubr.msk.bf16.mxu1 %vm6417_vm8, %v21160_v48  ;;  %v8367_v15 = vadd.f32 %v13167_v13, %v19228_v55  ;;  %v21164_v34 = vpack.c.bf16 %v21162_v37, %v21163_v59 }
 0x404   : > { %v8238_v14 = vpop.f32.mrf.mxu1  ;;  %v19431_v36 = vpop.f32.mrf.mxu0 }
 0x405   : > { %v8365_v42 = vadd.f32 %v8238_v14, %v19238_v47  ;;  %v19436_v29 = vadd.f32 %v13201_v38, %v8367_v15  ;;  %v13688_v15 = vld [vmem:[%s13938_s24 + $0x8] sm:$0xf]  ;;  %v13689_v14 = vld [vmem:[%s13938_s24 + $0xc] sm:$0xf] }
 0x406   : > { %v13168_v9 = vpop.f32.mrf.mxu1  ;;  %v19442_v54 = vpop.f32.mrf.mxu0 }
 0x407   : > { %v19445_v55 = vadd.f32 %v13168_v9, %v19242_v49  ;;  %v19447_v22 = vadd.f32 %v8660_v24, %v8365_v42  ;;  %v12269_v24 = vcombine.low %v13688_v15, %v13689_v14 }
 0x408   : > { %v8241_v47 = vpop.f32.mrf.mxu1  ;;  %v13213_v38 = vpop.f32.mrf.mxu0 }
 0x409   : > { %13364 = vmatmul.mubr.msk.bf16.gmra.mxu0 %vm6417_vm8, %v21164_v34  ;;  %v19455_v48 = vadd.f32 %v8241_v47, %v19246_v32 }
 0x40a   : > { %13330 = vmatmul.mubr.msk.bf16.gmra.mxu1 %vm6417_vm8, %v12234_v2  ;;  %v13171_v51 = vpop.f32.mrf.mxu1  ;;  %v8708_v13 = vpop.f32.mrf.mxu0  ;;  %v13691_v2 = vld [vmem:[%s13938_s24 + $0x14] sm:$0xf] }
 0x40b   : > { %13369 = vmatprep.mubr.msk.bf16.mxu1 %vm1454_vm11, %v12268_v4  ;;  %v8371_v49 = vadd.f32 %v13171_v51, %v19253_v12  ;;  %v12270_v60 = vcombine.low %v13690_v45, %v13691_v2  ;;  %v13692_v51 = vld [vmem:[%s13938_s24 + $0x18] sm:$0xf] }
 0x40c   : > { %v8254_v46 = vpop.f32.mrf.mxu1  ;;  %v19460_v0 = vpop.f32.mrf.mxu0 }
 0x40d   : > { %v8369_v4 = vadd.f32 %v8254_v46, %v19263_v61  ;;  %v19465_v42 = vadd.f32 %v13205_v17, %v8371_v49  ;;  %v13693_v49 = vld [vmem:[%s13938_s24 + $0x1c] sm:$0xf]  ;;  %v13695_v46 = vld [vmem:[%s13938_s24 + $0x24] sm:$0xf] }
 0x40e   : > { %v13172_v32 = vpop.f32.mrf.mxu1  ;;  %v19467_v37 = vpop.f32.mrf.mxu0  ;;  %v12271_v15 = vcombine.low %v13692_v51, %v13693_v49 }
 0x40f   : > { %v19470_v12 = vadd.f32 %v13172_v32, %v19267_v30  ;;  %v19472_v59 = vadd.f32 %v8676_v18, %v8369_v4  ;;  %v13694_v18 = vld [vmem:[%s13938_s24 + $0x20] sm:$0xf] }
 0x410   : > { %v8257_v34 = vpop.f32.mrf.mxu1  ;;  %v13217_v9 = vpop.f32.mrf.mxu0 }
 0x411   : > { %v19477_v61 = vadd.f32 %v8257_v34, %v19271_v40 }
 0x412   : > { %13370 = vmatmul.mubr.msk.bf16.vlgmr.msra.gmra.mxu1 %vm1454_vm11, %v12269_v24  ;;  %v13175_v17 = vpop.f32.mrf.mxu1  ;;  %v8724_v30 = vpop.f32.mrf.mxu0  ;;  %v12272_v24 = vcombine.low %v13694_v18, %v13695_v46 }
 0x413   : > { %13373 = vmatprep.mubr.msk.bf16.mxu1 %vm1454_vm11, %v12270_v60  ;;  %v8375_v47 = vadd.f32 %v13175_v17, %v19280_v16  ;;  %v13696_v17 = vld [vmem:[%s13938_s24 + $0x28] sm:$0xf] }
 0x414   : > { %v8270_v14 = vpop.f32.mrf.mxu1  ;;  %v19493_v32 = vpop.f32.mrf.mxu0 }
 0x415   : > { %v8373_v45 = vadd.f32 %v8270_v14, %v19288_v57  ;;  %v19485_v2 = vadd.f32 %v13209_v56, %v8375_v47  ;;  %v13697_v47 = vld [vmem:[%s13938_s24 + $0x2c] sm:$0xf] }
 0x416   : > { %v13176_v40 = vpop.f32.mrf.mxu1  ;;  %v12273_v51 = vcombine.low %v13696_v17, %v13697_v47  ;;  %v19502_v49 = vpop.f32.mrf.mxu0 }
 0x417   : > { %v19488_v60 = vadd.f32 %v13176_v40, %v19292_v33  ;;  %v19490_v16 = vadd.f32 %v8692_v19, %v8373_v45  ;;  %21165 = vst [vmem:[#allocation9_spill] sm:$0xff] %v19502_v49  ;;  %v13698_v19 = vld [vmem:[%s13938_s24 + $0x30] sm:$0xf] }
 0x418   : > { %v8273_v4 = vpop.f32.mrf.mxu1  ;;  %v13221_v40 = vpop.f32.mrf.mxu0 }
 0x419   : > { %v19497_v34 = vadd.f32 %v8273_v4, %v19296_v43 }
 0x41a   : > { %13374 = vmatmul.mubr.msk.bf16.gmra.mxu1 %vm1454_vm11, %v12271_v15  ;;  %v13179_v57 = vpop.f32.mrf.mxu1  ;;  %v13699_v15 = vld [vmem:[%s13938_s24 + $0x34] sm:$0xf]  ;;  %v8740_v47 = vpop.f32.mrf.mxu0 }
 0x41b   : > { %13377 = vmatprep.mubr.msk.bf16.mxu1 %vm1454_vm11, %v12272_v24  ;;  %v8379_v56 = vadd.f32 %v13179_v57, %v19307_v6  ;;  %v12274_v14 = vcombine.low %v13698_v19, %v13699_v15  ;;  %v13700_v57 = vld [vmem:[%s13938_s24 + $0x38] sm:$0xf] }
 0x41c   : > { %v8286_v33 = vpop.f32.mrf.mxu1 }
 0x41d   : > { %v8377_v18 = vadd.f32 %v8286_v33, %v19311_v25  ;;  %v19507_v46 = vadd.f32 %v13213_v38, %v8379_v56  ;;  %v13701_v56 = vld [vmem:[%s13938_s24 + $0x3c] sm:$0xf]  ;;  %v13703_v33 = vld [vmem:[%s13938_s24 + $0x44] sm:$0xf] }
 0x41e   : > { %v13180_v43 = vpop.f32.mrf.mxu1  ;;  %v12275_v17 = vcombine.low %v13700_v57, %v13701_v56  ;;  %v13706_v56 = vld [vmem:[%s13938_s24 + $0x50] sm:$0xf] }
 0x41f   : > { %v19510_v6 = vadd.f32 %v13180_v43, %v19314_v63  ;;  %v19512_v24 = vadd.f32 %v8708_v13, %v8377_v18  ;;  %v13702_v13 = vld [vmem:[%s13938_s24 + $0x40] sm:$0xf]  ;;  %v19533_v18 = vpop.f32.mrf.mxu0 }
 0x420   : > { %v8289_v45 = vpop.f32.mrf.mxu1  ;;  %21166 = vst [vmem:[#allocation6_spill] sm:$0xff] %v19533_v18 }
 0x421   : > { %v19517_v4 = vadd.f32 %v8289_v45, %v19317_v62  ;;  %v19541_v57 = vpop.f32.mrf.mxu0 }
 0x422   : > { %13378 = vmatmul.mubr.msk.bf16.gmra.mxu1 %vm1454_vm11, %v12273_v51  ;;  %v13183_v25 = vpop.f32.mrf.mxu1  ;;  %v12276_v51 = vcombine.low %v13702_v13, %v13703_v33  ;;  %21167 = vst [vmem:[#allocation33_spill] sm:$0xff] %v19541_v57 }
 0x423   : > { %13381 = vmatprep.mubr.msk.bf16.mxu1 %vm1454_vm11, %v12274_v14  ;;  %v8383_v38 = vadd.f32 %v13183_v25, %v19320_v5  ;;  %v13705_v25 = vld [vmem:[%s13938_s24 + $0x4c] sm:$0xf] }
 0x424   : > { %v8302_v63 = vpop.f32.mrf.mxu1 }
 0x425   : > { %v8381_v19 = vadd.f32 %v8302_v63, %v19324_v27  ;;  %v19525_v15 = vadd.f32 %v13217_v9, %v8383_v38  ;;  %v13704_v9 = vld [vmem:[%s13938_s24 + $0x48] sm:$0xf] }
 0x426   : > { %v13184_v62 = vpop.f32.mrf.mxu1  ;;  %v12277_v38 = vcombine.low %v13704_v9, %v13705_v25  ;;  %v13708_v25 = vld [vmem:[%s13938_s24 + $0x58] sm:$0xf] }
 0x427   : > { %v19528_v14 = vadd.f32 %v13184_v62, %v19327_v50  ;;  %v19530_v5 = vadd.f32 %v8724_v30, %v8381_v19  ;;  %v13707_v30 = vld [vmem:[%s13938_s24 + $0x54] sm:$0xf] }
 0x428   : > { %v19535_v43 = vpop.f32.mrf.mxu1 }
 0x42a   : > { %13382 = vmatmul.mubr.msk.bf16.gmra.mxu1 %vm1454_vm11, %v12275_v17  ;;  %v13187_v45 = vpop.f32.mrf.mxu1  ;;  %v12278_v17 = vcombine.low %v13706_v56, %v13707_v30 }
 0x42b   : > { %13385 = vmatprep.mubr.msk.bf16.mxu1 %vm1454_vm11, %v12276_v51  ;;  %v8387_v27 = vadd.f32 %v13187_v45, %v19331_v41  ;;  %v21169_v41 = vld [vmem:[#allocation49_spill] sm:$0xff]  ;;  %v13225_v45 = vpop.f32.mrf.mxu0 }
 0x42c   : > { %v8318_v50 = vpop.f32.mrf.mxu1  ;;  %v7708_v19 = vadd.f32 %v21169_v41, %v19358_v58  ;;  %v13710_v58 = vld [vmem:[%s13938_s24 + $0x60] sm:$0xf] }
 0x42d   : > { %v8385_v63 = vadd.f32 %v8318_v50, %v19347_v21  ;;  %v19546_v13 = vadd.f32 %v13221_v40, %v8387_v27  ;;  %v8756_v56 = vpop.f32.mrf.mxu0 }
 0x42e   : > { %v13188_v33 = vpop.f32.mrf.mxu1 }
 0x42f   : > { %v19549_v51 = vadd.f32 %v13188_v33, %v19361_v53  ;;  %v19553_v62 = vadd.f32 %v8740_v47, %v8385_v63  ;;  %v13709_v53 = vld [vmem:[%s13938_s24 + $0x5c] sm:$0xf]  ;;  %v13711_v47 = vld [vmem:[%s13938_s24 + $0x64] sm:$0xf] }
 0x430   : > { %v8321_v9 = vpop.f32.mrf.mxu1  ;;  %v12279_v50 = vcombine.low %v13708_v25, %v13709_v53  ;;  %v12280_v63 = vcombine.low %v13710_v58, %v13711_v47  ;;  %v13714_v53 = vld [vmem:[%s13938_s24 + $0x70] sm:$0xf] }
 0x431   : > { %21168 = vst [vmem:[#allocation52_spill] sm:$0xff] %v19549_v51  ;;  %v19557_v21 = vadd.f32 %v8321_v9, %v7708_v19  ;;  %v19575_v9 = vpop.f32.mrf.mxu0 }
 0x432   : > { %13386 = vmatmul.mubr.msk.bf16.gmra.mxu1 %vm1454_vm11, %v12277_v38  ;;  %v13191_v40 = vpop.f32.mrf.mxu1  ;;  %21172 = vst [vmem:[#allocation43_spill] sm:$0xff] %v19575_v9 }
 0x433   : > { %13389 = vmatprep.mubr.msk.bf16.mxu1 %vm1454_vm11, %v12278_v17  ;;  %21170 = vst [vmem:[#allocation35_spill] sm:$0xff] %v19557_v21  ;;  %v8391_v27 = vadd.f32 %v13191_v40, %v19368_v23  ;;  %v7712_v23 = vadd.f32 %v19259_v10, %v19393_v28  ;;  %v13715_v10 = vld [vmem:[%s13938_s24 + $0x74] sm:$0xf] }
 0x434   : > { %v8334_v30 = vpop.f32.mrf.mxu1  ;;  %v12282_v28 = vcombine.low %v13714_v53, %v13715_v10 }
 0x435   : > { %v8389_v38 = vadd.f32 %v8334_v30, %v19382_v1  ;;  %v19565_v17 = vadd.f32 %v13225_v45, %v8391_v27  ;;  %v19580_v45 = vpop.f32.mrf.mxu0  ;;  %v13713_v27 = vld [vmem:[%s13938_s24 + $0x6c] sm:$0xf] }
 0x436   : > { %v13192_v33 = vpop.f32.mrf.mxu1  ;;  %21174 = vst [vmem:[#allocation11_spill] sm:$0xff] %v19580_v45 }
 0x437   : > { %v19568_v41 = vadd.f32 %v13192_v33, %v19396_v8  ;;  %v19572_v19 = vadd.f32 %v8756_v56, %v8389_v38  ;;  %v13712_v8 = vld [vmem:[%s13938_s24 + $0x68] sm:$0xf]  ;;  %v13229_v56 = vpop.f32.mrf.mxu0  ;;  %v13717_v38 = vld [vmem:[%s13938_s24 + $0x7c] sm:$0xf] }
 0x438   : > { %v8337_v40 = vpop.f32.mrf.mxu1  ;;  %v12281_v25 = vcombine.low %v13712_v8, %v13713_v27 }
 0x439   : > { %21171 = vst [vmem:[#allocation8_spill] sm:$0xff] %v19568_v41  ;;  %v19578_v1 = vadd.f32 %v8337_v40, %v7712_v23  ;;  %v8772_v47 = vpop.f32.mrf.mxu0 }
 0x43a   : > { %13390 = vmatmul.mubr.msk.bf16.gmra.mxu1 %vm1454_vm11, %v12279_v50 }
 0x43b   : > { %13393 = vmatprep.mubr.msk.bf16.mxu1 %vm1454_vm11, %v12280_v63  ;;  %21173 = vst [vmem:[#allocation23_spill] sm:$0xff] %v19578_v1  ;;  %v13716_v63 = vld [vmem:[%s13938_s24 + $0x78] sm:$0xf]  ;;  %s12361_s24 = sshll.u32 %s13867_s21, 8  ;;  %s13718_s21 = scalar_lea.vmem %s20309_s25, 256 }
 0x43c   : > { %v12283_v33 = vcombine.low %v13716_v63, %v13717_v38  ;;  %s20307_s12 = scalar_lea.hbm %s20362_s11, %s12361_s24  ;;  %p13719_p11 = scmp.ne.s32.totalorder %s20309_s25, %s13718_s21 }
 0x43d   : > { %p13726_p1 = scmp.lt.s32.totalorder %s13724_s29, %s13718_s21 }
 0x43e   : > { %p13720_p12 = pnand %p13719_p11, %p13884_p5 }
 0x43f   : > { %p13727_p2 = por %p13726_p1, %p13725_p0 }
 0x440   : > { %p13721_p13 = pneg %p13720_p12 }
 0x441   : > { %v13195_v50 = vpop.f32.mrf.mxu1 }
 0x442   : > { %13394 = vmatmul.mubr.msk.bf16.gmra.mxu1 %vm1454_vm11, %v12281_v25  ;;  %v8395_v30 = vadd.f32 %v13195_v50, %v19402_v3  ;;  %v7716_v25 = vadd.f32 %v19337_v44, %v19426_v35  ;;  %v19601_v3 = vpop.f32.mrf.mxu0  ;;  %p13728_p3 = pnand %p13727_p2, %p13721_p13 }
 0x443   : > { %13397 = vmatprep.mubr.msk.bf16.mxu1 %vm1454_vm11, %v12282_v28  ;;  %v8350_v58 = vpop.f32.mrf.mxu1  ;;  %21176 = vst [vmem:[#allocation29_spill] sm:$0xff] %v19601_v3 }
 0x444   : > { %v8393_v23 = vadd.f32 %v8350_v58, %v19415_v39  ;;  %v19592_v40 = vadd.f32 %v13229_v56, %v8395_v30  ;;  %v19609_v30 = vpop.f32.mrf.mxu0 }
 0x445   : > { %v13196_v8 = vpop.f32.mrf.mxu1  ;;  %21178 = vst [vmem:[#allocation50_spill] sm:$0xff] %v19609_v30 }
 0x446   : > { %v19595_v27 = vadd.f32 %v13196_v8, %v19428_v52  ;;  %v19599_v53 = vadd.f32 %v8772_v47, %v8393_v23  ;;  %v13269_v58 = vpop.f32.mrf.mxu0 }
 0x447   : > { %v8353_v10 = vpop.f32.mrf.mxu1 }
 0x448   : > { %21175 = vst [vmem:[#allocation36_spill] sm:$0xff] %v19595_v27  ;;  %v19604_v28 = vadd.f32 %v8353_v10, %v7716_v25 }
 0x449   : > { %v13235_v50 = vpop.f32.mrf.mxu1 }
 0x44a   : > { %13398 = vmatmul.mubr.msk.bf16.gmra.mxu1 %vm1454_vm11, %v12283_v33  ;;  %21177 = vst [vmem:[#allocation54_spill] sm:$0xff] %v19604_v28  ;;  %v19607_v39 = vadd.f32 %v13235_v50, %v19436_v29  ;;  %v9712_v33 = vpop.f32.mrf.mxu0 }
 0x44b   : > { %v9034_v56 = vpop.f32.mrf.mxu1 }
 0x44c   : > { %v19612_v52 = vadd.f32 %v9034_v56, %v19447_v22  ;;  %v13270_v25 = vpop.f32.mrf.mxu0 }
 0x44d   : > { %v13236_v44 = vpop.f32.mrf.mxu1 }
 0x44e   : > { %v19629_v56 = vpop.f32.mrf.mxu0 }
 0x44f   : > { %v19614_v35 = vpop.f32.mrf.mxu1 }
 0x451   : > { %v13239_v47 = vpop.f32.mrf.mxu1 }
 0x452   : > { %v19617_v63 = vadd.f32 %v13239_v47, %v19465_v42 }
 0x453   : > { %v9050_v38 = vpop.f32.mrf.mxu1 }
 0x454   : > { %v19620_v23 = vadd.f32 %v9050_v38, %v19472_v59  ;;  %v19638_v59 = vpop.f32.mrf.mxu0 }
 0x455   : > { %v19622_v29 = vpop.f32.mrf.mxu1 }
 0x456   : > { %v19643_v3 = vpop.f32.mrf.mxu0 }
 0x457   : > { %v19624_v8 = vpop.f32.mrf.mxu1 }
 0x459   : > { %v13243_v22 = vpop.f32.mrf.mxu1 }
 0x45a   : > { %v19627_v10 = vadd.f32 %v13243_v22, %v19485_v2 }
 0x45b   : > { %v9066_v50 = vpop.f32.mrf.mxu1 }
 0x45c   : > { %v19632_v42 = vadd.f32 %v9066_v50, %v19490_v16  ;;  %v19650_v16 = vpop.f32.mrf.mxu0 }
 0x45d   : > { %v19634_v47 = vpop.f32.mrf.mxu1 }
 0x45e   : > { %v19654_v45 = vpop.f32.mrf.mxu0 }
 0x45f   : > { %v19636_v30 = vpop.f32.mrf.mxu1 }
 0x460   : > { %v19662_v41 = vpop.f32.mrf.mxu0 }
 0x462   : > { %v13247_v38 = vpop.f32.mrf.mxu1  ;;  %v19668_v57 = vpop.f32.mrf.mxu0 }
 0x463   : > { %v19641_v28 = vadd.f32 %v13247_v38, %v19507_v46 }
 0x464   : > { %v9082_v2 = vpop.f32.mrf.mxu1  ;;  %v19673_v51 = vpop.f32.mrf.mxu0 }
 0x465   : > { %v19646_v22 = vadd.f32 %v9082_v2, %v19512_v24 }
 0x466   : > { %v19648_v27 = vpop.f32.mrf.mxu1 }
 0x468   : > { %v19652_v50 = vpop.f32.mrf.mxu1 }
 0x46c   : > { %v13251_v1 = vpop.f32.mrf.mxu1 }
 0x46d   : > { %v19657_v9 = vadd.f32 %v13251_v1, %v19525_v15 }
 0x46e   : > { %v9098_v46 = vpop.f32.mrf.mxu1 }
 0x46f   : > { %21179 = vst [vmem:[#allocation51_spill] sm:$0xff] %v19657_v9  ;;  %v19660_v38 = vadd.f32 %v9098_v46, %v19530_v5  ;;  %v19680_v46 = vpop.f32.mrf.mxu0 }
 0x470   : > { %v19664_v24 = vpop.f32.mrf.mxu1 }
 0x471   : > { %21180 = vst [vmem:[#allocation53_spill] sm:$0xff] %v19660_v38  ;;  %21181 = vst [vmem:[#allocation55_spill] sm:$0xff] %v19664_v24  ;;  %v19684_v9 = vpop.f32.mrf.mxu0 }
 0x472   : > { %v19666_v2 = vpop.f32.mrf.mxu1 }
 0x473   : > { %21182 = vst [vmem:[#allocation56_spill] sm:$0xff] %v19666_v2 }
 0x476   : > { %v13255_v21 = vpop.f32.mrf.mxu1 }
 0x477   : > { %v19671_v18 = vadd.f32 %v13255_v21, %v19546_v13 }
 0x478   : > { %v9114_v15 = vpop.f32.mrf.mxu1 }
 0x479   : > { %21183 = vst [vmem:[#allocation57_spill] sm:$0xff] %v19671_v18  ;;  %v19676_v1 = vadd.f32 %v9114_v15, %v19553_v62  ;;  %v19692_v18 = vpop.f32.mrf.mxu0 }
 0x47a   : > { %v19678_v5 = vpop.f32.mrf.mxu1 }
 0x47b   : > { %21184 = vst [vmem:[#allocation59_spill] sm:$0xff] %v19676_v1  ;;  %21185 = vst [vmem:[#allocation58_spill] sm:$0xff] %v19678_v5  ;;  %v19698_v1 = vpop.f32.mrf.mxu0 }
 0x47c   : > { %v19682_v38 = vpop.f32.mrf.mxu1 }
 0x47d   : > { %21186 = vst [vmem:[#allocation60_spill] sm:$0xff] %v19682_v38 }
 0x480   : > { %v13259_v2 = vpop.f32.mrf.mxu1 }
 0x481   : > { %v19687_v49 = vadd.f32 %v13259_v2, %v19565_v17  ;;  %v19706_v2 = vpop.f32.mrf.mxu0 }
 0x482   : > { %v9130_v13 = vpop.f32.mrf.mxu1 }
 0x483   : > { %21187 = vst [vmem:[#allocation61_spill] sm:$0xff] %v19687_v49  ;;  %v19690_v21 = vadd.f32 %v9130_v13, %v19572_v19  ;;  %v8790_v13 = vadd.f32 %v19364_v31, %v19445_v55  ;;  %v8788_v49 = vadd.f32 %v19374_v26, %v19455_v48  ;;  %v19724_v31 = vld [vmem:[%s20355_s4] ss:$0 sm:$0xff]  ;;  %v8794_v26 = vadd.f32 %v19399_v11, %v19470_v12 }
 0x484   : > { %v19694_v62 = vpop.f32.mrf.mxu1  ;;  %v9845_v11 = vadd.f32 %v19638_v59, %v19617_v63 }
 0x485   : > { %21188 = vst [vmem:[#allocation62_spill] sm:$0xff] %v19690_v21 }
 0x486   : > { %v19696_v15 = vpop.f32.mrf.mxu1 }
 0x487   : > { %21189 = vst [vmem:[#allocation63_spill] sm:$0xff] %v19696_v15  ;;  %v9164_v15 = vadd.f32 %v13236_v44, %v8790_v13 }
 0x488   : > { %v13263_v5 = vpop.f32.mrf.mxu1 }
 0x489   : > { %v19701_v38 = vadd.f32 %v13263_v5, %v19592_v40  ;;  %v9841_v40 = vadd.f32 %v13269_v58, %v19607_v39  ;;  %v19717_v5 = vpop.f32.mrf.mxu0  ;;  %v9842_v13 = vadd.f32 %v13270_v25, %v9164_v15 }
 0x48a   : > { %v9146_v24 = vpop.f32.mrf.mxu1 }
 0x48b   : > { %21190 = vst [vmem:[#allocation65_spill] sm:$0xff] %v19701_v38  ;;  %v19704_v17 = vadd.f32 %v9146_v24, %v19599_v53  ;;  %v9162_v53 = vadd.f32 %v19614_v35, %v8788_v49  ;;  %v19728_v48 = vpop.f32.mrf.mxu0 }
 0x48c   : > { %v19708_v19 = vpop.f32.mrf.mxu1 }
 0x48d   : > { %21191 = vst [vmem:[#allocation7_spill] sm:$0xff] %v19704_v17  ;;  %v9839_v17 = vadd.f32 %v9712_v33, %v19612_v52  ;;  %v9840_v35 = vadd.f32 %v19629_v56, %v9162_v53  ;;  %v9168_v52 = vadd.f32 %v19622_v29, %v8794_v26  ;;  %v8792_v33 = vadd.f32 %v19408_v20, %v19477_v61 }
 0x48e   : > { %v19712_v21 = vpop.f32.mrf.mxu1  ;;  %v9843_v29 = vadd.f32 %v19643_v3, %v19620_v23 }
 0x48f   : > { %v9166_v12 = vadd.f32 %v19624_v8, %v8792_v33  ;;  %v8798_v8 = vadd.f32 %v19431_v36, %v19488_v60  ;;  %v9849_v60 = vadd.f32 %v19662_v41, %v19627_v10 }
 0x490   : > { %v13303_v38 = vpop.f32.mrf.mxu1 }
 0x491   : > { %v10263_v24 = vadd.f32 %v13303_v38, %v9841_v40  ;;  %v19740_v40 = vpop.f32.mrf.mxu0  ;;  %v9172_v33 = vadd.f32 %v19634_v47, %v8798_v8  ;;  %v21192_v8 = vld [vmem:[#allocation31_spill] sm:$0xff] }
 0x492   : > { %v10134_v55 = vpop.f32.mrf.mxu1 }
 0x493   : > { %v10261_v44 = vadd.f32 %v10134_v55, %v9839_v17  ;;  %v10302_v58 = vadd.f32 %v19724_v31, %v10263_v24  ;;  %v19748_v59 = vpop.f32.mrf.mxu0 }
 0x494   : > { %v13304_v39 = vpop.f32.mrf.mxu1 }
 0x495   : > { %v10264_v49 = vadd.f32 %v13304_v39, %v9842_v13  ;;  %v10300_v17 = vadd.f32 %v19724_v31, %v10261_v44  ;;  %v10334_v56 = vmax.f32 %v10302_v58, 0.0  ;;  %v9846_v44 = vadd.f32 %v19650_v16, %v9168_v52 }
 0x496   : > { %v10137_v38 = vpop.f32.mrf.mxu1  ;;  %v9844_v58 = vadd.f32 %v19654_v45, %v9166_v12  ;;  %v8796_v16 = vadd.f32 %v19442_v54, %v19497_v34  ;;  %v9847_v54 = vadd.f32 %v19668_v57, %v19632_v42 }
 0x497   : > { %v10303_v25 = vadd.f32 %v19724_v31, %v10264_v49  ;;  %v10262_v15 = vadd.f32 %v10137_v38, %v9840_v35  ;;  %v10332_v13 = vmax.f32 %v10300_v17, 0.0 }
 0x498   : > { %v13307_v24 = vpop.f32.mrf.mxu1 }
 0x499   : > { %v10335_v53 = vmax.f32 %v10303_v25, 0.0  ;;  %v10301_v20 = vadd.f32 %v19724_v31, %v10262_v15  ;;  %v10267_v61 = vadd.f32 %v13307_v24, %v9845_v11  ;;  %v9170_v25 = vadd.f32 %v19636_v30, %v8796_v16  ;;  %v19761_v15 = vpop.f32.mrf.mxu0 }
 0x49a   : > { %v10150_v55 = vpop.f32.mrf.mxu1 }
 0x49b   : > { %v10365_v26 = vpack.c.bf16 %v10335_v53, %v10334_v56  ;;  %v10333_v39 = vmax.f32 %v10301_v20, 0.0  ;;  %v10265_v63 = vadd.f32 %v10150_v55, %v9843_v29  ;;  %v10306_v3 = vadd.f32 %v19724_v31, %v10267_v61  ;;  %v19770_v20 = vpop.f32.mrf.mxu0 }
 0x49c   : > { %v13308_v49 = vpop.f32.mrf.mxu1  ;;  %v9850_v29 = vadd.f32 %v19673_v51, %v9172_v33  ;;  %v8802_v53 = vadd.f32 %v19460_v0, %v19510_v6  ;;  %v8800_v51 = vadd.f32 %v19467_v37, %v19517_v4  ;;  %v9853_v6 = vadd.f32 %v19684_v9, %v19641_v28 }
 0x49d   : > { %v10364_v35 = vpack.c.bf16 %v10333_v39, %v10332_v13  ;;  %v10268_v23 = vadd.f32 %v13308_v49, %v9846_v44  ;;  %v10304_v38 = vadd.f32 %v19724_v31, %v10265_v63  ;;  %v10338_v34 = vmax.f32 %v10306_v3, 0.0 }
 0x49e   : > { %v10153_v52 = vpop.f32.mrf.mxu1  ;;  %v9848_v44 = vadd.f32 %v19680_v46, %v9170_v25  ;;  %v9176_v13 = vadd.f32 %v19648_v27, %v8802_v53  ;;  %v7704_v49 = vadd.f32 %v21192_v8, %v19303_v7  ;;  %v9174_v46 = vadd.f32 %v19652_v50, %v8800_v51  ;;  %v19785_v27 = vpop.f32.mrf.mxu0 }
 0x49f   : > { %v10307_v17 = vadd.f32 %v19724_v31, %v10268_v23  ;;  %v10266_v36 = vadd.f32 %v10153_v52, %v9844_v58  ;;  %13403 = vmatprep.mubr.msk.bf16.mxu0 %vm6417_vm8, %v10364_v35  ;;  %v10336_v56 = vmax.f32 %v10304_v38, 0.0  ;;  %v9851_v37 = vadd.f32 %v19692_v18, %v19646_v22 }
 0x4a0   : > { %13404 = vmatmul.mubr.msk.bf16.vlgmr.msra.gmra.mxu0 %vm6417_vm8, %v10365_v26  ;;  %v8382_v9 = vadd.f32 %v19535_v43, %v7704_v49  ;;  %v9854_v7 = vadd.f32 %v19698_v1, %v9176_v13  ;;  %v8806_v38 = vadd.f32 %v19493_v32, %v19528_v14  ;;  %v9852_v25 = vadd.f32 %v19706_v2, %v9174_v46  ;;  %v21193_v43 = vld [vmem:[#allocation55_spill] sm:$0xff]  ;;  %v21197_v2 = vld [vmem:[#allocation53_spill] sm:$0xff] }
 0x4a1   : > { %v10339_v47 = vmax.f32 %v10307_v17, 0.0  ;;  %v10305_v11 = vadd.f32 %v19724_v31, %v10266_v36  ;;  %v19795_v17 = vpop.f32.mrf.mxu0  ;;  %v21195_v32 = vld [vmem:[#allocation51_spill] sm:$0xff] }
 0x4a2   : > { %v13311_v45 = vpop.f32.mrf.mxu1  ;;  %v9857_v14 = vadd.f32 %v19717_v5, %v21195_v32 }
 0x4a3   : > { %v10271_v12 = vadd.f32 %v13311_v45, %v9849_v60  ;;  %v10367_v41 = vpack.c.bf16 %v10339_v47, %v10338_v34  ;;  %v10337_v10 = vmax.f32 %v10305_v11, 0.0  ;;  %v9180_v45 = vadd.f32 %v21193_v43, %v8806_v38  ;;  %v21205_v38 = vld [vmem:[#allocation59_spill] sm:$0xff] }
 0x4a4   : > { %v10166_v24 = vpop.f32.mrf.mxu1 }
 0x4a5   : > { %v10269_v30 = vadd.f32 %v10166_v24, %v9847_v54  ;;  %v10366_v55 = vpack.c.bf16 %v10337_v10, %v10336_v56  ;;  %v10310_v57 = vadd.f32 %v19724_v31, %v10271_v12  ;;  %v21194_v54 = vld [vmem:[#allocation9_spill] sm:$0xff]  ;;  %v21196_v24 = vld [vmem:[#allocation56_spill] sm:$0xff]  ;;  %v13293_v56 = vpop.f32.mrf.mxu0  ;;  %v9855_v10 = vadd.f32 %v19728_v48, %v21197_v2 }
 0x4a6   : > { %v13312_v61 = vpop.f32.mrf.mxu1  ;;  %v8804_v1 = vadd.f32 %v21194_v54, %v8382_v9 }
 0x4a7   : > { %v10272_v42 = vadd.f32 %v13312_v61, %v9850_v29  ;;  %v10308_v39 = vadd.f32 %v19724_v31, %v10269_v30  ;;  %13407 = vmatprep.mubr.msk.bf16.mxu0 %vm6417_vm8, %v10366_v55  ;;  %v10342_v4 = vmax.f32 %v10310_v57, 0.0 }
 0x4a8   : > { %v10169_v26 = vpop.f32.mrf.mxu1  ;;  %13408 = vmatmul.mubr.msk.bf16.gmra.mxu0 %vm6417_vm8, %v10367_v41  ;;  %v9178_v29 = vadd.f32 %v21196_v24, %v8804_v1 }
 0x4a9   : > { %v10311_v63 = vadd.f32 %v19724_v31, %v10272_v42  ;;  %v10270_v0 = vadd.f32 %v10169_v26, %v9848_v44  ;;  %v10340_v33 = vmax.f32 %v10308_v39, 0.0  ;;  %v9858_v42 = vadd.f32 %v19740_v40, %v9180_v45  ;;  %v9808_v26 = vpop.f32.mrf.mxu0  ;;  %v21198_v39 = vld [vmem:[#allocation52_spill] sm:$0xff] }
 0x4aa   : > { %v13315_v35 = vpop.f32.mrf.mxu1  ;;  %v9856_v46 = vadd.f32 %v19748_v59, %v9178_v29 }
 0x4ab   : > { %v10343_v3 = vmax.f32 %v10311_v63, 0.0  ;;  %v10309_v23 = vadd.f32 %v19724_v31, %v10270_v0  ;;  %v10275_v58 = vadd.f32 %v13315_v35, %v9853_v6  ;;  %v21199_v63 = vld [vmem:[#allocation6_spill] sm:$0xff] }
 0x4ac   : > { %v10182_v28 = vpop.f32.mrf.mxu1  ;;  %v8810_v0 = vadd.f32 %v21199_v63, %v21198_v39  ;;  %v21200_v35 = vld [vmem:[#allocation58_spill] sm:$0xff] }
 0x4ad   : > { %v10369_v50 = vpack.c.bf16 %v10343_v3, %v10342_v4  ;;  %v10341_v16 = vmax.f32 %v10309_v23, 0.0  ;;  %v10273_v52 = vadd.f32 %v10182_v28, %v9851_v37  ;;  %v10314_v36 = vadd.f32 %v19724_v31, %v10275_v58  ;;  %v21201_v4 = vld [vmem:[#allocation35_spill] sm:$0xff]  ;;  %v21202_v3 = vld [vmem:[#allocation33_spill] sm:$0xff] }
 0x4ae   : > { %v13316_v18 = vpop.f32.mrf.mxu1  ;;  %v9184_v37 = vadd.f32 %v21200_v35, %v8810_v0  ;;  %v8808_v40 = vadd.f32 %v21202_v3, %v21201_v4  ;;  %v21213_v3 = vld [vmem:[#allocation36_spill] sm:$0xff] }
 0x4af   : > { %v10368_v22 = vpack.c.bf16 %v10341_v16, %v10340_v33  ;;  %v10276_v60 = vadd.f32 %v13316_v18, %v9854_v7  ;;  %v10312_v47 = vadd.f32 %v19724_v31, %v10273_v52  ;;  %v10346_v30 = vmax.f32 %v10314_v36, 0.0  ;;  %v21203_v7 = vld [vmem:[#allocation57_spill] sm:$0xff]  ;;  %v21204_v16 = vld [vmem:[#allocation60_spill] sm:$0xff] }
 0x4b0   : > { %v10185_v34 = vpop.f32.mrf.mxu1  ;;  %v9861_v33 = vadd.f32 %v19761_v15, %v21203_v7  ;;  %v9182_v52 = vadd.f32 %v21204_v16, %v8808_v40  ;;  %v9859_v18 = vadd.f32 %v19770_v20, %v21205_v38  ;;  %v9862_v45 = vadd.f32 %v19785_v27, %v9184_v37  ;;  %v21214_v40 = vld [vmem:[#allocation29_spill] sm:$0xff]  ;;  %v21215_v16 = vld [vmem:[#allocation54_spill] sm:$0xff] }
 0x4b1   : > { %v10315_v11 = vadd.f32 %v19724_v31, %v10276_v60  ;;  %v10274_v12 = vadd.f32 %v10185_v34, %v9852_v25  ;;  %13411 = vmatprep.mubr.msk.bf16.mxu0 %vm6417_vm8, %v10368_v22  ;;  %v10344_v44 = vmax.f32 %v10312_v47, 0.0 }
 0x4b2   : > { %v13319_v41 = vpop.f32.mrf.mxu1  ;;  %13412 = vmatmul.mubr.msk.bf16.gmra.mxu0 %vm6417_vm8, %v10369_v50  ;;  %v13294_v50 = vpop.f32.mrf.mxu0 }
 0x4b3   : > { %v10347_v53 = vmax.f32 %v10315_v11, 0.0  ;;  %v10313_v61 = vadd.f32 %v19724_v31, %v10274_v12  ;;  %v10279_v55 = vadd.f32 %v13319_v41, %v9857_v14  ;;  %v21206_v11 = vld [vmem:[#allocation8_spill] sm:$0xff]  ;;  %v21207_v12 = vld [vmem:[#allocation43_spill] sm:$0xff]  ;;  %v9860_v41 = vadd.f32 %v19795_v17, %v9182_v52  ;;  %v21216_v52 = vld [vmem:[#allocation50_spill] sm:$0xff] }
 0x4b4   : > { %v10198_v57 = vpop.f32.mrf.mxu1  ;;  %v9811_v47 = vpop.f32.mrf.mxu0  ;;  %v8814_v32 = vadd.f32 %v21207_v12, %v21206_v11 }
 0x4b5   : > { %v10371_v13 = vpack.c.bf16 %v10347_v53, %v10346_v30  ;;  %v10345_v5 = vmax.f32 %v10313_v61, 0.0  ;;  %v10277_v51 = vadd.f32 %v10198_v57, %v9855_v10  ;;  %v10318_v48 = vadd.f32 %v19724_v31, %v10279_v55  ;;  %v21208_v10 = vld [vmem:[#allocation23_spill] sm:$0xff] }
 0x4b6   : > { %v13320_v6 = vpop.f32.mrf.mxu1  ;;  %v9188_v2 = vadd.f32 %v19694_v62, %v8814_v32  ;;  %v21209_v30 = vld [vmem:[#allocation11_spill] sm:$0xff]  ;;  %v21212_v62 = vld [vmem:[#allocation62_spill] sm:$0xff] }
 0x4b7   : > { %v10370_v8 = vpack.c.bf16 %v10345_v5, %v10344_v44  ;;  %v10280_v49 = vadd.f32 %v13320_v6, %v9858_v42  ;;  %v10316_v58 = vadd.f32 %v19724_v31, %v10277_v51  ;;  %v10350_v22 = vmax.f32 %v10318_v48, 0.0  ;;  %v21210_v42 = vld [vmem:[#allocation61_spill] sm:$0xff]  ;;  %v21211_v5 = vld [vmem:[#allocation63_spill] sm:$0xff] }
 0x4b8   : > { %v10201_v23 = vpop.f32.mrf.mxu1  ;;  %v8812_v27 = vadd.f32 %v21209_v30, %v21208_v10  ;;  %v9865_v44 = vadd.f32 %v13293_v56, %v21210_v42  ;;  %v9863_v17 = vadd.f32 %v9808_v26, %v21212_v62 }
 0x4b9   : > { %v10319_v9 = vadd.f32 %v19724_v31, %v10280_v49  ;;  %v10278_v28 = vadd.f32 %v10201_v23, %v9856_v46  ;;  %13415 = vmatprep.mubr.msk.bf16.mxu0 %vm6417_vm8, %v10370_v8  ;;  %v10348_v54 = vmax.f32 %v10316_v58, 0.0  ;;  %v9866_v49 = vadd.f32 %v13294_v50, %v9188_v2 }
 0x4ba   : > { %v13323_v59 = vpop.f32.mrf.mxu1  ;;  %13416 = vmatmul.mubr.msk.bf16.gmra.mxu0 %vm6417_vm8, %v10371_v13  ;;  %v13297_v13 = vpop.f32.mrf.mxu0  ;;  %v9186_v51 = vadd.f32 %v21211_v5, %v8812_v27  ;;  %v8818_v23 = vadd.f32 %v21214_v40, %v21213_v3 }
 0x4bb   : > { %v10351_v36 = vmax.f32 %v10319_v9, 0.0  ;;  %v10317_v60 = vadd.f32 %v19724_v31, %v10278_v28  ;;  %v10283_v25 = vadd.f32 %v13323_v59, %v9861_v33  ;;  %v8816_v59 = vadd.f32 %v21216_v52, %v21215_v16 }
 0x4bc   : > { %v10214_v43 = vpop.f32.mrf.mxu1  ;;  %v9824_v56 = vpop.f32.mrf.mxu0  ;;  %v9864_v7 = vadd.f32 %v9811_v47, %v9186_v51  ;;  %v9192_v33 = vadd.f32 %v19708_v19, %v8818_v23  ;;  %v21218_v19 = vld [vmem:[#allocation7_spill] sm:$0xff] }
 0x4bd   : > { %v10373_v1 = vpack.c.bf16 %v10351_v36, %v10350_v22  ;;  %v10349_v15 = vmax.f32 %v10317_v60, 0.0  ;;  %v10281_v34 = vadd.f32 %v10214_v43, %v9859_v18  ;;  %v10322_v20 = vadd.f32 %v19724_v31, %v10283_v25  ;;  %v21217_v36 = vld [vmem:[#allocation65_spill] sm:$0xff] }
 0x4be   : > { %v13324_v14 = vpop.f32.mrf.mxu1  ;;  %v9869_v60 = vadd.f32 %v13297_v13, %v21217_v36  ;;  %v13298_v25 = vpop.f32.mrf.mxu0  ;;  %v9190_v43 = vadd.f32 %v19712_v21, %v8816_v59 }
 0x4bf   : > { %v10372_v24 = vpack.c.bf16 %v10349_v15, %v10348_v54  ;;  %v10284_v29 = vadd.f32 %v13324_v14, %v9862_v45  ;;  %v10320_v61 = vadd.f32 %v19724_v31, %v10281_v34  ;;  %v10354_v63 = vmax.f32 %v10322_v20, 0.0 }
 0x4c0   : > { %v10217_v53 = vpop.f32.mrf.mxu1  ;;  %v9867_v54 = vadd.f32 %v9824_v56, %v21218_v19  ;;  %v9870_v12 = vadd.f32 %v13298_v25, %v9192_v33 }
 0x4c1   : > { %v10323_v55 = vadd.f32 %v19724_v31, %v10284_v29  ;;  %v10282_v57 = vadd.f32 %v10217_v53, %v9860_v41  ;;  %13419 = vmatprep.mubr.msk.bf16.mxu0 %vm6417_vm8, %v10372_v24  ;;  %v10352_v46 = vmax.f32 %v10320_v61, 0.0  ;;  %v9827_v29 = vpop.f32.mrf.mxu0 }
 0x4c2   : > { %v13327_v39 = vpop.f32.mrf.mxu1  ;;  %13420 = vmatmul.mubr.msk.bf16.gmra.mxu0 %vm6417_vm8, %v10373_v1  ;;  %v9868_v30 = vadd.f32 %v9827_v29, %v9190_v43 }
 0x4c3   : > { %v10355_v0 = vmax.f32 %v10323_v55, 0.0  ;;  %v10321_v6 = vadd.f32 %v19724_v31, %v10282_v57  ;;  %v10287_v8 = vadd.f32 %v13327_v39, %v9865_v44  ;;  %v13337_v62 = vpop.f32.mrf.mxu0 }
 0x4c4   : > { %v10230_v48 = vpop.f32.mrf.mxu1 }
 0x4c5   : > { %v10375_v35 = vpack.c.bf16 %v10355_v0, %v10354_v63  ;;  %v10353_v37 = vmax.f32 %v10321_v6, 0.0  ;;  %v10285_v4 = vadd.f32 %v10230_v48, %v9863_v17  ;;  %v10326_v28 = vadd.f32 %v19724_v31, %v10287_v8  ;;  %v10467_v17 = vpop.f32.mrf.mxu0 }
 0x4c6   : > { %v13328_v58 = vpop.f32.mrf.mxu1 }
 0x4c7   : > { %v10374_v9 = vpack.c.bf16 %v10353_v37, %v10352_v46  ;;  %v10288_v26 = vadd.f32 %v13328_v58, %v9866_v49  ;;  %v10324_v38 = vadd.f32 %v19724_v31, %v10285_v4  ;;  %v10358_v1 = vmax.f32 %v10326_v28, 0.0  ;;  %v13338_v63 = vpop.f32.mrf.mxu0  ;;  %v13632_v46 = vld [vmem:[%s20360_s9] sm:$0xff]  }
 0x4c8   : > { %v10233_v50 = vpop.f32.mrf.mxu1 }
 0x4c9   : > { %v10327_v18 = vadd.f32 %v19724_v31, %v10288_v26  ;;  %v10286_v22 = vadd.f32 %v10233_v50, %v9864_v7  ;;  %13423 = vmatprep.mubr.msk.bf16.mxu0 %vm6417_vm8, %v10374_v9  ;;  %v10356_v32 = vmax.f32 %v10324_v38, 0.0  ;;  %v10470_v0 = vpop.f32.mrf.mxu0 }
 0x4ca   : > { %v13331_v45 = vpop.f32.mrf.mxu1  ;;  %13424 = vmatmul.mubr.msk.bf16.gmra.mxu0 %vm6417_vm8, %v10375_v35  ;;  %v13781_v35 = vmov 0.0  }
 0x4cb   : > { %v10359_v15 = vmax.f32 %v10327_v18, 0.0  ;;  %v10325_v34 = vadd.f32 %v19724_v31, %v10286_v22  ;;  %v10291_v47 = vadd.f32 %v13331_v45, %v9869_v60  ;;  %v19867_v6 = vpop.f32.mrf.mxu0  ;;  %13435 = vmatprep.subr.bf16.mxu1 %v13781_v35  ;;  %13437 = vmatprep.mubr.msk.bf16.mxu1 %vm13782_vm0, %v13781_v35 }
 0x4cc   : > { %v10246_v11 = vpop.f32.mrf.mxu1  ;;  %13436 = vmatpush3.bf16.msra.mxu1 %v13632_v46 }
 0x4cd   : > { %v10377_v14 = vpack.c.bf16 %v10359_v15, %v10358_v1  ;;  %v10357_v24 = vmax.f32 %v10325_v34, 0.0  ;;  %v10289_v20 = vadd.f32 %v10246_v11, %v9867_v54  ;;  %v10330_v21 = vadd.f32 %v19724_v31, %v10291_v47  ;;  %v19869_v8 = vpop.f32.mrf.mxu0 }
 0x4ce   : > { %v13332_v41 = vpop.f32.mrf.mxu1 }
 0x4cf   : > { %v10376_v2 = vpack.c.bf16 %v10357_v24, %v10356_v32  ;;  %v10292_v10 = vadd.f32 %v13332_v41, %v9870_v12  ;;  %v10328_v53 = vadd.f32 %v19724_v31, %v10289_v20  ;;  %v10362_v57 = vmax.f32 %v10330_v21, 0.0  ;;  %v19871_v48 = vpop.f32.mrf.mxu0 }
 0x4d0   : > { %v10249_v27 = vpop.f32.mrf.mxu1 }
 0x4d1   : > { %v10331_v61 = vadd.f32 %v19724_v31, %v10292_v10  ;;  %v10290_v55 = vadd.f32 %v10249_v27, %v9868_v30  ;;  %13427 = vmatprep.mubr.msk.bf16.mxu0 %vm6417_vm8, %v10376_v2  ;;  %v10360_v13 = vmax.f32 %v10328_v53, 0.0  ;;  %v19873_v49 = vpop.f32.mrf.mxu0 }
 0x4d2   : > { %13428 = vmatmul.mubr.msk.bf16.gmra.mxu0 %vm6417_vm8, %v10377_v14  ;;  %v13371_v58 = vpop.f32.mrf.mxu1 }
 0x4d3   : > { %v10363_v42 = vmax.f32 %v10331_v61, 0.0  ;;  %v10329_v44 = vadd.f32 %v19724_v31, %v10290_v55  ;;  %v19875_v31 = vpop.f32.mrf.mxu0  ;;  %v10768_v30 = vadd.f32 %v13371_v58, %v13337_v62 }
 0x4d4   : > { %v10759_v28 = vpop.f32.mrf.mxu1 }
 0x4d5   : > { %v10379_v5 = vpack.c.bf16 %v10363_v42, %v10362_v57  ;;  %v10361_v51 = vmax.f32 %v10329_v44, 0.0  ;;  %v19880_v37 = vpop.f32.mrf.mxu0  ;;  %v10760_v27 = vadd.f32 %v10759_v28, %v10467_v17  ;;  %v19949_v44 = vld [vmem:[%s20359_s8] ss:$0 sm:$0xff] }
 0x4d6   : > { %v13372_v7 = vpop.f32.mrf.mxu1 }
 0x4d7   : > { %v10378_v39 = vpack.c.bf16 %v10361_v51, %v10360_v13  ;;  %v19882_v4 = vpop.f32.mrf.mxu0  ;;  %v10771_v55 = vadd.f32 %v13372_v7, %v13338_v63 }
 0x4d8   : > { %v10762_v16 = vpop.f32.mrf.mxu1 }
 0x4d9   : > { %13431 = vmatprep.mubr.msk.bf16.mxu0 %vm6417_vm8, %v10378_v39  ;;  %v19884_v56 = vpop.f32.mrf.mxu0 }
 0x4da   : > { %13432 = vmatmul.mubr.msk.bf16.gmra.mxu0 %vm6417_vm8, %v10379_v5  ;;  %v13375_v59 = vpop.f32.mrf.mxu1  ;;  %v10763_v5 = vadd.f32 %v10762_v16, %v10470_v0 }
 0x4db   : > { %v19886_v3 = vpop.f32.mrf.mxu0  ;;  %v10784_v28 = vadd.f32 %v13375_v59, %v19867_v6 }
 0x4dc   : > { %v10775_v38 = vpop.f32.mrf.mxu1 }
 0x4dd   : > { %v19888_v40 = vpop.f32.mrf.mxu0  ;;  %v10776_v7 = vadd.f32 %v10775_v38, %v19869_v8 }
 0x4de   : > { %v13376_v22 = vpop.f32.mrf.mxu1 }
 0x4df   : > { %v19890_v23 = vpop.f32.mrf.mxu0 }
 0x4e0   : > { %v10778_v60 = vpop.f32.mrf.mxu1 }
 0x4e1   : > { %v19892_v9 = vpop.f32.mrf.mxu0  ;;  %v10779_v8 = vadd.f32 %v10778_v60, %v19873_v49 }
 0x4e2   : > { %v19908_v43 = vpop.f32.mrf.mxu1 }
 0x4e3   : > { %v19894_v26 = vpop.f32.mrf.mxu0 }
 0x4e4   : > { %v19912_v19 = vpop.f32.mrf.mxu1 }
 0x4e5   : > { %v19896_v33 = vpop.f32.mrf.mxu0 }
 0x4e6   : > { %v19916_v1 = vpop.f32.mrf.mxu1 }
 0x4e7   : > { %v19898_v52 = vpop.f32.mrf.mxu0 }
 0x4e8   : > { %v19920_v34 = vpop.f32.mrf.mxu1 }
 0x4e9   : > { %v19900_v50 = vpop.f32.mrf.mxu0 }
 0x4ea   : > { %v19924_v11 = vpop.f32.mrf.mxu1 }
 0x4eb   : > { %v19902_v18 = vpop.f32.mrf.mxu0 }
 0x4ec   : > { %v19928_v32 = vpop.f32.mrf.mxu1 }
 0x4ed   : > { %v19904_v36 = vpop.f32.mrf.mxu0 }
 0x4ee   : > { %v19932_v24 = vpop.f32.mrf.mxu1 }
 0x4ef   : > { %v19906_v25 = vpop.f32.mrf.mxu0 }
 0x4f0   : > { %v19936_v29 = vpop.f32.mrf.mxu1 }
 0x4f1   : > { %v19910_v45 = vpop.f32.mrf.mxu0 }
 0x4f2   : > { %v19940_v2 = vpop.f32.mrf.mxu1 }
 0x4f3   : > { %v19914_v54 = vpop.f32.mrf.mxu0 }
 0x4f4   : > { %v19944_v53 = vpop.f32.mrf.mxu1 }
 0x4f5   : > { %v19918_v15 = vpop.f32.mrf.mxu0 }
 0x4f6   : > { %v19951_v51 = vpop.f32.mrf.mxu1 }
 0x4f7   : > { %v19922_v47 = vpop.f32.mrf.mxu0 }
 0x4f9   : > { %v19926_v12 = vpop.f32.mrf.mxu0 }
 0x4fb   : > { %v19930_v14 = vpop.f32.mrf.mxu0 }
 0x4fd   : > { %v19934_v20 = vpop.f32.mrf.mxu0 }
 0x4ff   : > { %v19938_v41 = vpop.f32.mrf.mxu0 }
 0x501   : > { %v19942_v21 = vpop.f32.mrf.mxu0 }
 0x560   : > { %v13405_v10 = vpop.f32.mrf.mxu0 }
 0x561   : > { %v11101_v57 = vadd.f32 %v13405_v10, %v10768_v30  ;;  %v19962_v10 = vpop.f32.mrf.mxu1  ;;  %v10787_v30 = vadd.f32 %v13376_v22, %v19871_v48 }
 0x562   : > { %v10972_v61 = vpop.f32.mrf.mxu0 }
 0x563   : > { %v11099_v42 = vadd.f32 %v10972_v61, %v10760_v27  ;;  %v19957_v46 = vadd.f32 %v19949_v44, %v11101_v57 }
 0x564   : > { %v13406_v13 = vpop.f32.mrf.mxu0 }
 0x565   : > { %v19954_v39 = vadd.f32 %v19949_v44, %v11099_v42  ;;  %v11102_v62 = vadd.f32 %v13406_v13, %v10771_v55  ;;  %v11172_v61 = vmax.f32 %v19957_v46, 0.0  ;;  %v19977_v42 = vpop.f32.mrf.mxu1 }
 0x566   : > { %v10975_v17 = vpop.f32.mrf.mxu0 }
 0x567   : > { %v11100_v63 = vadd.f32 %v10975_v17, %v10763_v5  ;;  %v11170_v35 = vmax.f32 %v19954_v39, 0.0  ;;  %v19965_v0 = vadd.f32 %v19949_v44, %v11102_v62  ;;  %v11206_v49 = vsel %vm11202_vm1, %v11172_v61, 0.0 }
 0x568   : > { %v13409_v58 = vpop.f32.mrf.mxu0 }
 0x569   : > { %v19968_v16 = vadd.f32 %v19949_v44, %v11100_v63  ;;  %v11105_v57 = vadd.f32 %v13409_v58, %v10784_v28  ;;  %v11203_v59 = vsel %vm11202_vm1, %v11170_v35, 0.0  ;;  %v20505_v13 = vmax.f32 %v19965_v0, 0.0 }
 0x56a   : > { %v10988_v27 = vpop.f32.mrf.mxu0  ;;  %v10800_v28 = vadd.f32 %v19908_v43, %v19875_v31  ;;  %v10803_v31 = vadd.f32 %v19916_v1, %v19882_v4 }
 0x56b   : > { %v11171_v55 = vmax.f32 %v19968_v16, 0.0  ;;  %v11103_v6 = vadd.f32 %v10988_v27, %v10776_v7  ;;  %v19990_v60 = vadd.f32 %v19949_v44, %v11105_v57 }
 0x56c   : > { %v13410_v38 = vpop.f32.mrf.mxu0 }
 0x56d   : > { %v11204_v48 = vsel %vm11202_vm1, %v11171_v55, 0.0  ;;  %v19984_v22 = vadd.f32 %v19949_v44, %v11103_v6  ;;  %v11106_v5 = vadd.f32 %v13410_v38, %v10787_v30  ;;  %v10792_v30 = vadd.f32 %v19912_v19, %v19880_v37  ;;  %v19997_v6 = vpop.f32.mrf.mxu1 }
 0x56e   : > { %v11205_v62 = vadd.f32 %v11204_v48, %v11203_v59  ;;  %v10991_v17 = vpop.f32.mrf.mxu0  ;;  %v11208_v59 = vsel %vm11202_vm1, %v20505_v13, 0.0  ;;  %v11176_v37 = vmax.f32 %v19990_v60, 0.0 }
 0x56f   : > { %v11174_v63 = vmax.f32 %v19984_v22, 0.0  ;;  %v11104_v58 = vadd.f32 %v10991_v17, %v10779_v8  ;;  %v20003_v57 = vadd.f32 %v19949_v44, %v11106_v5  ;;  %v10795_v5 = vadd.f32 %v19920_v34, %v19884_v56  ;;  %v20017_v13 = vpop.f32.mrf.mxu1 }
 0x570   : > { %v11207_v7 = vadd.f32 %v11206_v49, %v11205_v62  ;;  %v11214_v56 = vsel %vm11202_vm1, %v11176_v37, 0.0 }
 0x571   : > { %v20006_v38 = vadd.f32 %v19949_v44, %v11104_v58  ;;  %v11210_v19 = vsel %vm11202_vm1, %v11174_v63, 0.0  ;;  %v20507_v4 = vmax.f32 %v20003_v57, 0.0 }
 0x572   : > { %v13413_v27 = vpop.f32.mrf.mxu0  ;;  %v11209_v43 = vadd.f32 %v11208_v59, %v11207_v7 }
 0x573   : > { %v11109_v8 = vadd.f32 %v13413_v27, %v10800_v28  ;;  %v20506_v62 = vmax.f32 %v20006_v38, 0.0 }
 0x574   : > { %v11004_v48 = vpop.f32.mrf.mxu0  ;;  %v11211_v49 = vadd.f32 %v11210_v19, %v11209_v43 }
 0x575   : > { %v11107_v17 = vadd.f32 %v11004_v48, %v10792_v30  ;;  %v11212_v1 = vsel %vm11202_vm1, %v20506_v62, 0.0  ;;  %v20027_v30 = vadd.f32 %v19949_v44, %v11109_v8  ;;  %v10816_v48 = vadd.f32 %v19924_v11, %v19886_v3 }
 0x576   : > { %v13414_v58 = vpop.f32.mrf.mxu0  ;;  %v11213_v27 = vadd.f32 %v11212_v1, %v11211_v49  ;;  %v11216_v8 = vsel %vm11202_vm1, %v20507_v4, 0.0  ;;  %v10819_v3 = vadd.f32 %v19932_v24, %v19890_v23 }
 0x577   : > { %v20024_v28 = vadd.f32 %v19949_v44, %v11107_v17  ;;  %v11110_v7 = vadd.f32 %v13414_v58, %v10803_v31  ;;  %v10808_v31 = vadd.f32 %v19928_v32, %v19888_v40  ;;  %v20037_v17 = vpop.f32.mrf.mxu1  ;;  %v20514_v11 = vmax.f32 %v20027_v30, 0.0 }
 0x578   : > { %v11007_v59 = vpop.f32.mrf.mxu0  ;;  %v11215_v19 = vadd.f32 %v11214_v56, %v11213_v27 }
 0x579   : > { %v20508_v34 = vmax.f32 %v20024_v28, 0.0  ;;  %v11108_v43 = vadd.f32 %v11007_v59, %v10795_v5  ;;  %v20043_v49 = vadd.f32 %v19949_v44, %v11110_v7  ;;  %v10811_v7 = vadd.f32 %v19936_v29, %v19892_v9  ;;  %v20057_v4 = vpop.f32.mrf.mxu1 }
 0x57a   : > { %v13417_v62 = vpop.f32.mrf.mxu0  ;;  %v11217_v5 = vadd.f32 %v11216_v8, %v11215_v19  ;;  %v11222_v9 = vsel %vm11202_vm1, %v20514_v11, 0.0 }
 0x57b   : > { %v20046_v58 = vadd.f32 %v19949_v44, %v11108_v43  ;;  %v11218_v40 = vsel %vm11202_vm1, %v20508_v34, 0.0  ;;  %v11113_v27 = vadd.f32 %v13417_v62, %v10816_v48  ;;  %v20509_v23 = vmax.f32 %v20043_v49, 0.0 }
 0x57c   : > { %v11020_v1 = vpop.f32.mrf.mxu0  ;;  %v11219_v56 = vadd.f32 %v11218_v40, %v11217_v5  ;;  %v10832_v5 = vadd.f32 %v19940_v2, %v19894_v26 }
 0x57d   : > { %v20515_v32 = vmax.f32 %v20046_v58, 0.0  ;;  %v11111_v59 = vadd.f32 %v11020_v1, %v10808_v31  ;;  %v20070_v29 = vadd.f32 %v19949_v44, %v11113_v27 }
 0x57e   : > { %v13418_v43 = vpop.f32.mrf.mxu0 }
 0x57f   : > { %v11220_v24 = vsel %vm11202_vm1, %v20515_v32, 0.0  ;;  %v20064_v19 = vadd.f32 %v19949_v44, %v11111_v59  ;;  %v11114_v8 = vadd.f32 %v13418_v43, %v10819_v3  ;;  %v10824_v3 = vadd.f32 %v19944_v53, %v19896_v33  ;;  %v10855_v59 = vpop.f32.mrf.mxu1 }
 0x580   : > { %v11221_v34 = vadd.f32 %v11220_v24, %v11219_v56  ;;  %v11023_v62 = vpop.f32.mrf.mxu0  ;;  %v11224_v56 = vsel %vm11202_vm1, %v20509_v23, 0.0  ;;  %v20512_v24 = vmax.f32 %v20070_v29, 0.0 }
 0x581   : > { %v20513_v48 = vmax.f32 %v20064_v19, 0.0  ;;  %v11112_v31 = vadd.f32 %v11023_v62, %v10811_v7  ;;  %v20081_v43 = vadd.f32 %v19949_v44, %v11114_v8  ;;  %v10835_v7 = vadd.f32 %v19951_v51, %v19898_v52  ;;  %v13396_v23 = vpop.f32.mrf.mxu1 }
 0x582   : > { %v11223_v1 = vadd.f32 %v11222_v9, %v11221_v34  ;;  %v13421_v40 = vpop.f32.mrf.mxu0  ;;  %v10827_v8 = vadd.f32 %v19962_v10, %v19900_v50  ;;  %v11230_v50 = vsel %vm11202_vm1, %v20512_v24, 0.0 }
 0x583   : > { %v20084_v27 = vadd.f32 %v19949_v44, %v11112_v31  ;;  %v11117_v2 = vadd.f32 %v13421_v40, %v10832_v5  ;;  %v11226_v33 = vsel %vm11202_vm1, %v20513_v48, 0.0  ;;  %v20511_v52 = vmax.f32 %v20081_v43, 0.0 }
 0x584   : > { %v11225_v26 = vadd.f32 %v11224_v56, %v11223_v1  ;;  %v11036_v34 = vpop.f32.mrf.mxu0 }
 0x585   : > { %v20510_v53 = vmax.f32 %v20084_v27, 0.0  ;;  %v11115_v62 = vadd.f32 %v11036_v34, %v10824_v3  ;;  %v20103_v56 = vadd.f32 %v19949_v44, %v11117_v2  ;;  %v10848_v34 = vadd.f32 %v19977_v42, %v19902_v18 }
 0x586   : > { %v11227_v9 = vadd.f32 %v11226_v33, %v11225_v26  ;;  %v13422_v31 = vpop.f32.mrf.mxu0  ;;  %v11232_v2 = vsel %vm11202_vm1, %v20511_v52, 0.0 }
 0x587   : > { %v11228_v51 = vsel %vm11202_vm1, %v20510_v53, 0.0  ;;  %v20100_v5 = vadd.f32 %v19949_v44, %v11115_v62  ;;  %v11118_v1 = vadd.f32 %v13422_v31, %v10835_v7  ;;  %v10840_v7 = vadd.f32 %v19997_v6, %v19904_v36  ;;  %v10858_v62 = vpop.f32.mrf.mxu1 }
 0x588   : > { %v11229_v40 = vadd.f32 %v11228_v51, %v11227_v9  ;;  %v11039_v3 = vpop.f32.mrf.mxu0  ;;  %v11188_v18 = vmax.f32 %v20103_v56, 0.0  ;;  %v21220_v56 = vmax.f32 %v20006_v38, 0.0 }
 0x589   : > { %v11186_v10 = vmax.f32 %v20100_v5, 0.0  ;;  %v11116_v26 = vadd.f32 %v11039_v3, %v10827_v8  ;;  %v20117_v9 = vadd.f32 %v19949_v44, %v11118_v1  ;;  %v10851_v8 = vadd.f32 %v20017_v13, %v19906_v25  ;;  %v13399_v52 = vpop.f32.mrf.mxu1 }
 0x58a   : > { %v11231_v33 = vadd.f32 %v11230_v50, %v11229_v40  ;;  %v13425_v53 = vpop.f32.mrf.mxu0  ;;  %v10843_v1 = vadd.f32 %v20037_v17, %v19910_v45 }
 0x58b   : > { %v20120_v31 = vadd.f32 %v19949_v44, %v11116_v26  ;;  %v11234_v36 = vsel %vm11202_vm1, %v11186_v10, 0.0  ;;  %v11121_v40 = vadd.f32 %v13425_v53, %v10848_v34  ;;  %v11189_v25 = vmax.f32 %v20117_v9, 0.0 }
 0x58c   : > { %v11233_v42 = vadd.f32 %v11232_v2, %v11231_v33  ;;  %v11052_v51 = vpop.f32.mrf.mxu0  ;;  %v11238_v53 = vsel %vm11202_vm1, %v11188_v18, 0.0 }
 0x58d   : > { %v11187_v6 = vmax.f32 %v20120_v31, 0.0  ;;  %v11119_v3 = vadd.f32 %v11052_v51, %v10840_v7  ;;  %v20142_v45 = vadd.f32 %v19949_v44, %v11121_v40  ;;  %v10864_v7 = vadd.f32 %v20057_v4, %v19914_v54 }
 0x58e   : > { %v11235_v50 = vadd.f32 %v11234_v36, %v11233_v42  ;;  %v13426_v26 = vpop.f32.mrf.mxu0  ;;  %v10856_v36 = vadd.f32 %v10855_v59, %v19918_v15 }
 0x58f   : > { %v11236_v13 = vsel %vm11202_vm1, %v11187_v6, 0.0  ;;  %v20136_v33 = vadd.f32 %v19949_v44, %v11119_v3  ;;  %v11122_v2 = vadd.f32 %v13426_v26, %v10851_v8  ;;  %v10871_v8 = vpop.f32.mrf.mxu1  ;;  %v11240_v3 = vsel %vm11202_vm1, %v11189_v25, 0.0 }
 0x590   : > { %v11237_v24 = vadd.f32 %v11236_v13, %v11235_v50  ;;  %v11055_v48 = vpop.f32.mrf.mxu0  ;;  %v11192_v4 = vmax.f32 %v20142_v45, 0.0  ;;  %v10859_v13 = vadd.f32 %v10858_v62, %v19926_v12  ;;  %v21224_v45 = vmax.f32 %v20046_v58, 0.0 }
 0x591   : > { %v11190_v17 = vmax.f32 %v20136_v33, 0.0  ;;  %v11120_v34 = vadd.f32 %v11055_v48, %v10843_v1  ;;  %v20152_v50 = vadd.f32 %v19949_v44, %v11122_v2  ;;  %v10867_v48 = vadd.f32 %v13396_v23, %v19922_v47 }
 0x592   : > { %v11239_v42 = vadd.f32 %v11238_v53, %v11237_v24  ;;  %v13429_v51 = vpop.f32.mrf.mxu0  ;;  %v11246_v12 = vsel %vm11202_vm1, %v11192_v4, 0.0 }
 0x593   : > { %v20155_v40 = vadd.f32 %v19949_v44, %v11120_v34  ;;  %v11125_v26 = vadd.f32 %v13429_v51, %v10864_v7  ;;  %v11242_v15 = vsel %vm11202_vm1, %v11190_v17, 0.0  ;;  %v13400_v34 = vpop.f32.mrf.mxu1  ;;  %v11193_v11 = vmax.f32 %v20152_v50, 0.0 }
 0x594   : > { %v11241_v1 = vadd.f32 %v11240_v3, %v11239_v42  ;;  %v11068_v54 = vpop.f32.mrf.mxu0 }
 0x595   : > { %v11191_v59 = vmax.f32 %v20155_v40, 0.0  ;;  %v11123_v24 = vadd.f32 %v11068_v54, %v10856_v36  ;;  %v20172_v51 = vadd.f32 %v19949_v44, %v11125_v26  ;;  %v10874_v32 = vpop.f32.mrf.mxu1 }
 0x596   : > { %v11243_v2 = vadd.f32 %v11242_v15, %v11241_v1  ;;  %v13430_v53 = vpop.f32.mrf.mxu0  ;;  %v10880_v1 = vadd.f32 %v13399_v52, %v19930_v14 }
 0x597   : > { %v11244_v47 = vsel %vm11202_vm1, %v11191_v59, 0.0  ;;  %v20169_v23 = vadd.f32 %v19949_v44, %v11123_v24  ;;  %v11126_v7 = vadd.f32 %v13430_v53, %v10867_v48  ;;  %v10872_v24 = vadd.f32 %v10871_v8, %v19934_v20 }
 0x598   : > { %v11245_v42 = vadd.f32 %v11244_v47, %v11243_v2  ;;  %v11071_v36 = vpop.f32.mrf.mxu0  ;;  %v11248_v48 = vsel %vm11202_vm1, %v11193_v11, 0.0  ;;  %v10883_v53 = vadd.f32 %v13400_v34, %v19938_v41 }
 0x599   : > { %v20516_v62 = vmax.f32 %v20169_v23, 0.0  ;;  %v11124_v3 = vadd.f32 %v11071_v36, %v10859_v13  ;;  %v20184_v26 = vadd.f32 %v19949_v44, %v11126_v7  ;;  %v20519_v13 = vmax.f32 %v20172_v51, 0.0 }
 0x59a   : > { %v11247_v54 = vadd.f32 %v11246_v12, %v11245_v42  ;;  %v13433_v15 = vpop.f32.mrf.mxu0  ;;  %v10875_v7 = vadd.f32 %v10874_v32, %v19942_v21 }
 0x59b   : > { %v20187_v2 = vadd.f32 %v19949_v44, %v11124_v3  ;;  %v11250_v20 = vsel %vm11202_vm1, %v20516_v62, 0.0  ;;  %v11129_v47 = vadd.f32 %v13433_v15, %v10880_v1  ;;  %v20518_v3 = vmax.f32 %v20184_v26, 0.0 }
 0x59c   : > { %v11249_v14 = vadd.f32 %v11248_v48, %v11247_v54  ;;  %v11084_v52 = vpop.f32.mrf.mxu0  ;;  %v11254_v1 = vsel %vm11202_vm1, %v20519_v13, 0.0 }
 0x59d   : > { %v11195_v8 = vmax.f32 %v20187_v2, 0.0  ;;  %v11127_v42 = vadd.f32 %v11084_v52, %v10872_v24  ;;  %v20207_v21 = vadd.f32 %v19949_v44, %v11129_v47  ;;  %v21229_v2 = vmax.f32 %v20064_v19, 0.0 }
 0x59e   : > { %v11251_v36 = vadd.f32 %v11250_v20, %v11249_v14  ;;  %v13434_v12 = vpop.f32.mrf.mxu0  ;;  %v11256_v14 = vsel %vm11202_vm1, %v20518_v3, 0.0 }
 0x59f   : > { %v11252_v41 = vsel %vm11202_vm1, %v11195_v8, 0.0  ;;  %v20201_v34 = vadd.f32 %v19949_v44, %v11127_v42  ;;  %v11130_v54 = vadd.f32 %v13434_v12, %v10883_v53  ;;  %v20520_v42 = vmax.f32 %v20207_v21, 0.0 }
 0x5a0   : > { %v11253_v48 = vadd.f32 %v11252_v41, %v11251_v36  ;;  %v11087_v62 = vpop.f32.mrf.mxu0  ;;  %v21233_v19 = vmax.f32 %v20207_v21, 0.0 }
 0x5a1   : > { %v20517_v32 = vmax.f32 %v20201_v34, 0.0  ;;  %v11128_v15 = vadd.f32 %v11087_v62, %v10875_v7  ;;  %v20214_v52 = vadd.f32 %v19949_v44, %v11130_v54 }
 0x5a2   : > { %v11255_v24 = vadd.f32 %v11254_v1, %v11253_v48 }
 0x5a3   : > { %v20217_v53 = vadd.f32 %v19949_v44, %v11128_v15  ;;  %v11258_v47 = vsel %vm11202_vm1, %v20517_v32, 0.0  ;;  %v20521_v36 = vmax.f32 %v20214_v52, 0.0  ;;  %v11262_v44 = vsel %vm11202_vm1, %v20520_v42, 0.0 }
 0x5a4   : > { %v11257_v20 = vadd.f32 %v11256_v14, %v11255_v24 }
 0x5a5   : > { %v11199_v62 = vmax.f32 %v20217_v53, 0.0  ;;  %v11264_v48 = vsel %vm11202_vm1, %v20521_v36, 0.0 }
 0x5a6   : > { %v11259_v7 = vadd.f32 %v11258_v47, %v11257_v20 }
 0x5a7   : > { %v11260_v12 = vsel %vm11202_vm1, %v11199_v62, 0.0 }
 0x5a8   : > { %v11261_v41 = vadd.f32 %v11260_v12, %v11259_v7  ;;  %v11277_v7 = vld [vmem:[%s20361_s10] sm:$0x1] }
 0x5aa   : > { %v11263_v54 = vadd.f32 %v11262_v44, %v11261_v41 }
 0x5ac   : > { %v11265_v1 = vadd.f32 %v11264_v48, %v11263_v54 }
 0x5ae   : > { %v11266_v15 = vrot.slane %v11265_v1, 4 }
 0x5b0   : > { %v11267_v24 = vadd.f32 %v11266_v15, %v11265_v1 }
 0x5b2   : > { %v11268_v14 = vrot.slane %v11267_v24, 2 }
 0x5b4   : > { %v11269_v20 = vadd.f32 %v11268_v14, %v11267_v24  ;;  %v11333_v24 = vlaneseq }
 0x5b6   : > { %v11270_v47 = vrot.slane %v11269_v20, 1 }
 0x5b8   : > { %v11271_v32 = vadd.f32 %v11270_v47, %v11269_v20 }
 0x5ba   : > { %v11273_v3 = vmul.f32 0.00390625, %v11271_v32  ;;  %v11334_v32 = vshrl.u32 %v11333_v24, 7  ;;  %v21228_v24 = vmax.f32 %v20184_v26, 0.0 }
 0x5bc   : > { %v11274_v13 = vpack.c.bf16 %v11273_v3, %v11273_v3  ;;  %v11335_v3 = vsub.s32 0, %v11334_v32 }
 0x5be   : > { %13438 = vmatmul.mubr.msk.bf16.vlgmr.msra.gmra.mxu1 %vm11202_vm1, %v11274_v13 }
 0x67e   : > { %v11321_v12 = vpop.f32.mrf.mxu1 }
 0x67f   : > { %v11322_v41 = vadd.f32 %v11321_v12, %v11277_v7 }
 0x680   : > { %v13439_v44 = vpop.f32.mrf.mxu1 }
 0x681   : > { %v11327_v42 = vsub.f32 0.0, %v11322_v41 }
 0x682   : > { %v11324_v36 = vpop.f32.mrf.mxu1 }
 0x683   : > { %v11328_v54 = vmul.f32 1.442695, %v11327_v42 }
 0x684   : > { %v13440_v48 = vpop.f32.mrf.mxu1 }
 0x685   : > { %13633 = vpow2.f32 %v11328_v54  ;;  %v21226_v48 = vmax.f32 %v20172_v51, 0.0 }
 0x692   : > { %v13634_v1 = vpop.eup %13633 }
 0x693   : > { %v11330_v15 = vadd.f32 1.0, %v13634_v1 }
 0x695   : > { %13635 = vrcp.f32 %v11330_v15 }
 0x6a2   : > { %v13636_v14 = vpop.eup %13635 }
 0x6a3   : > { %v11336_v13 = vrot.slane %v13636_v14, %v11335_v3  ;;  %v21230_v3 = vmax.f32 %v20201_v34, 0.0  ;;  %v21231_v14 = vmax.f32 %v20084_v27, 0.0  ;;  %v21235_v27 = vmax.f32 %v20214_v52, 0.0 }
 0x6a5   : > { %v11337_v20 = vmul.f32 %v11336_v13, %v11170_v35  ;;  %v11353_v47 = vmul.f32 %v11336_v13, %v11186_v10  ;;  %v11338_v42 = vmul.f32 %v11336_v13, %v11171_v55  ;;  %v11354_v36 = vmul.f32 %v11336_v13, %v11187_v6 }
 0x6a6   : > { %v11339_v41 = vmul.f32 %v11336_v13, %v11172_v61  ;;  %v11355_v44 = vmul.f32 %v11336_v13, %v11188_v18  ;;  %v21219_v35 = vmax.f32 %v19965_v0, 0.0  ;;  %v11356_v16 = vmul.f32 %v11336_v13, %v11189_v25 }
 0x6a7   : > { %v13509_v7 = vpack.i.bf16 %v11353_v47, %v11337_v20  ;;  %v13511_v12 = vpack.i.bf16 %v11354_v36, %v11338_v42  ;;  %v11341_v10 = vmul.f32 %v11336_v13, %v11174_v63  ;;  %v11357_v46 = vmul.f32 %v11336_v13, %v11190_v17 }
 0x6a8   : > { %v13513_v39 = vpack.i.bf16 %v11355_v44, %v11339_v41  ;;  %v11340_v5 = vmul.f32 %v11336_v13, %v21219_v35  ;;  %v11342_v31 = vmul.f32 %v11336_v13, %v21220_v56  ;;  %v11358_v0 = vmul.f32 %v11336_v13, %v11191_v59 }
 0x6a9   : > { %13510 = vxpose.xlu0.b32.start [1/16] (narrow) %v13509_v7, 16  ;;  %v13517_v61 = vpack.i.bf16 %v11357_v46, %v11341_v10  ;;  %v11343_v9 = vmul.f32 %v11336_v13, %v11176_v37  ;;  %v11359_v22 = vmul.f32 %v11336_v13, %v11192_v4  ;;  %v21221_v6 = vmax.f32 %v20003_v57, 0.0 }
 0x6aa   : > { %v13515_v55 = vpack.i.bf16 %v11356_v16, %v11340_v5  ;;  %v13519_v18 = vpack.i.bf16 %v11358_v0, %v11342_v31  ;;  %v11360_v38 = vmul.f32 %v11336_v13, %v11193_v11  ;;  %v21222_v17 = vmax.f32 %v20024_v28, 0.0 }
 0x6ab   : > { %v13521_v63 = vpack.i.bf16 %v11359_v22, %v11343_v9  ;;  %v11344_v25 = vmul.f32 %v11336_v13, %v21221_v6  ;;  %v21223_v59 = vmax.f32 %v20169_v23, 0.0  ;;  %v11346_v4 = vmul.f32 %v11336_v13, %v21224_v45 }
 0x6ac   : > { %v11345_v40 = vmul.f32 %v11336_v13, %v21222_v17  ;;  %v11362_v57 = vmul.f32 %v11336_v13, %v11195_v8  ;;  %v21225_v11 = vmax.f32 %v20027_v30, 0.0  ;;  %v11363_v28 = vmul.f32 %v11336_v13, %v21226_v48 }
 0x6ad   : > { %13512 = vxpose.xlu0.b32.cont [2/16] (narrow) %v13511_v12, 16  ;;  %v13523_v33 = vpack.i.bf16 %v11360_v38, %v11344_v25  ;;  %v11361_v60 = vmul.f32 %v11336_v13, %v21223_v59  ;;  %v21227_v23 = vmax.f32 %v20043_v49, 0.0  ;;  %v11364_v58 = vmul.f32 %v11336_v13, %v21228_v24 }
 0x6ae   : > { %v13527_v54 = vpack.i.bf16 %v11362_v57, %v11346_v4  ;;  %v11347_v50 = vmul.f32 %v11336_v13, %v21225_v11  ;;  %v11349_v8 = vmul.f32 %v11336_v13, %v21229_v2  ;;  %v11365_v30 = vmul.f32 %v11336_v13, %v21230_v3 }
 0x6af   : > { %v13525_v37 = vpack.i.bf16 %v11361_v60, %v11345_v40  ;;  %v11348_v15 = vmul.f32 %v11336_v13, %v21227_v23  ;;  %v11350_v20 = vmul.f32 %v11336_v13, %v21231_v14  ;;  %v11366_v49 = vmul.f32 %v11336_v13, %v11199_v62 }
 0x6b0   : > { %v13529_v1 = vpack.i.bf16 %v11363_v28, %v11347_v50  ;;  %v13533_v51 = vpack.i.bf16 %v11365_v30, %v11349_v8  ;;  %v21232_v47 = vmax.f32 %v20070_v29, 0.0  ;;  %v11367_v42 = vmul.f32 %v11336_v13, %v21233_v19 }
 0x6b1   : > { %13514 = vxpose.xlu0.b32.cont [3/16] (narrow) %v13513_v39, 16  ;;  %v13531_v32 = vpack.i.bf16 %v11364_v58, %v11348_v15  ;;  %v13535_v26 = vpack.i.bf16 %v11366_v49, %v11350_v20  ;;  %v21234_v36 = vmax.f32 %v20081_v43, 0.0  ;;  %v11368_v41 = vmul.f32 %v11336_v13, %v21235_v27 }
 0x6b2   : > { %v11351_v7 = vmul.f32 %v11336_v13, %v21232_v47 }
 0x6b3   : > { %v11352_v12 = vmul.f32 %v11336_v13, %v21234_v36 }
 0x6b4   : > { %v13537_v34 = vpack.i.bf16 %v11367_v42, %v11351_v7 }
 0x6b5   : > { %13516 = vxpose.xlu0.b32.cont [4/16] (narrow) %v13515_v55, 16  ;;  %v13539_v53 = vpack.i.bf16 %v11368_v41, %v11352_v12 }
 0x6b9   : > { %13518 = vxpose.xlu0.b32.cont [5/16] (narrow) %v13517_v61, 16 }
 0x6bd   : > { %13520 = vxpose.xlu0.b32.cont [6/16] (narrow) %v13519_v18, 16 }
 0x6c1   : > { %13522 = vxpose.xlu0.b32.cont [7/16] (narrow) %v13521_v63, 16 }
 0x6c5   : > { %13524 = vxpose.xlu0.b32.cont [8/16] (narrow) %v13523_v33, 16 }
 0x6c9   : > { %13526 = vxpose.xlu0.b32.cont [9/16] (narrow) %v13525_v37, 16 }
 0x6cd   : > { %13528 = vxpose.xlu0.b32.cont [10/16] (narrow) %v13527_v54, 16 }
 0x6d1   : > { %13530 = vxpose.xlu0.b32.cont [11/16] (narrow) %v13529_v1, 16 }
 0x6d5   : > { %13532 = vxpose.xlu0.b32.cont [12/16] (narrow) %v13531_v32, 16 }
 0x6d9   : > { %13534 = vxpose.xlu0.b32.cont [13/16] (narrow) %v13533_v51, 16 }
 0x6dd   : > { %13536 = vxpose.xlu0.b32.cont [14/16] (narrow) %v13535_v26, 16 }
 0x6e1   : > { %13538 = vxpose.xlu0.b32.cont [15/16] (narrow) %v13537_v34, 16 }
 0x6e5   : > { %13540 = vxpose.xlu0.b32.end [16/16] (narrow) %v13539_v53, 16 }
 0x725   : > { %v13541_v62 = vpop.trf.xlu0 }
 0x726   : > { %v13545_v29 = vunpack.i.h.bf16 %v13541_v62  ;;  %v13542_v44 = vunpack.i.l.bf16 %v13541_v62 }
 0x728   : > { %v12359_v39 = vpack.c.bf16 %v13545_v29, %v13542_v44 }
 0x729   : > { %v13546_v21 = vpop.trf.xlu0 }
 0x72a   : > { %11445 = vst [vmem:[%s379_s22] sm:$0xff] %v12359_v39  ;;  %v13550_v43 = vunpack.i.h.bf16 %v13546_v21  ;;  %v13547_v35 = vunpack.i.l.bf16 %v13546_v21 }
 0x72c   : > { %v12360_v52 = vpack.c.bf16 %v13550_v43, %v13547_v35 }
 0x72e   : > { %11446 = vst [vmem:[%s379_s22 + $0x8] sm:$0xff] %v12360_v52 }
 0x72f   : > { %13731 = shalt.err (!%p13728_p3)
}
 0x730   : > { %s13732_s15 = scalar_lea.hbm %s20307_s12, 256  ;;  %s13736_s30 = scalar_lea.hbm %s20362_s11, 512 }
 0x731   : > { %p13733_p4 = scmp.ne.s32.totalorder %s20307_s12, %s13732_s15  ;;  %p13737_p9 = scmp.lt.s32.totalorder %s20307_s12, %s20362_s11 }
 0x732   : > { %p13738_p10 = scmp.lt.s32.totalorder %s13736_s30, %s13732_s15 }
 0x733   : > { %p13734_p7 = pnand %p13733_p4, %p13884_p5 }
 0x734   : > { %p13739_p11 = por %p13738_p10, %p13737_p9 }
 0x735   : > { %p13735_p8 = pneg %p13734_p7 }
 0x737   : > { %p13740_p12 = pnand %p13739_p11, %p13735_p8 }
 0x739   : > { %13743 = shalt.err (!%p13740_p12)
}
 0x73a   : > { %s13784_s21 = smov 128   ;;  %s13785_s16 = smov 8  }
 0x73b   : > { %13465 = dma.vmem_to_hbm [thread:$0]  (%p13884_p5), %s20309_s25, 256, %s20307_s12, %s20311_s13, %s13784_s21, %s13784_s21, %s13785_s16  }
 0x73c PF: > { %p13471_p13 = scmp.ge.s32.totalorder %s13778_s20, 2  ;;  %s11476_s29 = sand.u32 1, %s13766_s17  }
 0x73d   : > { %s11477_s0 = scalar_lea.sflag [#allocation4], %s11476_s29 }
 0x73e   : > { %p13468_p0 = pnand %p13471_p13, %p13888_p6 }
 0x740   : > { %p13469_p1 = pneg %p13468_p0 }
 0x742   : > { %13761 = dma.done.wait (%p13469_p1), %s11477_s0, 256  }
 0x743   : > { %13763 = vsyncadd (%p13469_p1), %s11477_s0, 4294967040  ;;  %p21_p2 = scmp.ge.s32.totalorder %s13871_s23, 4   ;;  %s21236_s17 = smov %s13770_s18 }
 0x744   : > { %s21237_s18 = smov %s13774_s19  ;;  %s21238_s19 = smov %s13882_s26 }
 0x745   : > { %s21239_s20 = smov %s13871_s23  ;;  %23 = sbr.rel (!%p21_p2) target bundleno = 5 (0x5), region = 118 }
 0x74a   :  { %11482 = vsyncpa [#allocation4], 1 }
 0x74b   :  { %11484 = vsyncpa [#allocation4 + $0x1], 1 }

</bundles_post_ra>
